<compile_context>
chip_gen: v6e
topology: v6e:2x2x1
jax: 0.10.0
libtpu: 0.0.40
codegen_flags: <defaults>
</compile_context>

<pallas_src>
import jax
import jax.numpy as jnp
from jax.experimental import pallas as pl
from jax.experimental.pallas import tpu as pltpu

LATENT_DIM = 100
BN_EPS = 1e-5
LRELU_SLOPE = 0.2
OUT_TILE_N = 3072          # 12288 / 3072 = 4 grid steps (even -> balanced on v7x's 2 TCs)


# ---------------------------------------------------------------------------
# Kernel
# ---------------------------------------------------------------------------
def _lin_lrelu_bn(x, w_ref, b_ref, g_ref, be_ref):
    """Y = BN( LeakyReLU( X @ W + b ) ), BN over the (full) batch axis, f32."""
    y = jnp.dot(x, w_ref[...], preferred_element_type=jnp.float32) + b_ref[...]
    y = jnp.where(y > 0, y, LRELU_SLOPE * y)
    mean = jnp.mean(y, axis=0, keepdims=True)
    c = y - mean
    var = jnp.mean(c * c, axis=0, keepdims=True)
    return g_ref[...] * (c * jax.lax.rsqrt(var + BN_EPS)) + be_ref[...]


def _generator_kernel(z_ref,
                      w1_ref, b1_ref, g1_ref, be1_ref,
                      w2_ref, b2_ref, g2_ref, be2_ref,
                      w3_ref, b3_ref, g3_ref, be3_ref,
                      wo_ref, bo_ref,
                      o_ref):
    """Full generator forward for one output-feature tile of the final layer.

    The tiny hidden stack (~11 MFLOP, all params resident in VMEM) is
    recomputed every grid step; it is fully hidden under the streamed W-tile
    DMA and keeps the kernel v7x-megacore safe (no cross-step carried state).
    """
    h = _lin_lrelu_bn(z_ref[...], w1_ref, b1_ref, g1_ref, be1_ref)
    h = _lin_lrelu_bn(h, w2_ref, b2_ref, g2_ref, be2_ref)
    h = _lin_lrelu_bn(h, w3_ref, b3_ref, g3_ref, be3_ref)

    # Final Linear tile -> Tanh.  Weight is streamed (bf16 by default); cast
    # the activation to the weight's dtype, accumulate in f32 on the MXU.
    y = jnp.dot(h.astype(wo_ref.dtype), wo_ref[...],
                preferred_element_type=jnp.float32) + bo_ref[...]
    o_ref[...] = jnp.tanh(y)


# ---------------------------------------------------------------------------
# Wrapper
# ---------------------------------------------------------------------------
def generator_forward(z, params):
    """Forward pass. z: (B, latent_dim) f32 -> (B, 3, 64, 64) f32 in [-1, 1]."""
    B, latent = z.shape
    assert B >= 2, "training-mode BatchNorm1d needs batch size > 1"

    hidden = params["hidden"]
    w_blk, b_out = params["out"]          # w_blk pre-blocked: (N//tile_n, K, tile_n)
    n_tiles, K, tile_n = w_blk.shape
    N = n_tiles * tile_n

    flat = []
    in_specs = [pl.BlockSpec((B, latent), lambda j: (0, 0))]   # z: full, resident
    for (w, b, gamma, beta) in hidden:
        k, n = w.shape
        flat += [w, b.reshape(1, n), gamma.reshape(1, n), beta.reshape(1, n)]
        in_specs += [
            pl.BlockSpec((k, n), lambda j: (0, 0)),            # whole-array, constant
            pl.BlockSpec((1, n), lambda j: (0, 0)),
            pl.BlockSpec((1, n), lambda j: (0, 0)),
            pl.BlockSpec((1, n), lambda j: (0, 0)),
        ]
    in_specs += [
        pl.BlockSpec((None, K, tile_n), lambda j: (j, 0, 0)),  # contiguous W tile stream
        pl.BlockSpec((1, tile_n), lambda j: (0, j)),           # bias tile (f32)
    ]

    # bf16 stream fits comfortably in 32 MiB scoped VMEM (safe on v7x's 64 MiB
    # physical VMEM); allow extra headroom only for the f32-parity path.
    vmem_limit = (48 if w_blk.dtype == jnp.float32 else 32) * 1024 * 1024

    img = pl.pallas_call(
        _generator_kernel,
        out_shape=jax.ShapeDtypeStruct((B, N), jnp.float32),
        grid=(n_tiles,),
        in_specs=in_specs,
        out_specs=pl.BlockSpec((B, tile_n), lambda j: (0, j)),
        compiler_params=pltpu.CompilerParams(
            dimension_semantics=("parallel",),
            vmem_limit_bytes=vmem_limit,
        ),
    )(z, *flat, w_blk, b_out.reshape(1, N))

    return img.reshape(B, 3, 64, 64)


# ---------------------------------------------------------------------------
# Parameter init (matches PyTorch nn.Linear init distribution:
# U(-1/sqrt(fan_in), 1/sqrt(fan_in)) for weight & bias; BN gamma=1, beta=0).
# The final weight is pre-blocked once here (contiguous per-tile DMA) and cast
# to `stream_dtype` (bf16 by default; pass jnp.float32 for bit-parity).
# ---------------------------------------------------------------------------
def _preblock_weight(w, tile_n, dtype):
    k, n = w.shape
    assert n % tile_n == 0
    # (K, N) -> (N//tile_n, K, tile_n); tile j equals w[:, j*tile_n:(j+1)*tile_n]
    return jnp.transpose(w.reshape(k, n // tile_n, tile_n), (1, 0, 2)).astype(dtype)


def init_params(key, out_tile_n=OUT_TILE_N, stream_dtype=jnp.bfloat16):
    dims = [LATENT_DIM, 256, 512, 1024, 3 * 64 * 64]
    hidden = []
    for i in range(3):
        fan_in, fan_out = dims[i], dims[i + 1]
        key, kw, kb = jax.random.split(key, 3)
        bound = 1.0 / jnp.sqrt(fan_in)
        # stored as (in, out) == PyTorch weight.T
        w = jax.random.uniform(kw, (fan_in, fan_out), jnp.float32, -bound, bound)
        b = jax.random.uniform(kb, (fan_out,), jnp.float32, -bound, bound)
        gamma = jnp.ones((fan_out,), jnp.float32)
        beta = jnp.zeros((fan_out,), jnp.float32)
        hidden.append((w, b, gamma, beta))

    fan_in, fan_out = dims[3], dims[4]
    key, kw, kb = jax.random.split(key, 3)
    bound = 1.0 / jnp.sqrt(fan_in)
    w_out = jax.random.uniform(kw, (fan_in, fan_out), jnp.float32, -bound, bound)
    b_out = jax.random.uniform(kb, (fan_out,), jnp.float32, -bound, bound)
    w_out_blocked = _preblock_weight(w_out, out_tile_n, stream_dtype)
    return {"hidden": hidden, "out": (w_out_blocked, b_out)}


# ---------------------------------------------------------------------------
if __name__ == "__main__":
    key = jax.random.PRNGKey(0)
    key, kz = jax.random.split(key)

    B = 8  # must be > 1 for training-mode BatchNorm semantics
    z = jax.random.normal(kz, (B, LATENT_DIM), jnp.float32)
    params = init_params(key)   # bf16 stream of the final weight by default

    img = jax.jit(generator_forward)(z, params)
    img = jax.block_until_ready(img)

    assert img.shape == (B, 3, 64, 64), img.shape
    assert img.dtype == jnp.float32
    assert bool(jnp.all(jnp.isfinite(img)))
    # Tanh output must be bounded.
    assert bool(jnp.all(jnp.abs(img) <= 1.0 + 1e-6))

    print("KERNEL_OK")
</pallas_src>

<mosaic_0001>
module attributes {stable_mosaic.version = 11 : i64} {
  func.func @_generator_kernel(%arg0: i32, %arg1: memref<8x100xf32, #tpu.memory_space<vmem>>, %arg2: memref<100x256xf32, #tpu.memory_space<vmem>>, %arg3: memref<1x256xf32, #tpu.memory_space<vmem>>, %arg4: memref<1x256xf32, #tpu.memory_space<vmem>>, %arg5: memref<1x256xf32, #tpu.memory_space<vmem>>, %arg6: memref<256x512xf32, #tpu.memory_space<vmem>>, %arg7: memref<1x512xf32, #tpu.memory_space<vmem>>, %arg8: memref<1x512xf32, #tpu.memory_space<vmem>>, %arg9: memref<1x512xf32, #tpu.memory_space<vmem>>, %arg10: memref<512x1024xf32, #tpu.memory_space<vmem>>, %arg11: memref<1x1024xf32, #tpu.memory_space<vmem>>, %arg12: memref<1x1024xf32, #tpu.memory_space<vmem>>, %arg13: memref<1x1024xf32, #tpu.memory_space<vmem>>, %arg14: memref<1x1024x3072xbf16, #tpu.memory_space<vmem>>, %arg15: memref<1x3072xf32, #tpu.memory_space<vmem>>, %arg16: memref<8x3072xf32, #tpu.memory_space<vmem>>) attributes {dimension_semantics = [#tpu.dimension_semantics<parallel>], iteration_bounds = array<i64: 4>, scalar_prefetch = 0 : i64, scratch_operands = 0 : i64, tpu.core_type = #tpu.core_type<tc>, window_params = [{pipeline_mode = #tpu.pipeline_mode<synchronous>, transform_indices = @transform_0, window_bounds = array<i64: 8, 100>}, {pipeline_mode = #tpu.pipeline_mode<synchronous>, transform_indices = @transform_1, window_bounds = array<i64: 100, 256>}, {pipeline_mode = #tpu.pipeline_mode<synchronous>, transform_indices = @transform_2, window_bounds = array<i64: 1, 256>}, {pipeline_mode = #tpu.pipeline_mode<synchronous>, transform_indices = @transform_3, window_bounds = array<i64: 1, 256>}, {pipeline_mode = #tpu.pipeline_mode<synchronous>, transform_indices = @transform_4, window_bounds = array<i64: 1, 256>}, {pipeline_mode = #tpu.pipeline_mode<synchronous>, transform_indices = @transform_5, window_bounds = array<i64: 256, 512>}, {pipeline_mode = #tpu.pipeline_mode<synchronous>, transform_indices = @transform_6, window_bounds = array<i64: 1, 512>}, {pipeline_mode = #tpu.pipeline_mode<synchronous>, transform_indices = @transform_7, window_bounds = array<i64: 1, 512>}, {pipeline_mode = #tpu.pipeline_mode<synchronous>, transform_indices = @transform_8, window_bounds = array<i64: 1, 512>}, {pipeline_mode = #tpu.pipeline_mode<synchronous>, transform_indices = @transform_9, window_bounds = array<i64: 512, 1024>}, {pipeline_mode = #tpu.pipeline_mode<synchronous>, transform_indices = @transform_10, window_bounds = array<i64: 1, 1024>}, {pipeline_mode = #tpu.pipeline_mode<synchronous>, transform_indices = @transform_11, window_bounds = array<i64: 1, 1024>}, {pipeline_mode = #tpu.pipeline_mode<synchronous>, transform_indices = @transform_12, window_bounds = array<i64: 1, 1024>}, {transform_indices = @transform_13, window_bounds = array<i64: 1, 1024, 3072>}, {transform_indices = @transform_14, window_bounds = array<i64: 1, 3072>}, {transform_indices = @transform_15, window_bounds = array<i64: 8, 3072>}]} {
    %c0 = arith.constant 0 : index
    %c0_0 = arith.constant 0 : index
    %0 = vector.load %arg1[%c0, %c0_0] : memref<8x100xf32, #tpu.memory_space<vmem>>, vector<8x100xf32>
    %c0_1 = arith.constant 0 : index
    %c0_2 = arith.constant 0 : index
    %1 = vector.load %arg2[%c0_1, %c0_2] : memref<100x256xf32, #tpu.memory_space<vmem>>, vector<100x256xf32>
    %cst = arith.constant dense<0.000000e+00> : vector<8x256xf32>
    %2 = tpu.matmul %0, %1, %cst {dimension_numbers = #tpu.dot_dimension_numbers<[1], [0], [0], [1], [0, 0, 1, 1], [], []>} : vector<8x100xf32>, vector<100x256xf32>, vector<8x256xf32> -> vector<8x256xf32>
    %c0_3 = arith.constant 0 : index
    %c0_4 = arith.constant 0 : index
    %3 = vector.load %arg3[%c0_3, %c0_4] : memref<1x256xf32, #tpu.memory_space<vmem>>, vector<1x256xf32>
    %4 = vector.broadcast %3 : vector<1x256xf32> to vector<8x256xf32>
    %5 = arith.addf %2, %4 : vector<8x256xf32>
    %cst_5 = arith.constant 0.000000e+00 : f32
    %6 = vector.broadcast %cst_5 : f32 to vector<8x256xf32>
    %7 = arith.cmpf ogt, %5, %6 : vector<8x256xf32>
    %cst_6 = arith.constant 2.000000e-01 : f32
    %8 = vector.broadcast %cst_6 : f32 to vector<8x256xf32>
    %9 = arith.mulf %8, %5 : vector<8x256xf32>
    %10 = arith.select %7, %5, %9 : vector<8x256xi1>, vector<8x256xf32>
    %cst_7 = arith.constant dense<0.000000e+00> : vector<256xf32>
    %11 = vector.multi_reduction <add>, %10, %cst_7 [0] : vector<8x256xf32> to vector<256xf32>
    %12 = vector.shape_cast %11 : vector<256xf32> to vector<1x256xf32>
    %cst_8 = arith.constant 8.000000e+00 : f32
    %13 = vector.broadcast %cst_8 : f32 to vector<1x256xf32>
    %14 = arith.divf %12, %13 : vector<1x256xf32>
    %15 = vector.broadcast %14 : vector<1x256xf32> to vector<8x256xf32>
    %16 = arith.subf %10, %15 : vector<8x256xf32>
    %17 = arith.mulf %16, %16 : vector<8x256xf32>
    %cst_9 = arith.constant dense<0.000000e+00> : vector<256xf32>
    %18 = vector.multi_reduction <add>, %17, %cst_9 [0] : vector<8x256xf32> to vector<256xf32>
    %19 = vector.shape_cast %18 : vector<256xf32> to vector<1x256xf32>
    %cst_10 = arith.constant 8.000000e+00 : f32
    %20 = vector.broadcast %cst_10 : f32 to vector<1x256xf32>
    %21 = arith.divf %19, %20 : vector<1x256xf32>
    %c0_11 = arith.constant 0 : index
    %c0_12 = arith.constant 0 : index
    %22 = vector.load %arg4[%c0_11, %c0_12] : memref<1x256xf32, #tpu.memory_space<vmem>>, vector<1x256xf32>
    %cst_13 = arith.constant 9.99999974E-6 : f32
    %23 = vector.broadcast %cst_13 : f32 to vector<1x256xf32>
    %24 = arith.addf %21, %23 : vector<1x256xf32>
    %25 = math.rsqrt %24 : vector<1x256xf32>
    %26 = vector.broadcast %25 : vector<1x256xf32> to vector<8x256xf32>
    %27 = arith.mulf %16, %26 : vector<8x256xf32>
    %28 = vector.broadcast %22 : vector<1x256xf32> to vector<8x256xf32>
    %29 = arith.mulf %28, %27 : vector<8x256xf32>
    %c0_14 = arith.constant 0 : index
    %c0_15 = arith.constant 0 : index
    %30 = vector.load %arg5[%c0_14, %c0_15] : memref<1x256xf32, #tpu.memory_space<vmem>>, vector<1x256xf32>
    %31 = vector.broadcast %30 : vector<1x256xf32> to vector<8x256xf32>
    %32 = arith.addf %29, %31 : vector<8x256xf32>
    %c0_16 = arith.constant 0 : index
    %c0_17 = arith.constant 0 : index
    %33 = vector.load %arg6[%c0_16, %c0_17] : memref<256x512xf32, #tpu.memory_space<vmem>>, vector<256x512xf32>
    %cst_18 = arith.constant dense<0.000000e+00> : vector<8x512xf32>
    %34 = tpu.matmul %32, %33, %cst_18 {dimension_numbers = #tpu.dot_dimension_numbers<[1], [0], [0], [1], [0, 0, 1, 1], [], []>} : vector<8x256xf32>, vector<256x512xf32>, vector<8x512xf32> -> vector<8x512xf32>
    %c0_19 = arith.constant 0 : index
    %c0_20 = arith.constant 0 : index
    %35 = vector.load %arg7[%c0_19, %c0_20] : memref<1x512xf32, #tpu.memory_space<vmem>>, vector<1x512xf32>
    %36 = vector.broadcast %35 : vector<1x512xf32> to vector<8x512xf32>
    %37 = arith.addf %34, %36 : vector<8x512xf32>
    %cst_21 = arith.constant 0.000000e+00 : f32
    %38 = vector.broadcast %cst_21 : f32 to vector<8x512xf32>
    %39 = arith.cmpf ogt, %37, %38 : vector<8x512xf32>
    %cst_22 = arith.constant 2.000000e-01 : f32
    %40 = vector.broadcast %cst_22 : f32 to vector<8x512xf32>
    %41 = arith.mulf %40, %37 : vector<8x512xf32>
    %42 = arith.select %39, %37, %41 : vector<8x512xi1>, vector<8x512xf32>
    %cst_23 = arith.constant dense<0.000000e+00> : vector<512xf32>
    %43 = vector.multi_reduction <add>, %42, %cst_23 [0] : vector<8x512xf32> to vector<512xf32>
    %44 = vector.shape_cast %43 : vector<512xf32> to vector<1x512xf32>
    %cst_24 = arith.constant 8.000000e+00 : f32
    %45 = vector.broadcast %cst_24 : f32 to vector<1x512xf32>
    %46 = arith.divf %44, %45 : vector<1x512xf32>
    %47 = vector.broadcast %46 : vector<1x512xf32> to vector<8x512xf32>
    %48 = arith.subf %42, %47 : vector<8x512xf32>
    %49 = arith.mulf %48, %48 : vector<8x512xf32>
    %cst_25 = arith.constant dense<0.000000e+00> : vector<512xf32>
    %50 = vector.multi_reduction <add>, %49, %cst_25 [0] : vector<8x512xf32> to vector<512xf32>
    %51 = vector.shape_cast %50 : vector<512xf32> to vector<1x512xf32>
    %cst_26 = arith.constant 8.000000e+00 : f32
    %52 = vector.broadcast %cst_26 : f32 to vector<1x512xf32>
    %53 = arith.divf %51, %52 : vector<1x512xf32>
    %c0_27 = arith.constant 0 : index
    %c0_28 = arith.constant 0 : index
    %54 = vector.load %arg8[%c0_27, %c0_28] : memref<1x512xf32, #tpu.memory_space<vmem>>, vector<1x512xf32>
    %cst_29 = arith.constant 9.99999974E-6 : f32
    %55 = vector.broadcast %cst_29 : f32 to vector<1x512xf32>
    %56 = arith.addf %53, %55 : vector<1x512xf32>
    %57 = math.rsqrt %56 : vector<1x512xf32>
    %58 = vector.broadcast %57 : vector<1x512xf32> to vector<8x512xf32>
    %59 = arith.mulf %48, %58 : vector<8x512xf32>
    %60 = vector.broadcast %54 : vector<1x512xf32> to vector<8x512xf32>
    %61 = arith.mulf %60, %59 : vector<8x512xf32>
    %c0_30 = arith.constant 0 : index
    %c0_31 = arith.constant 0 : index
    %62 = vector.load %arg9[%c0_30, %c0_31] : memref<1x512xf32, #tpu.memory_space<vmem>>, vector<1x512xf32>
    %63 = vector.broadcast %62 : vector<1x512xf32> to vector<8x512xf32>
    %64 = arith.addf %61, %63 : vector<8x512xf32>
    %c0_32 = arith.constant 0 : index
    %c0_33 = arith.constant 0 : index
    %65 = vector.load %arg10[%c0_32, %c0_33] : memref<512x1024xf32, #tpu.memory_space<vmem>>, vector<512x1024xf32>
    %cst_34 = arith.constant dense<0.000000e+00> : vector<8x1024xf32>
    %66 = tpu.matmul %64, %65, %cst_34 {dimension_numbers = #tpu.dot_dimension_numbers<[1], [0], [0], [1], [0, 0, 1, 1], [], []>} : vector<8x512xf32>, vector<512x1024xf32>, vector<8x1024xf32> -> vector<8x1024xf32>
    %c0_35 = arith.constant 0 : index
    %c0_36 = arith.constant 0 : index
    %67 = vector.load %arg11[%c0_35, %c0_36] : memref<1x1024xf32, #tpu.memory_space<vmem>>, vector<1x1024xf32>
    %68 = vector.broadcast %67 : vector<1x1024xf32> to vector<8x1024xf32>
    %69 = arith.addf %66, %68 : vector<8x1024xf32>
    %cst_37 = arith.constant 0.000000e+00 : f32
    %70 = vector.broadcast %cst_37 : f32 to vector<8x1024xf32>
    %71 = arith.cmpf ogt, %69, %70 : vector<8x1024xf32>
    %cst_38 = arith.constant 2.000000e-01 : f32
    %72 = vector.broadcast %cst_38 : f32 to vector<8x1024xf32>
    %73 = arith.mulf %72, %69 : vector<8x1024xf32>
    %74 = arith.select %71, %69, %73 : vector<8x1024xi1>, vector<8x1024xf32>
    %cst_39 = arith.constant dense<0.000000e+00> : vector<1024xf32>
    %75 = vector.multi_reduction <add>, %74, %cst_39 [0] : vector<8x1024xf32> to vector<1024xf32>
    %76 = vector.shape_cast %75 : vector<1024xf32> to vector<1x1024xf32>
    %cst_40 = arith.constant 8.000000e+00 : f32
    %77 = vector.broadcast %cst_40 : f32 to vector<1x1024xf32>
    %78 = arith.divf %76, %77 : vector<1x1024xf32>
    %79 = vector.broadcast %78 : vector<1x1024xf32> to vector<8x1024xf32>
    %80 = arith.subf %74, %79 : vector<8x1024xf32>
    %81 = arith.mulf %80, %80 : vector<8x1024xf32>
    %cst_41 = arith.constant dense<0.000000e+00> : vector<1024xf32>
    %82 = vector.multi_reduction <add>, %81, %cst_41 [0] : vector<8x1024xf32> to vector<1024xf32>
    %83 = vector.shape_cast %82 : vector<1024xf32> to vector<1x1024xf32>
    %cst_42 = arith.constant 8.000000e+00 : f32
    %84 = vector.broadcast %cst_42 : f32 to vector<1x1024xf32>
    %85 = arith.divf %83, %84 : vector<1x1024xf32>
    %c0_43 = arith.constant 0 : index
    %c0_44 = arith.constant 0 : index
    %86 = vector.load %arg12[%c0_43, %c0_44] : memref<1x1024xf32, #tpu.memory_space<vmem>>, vector<1x1024xf32>
    %cst_45 = arith.constant 9.99999974E-6 : f32
    %87 = vector.broadcast %cst_45 : f32 to vector<1x1024xf32>
    %88 = arith.addf %85, %87 : vector<1x1024xf32>
    %89 = math.rsqrt %88 : vector<1x1024xf32>
    %90 = vector.broadcast %89 : vector<1x1024xf32> to vector<8x1024xf32>
    %91 = arith.mulf %80, %90 : vector<8x1024xf32>
    %92 = vector.broadcast %86 : vector<1x1024xf32> to vector<8x1024xf32>
    %93 = arith.mulf %92, %91 : vector<8x1024xf32>
    %c0_46 = arith.constant 0 : index
    %c0_47 = arith.constant 0 : index
    %94 = vector.load %arg13[%c0_46, %c0_47] : memref<1x1024xf32, #tpu.memory_space<vmem>>, vector<1x1024xf32>
    %95 = vector.broadcast %94 : vector<1x1024xf32> to vector<8x1024xf32>
    %96 = arith.addf %93, %95 : vector<8x1024xf32>
    %97 = arith.truncf %96 : vector<8x1024xf32> to vector<8x1024xbf16>
    %c0_48 = arith.constant 0 : index
    %c0_49 = arith.constant 0 : index
    %c0_50 = arith.constant 0 : index
    %98 = vector.load %arg14[%c0_48, %c0_49, %c0_50] : memref<1x1024x3072xbf16, #tpu.memory_space<vmem>>, vector<1x1024x3072xbf16>
    %99 = vector.shape_cast %98 : vector<1x1024x3072xbf16> to vector<1024x3072xbf16>
    %cst_51 = arith.constant dense<0.000000e+00> : vector<8x3072xf32>
    %100 = tpu.matmul %97, %99, %cst_51 {dimension_numbers = #tpu.dot_dimension_numbers<[1], [0], [0], [1], [0, 0, 1, 1], [], []>} : vector<8x1024xbf16>, vector<1024x3072xbf16>, vector<8x3072xf32> -> vector<8x3072xf32>
    %c0_52 = arith.constant 0 : index
    %c0_53 = arith.constant 0 : index
    %101 = vector.load %arg15[%c0_52, %c0_53] : memref<1x3072xf32, #tpu.memory_space<vmem>>, vector<1x3072xf32>
    %102 = vector.broadcast %101 : vector<1x3072xf32> to vector<8x3072xf32>
    %103 = arith.addf %100, %102 : vector<8x3072xf32>
    %104 = math.tanh %103 : vector<8x3072xf32>
    %c0_54 = arith.constant 0 : index
    %c0_55 = arith.constant 0 : index
    %105 = vector.load %arg16[%c0_54, %c0_55] : memref<8x3072xf32, #tpu.memory_space<vmem>>, vector<8x3072xf32>
    tpu.vector_store %arg16[%c0_54, %c0_55], %104 {strides = array<i32>} : memref<8x3072xf32, #tpu.memory_space<vmem>>, vector<8x3072xf32>,
    return
  }
  func.func @transform_0(%arg0: i32) -> (i32, i32) {
    %c0_i32 = arith.constant 0 : i32
    %c0_i32_0 = arith.constant 0 : i32
    %c0_i32_1 = arith.constant 0 : i32
    return %c0_i32, %c0_i32_0 : i32, i32
  }
  func.func @transform_1(%arg0: i32) -> (i32, i32) {
    %c0_i32 = arith.constant 0 : i32
    %c0_i32_0 = arith.constant 0 : i32
    %c0_i32_1 = arith.constant 0 : i32
    return %c0_i32, %c0_i32_0 : i32, i32
  }
  func.func @transform_2(%arg0: i32) -> (i32, i32) {
    %c0_i32 = arith.constant 0 : i32
    %c0_i32_0 = arith.constant 0 : i32
    %c0_i32_1 = arith.constant 0 : i32
    return %c0_i32, %c0_i32_0 : i32, i32
  }
  func.func @transform_3(%arg0: i32) -> (i32, i32) {
    %c0_i32 = arith.constant 0 : i32
    %c0_i32_0 = arith.constant 0 : i32
    %c0_i32_1 = arith.constant 0 : i32
    return %c0_i32, %c0_i32_0 : i32, i32
  }
  func.func @transform_4(%arg0: i32) -> (i32, i32) {
    %c0_i32 = arith.constant 0 : i32
    %c0_i32_0 = arith.constant 0 : i32
    %c0_i32_1 = arith.constant 0 : i32
    return %c0_i32, %c0_i32_0 : i32, i32
  }
  func.func @transform_5(%arg0: i32) -> (i32, i32) {
    %c0_i32 = arith.constant 0 : i32
    %c0_i32_0 = arith.constant 0 : i32
    %c0_i32_1 = arith.constant 0 : i32
    return %c0_i32, %c0_i32_0 : i32, i32
  }
  func.func @transform_6(%arg0: i32) -> (i32, i32) {
    %c0_i32 = arith.constant 0 : i32
    %c0_i32_0 = arith.constant 0 : i32
    %c0_i32_1 = arith.constant 0 : i32
    return %c0_i32, %c0_i32_0 : i32, i32
  }
  func.func @transform_7(%arg0: i32) -> (i32, i32) {
    %c0_i32 = arith.constant 0 : i32
    %c0_i32_0 = arith.constant 0 : i32
    %c0_i32_1 = arith.constant 0 : i32
    return %c0_i32, %c0_i32_0 : i32, i32
  }
  func.func @transform_8(%arg0: i32) -> (i32, i32) {
    %c0_i32 = arith.constant 0 : i32
    %c0_i32_0 = arith.constant 0 : i32
    %c0_i32_1 = arith.constant 0 : i32
    return %c0_i32, %c0_i32_0 : i32, i32
  }
  func.func @transform_9(%arg0: i32) -> (i32, i32) {
    %c0_i32 = arith.constant 0 : i32
    %c0_i32_0 = arith.constant 0 : i32
    %c0_i32_1 = arith.constant 0 : i32
    return %c0_i32, %c0_i32_0 : i32, i32
  }
  func.func @transform_10(%arg0: i32) -> (i32, i32) {
    %c0_i32 = arith.constant 0 : i32
    %c0_i32_0 = arith.constant 0 : i32
    %c0_i32_1 = arith.constant 0 : i32
    return %c0_i32, %c0_i32_0 : i32, i32
  }
  func.func @transform_11(%arg0: i32) -> (i32, i32) {
    %c0_i32 = arith.constant 0 : i32
    %c0_i32_0 = arith.constant 0 : i32
    %c0_i32_1 = arith.constant 0 : i32
    return %c0_i32, %c0_i32_0 : i32, i32
  }
  func.func @transform_12(%arg0: i32) -> (i32, i32) {
    %c0_i32 = arith.constant 0 : i32
    %c0_i32_0 = arith.constant 0 : i32
    %c0_i32_1 = arith.constant 0 : i32
    return %c0_i32, %c0_i32_0 : i32, i32
  }
  func.func @transform_13(%arg0: i32) -> (i32, i32, i32) {
    %c0_i32 = arith.constant 0 : i32
    %c0_i32_0 = arith.constant 0 : i32
    %c0_i32_1 = arith.constant 0 : i32
    return %arg0, %c0_i32, %c0_i32_0 : i32, i32, i32
  }
  func.func @transform_14(%arg0: i32) -> (i32, i32) {
    %c0_i32 = arith.constant 0 : i32
    %c0_i32_0 = arith.constant 0 : i32
    return %c0_i32, %arg0 : i32, i32
  }
  func.func @transform_15(%arg0: i32) -> (i32, i32) {
    %c0_i32 = arith.constant 0 : i32
    %c0_i32_0 = arith.constant 0 : i32
    return %c0_i32, %arg0 : i32, i32
  }
}

</mosaic_0001>

<bundles_post_ra>
// kernel: generator_forward.1
= control target key start
LH: loop header
LB: loop body
LE: loop exit
PB: predicated region body
PF: predicated region fallthrough
CT: control target
= control target key end

     0   :  { %s19084_s0 = inlined_call_operand.hbm [shape: f32[8,100], index: 0, kind: input, shape index: {}]   ;;  %s19085_s1 = inlined_call_operand.hbm [shape: f32[100,256], index: 1, kind: input, shape index: {}]   ;;  %s19086_s2 = inlined_call_operand.hbm [shape: f32[1,256], index: 2, kind: input, shape index: {}]   ;;  %s19087_s3 = inlined_call_operand.hbm [shape: f32[1,256], index: 3, kind: input, shape index: {}]   ;;  %s19088_s4 = inlined_call_operand.hbm [shape: f32[1,256], index: 4, kind: input, shape index: {}]   ;;  %s19089_s5 = inlined_call_operand.hbm [shape: f32[256,512], index: 5, kind: input, shape index: {}]   ;;  %s19090_s6 = inlined_call_operand.hbm [shape: f32[1,512], index: 6, kind: input, shape index: {}]   ;;  %s19091_s7 = inlined_call_operand.hbm [shape: f32[1,512], index: 7, kind: input, shape index: {}]   ;;  %s19092_s8 = inlined_call_operand.hbm [shape: f32[1,512], index: 8, kind: input, shape index: {}]   ;;  %s19093_s9 = inlined_call_operand.hbm [shape: f32[512,1024], index: 9, kind: input, shape index: {}]   ;;  %s19094_s10 = inlined_call_operand.hbm [shape: f32[1,1024], index: 10, kind: input, shape index: {}]   ;;  %s19095_s11 = inlined_call_operand.hbm [shape: f32[1,1024], index: 11, kind: input, shape index: {}]   ;;  %s19096_s12 = inlined_call_operand.hbm [shape: f32[1,1024], index: 12, kind: input, shape index: {}]   ;;  %s19097_s13 = inlined_call_operand.hbm [shape: bf16[4,1024,3072], index: 13, kind: input, shape index: {}]   ;;  %s19098_s14 = inlined_call_operand.hbm [shape: f32[1,12288], index: 14, kind: input, shape index: {}]   ;;  %s19099_s15 = inlined_call_operand.vmem [shape: f32[8,12288], index: 15, kind: output, shape index: {}]  }
   0x1   :  { %19111 = sst [smem:[#allocation34_spill]] %s19084_s0 }
   0x2   :  { %19112 = sst [smem:[#allocation35_spill]] %s19085_s1 }
   0x3   :  { %19113 = sst [smem:[#allocation36_spill]] %s19087_s3 }
   0x4   :  { %19114 = sst [smem:[#allocation37_spill]] %s19089_s5 }
   0x5   :  { %19115 = sst [smem:[#allocation38_spill]] %s19091_s7 }
   0x6   :  { %19116 = sst [smem:[#allocation39_spill]] %s19093_s9 }
   0x7   :  { %19117 = sst [smem:[#allocation40_spill]] %s19095_s11 }
   0x8   :  { %19118 = sst [smem:[#allocation41_spill]] %s19098_s14 }
   0x9   :  { %19119 = sst [smem:[#allocation42_spill]] %s19099_s15 }
   0xa   :  { %20 = vsyncpa [#allocation3], 0 }
   0xb   :  { %21 = vsyncpa [#allocation5], 0 }
   0xc   :  { %22 = vsyncpa [#allocation8], 0 }
   0xd   :  { %23 = vsyncpa [#allocation11], 0 }
   0xe   :  { %24 = vsyncpa [#allocation14], 0 }
   0xf   :  { %25 = vsyncpa [#allocation17], 0 }
  0x10   :  { %26 = vsyncpa [#allocation20], 0 }
  0x11   :  { %27 = vsyncpa [#allocation23], 0 }
  0x12   :  { %29 = vsyncpa [#allocation23 + $0x1], 0  ;;  %s16734_s18 = smov 0   ;;  %s16736_s19 = smov 0  }
  0x13   :  { %s16738_s20 = smov 0   ;;  %s16740_s21 = smov 0  }
  0x14 LB: > { %s16630_s22 = smov [#allocation4]   ;;  %s16755_s24 = sadd.s32 4294967295, %s16628_s21   ;;  %s16628_s21 = sphi %s16740_s21, %s19163_s21   ;;  %s16624_s20 = sphi %s16738_s20, %s19162_s20   ;;  %s16620_s19 = sphi %s16736_s19, %s19161_s19   ;;  %s16616_s18 = sphi %s16734_s18, %s19160_s18  }
  0x15   : > { %s414_s23 = sshll.u32 %s16630_s22, 4  ;;  %p14326_p0 = scmp.ge.s32.totalorder %s16628_s21, 1  ;;  %s415_s23 = int_to_ptr.vmem [resolvable:$true] %s414_s23 }
  0x16   : > { %p19101_p1 = scmp.eq.s32.totalorder %s16755_s24, 0  ;;  %p391_p2 = scmp.lt.s32.totalorder %s16628_s21, 5 }
  0x17   : > { %s16631_s26 = smov [#allocation7]   ;;  %s16632_s29 = smov [#allocation10]  }
  0x18   : > { %p16760_p3 = pnand %p14326_p0, %p391_p2  ;;  %s439_s27 = sshll.u32 %s16631_s26, 4  ;;  %s440_s27 = int_to_ptr.vmem [resolvable:$true] %s439_s27 }
  0x19   : > { %s460_s30 = sshll.u32 %s16632_s29, 4  ;;  %s16183_s17 = scalar_lea.vmem %s415_s23, 3328  ;;  %s16772_s30 = int_to_ptr.vmem [resolvable:$true] %s460_s30 }
  0x1a   : > { %s19120_s25 = scalar_select %p16760_p3, 1, 0 }
  0x1b   : > { %p15961_p4 = pneg %p16760_p3  ;;  %p16184_p7 = scmp.ne.s32.totalorder %s415_s23, %s16183_s17 }
  0x1c   : > { %19121 = sst [smem:[#allocation33_spill]] %s19120_s25  ;;  %p16191_p10 = scmp.lt.s32.totalorder %s415_s23, %s415_s23 }
  0x1d   : > { %p16768_p5 = pnand %p15961_p4, %p19101_p1  ;;  %p16192_p11 = scmp.lt.s32.totalorder %s16183_s17, %s16183_s17 }
  0x1f   : > { %s19122_s28 = scalar_select %p16768_p5, 1, 0 }
  0x20   : > { %p16776_p6 = pneg %p16768_p5  ;;  %p16193_p12 = por %p16192_p11, %p16191_p10 }
  0x22   : > { %p16186_p8 = pnand %p16184_p7, %p16776_p6 }
  0x24   : > { %p16187_p9 = pneg %p16186_p8 }
  0x26   : > { %p16194_p13 = pnand %p16193_p12, %p16187_p9 }
  0x28   : > { %16197 = shalt.err (!%p16194_p13)
}
  0x29   : > { %s16633_s22 = smov 256   ;;  %s16634_s26 = smov 16  }
  0x2a   : > { %s19124_s1 = sld [smem:[#allocation35_spill]]  ;;  %s16209_s25 = scalar_lea.vmem %s440_s27, 32 }
  0x2b   : > { %p16210_p0 = scmp.ne.s32.totalorder %s440_s27, %s16209_s25  ;;  %p16217_p7 = scmp.lt.s32.totalorder %s440_s27, %s440_s27 }
  0x2c   : > { %p16218_p8 = scmp.lt.s32.totalorder %s16209_s25, %s16209_s25 }
  0x2d   : > { %p16212_p2 = pnand %p16210_p0, %p16776_p6 }
  0x2e   : > { %p16219_p1 = por %p16218_p8, %p16217_p7 }
  0x2f   : > { %p16213_p4 = pneg %p16212_p2 }
  0x30   : > { %15967 = dma.hbm_to_vmem [thread:$0]  (!%p16768_p5), %s19124_s1, 3328, %s415_s23, [#allocation5], %s16633_s22, %s16633_s22, %s16634_s26  }
  0x31   : > { %p16220_p10 = pnand %p16219_p1, %p16213_p4 }
  0x33   : > { %16223 = shalt.err (!%p16220_p10)
}
  0x34   : > { %s19125_s3 = sld [smem:[#allocation36_spill]]  ;;  %s16235_s15 = scalar_lea.vmem %s16772_s30, 16384 }
  0x35   : > { %p16236_p9 = scmp.ne.s32.totalorder %s16772_s30, %s16235_s15  ;;  %p16243_p13 = scmp.lt.s32.totalorder %s16772_s30, %s16772_s30 }
  0x36   : > { %p16244_p0 = scmp.lt.s32.totalorder %s16235_s15, %s16235_s15 }
  0x37   : > { %p16238_p11 = pnand %p16236_p9, %p16776_p6 }
  0x38   : > { %p16245_p1 = por %p16244_p0, %p16243_p13 }
  0x39   : > { %p16239_p12 = pneg %p16238_p11 }
  0x3a   : > { %15973 = dma.hbm_to_vmem [thread:$0]  (!%p16768_p5), %s19125_s3, 32, %s440_s27, [#allocation8]  }
  0x3b   : > { %p16246_p2 = pnand %p16245_p1, %p16239_p12 }
  0x3d   : > { %16249 = shalt.err (!%p16246_p2)
}
  0x3e   : > { %s16635_s23 = smov 512   ;;  %s16636_s14 = smov 32  }
  0x3f   : > { %s19126_s5 = sld [smem:[#allocation37_spill]]  ;;  %s16637_s27 = smov [#allocation13]  }
  0x40   : > { %s485_s26 = sshll.u32 %s16637_s27, 4  ;;  %s16638_s29 = smov [#allocation16]   ;;  %s486_s26 = int_to_ptr.vmem [resolvable:$true] %s485_s26 }
  0x41   : > { %s506_s17 = sshll.u32 %s16638_s29, 4  ;;  %s16261_s1 = scalar_lea.vmem %s486_s26, 64  ;;  %s507_s17 = int_to_ptr.vmem [resolvable:$true] %s506_s17 }
  0x42   : > { %p16262_p4 = scmp.ne.s32.totalorder %s486_s26, %s16261_s1  ;;  %p16269_p10 = scmp.lt.s32.totalorder %s486_s26, %s486_s26 }
  0x43   : > { %p16270_p9 = scmp.lt.s32.totalorder %s16261_s1, %s16261_s1 }
  0x44   : > { %p16264_p7 = pnand %p16262_p4, %p16776_p6 }
  0x45   : > { %15979 = dma.hbm_to_vmem [thread:$0]  (!%p16768_p5), %s19126_s5, 16384, %s16772_s30, [#allocation11], %s16635_s23, %s16635_s23, %s16636_s14  }
  0x46   : > { %p16265_p8 = pneg %p16264_p7  ;;  %p16271_p11 = por %p16270_p9, %p16269_p10 }
  0x48   : > { %p16272_p12 = pnand %p16271_p11, %p16265_p8 }
  0x4a   : > { %16275 = shalt.err (!%p16272_p12)
}
  0x4b   : > { %s19127_s7 = sld [smem:[#allocation38_spill]]  ;;  %s16287_s30 = scalar_lea.vmem %s507_s17, 65536 }
  0x4c   : > { %p16288_p13 = scmp.ne.s32.totalorder %s507_s17, %s16287_s30  ;;  %p16295_p2 = scmp.lt.s32.totalorder %s507_s17, %s507_s17 }
  0x4d   : > { %p16296_p4 = scmp.lt.s32.totalorder %s16287_s30, %s16287_s30 }
  0x4e   : > { %p16290_p0 = pnand %p16288_p13, %p16776_p6 }
  0x4f   : > { %p16297_p7 = por %p16296_p4, %p16295_p2 }
  0x50   : > { %p16291_p1 = pneg %p16290_p0 }
  0x51   : > { %15985 = dma.hbm_to_vmem [thread:$0]  (!%p16768_p5), %s19127_s7, 64, %s486_s26, [#allocation14]  }
  0x52   : > { %p16298_p3 = pnand %p16297_p7, %p16291_p1 }
  0x54   : > { %16301 = shalt.err (!%p16298_p3)
}
  0x55   : > { %s16639_s1 = smov 1024   ;;  %s16640_s23 = smov 64  }
  0x56   : > { %s19128_s9 = sld [smem:[#allocation39_spill]]  ;;  %s16641_s27 = smov [#allocation19]  }
  0x57   : > { %s531_s26 = sshll.u32 %s16641_s27, 4  ;;  %s532_s26 = int_to_ptr.vmem [resolvable:$true] %s531_s26 }
  0x58   : > { %s16313_s29 = scalar_lea.vmem %s532_s26, 128  ;;  %p16321_p11 = scmp.lt.s32.totalorder %s532_s26, %s532_s26 }
  0x59   : > { %p16314_p8 = scmp.ne.s32.totalorder %s532_s26, %s16313_s29  ;;  %p16322_p12 = scmp.lt.s32.totalorder %s16313_s29, %s16313_s29 }
  0x5b   : > { %p16316_p10 = pnand %p16314_p8, %p16776_p6  ;;  %p16323_p3 = por %p16322_p12, %p16321_p11 }
  0x5c   : > { %15991 = dma.hbm_to_vmem [thread:$0]  (!%p16768_p5), %s19128_s9, 65536, %s507_s17, [#allocation17], %s16639_s1, %s16639_s1, %s16640_s23  }
  0x5d   : > { %p16317_p9 = pneg %p16316_p10 }
  0x5f   : > { %p16324_p13 = pnand %p16323_p3, %p16317_p9 }
  0x61   : > { %16327 = shalt.err (!%p16324_p13)
}
  0x62   : > { %s19129_s11 = sld [smem:[#allocation40_spill]]  ;;  %s16828_s17 = sadd.s32 1, %s16628_s21  }
  0x63   : > { %s315_s30 = sadd.s32 1, %s16624_s20  ;;  %s312_s1 = ssub.s32 %s16628_s21, %s16828_s17 }
  0x64   : > { %p322_p0 = scmp.ne.s32.totalorder %s16624_s20, %s16620_s19  ;;  %p313_p1 = scmp.eq.s32.totalorder %s312_s1, 0 }
  0x65   : > { %p323_p2 = scmp.eq.s32.totalorder %s16628_s21, 0  ;;  %p328_p4 = scmp.ne.s32.totalorder %s16620_s19, %s16616_s18 }
  0x66   : > { %p16021_p7 = scmp.lt.s32.totalorder %s16628_s21, 4  ;;  %p19130_p10 = scmp.eq.s32.totalorder %s16755_s24, 0 }
  0x67   : > { %s16840_s23 = scalar_select %p313_p1, %s16624_s20, %s315_s30  }
  0x68   : > { %15997 = dma.hbm_to_vmem [thread:$0]  (!%p16768_p5), %s19129_s11, 128, %s532_s26, [#allocation20]  }
  0x69   : > { %p324_p8 = por %p323_p2, %p322_p0  ;;  %p16844_p9 = por %p19130_p10, %p328_p4 }
  0x6a   : > { %s553_s22 = sand.u32 1, %s16628_s21   ;;  %s19104_s27 = sand.u32 1, %s16624_s20  }
  0x6b   : > { %s19131_s14 = scalar_select %p16844_p9, 1, 0 }
  0x6c   : > { %s15900_s26 = smul.u32 12288, %s19104_s27  ;;  %p16853_p11 = pnand %p16021_p7, %p324_p8 }
  0x6d   : > { %s15901_s29 = smul.u32 196608, %s16628_s21  ;;  %s16864_s27 = scalar_lea.sflag [#allocation23], %s553_s22 }
  0x6e   : > { %s19132_s15 = scalar_select %p16853_p11, 1, 0 }
  0x6f   : > { %s16860_s30 = scalar_lea.hbm %s19097_s13, %s15901_s29  ;;  %s557_s1 = scalar_lea.vmem [#allocation22], %s15900_s26 }
  0x70   : > { %s564_s3 = sshll.u32 %s557_s1, 4  ;;  %s16328_s5 = scalar_lea.hbm %s16860_s30, 196608  ;;  %s16862_s3 = int_to_ptr.vmem [resolvable:$true] %s564_s3 }
  0x71   : > { %p16329_p12 = scmp.ne.s32.totalorder %s16860_s30, %s16328_s5  ;;  %p19108_p3 = pneg %p16853_p11 }
  0x72   : > { %s16333_s18 = scalar_lea.hbm %s19097_s13, 786432  ;;  %p16334_p1 = scmp.lt.s32.totalorder %s16860_s30, %s19097_s13 }
  0x73   : > { %p16331_p13 = pnand %p19108_p3, %p16329_p12  ;;  %p16335_p2 = scmp.lt.s32.totalorder %s16333_s18, %s16328_s5 }
  0x75   : > { %p16332_p0 = pneg %p16331_p13  ;;  %p16336_p4 = por %p16335_p2, %p16334_p1 }
  0x77   : > { %p16337_p7 = pnand %p16336_p4, %p16332_p0 }
  0x79   : > { %16340 = shalt.err (!%p16337_p7)
}
  0x7a   : > { %s16341_s22 = scalar_lea.vmem %s16862_s3, 196608  ;;  %s16642_s26 = smov [#allocation22]  }
  0x7b   : > { %p16342_p8 = scmp.ne.s32.totalorder %s16862_s3, %s16341_s22  ;;  %s16346_s1 = sshll.u32 %s16642_s26, 4  ;;  %s16347_s1 = int_to_ptr.vmem [resolvable:$false] %s16346_s1 }
  0x7c   : > { %s16348_s25 = scalar_lea.vmem %s16347_s1, 393216  ;;  %p16349_p13 = scmp.lt.s32.totalorder %s16862_s3, %s16347_s1 }
  0x7d   : > { %p16344_p10 = pnand %p16342_p8, %p19108_p3  ;;  %p16350_p9 = scmp.lt.s32.totalorder %s16348_s25, %s16341_s22 }
  0x7f   : > { %p16345_p12 = pneg %p16344_p10  ;;  %p16351_p5 = por %p16350_p9, %p16349_p13 }
  0x81   : > { %p16352_p1 = pnand %p16351_p5, %p16345_p12 }
  0x83   : > { %16355 = shalt.err (!%p16352_p1)
}
  0x84   : > { %s16643_s5 = smov 1536   ;;  %s16644_s7 = smov 96  }
  0x85   : > { %16004 = dma.hbm_to_vmem [thread:$0]  (!%p16853_p11), %s16860_s30, 196608, %s16862_s3, %s16864_s27, %s16643_s5, %s16643_s5, %s16644_s7  }
  0x86   : > { %s16645_s9 = smov [#allocation2]   ;;  %s16646_s18 = smov [#allocation6]  }
  0x87   : > { %s404_s29 = sshll.u32 %s16645_s9, 4  ;;  %s428_s26 = sshll.u32 %s16646_s18, 4  ;;  %s405_s29 = int_to_ptr.vmem [resolvable:$true] %s404_s29  ;;  %s429_s26 = int_to_ptr.vmem [resolvable:$true] %s428_s26 }
  0x88   : > { %s16367_s11 = scalar_lea.vmem %s405_s29, 128  ;;  %p16375_p2 = scmp.lt.s32.totalorder %s405_s29, %s405_s29 }
  0x89   : > { %p16368_p0 = scmp.ne.s32.totalorder %s405_s29, %s16367_s11  ;;  %p16376_p4 = scmp.lt.s32.totalorder %s16367_s11, %s16367_s11 }
  0x8b   : > { %p16370_p9 = pnand %p16368_p0, %p16776_p6  ;;  %p16377_p7 = por %p16376_p4, %p16375_p2 }
  0x8d   : > { %p16371_p5 = pneg %p16370_p9 }
  0x8f   : > { %p16378_p8 = pnand %p16377_p7, %p16371_p5 }
  0x91   : > { %16381 = shalt.err (!%p16378_p8)
}
  0x92   : > { %p19133_p10 = scmp.ne.s32.totalorder %s19122_s28, 0  ;;  %s19134_s0 = sld [smem:[#allocation34_spill]] }
  0x93   : > { %s16393_s3 = scalar_lea.vmem %s429_s26, 32  ;;  %p16401_p0 = scmp.lt.s32.totalorder %s429_s26, %s429_s26 }
  0x94   : > { %p16394_p12 = scmp.ne.s32.totalorder %s429_s26, %s16393_s3  ;;  %p16402_p9 = scmp.lt.s32.totalorder %s16393_s3, %s16393_s3 }
  0x96   : > { %p16396_p13 = pnand %p16394_p12, %p16776_p6  ;;  %p16403_p3 = por %p16402_p9, %p16401_p0 }
  0x98   : > { %15964 = dma.hbm_to_vmem [thread:$0]  (!%p19133_p10), %s19134_s0, 128, %s405_s29, [#allocation3]  }
  0x99   : > { %p16397_p1 = pneg %p16396_p13 }
  0x9b   : > { %p16404_p11 = pnand %p16403_p3, %p16397_p1 }
  0x9d   : > { %16407 = shalt.err (!%p16404_p11)
}
  0x9e   : > { %15970 = dma.hbm_to_vmem [thread:$0]  (!%p19133_p10), %s19086_s2, 32, %s429_s26, [#allocation5]  }
  0x9f   : > { %s16647_s25 = smov [#allocation9]   ;;  %s16648_s7 = smov [#allocation12]  }
  0xa0   : > { %s450_s5 = sshll.u32 %s16647_s25, 4  ;;  %s474_s9 = sshll.u32 %s16648_s7, 4  ;;  %s451_s5 = int_to_ptr.vmem [resolvable:$true] %s450_s5  ;;  %s475_s9 = int_to_ptr.vmem [resolvable:$true] %s474_s9 }
  0xa1   : > { %s16419_s29 = scalar_lea.vmem %s451_s5, 32  ;;  %p16427_p7 = scmp.lt.s32.totalorder %s451_s5, %s451_s5 }
  0xa2   : > { %p16420_p5 = scmp.ne.s32.totalorder %s451_s5, %s16419_s29  ;;  %p16428_p3 = scmp.lt.s32.totalorder %s16419_s29, %s16419_s29 }
  0xa4   : > { %p16422_p2 = pnand %p16420_p5, %p16776_p6  ;;  %p16429_p11 = por %p16428_p3, %p16427_p7 }
  0xa6   : > { %p16423_p4 = pneg %p16422_p2 }
  0xa8   : > { %p16430_p8 = pnand %p16429_p11, %p16423_p4 }
  0xaa   : > { %16433 = shalt.err (!%p16430_p8)
}
  0xab   : > { %15976 = dma.hbm_to_vmem [thread:$0]  (!%p19133_p10), %s19088_s4, 32, %s451_s5, [#allocation8]  }
  0xac   : > { %s16445_s26 = scalar_lea.vmem %s475_s9, 64  ;;  %p16453_p0 = scmp.lt.s32.totalorder %s475_s9, %s475_s9 }
  0xad   : > { %p16446_p12 = scmp.ne.s32.totalorder %s475_s9, %s16445_s26  ;;  %p16454_p9 = scmp.lt.s32.totalorder %s16445_s26, %s16445_s26 }
  0xaf   : > { %p16448_p13 = pnand %p16446_p12, %p16776_p6  ;;  %p16455_p5 = por %p16454_p9, %p16453_p0 }
  0xb1   : > { %p16449_p1 = pneg %p16448_p13 }
  0xb3   : > { %p16456_p2 = pnand %p16455_p5, %p16449_p1 }
  0xb5   : > { %16459 = shalt.err (!%p16456_p2)
}
  0xb6   : > { %15982 = dma.hbm_to_vmem [thread:$0]  (!%p19133_p10), %s19090_s6, 64, %s475_s9, [#allocation11]  }
  0xb7   : > { %s16649_s11 = smov [#allocation15]   ;;  %s16650_s25 = smov [#allocation18]  }
  0xb8   : > { %s496_s30 = sshll.u32 %s16649_s11, 4  ;;  %s520_s5 = sshll.u32 %s16650_s25, 4  ;;  %s497_s30 = int_to_ptr.vmem [resolvable:$true] %s496_s30  ;;  %s521_s5 = int_to_ptr.vmem [resolvable:$true] %s520_s5 }
  0xb9   : > { %s16471_s7 = scalar_lea.vmem %s497_s30, 64  ;;  %p16479_p11 = scmp.lt.s32.totalorder %s497_s30, %s497_s30 }
  0xba   : > { %p16472_p4 = scmp.ne.s32.totalorder %s497_s30, %s16471_s7  ;;  %p16480_p8 = scmp.lt.s32.totalorder %s16471_s7, %s16471_s7 }
  0xbc   : > { %p16474_p7 = pnand %p16472_p4, %p16776_p6  ;;  %p16481_p12 = por %p16480_p8, %p16479_p11 }
  0xbe   : > { %p16475_p3 = pneg %p16474_p7 }
  0xc0   : > { %p16482_p13 = pnand %p16481_p12, %p16475_p3 }
  0xc2   : > { %16485 = shalt.err (!%p16482_p13)
}
  0xc3   : > { %15988 = dma.hbm_to_vmem [thread:$0]  (!%p19133_p10), %s19092_s8, 64, %s497_s30, [#allocation14]  }
  0xc4   : > { %s16497_s9 = scalar_lea.vmem %s521_s5, 128  ;;  %p16505_p5 = scmp.lt.s32.totalorder %s521_s5, %s521_s5 }
  0xc5   : > { %p16498_p1 = scmp.ne.s32.totalorder %s521_s5, %s16497_s9  ;;  %p16506_p2 = scmp.lt.s32.totalorder %s16497_s9, %s16497_s9 }
  0xc7   : > { %p16500_p0 = pnand %p16498_p1, %p16776_p6  ;;  %p16507_p4 = por %p16506_p2, %p16505_p5 }
  0xc9   : > { %p16501_p9 = pneg %p16500_p0 }
  0xcb   : > { %p16508_p7 = pnand %p16507_p4, %p16501_p9 }
  0xcd   : > { %16511 = shalt.err (!%p16508_p7)
}
  0xce   : > { %15994 = dma.hbm_to_vmem [thread:$0]  (!%p19133_p10), %s19094_s10, 128, %s521_s5, [#allocation17]  }
  0xcf   : > { %s16651_s1 = smov [#allocation21]   ;;  %s19135_s11 = sand.u32 1, %s16624_s20  }
  0xd0   : > { %s542_s3 = sshll.u32 %s16651_s1, 4  ;;  %s15902_s30 = smul.u32 24, %s19135_s11  ;;  %s543_s3 = int_to_ptr.vmem [resolvable:$true] %s542_s3 }
  0xd1   : > { %s15899_s25 = smul.u32 384, %s16628_s21  ;;  %s16523_s7 = scalar_lea.vmem %s543_s3, 128 }
  0xd2   : > { %p16524_p3 = scmp.ne.s32.totalorder %s543_s3, %s16523_s7  ;;  %p16531_p12 = scmp.lt.s32.totalorder %s543_s3, %s543_s3 }
  0xd3   : > { %p16532_p13 = scmp.lt.s32.totalorder %s16523_s7, %s16523_s7 }
  0xd4   : > { %p16526_p11 = pnand %p16524_p3, %p16776_p6 }
  0xd5   : > { %p16533_p1 = por %p16532_p13, %p16531_p12 }
  0xd6   : > { %p16527_p8 = pneg %p16526_p11 }
  0xd8   : > { %p16534_p0 = pnand %p16533_p1, %p16527_p8 }
  0xda   : > { %16537 = shalt.err (!%p16534_p0)
}
  0xdb   : > { %16000 = dma.hbm_to_vmem [thread:$0]  (!%p19133_p10), %s19096_s12, 128, %s543_s3, [#allocation20]  }
  0xdc   : > { %s19136_s21 = sld [smem:[#allocation41_spill]]  ;;  %s578_s1 = scalar_lea.vmem [#allocation24], %s15902_s30 }
  0xdd   : > { %s586_s16 = sshll.u32 %s578_s1, 4  ;;  %p19138_p9 = scmp.ne.s32.totalorder %s19132_s15, 0  ;;  %s587_s16 = int_to_ptr.vmem [resolvable:$true] %s586_s16 }
  0xdf   : > { %p19139_p5 = pneg %p19138_p9 }
  0xe2   : > { %s19137_s22 = smov %s19136_s21  ;;  %s584_s26 = scalar_lea.hbm %s19136_s21, %s15899_s25 }
  0xe3   : > { %s16538_s11 = scalar_lea.hbm %s584_s26, 384  ;;  %s16543_s0 = scalar_lea.hbm %s19137_s22, 1536 }
  0xe4   : > { %p16539_p6 = scmp.ne.s32.totalorder %s584_s26, %s16538_s11  ;;  %p16544_p10 = scmp.lt.s32.totalorder %s584_s26, %s19137_s22 }
  0xe5   : > { %p16545_p7 = scmp.lt.s32.totalorder %s16543_s0, %s16538_s11 }
  0xe6   : > { %p16541_p2 = pnand %p16539_p6, %p19139_p5 }
  0xe7   : > { %p16546_p3 = por %p16545_p7, %p16544_p10 }
  0xe8   : > { %p16542_p4 = pneg %p16541_p2 }
  0xea   : > { %p16547_p11 = pnand %p16546_p3, %p16542_p4 }
  0xec   : > { %16550 = shalt.err (!%p16547_p11)
}
  0xed   : > { %s16551_s3 = scalar_lea.vmem %s587_s16, 384  ;;  %p19140_p12 = pmov %p19139_p5 }
  0xee   : > { %p16552_p8 = scmp.ne.s32.totalorder %s587_s16, %s16551_s3  ;;  %s16652_s30 = smov [#allocation24]  }
  0xef   : > { %s16556_s25 = sshll.u32 %s16652_s30, 4  ;;  %s16557_s25 = int_to_ptr.vmem [resolvable:$false] %s16556_s25 }
  0xf0   : > { %p16554_p13 = pnand %p16552_p8, %p19140_p12  ;;  %s16558_s18 = scalar_lea.vmem %s16557_s25, 768 }
  0xf1   : > { %p16559_p0 = scmp.lt.s32.totalorder %s587_s16, %s16557_s25  ;;  %p16560_p6 = scmp.lt.s32.totalorder %s16558_s18, %s16551_s3 }
  0xf2   : > { %p16555_p1 = pneg %p16554_p13 }
  0xf3   : > { %p16561_p5 = por %p16560_p6, %p16559_p0 }
  0xf5   : > { %p16562_p2 = pnand %p16561_p5, %p16555_p1 }
  0xf7   : > { %16565 = shalt.err (!%p16562_p2)
}
  0xf8   : > { %16007 = dma.hbm_to_vmem [thread:$0]  (!%p19138_p9), %s584_s26, 384, %s587_s16, %s16864_s27  }
  0xf9   : > { %s19141_s0 = sld [smem:[#allocation33_spill]] }
  0xff   : > { %p19142_p4 = scmp.ne.s32.totalorder %s19141_s0, 0 }
 0x100   : > { %p19143_p10 = scmp.eq.s32.totalorder (!%p19142_p4), %s16755_s24, 0 }
 0x101   : > { %595 = sbr.rel (%p19142_p4) target bundleno = 2902 (0xb56), region = 80 }
 0x106   : > { %16583 = dma.done.wait (%p19143_p10), [#allocation3], 128   ;;  %p19144_p7 = pmov %p19143_p10 }
 0x108   : > { %16585 = vsyncadd (%p19144_p7), [#allocation3], 4294967168  ;;  %p19145_p3 = pmov %p19144_p7 }
 0x10a   : > { %16587 = dma.done.wait (%p19145_p3), [#allocation5], 3360   ;;  %p19146_p11 = pmov %p19145_p3 }
 0x10b   : > { %p19147_p8 = pmov %p19145_p3 }
 0x10c   : > { %16589 = vsyncadd (%p19146_p11), [#allocation5], 4294963936 }
 0x10d   : > { %16591 = dma.done.wait (%p19147_p8), [#allocation8], 64   ;;  %p19148_p9 = pmov %p19145_p3 }
 0x10e   : > { %p19149_p12 = pmov %p19145_p3 }
 0x10f   : > { %16593 = vsyncadd (%p19148_p9), [#allocation8], 4294967232 }
 0x110   : > { %16595 = dma.done.wait (%p19149_p12), [#allocation11], 16448   ;;  %p19150_p13 = pmov %p19145_p3 }
 0x111   : > { %p19151_p1 = pmov %p19145_p3 }
 0x112   : > { %16597 = vsyncadd (%p19150_p13), [#allocation11], 4294950848 }
 0x113   : > { %16599 = dma.done.wait (%p19151_p1), [#allocation14], 128   ;;  %p19152_p0 = pmov %p19151_p1 }
 0x115   : > { %16601 = vsyncadd (%p19152_p0), [#allocation14], 4294967168  ;;  %p19153_p6 = pmov %p19152_p0 }
 0x116   : > { %p19154_p5 = pmov %p19152_p0 }
 0x117   : > { %16603 = dma.done.wait (%p19153_p6), [#allocation17], 65664  }
 0x118   : > { %16605 = vsyncadd (%p19154_p5), [#allocation17], 4294901632  ;;  %p19155_p2 = pmov %p19152_p0 }
 0x119   : > { %p19156_p4 = pmov %p19152_p0 }
 0x11a   : > { %16607 = dma.done.wait (%p19155_p2), [#allocation20], 256  }
 0x11b   : > { %16609 = vsyncadd (%p19156_p4), [#allocation20], 4294967040  ;;  %s649_s27 = sand.u32 1, %s16755_s24   ;;  %s651_s15 = sand.u32 1, %s16620_s19  }
 0x11c   : > { %s15903_s9 = smul.u32 12288, %s651_s15  ;;  %s650_s21 = scalar_lea.sflag [#allocation23], %s649_s27 }
 0x11d   : > { %p19157_p10 = scmp.ne.s32.totalorder %s19131_s14, 0 }
 0x11e   : > { %s16995_s26 = scalar_lea.vmem [#allocation22], %s15903_s9 }
 0x11f   : > { %16611 = dma.done.wait (%p19157_p10), %s650_s21, 196992  }
 0x120   : > { %16613 = vsyncadd (%p19157_p10), %s650_s21, 4294770304  ;;  %v16653_v0 = vmov 0.0   ;;  %vm764_vm0 = vcmask 1043456   ;;  %v747_v1 = vld [vmem:[#allocation4 + $0xc8] sm:$0xf]  ;;  %v745_v3 = vld [vmem:[#allocation4 + $0xb8] sm:$0xff] }
 0x121   : > { %835 = vmatprep.mubr.f32.mxu0 %v16653_v0  ;;  %v746_v2 = vld [vmem:[#allocation4 + $0xc0] sm:$0xf]  ;;  %14358 = vmatprep.subr.msk.mxu0 %vm764_vm0, %v747_v1  ;;  %v744_v4 = vld [vmem:[#allocation4 + $0xb0] sm:$0xff]  ;;  %v743_v5 = vld [vmem:[#allocation4 + $0xa8] sm:$0xff]  ;;  %vm760_vm1 = vcmask 818176   ;;  %s15904_s14 = smul.u32 24, %s651_s15 }
 0x122   : > { %14359 = vmatpush1.msk.msra.mxu0 %vm764_vm0, %v746_v2  ;;  %v742_v6 = vld [vmem:[#allocation4 + $0xa0] sm:$0xff]  ;;  %v741_v7 = vld [vmem:[#allocation4 + $0x98] sm:$0xff]  ;;  %v740_v8 = vld [vmem:[#allocation4 + $0x90] sm:$0xff]  ;;  %s715_s16 = smul.u32 24, %s16755_s24  ;;  %s19159_s29 = sld [smem:[#allocation42_spill]] }
 0x123   : > { %779 = vmatprep.subr.mxu0 %v745_v3  ;;  %v739_v9 = vld [vmem:[#allocation4 + $0x88] sm:$0xff]  ;;  %v738_v10 = vld [vmem:[#allocation4 + $0x80] sm:$0xff]  ;;  %v737_v11 = vld [vmem:[#allocation4 + $0x78] sm:$0xff]  ;;  %s17450_s1 = scalar_lea.vmem [#allocation24], %s15904_s14 }
 0x124   : > { %780 = vmatpush1.msra.mxu0 %v744_v4  ;;  %v736_v12 = vld [vmem:[#allocation4 + $0x70] sm:$0xff]  ;;  %v976_v13 = vld [vmem:[#allocation10 + $0x1e8] sm:$0xff]  ;;  %v735_v14 = vld [vmem:[#allocation4 + $0x68] sm:$0xff]  ;;  %p17629_p7 = scmp.lt.s32.totalorder %s715_s16, 95 }
 0x125   : > { %781 = vmatprep.subr.mxu0 %v743_v5  ;;  %1065 = vmatprep.subr.mxu1 %v976_v13  ;;  %v734_v15 = vld [vmem:[#allocation4 + $0x60] sm:$0xff]  ;;  %v733_v16 = vld [vmem:[#allocation4 + $0x58] sm:$0xff]  ;;  %v732_v17 = vld [vmem:[#allocation4 + $0x50] sm:$0xff] }
 0x126   : > { %782 = vmatpush1.msra.mxu0 %v742_v6  ;;  %v731_v18 = vld [vmem:[#allocation4 + $0x48] sm:$0xff]  ;;  %v730_v19 = vld [vmem:[#allocation4 + $0x40] sm:$0xff]  ;;  %v729_v20 = vld [vmem:[#allocation4 + $0x38] sm:$0xff]  ;;  %s19165_s16 = smov (!%p17629_p7, %s715_s16), 95 }
 0x127   : > { %783 = vmatprep.subr.mxu0 %v741_v7  ;;  %v728_v21 = vld [vmem:[#allocation4 + $0x30] sm:$0xff]  ;;  %v727_v22 = vld [vmem:[#allocation4 + $0x28] sm:$0xff]  ;;  %v726_v23 = vld [vmem:[#allocation4 + $0x20] sm:$0xff]  ;;  %s14357_s7 = sshll.u32 %s19165_s16, 3 }
 0x128   : > { %784 = vmatpush1.msra.mxu0 %v740_v8  ;;  %v725_v24 = vld [vmem:[#allocation4 + $0x18] sm:$0xff]  ;;  %v724_v25 = vld [vmem:[#allocation4 + $0x10] sm:$0xff]  ;;  %v723_v26 = vld [vmem:[#allocation4 + $0x8] sm:$0xff]  ;;  %s17653_s5 = scalar_lea.vmem %s19159_s29, %s14357_s7 }
 0x129   : > { %785 = vmatprep.subr.mxu0 %v739_v9  ;;  %v722_v27 = vld [vmem:[#allocation4] sm:$0xff]  ;;  %v721_v28 = vld [vmem:[#allocation2] sm:$0xff]  ;;  %v978_v29 = vld [vmem:[#allocation10 + $0x1f8] sm:$0xff] }
 0x12a   : > { %786 = vmatpush1.msra.mxu0 %v738_v10  ;;  %v975_v30 = vld [vmem:[#allocation10 + $0x1e0] sm:$0xff]  ;;  %v977_v31 = vld [vmem:[#allocation10 + $0x1f0] sm:$0xff]  ;;  %v972_v32 = vld [vmem:[#allocation10 + $0x1c8] sm:$0xff] }
 0x12b   : > { %787 = vmatprep.subr.mxu0 %v737_v11  ;;  %1066 = vmatpush1.msra.mxu1 %v975_v30  ;;  %v974_v33 = vld [vmem:[#allocation10 + $0x1d8] sm:$0xff]  ;;  %v971_v34 = vld [vmem:[#allocation10 + $0x1c0] sm:$0xff]  ;;  %v973_v35 = vld [vmem:[#allocation10 + $0x1d0] sm:$0xff] }
 0x12c   : > { %788 = vmatpush1.msra.mxu0 %v736_v12  ;;  %1067 = vmatprep.subr.mxu1 %v972_v32  ;;  %v968_v36 = vld [vmem:[#allocation10 + $0x1a8] sm:$0xff]  ;;  %v970_v37 = vld [vmem:[#allocation10 + $0x1b8] sm:$0xff]  ;;  %v967_v38 = vld [vmem:[#allocation10 + $0x1a0] sm:$0xff] }
 0x12d   : > { %789 = vmatprep.subr.mxu0 %v735_v14  ;;  %1068 = vmatpush1.msra.mxu1 %v971_v34  ;;  %v969_v39 = vld [vmem:[#allocation10 + $0x1b0] sm:$0xff]  ;;  %v964_v40 = vld [vmem:[#allocation10 + $0x188] sm:$0xff]  ;;  %v966_v41 = vld [vmem:[#allocation10 + $0x198] sm:$0xff] }
 0x12e   : > { %790 = vmatpush1.msra.mxu0 %v734_v15  ;;  %1069 = vmatprep.subr.mxu1 %v968_v36  ;;  %v963_v42 = vld [vmem:[#allocation10 + $0x180] sm:$0xff]  ;;  %v965_v43 = vld [vmem:[#allocation10 + $0x190] sm:$0xff]  ;;  %v960_v44 = vld [vmem:[#allocation10 + $0x168] sm:$0xff] }
 0x12f   : > { %791 = vmatprep.subr.mxu0 %v733_v16  ;;  %1070 = vmatpush1.msra.mxu1 %v967_v38  ;;  %v962_v45 = vld [vmem:[#allocation10 + $0x178] sm:$0xff]  ;;  %v959_v46 = vld [vmem:[#allocation10 + $0x160] sm:$0xff]  ;;  %v961_v47 = vld [vmem:[#allocation10 + $0x170] sm:$0xff] }
 0x130   : > { %792 = vmatpush1.msra.mxu0 %v732_v17  ;;  %1071 = vmatprep.subr.mxu1 %v964_v40  ;;  %v956_v48 = vld [vmem:[#allocation10 + $0x148] sm:$0xff]  ;;  %v958_v49 = vld [vmem:[#allocation10 + $0x158] sm:$0xff]  ;;  %v955_v50 = vld [vmem:[#allocation10 + $0x140] sm:$0xff] }
 0x131   : > { %793 = vmatprep.subr.mxu0 %v731_v18  ;;  %1072 = vmatpush1.msra.mxu1 %v963_v42  ;;  %v957_v51 = vld [vmem:[#allocation10 + $0x150] sm:$0xff]  ;;  %v952_v52 = vld [vmem:[#allocation10 + $0x128] sm:$0xff]  ;;  %v954_v53 = vld [vmem:[#allocation10 + $0x138] sm:$0xff] }
 0x132   : > { %794 = vmatpush1.msra.mxu0 %v730_v19  ;;  %1073 = vmatprep.subr.mxu1 %v960_v44  ;;  %v951_v54 = vld [vmem:[#allocation10 + $0x120] sm:$0xff]  ;;  %v953_v55 = vld [vmem:[#allocation10 + $0x130] sm:$0xff]  ;;  %v948_v56 = vld [vmem:[#allocation10 + $0x108] sm:$0xff] }
 0x133   : > { %795 = vmatprep.subr.mxu0 %v729_v20  ;;  %1074 = vmatpush1.msra.mxu1 %v959_v46  ;;  %v950_v57 = vld [vmem:[#allocation10 + $0x118] sm:$0xff]  ;;  %v947_v58 = vld [vmem:[#allocation10 + $0x100] sm:$0xff]  ;;  %v949_v59 = vld [vmem:[#allocation10 + $0x110] sm:$0xff] }
 0x134   : > { %796 = vmatpush1.msra.mxu0 %v728_v21  ;;  %1075 = vmatprep.subr.mxu1 %v956_v48  ;;  %v944_v60 = vld [vmem:[#allocation10 + $0xe8] sm:$0xff]  ;;  %v946_v61 = vld [vmem:[#allocation10 + $0xf8] sm:$0xff]  ;;  %v943_v62 = vld [vmem:[#allocation10 + $0xe0] sm:$0xff] }
 0x135   : > { %797 = vmatprep.subr.mxu0 %v727_v22  ;;  %1076 = vmatpush1.msra.mxu1 %v955_v50  ;;  %v945_v63 = vld [vmem:[#allocation10 + $0xf0] sm:$0xff]  ;;  %v940_v0 = vld [vmem:[#allocation10 + $0xc8] sm:$0xff]  ;;  %v942_v1 = vld [vmem:[#allocation10 + $0xd8] sm:$0xff] }
 0x136   : > { %798 = vmatpush1.msra.mxu0 %v726_v23  ;;  %1077 = vmatprep.subr.mxu1 %v952_v52  ;;  %v939_v2 = vld [vmem:[#allocation10 + $0xc0] sm:$0xff]  ;;  %v941_v3 = vld [vmem:[#allocation10 + $0xd0] sm:$0xff]  ;;  %v936_v4 = vld [vmem:[#allocation10 + $0xa8] sm:$0xff] }
 0x137   : > { %799 = vmatprep.subr.mxu0 %v725_v24  ;;  %1078 = vmatpush1.msra.mxu1 %v951_v54  ;;  %v938_v5 = vld [vmem:[#allocation10 + $0xb8] sm:$0xff]  ;;  %v935_v6 = vld [vmem:[#allocation10 + $0xa0] sm:$0xff]  ;;  %v937_v7 = vld [vmem:[#allocation10 + $0xb0] sm:$0xff] }
 0x138   : > { %800 = vmatpush1.msra.mxu0 %v724_v25  ;;  %1079 = vmatprep.subr.mxu1 %v948_v56  ;;  %v932_v8 = vld [vmem:[#allocation10 + $0x88] sm:$0xff]  ;;  %v934_v9 = vld [vmem:[#allocation10 + $0x98] sm:$0xff]  ;;  %v931_v10 = vld [vmem:[#allocation10 + $0x80] sm:$0xff] }
 0x139   : > { %801 = vmatprep.subr.mxu0 %v723_v26  ;;  %1080 = vmatpush1.msra.mxu1 %v947_v58  ;;  %v933_v11 = vld [vmem:[#allocation10 + $0x90] sm:$0xff]  ;;  %v928_v12 = vld [vmem:[#allocation10 + $0x68] sm:$0xff]  ;;  %v930_v13 = vld [vmem:[#allocation10 + $0x78] sm:$0xff] }
 0x13a   : > { %802 = vmatpush1.msra.mxu0 %v722_v27  ;;  %1081 = vmatprep.subr.mxu1 %v944_v60  ;;  %v927_v14 = vld [vmem:[#allocation10 + $0x60] sm:$0xff]  ;;  %v929_v15 = vld [vmem:[#allocation10 + $0x70] sm:$0xff]  ;;  %v924_v16 = vld [vmem:[#allocation10 + $0x48] sm:$0xff] }
 0x13b   : > { %14360 = vmatmul.mubr.msk.f32.vlgmr.msra.gmra.mxu0 %vm760_vm1, %v721_v28  ;;  %1136 = vmatprep.subr.mxu0 %v978_v29  ;;  %v926_v17 = vld [vmem:[#allocation10 + $0x58] sm:$0xff]  ;;  %v923_v18 = vld [vmem:[#allocation10 + $0x40] sm:$0xff]  ;;  %v925_v19 = vld [vmem:[#allocation10 + $0x50] sm:$0xff] }
 0x13c   : > { %1137 = vmatpush1.msra.mxu0 %v977_v31  ;;  %1082 = vmatpush1.msra.mxu1 %v943_v62  ;;  %v920_v20 = vld [vmem:[#allocation10 + $0x28] sm:$0xff]  ;;  %v922_v21 = vld [vmem:[#allocation10 + $0x38] sm:$0xff]  ;;  %v919_v22 = vld [vmem:[#allocation10 + $0x20] sm:$0xff] }
 0x13d   : > { %1138 = vmatprep.subr.mxu0 %v974_v33  ;;  %1083 = vmatprep.subr.mxu1 %v940_v0  ;;  %v921_v23 = vld [vmem:[#allocation10 + $0x30] sm:$0xff]  ;;  %v916_v24 = vld [vmem:[#allocation10 + $0x8] sm:$0xff]  ;;  %v918_v25 = vld [vmem:[#allocation10 + $0x18] sm:$0xff] }
 0x13e   : > { %1139 = vmatpush1.msra.mxu0 %v973_v35  ;;  %1084 = vmatpush1.msra.mxu1 %v939_v2  ;;  %v915_v26 = vld [vmem:[#allocation10] sm:$0xff]  ;;  %v917_v27 = vld [vmem:[#allocation10 + $0x10] sm:$0xff]  ;;  %v1040_v28 = vld [vmem:[#allocation10 + $0x3e8] sm:$0xff] }
 0x13f   : > { %1140 = vmatprep.subr.mxu0 %v970_v37  ;;  %1085 = vmatprep.subr.mxu1 %v936_v4  ;;  %v1042_v29 = vld [vmem:[#allocation10 + $0x3f8] sm:$0xff]  ;;  %v1039_v30 = vld [vmem:[#allocation10 + $0x3e0] sm:$0xff]  ;;  %v1041_v31 = vld [vmem:[#allocation10 + $0x3f0] sm:$0xff] }
 0x140   : > { %1141 = vmatpush1.msra.mxu0 %v969_v39  ;;  %1086 = vmatpush1.msra.mxu1 %v935_v6  ;;  %v1036_v32 = vld [vmem:[#allocation10 + $0x3c8] sm:$0xff]  ;;  %v1038_v33 = vld [vmem:[#allocation10 + $0x3d8] sm:$0xff]  ;;  %v1035_v34 = vld [vmem:[#allocation10 + $0x3c0] sm:$0xff] }
 0x141   : > { %1142 = vmatprep.subr.mxu0 %v966_v41  ;;  %1087 = vmatprep.subr.mxu1 %v932_v8  ;;  %v1037_v35 = vld [vmem:[#allocation10 + $0x3d0] sm:$0xff]  ;;  %v1032_v36 = vld [vmem:[#allocation10 + $0x3a8] sm:$0xff]  ;;  %v1034_v37 = vld [vmem:[#allocation10 + $0x3b8] sm:$0xff] }
 0x142   : > { %1143 = vmatpush1.msra.mxu0 %v965_v43  ;;  %1088 = vmatpush1.msra.mxu1 %v931_v10  ;;  %v1031_v38 = vld [vmem:[#allocation10 + $0x3a0] sm:$0xff]  ;;  %v1033_v39 = vld [vmem:[#allocation10 + $0x3b0] sm:$0xff]  ;;  %v1028_v40 = vld [vmem:[#allocation10 + $0x388] sm:$0xff] }
 0x143   : > { %1144 = vmatprep.subr.mxu0 %v962_v45  ;;  %1089 = vmatprep.subr.mxu1 %v928_v12  ;;  %v1030_v41 = vld [vmem:[#allocation10 + $0x398] sm:$0xff]  ;;  %v1027_v42 = vld [vmem:[#allocation10 + $0x380] sm:$0xff]  ;;  %v1029_v43 = vld [vmem:[#allocation10 + $0x390] sm:$0xff] }
 0x144   : > { %1145 = vmatpush1.msra.mxu0 %v961_v47  ;;  %1090 = vmatpush1.msra.mxu1 %v927_v14  ;;  %v1024_v44 = vld [vmem:[#allocation10 + $0x368] sm:$0xff]  ;;  %v1026_v45 = vld [vmem:[#allocation10 + $0x378] sm:$0xff]  ;;  %v1023_v46 = vld [vmem:[#allocation10 + $0x360] sm:$0xff] }
 0x145   : > { %1146 = vmatprep.subr.mxu0 %v958_v49  ;;  %1091 = vmatprep.subr.mxu1 %v924_v16  ;;  %v1025_v47 = vld [vmem:[#allocation10 + $0x370] sm:$0xff]  ;;  %v1020_v48 = vld [vmem:[#allocation10 + $0x348] sm:$0xff]  ;;  %v1022_v49 = vld [vmem:[#allocation10 + $0x358] sm:$0xff] }
 0x146   : > { %1147 = vmatpush1.msra.mxu0 %v957_v51  ;;  %1092 = vmatpush1.msra.mxu1 %v923_v18  ;;  %v1019_v50 = vld [vmem:[#allocation10 + $0x340] sm:$0xff]  ;;  %v1021_v51 = vld [vmem:[#allocation10 + $0x350] sm:$0xff]  ;;  %v1016_v52 = vld [vmem:[#allocation10 + $0x328] sm:$0xff] }
 0x147   : > { %1148 = vmatprep.subr.mxu0 %v954_v53  ;;  %1093 = vmatprep.subr.mxu1 %v920_v20  ;;  %v1018_v53 = vld [vmem:[#allocation10 + $0x338] sm:$0xff]  ;;  %v1015_v54 = vld [vmem:[#allocation10 + $0x320] sm:$0xff]  ;;  %v1012_v56 = vld [vmem:[#allocation10 + $0x308] sm:$0xff] }
 0x148   : > { %1149 = vmatpush1.msra.mxu0 %v953_v55  ;;  %1094 = vmatpush1.msra.mxu1 %v919_v22  ;;  %v1017_v55 = vld [vmem:[#allocation10 + $0x330] sm:$0xff]  ;;  %v1011_v58 = vld [vmem:[#allocation10 + $0x300] sm:$0xff]  ;;  %v1008_v60 = vld [vmem:[#allocation10 + $0x2e8] sm:$0xff] }
 0x149   : > { %1150 = vmatprep.subr.mxu0 %v950_v57  ;;  %1095 = vmatprep.subr.mxu1 %v916_v24  ;;  %v1014_v57 = vld [vmem:[#allocation10 + $0x318] sm:$0xff]  ;;  %v1007_v62 = vld [vmem:[#allocation10 + $0x2e0] sm:$0xff]  ;;  %v1004_v0 = vld [vmem:[#allocation10 + $0x2c8] sm:$0xff] }
 0x14a   : > { %1151 = vmatpush1.msra.mxu0 %v949_v59  ;;  %1096 = vmatpush1.msra.mxu1 %v915_v26  ;;  %v1013_v59 = vld [vmem:[#allocation10 + $0x310] sm:$0xff]  ;;  %v1003_v2 = vld [vmem:[#allocation10 + $0x2c0] sm:$0xff]  ;;  %v1000_v4 = vld [vmem:[#allocation10 + $0x2a8] sm:$0xff] }
 0x14b   : > { %1152 = vmatprep.subr.mxu0 %v946_v61  ;;  %1097 = vmatprep.subr.mxu1 %v1040_v28  ;;  %v1010_v61 = vld [vmem:[#allocation10 + $0x2f8] sm:$0xff]  ;;  %v999_v6 = vld [vmem:[#allocation10 + $0x2a0] sm:$0xff]  ;;  %v996_v8 = vld [vmem:[#allocation10 + $0x288] sm:$0xff] }
 0x14c   : > { %1153 = vmatpush1.msra.mxu0 %v945_v63  ;;  %1098 = vmatpush2.msra.mxu1 %v1039_v30  ;;  %v1009_v63 = vld [vmem:[#allocation10 + $0x2f0] sm:$0xff]  ;;  %v995_v10 = vld [vmem:[#allocation10 + $0x280] sm:$0xff]  ;;  %v992_v12 = vld [vmem:[#allocation10 + $0x268] sm:$0xff]  ;;  %v750_v30 = vlaneseq }
 0x14d   : > { %1154 = vmatprep.subr.mxu0 %v942_v1  ;;  %1099 = vmatprep.subr.mxu1 %v1036_v32  ;;  %v1006_v1 = vld [vmem:[#allocation10 + $0x2d8] sm:$0xff]  ;;  %v991_v14 = vld [vmem:[#allocation10 + $0x260] sm:$0xff]  ;;  %v988_v16 = vld [vmem:[#allocation10 + $0x248] sm:$0xff] }
 0x14e   : > { %1155 = vmatpush1.msra.mxu0 %v941_v3  ;;  %1100 = vmatpush2.msra.mxu1 %v1035_v34  ;;  %v1005_v3 = vld [vmem:[#allocation10 + $0x2d0] sm:$0xff]  ;;  %v987_v18 = vld [vmem:[#allocation10 + $0x240] sm:$0xff]  ;;  %v984_v20 = vld [vmem:[#allocation10 + $0x228] sm:$0xff] }
 0x14f   : > { %1156 = vmatprep.subr.mxu0 %v938_v5  ;;  %1101 = vmatprep.subr.mxu1 %v1032_v36  ;;  %v1002_v5 = vld [vmem:[#allocation10 + $0x2b8] sm:$0xff]  ;;  %v983_v22 = vld [vmem:[#allocation10 + $0x220] sm:$0xff]  ;;  %v980_v24 = vld [vmem:[#allocation10 + $0x208] sm:$0xff] }
 0x150   : > { %1157 = vmatpush1.msra.mxu0 %v937_v7  ;;  %1102 = vmatpush2.msra.mxu1 %v1031_v38  ;;  %v1001_v7 = vld [vmem:[#allocation10 + $0x2b0] sm:$0xff]  ;;  %v979_v26 = vld [vmem:[#allocation10 + $0x200] sm:$0xff] }
 0x151   : > { %1158 = vmatprep.subr.mxu0 %v934_v9  ;;  %1103 = vmatprep.subr.mxu1 %v1028_v40  ;;  %v998_v9 = vld [vmem:[#allocation10 + $0x298] sm:$0xff] }
 0x152   : > { %1159 = vmatpush1.msra.mxu0 %v933_v11  ;;  %1104 = vmatpush2.msra.mxu1 %v1027_v42  ;;  %v997_v11 = vld [vmem:[#allocation10 + $0x290] sm:$0xff] }
 0x153   : > { %1160 = vmatprep.subr.mxu0 %v930_v13  ;;  %1105 = vmatprep.subr.mxu1 %v1024_v44  ;;  %v994_v13 = vld [vmem:[#allocation10 + $0x278] sm:$0xff] }
 0x154   : > { %1161 = vmatpush1.msra.mxu0 %v929_v15  ;;  %1106 = vmatpush2.msra.mxu1 %v1023_v46  ;;  %v993_v15 = vld [vmem:[#allocation10 + $0x270] sm:$0xff] }
 0x155   : > { %1162 = vmatprep.subr.mxu0 %v926_v17  ;;  %1107 = vmatprep.subr.mxu1 %v1020_v48  ;;  %v990_v17 = vld [vmem:[#allocation10 + $0x258] sm:$0xff] }
 0x156   : > { %1163 = vmatpush1.msra.mxu0 %v925_v19  ;;  %1108 = vmatpush2.msra.mxu1 %v1019_v50  ;;  %v989_v19 = vld [vmem:[#allocation10 + $0x250] sm:$0xff] }
 0x157   : > { %1164 = vmatprep.subr.mxu0 %v922_v21  ;;  %1109 = vmatprep.subr.mxu1 %v1016_v52  ;;  %v986_v21 = vld [vmem:[#allocation10 + $0x238] sm:$0xff] }
 0x158   : > { %1165 = vmatpush1.msra.mxu0 %v921_v23  ;;  %1110 = vmatpush2.msra.mxu1 %v1015_v54  ;;  %v985_v23 = vld [vmem:[#allocation10 + $0x230] sm:$0xff] }
 0x159   : > { %1166 = vmatprep.subr.mxu0 %v918_v25  ;;  %1111 = vmatprep.subr.mxu1 %v1012_v56  ;;  %v982_v25 = vld [vmem:[#allocation10 + $0x218] sm:$0xff] }
 0x15a   : > { %1167 = vmatpush1.msra.mxu0 %v917_v27  ;;  %1112 = vmatpush2.msra.mxu1 %v1011_v58  ;;  %v981_v27 = vld [vmem:[#allocation10 + $0x210] sm:$0xff] }
 0x15b   : > { %1168 = vmatprep.subr.mxu0 %v1042_v29  ;;  %1113 = vmatprep.subr.mxu1 %v1008_v60  ;;  %v1468_v28 = vld [vmem:[#allocation16 + $0x3c8] sm:$0xff] }
 0x15c   : > { %1169 = vmatpush2.msra.mxu0 %v1041_v31  ;;  %1114 = vmatpush2.msra.mxu1 %v1007_v62  ;;  %v1724_v29 = vld [vmem:[#allocation16 + $0xbc8] sm:$0xff]  ;;  %v17001_v31 = vshrl.u32 %v750_v30, 7  ;;  %v1723_v30 = vld [vmem:[#allocation16 + $0xbc0] sm:$0xff] }
 0x15d   : > { %1170 = vmatprep.subr.mxu0 %v1038_v33  ;;  %1115 = vmatprep.subr.mxu1 %v1004_v0  ;;  %v748_v33 = vld [vmem:[#allocation6] sm:$0x3] }
 0x15e   : > { %1171 = vmatpush2.msra.mxu0 %v1037_v35  ;;  %1116 = vmatpush2.msra.mxu1 %v1003_v2  ;;  %v17004_v32 = vsub.s32 0, %v17001_v31  ;;  %v17007_v34 = vsub.s32 1, %v17001_v31 }
 0x15f   : > { %1172 = vmatprep.subr.mxu0 %v1034_v37  ;;  %1117 = vmatprep.subr.mxu1 %v1000_v4 }
 0x160   : > { %1173 = vmatpush2.msra.mxu0 %v1033_v39  ;;  %1118 = vmatpush2.msra.mxu1 %v999_v6  ;;  %v753_v35 = vrot.slane %v748_v33, %v17004_v32  ;;  %v757_v36 = vrot.slane %v748_v33, %v17007_v34  ;;  %v1460_v33 = vld [vmem:[#allocation16 + $0x388] sm:$0xff] }
 0x161   : > { %1174 = vmatprep.subr.mxu0 %v1030_v41  ;;  %1119 = vmatprep.subr.mxu1 %v996_v8 }
 0x162   : > { %1175 = vmatpush2.msra.mxu0 %v1029_v43  ;;  %1120 = vmatpush2.msra.mxu1 %v995_v10 }
 0x163   : > { %1176 = vmatprep.subr.mxu0 %v1026_v45  ;;  %1121 = vmatprep.subr.mxu1 %v992_v12 }
 0x164   : > { %1177 = vmatpush2.msra.mxu0 %v1025_v47  ;;  %1122 = vmatpush2.msra.mxu1 %v991_v14 }
 0x165   : > { %1178 = vmatprep.subr.mxu0 %v1022_v49  ;;  %1123 = vmatprep.subr.mxu1 %v988_v16 }
 0x166   : > { %1179 = vmatpush2.msra.mxu0 %v1021_v51  ;;  %1124 = vmatpush2.msra.mxu1 %v987_v18 }
 0x167   : > { %1180 = vmatprep.subr.mxu0 %v1018_v53  ;;  %1125 = vmatprep.subr.mxu1 %v984_v20 }
 0x168   : > { %1181 = vmatpush2.msra.mxu0 %v1017_v55  ;;  %1126 = vmatpush2.msra.mxu1 %v983_v22 }
 0x169   : > { %1182 = vmatprep.subr.mxu0 %v1014_v57  ;;  %1127 = vmatprep.subr.mxu1 %v980_v24 }
 0x16a   : > { %1183 = vmatpush2.msra.mxu0 %v1013_v59  ;;  %1128 = vmatpush2.msra.mxu1 %v979_v26 }
 0x16b   : > { %1184 = vmatprep.subr.mxu0 %v1010_v61  ;;  %1901 = vmatprep.subr.mxu1 %v1468_v28 }
 0x16c   : > { %1185 = vmatpush2.msra.mxu0 %v1009_v63 }
 0x16d   : > { %1186 = vmatprep.subr.mxu0 %v1006_v1 }
 0x16e   : > { %1187 = vmatpush2.msra.mxu0 %v1005_v3 }
 0x16f   : > { %1188 = vmatprep.subr.mxu0 %v1002_v5 }
 0x170   : > { %1189 = vmatpush2.msra.mxu0 %v1001_v7 }
 0x171   : > { %1190 = vmatprep.subr.mxu0 %v998_v9 }
 0x172   : > { %1191 = vmatpush2.msra.mxu0 %v997_v11 }
 0x173   : > { %1192 = vmatprep.subr.mxu0 %v994_v13 }
 0x174   : > { %1193 = vmatpush2.msra.mxu0 %v993_v15  ;;  %v881_v15 = vld [vmem:[#allocation7] sm:$0x3] }
 0x175   : > { %1194 = vmatprep.subr.mxu0 %v990_v17  ;;  %v892_v17 = vrot.slane %v881_v15, %v17004_v32  ;;  %v896_v18 = vrot.slane %v881_v15, %v17007_v34  ;;  %v1628_v15 = vld [vmem:[#allocation16 + $0x8c8] sm:$0xff] }
 0x176   : > { %1195 = vmatpush2.msra.mxu0 %v989_v19  ;;  %v901_v19 = vld [vmem:[#allocation9] sm:$0x3] }
 0x177   : > { %1196 = vmatprep.subr.mxu0 %v986_v21  ;;  %v906_v24 = vrot.slane %v901_v19, %v17004_v32 }
 0x178   : > { %1197 = vmatpush2.msra.mxu0 %v985_v23  ;;  %v910_v23 = vrot.slane %v901_v19, %v17007_v34  ;;  %v1620_v19 = vld [vmem:[#allocation16 + $0x888] sm:$0xff] }
 0x179   : > { %1198 = vmatprep.subr.mxu0 %v982_v25 }
 0x17a   : > { %1199 = vmatpush2.msra.mxu0 %v981_v27 }
 0x17b   : > { %1972 = vmatprep.subr.mxu0 %v1724_v29  ;;  %v1467_v29 = vld [vmem:[#allocation16 + $0x3c0] sm:$0xff] }
 0x1fb   : > { %v837_v37 = vpop.f32.mrf.mxu0 }
 0x1fc   : > { %v838_v38 = vadd.f32 %v837_v37, %v753_v35  ;;  %v1716_v35 = vld [vmem:[#allocation16 + $0xb88] sm:$0xff]  ;;  %v1715_v37 = vld [vmem:[#allocation16 + $0xb80] sm:$0xff] }
 0x1fd   : > { %v839_v39 = vpop.f32.mrf.mxu0 }
 0x1fe   : > { %vm842_vm2 = vcmp.gt.f32.partialorder %v838_v38, 0.0  ;;  %v844_v40 = vmul.f32 0.2, %v838_v38  ;;  %v840_v41 = vadd.f32 %v839_v39, %v757_v36  ;;  %v1459_v36 = vld [vmem:[#allocation16 + $0x380] sm:$0xff]  ;;  %v1708_v39 = vld [vmem:[#allocation16 + $0xb48] sm:$0xff] }
 0x200   : > { %v846_v42 = vsel %vm842_vm2, %v838_v38, %v844_v40  ;;  %vm843_vm3 = vcmp.gt.f32.partialorder %v840_v41, 0.0  ;;  %v845_v43 = vmul.f32 0.2, %v840_v41  ;;  %v1452_v38 = vld [vmem:[#allocation16 + $0x348] sm:$0xff]  ;;  %v1451_v40 = vld [vmem:[#allocation16 + $0x340] sm:$0xff] }
 0x201   : > { %v848_v44 = vrot.slane %v846_v42, 4 }
 0x202   : > { %v847_v45 = vsel %vm843_vm3, %v840_v41, %v845_v43  ;;  %v1707_v41 = vld [vmem:[#allocation16 + $0xb40] sm:$0xff]  ;;  %v1700_v43 = vld [vmem:[#allocation16 + $0xb08] sm:$0xff] }
 0x203   : > { %v849_v46 = vadd.f32 %v848_v44, %v846_v42  ;;  %v854_v47 = vrot.slane %v847_v45, 4  ;;  %v1443_v44 = vld [vmem:[#allocation16 + $0x300] sm:$0xff] }
 0x205   : > { %v850_v48 = vrot.slane %v849_v46, 2  ;;  %v855_v49 = vadd.f32 %v854_v47, %v847_v45  ;;  %v1692_v47 = vld [vmem:[#allocation16 + $0xac8] sm:$0xff] }
 0x207   : > { %v851_v50 = vadd.f32 %v850_v48, %v849_v46  ;;  %v856_v51 = vrot.slane %v855_v49, 2  ;;  %v1436_v46 = vld [vmem:[#allocation16 + $0x2c8] sm:$0xff]  ;;  %v1435_v48 = vld [vmem:[#allocation16 + $0x2c0] sm:$0xff] }
 0x209   : > { %v852_v52 = vrot.slane %v851_v50, 1  ;;  %v857_v53 = vadd.f32 %v856_v51, %v855_v49  ;;  %v1691_v49 = vld [vmem:[#allocation16 + $0xac0] sm:$0xff]  ;;  %v1684_v51 = vld [vmem:[#allocation16 + $0xa88] sm:$0xff] }
 0x20b   : > { %v853_v54 = vadd.f32 %v852_v52, %v851_v50  ;;  %v858_v55 = vrot.slane %v857_v53, 1  ;;  %v1428_v50 = vld [vmem:[#allocation16 + $0x288] sm:$0xff]  ;;  %v1427_v52 = vld [vmem:[#allocation16 + $0x280] sm:$0xff] }
 0x20d   : > { %v861_v56 = vmul.f32 0.125, %v853_v54  ;;  %v859_v57 = vadd.f32 %v858_v55, %v857_v53  ;;  %v1683_v53 = vld [vmem:[#allocation16 + $0xa80] sm:$0xff]  ;;  %v1420_v54 = vld [vmem:[#allocation16 + $0x248] sm:$0xff] }
 0x20e   : > { %v1676_v55 = vld [vmem:[#allocation16 + $0xa48] sm:$0xff] }
 0x20f   : > { %v863_v58 = vsub.f32 %v846_v42, %v861_v56  ;;  %v862_v59 = vmul.f32 0.125, %v859_v57  ;;  %v1444_v42 = vld [vmem:[#allocation16 + $0x308] sm:$0xff]  ;;  %v1419_v56 = vld [vmem:[#allocation16 + $0x240] sm:$0xff] }
 0x210   : > { %v1675_v57 = vld [vmem:[#allocation16 + $0xa40] sm:$0xff] }
 0x211   : > { %v865_v60 = vmul.f32 %v863_v58, %v863_v58  ;;  %v864_v61 = vsub.f32 %v847_v45, %v862_v59  ;;  %v1699_v45 = vld [vmem:[#allocation16 + $0xb00] sm:$0xff]  ;;  %v1668_v59 = vld [vmem:[#allocation16 + $0xa08] sm:$0xff] }
 0x213   : > { %v867_v62 = vrot.slane %v865_v60, 4  ;;  %v866_v63 = vmul.f32 %v864_v61, %v864_v61 }
 0x215   : > { %v868_v0 = vadd.f32 %v867_v62, %v865_v60  ;;  %v873_v1 = vrot.slane %v866_v63, 4  ;;  %v1411_v60 = vld [vmem:[#allocation16 + $0x200] sm:$0xff]  ;;  %v1404_v62 = vld [vmem:[#allocation16 + $0x1c8] sm:$0xff] }
 0x217   : > { %v869_v2 = vrot.slane %v868_v0, 2  ;;  %v874_v3 = vadd.f32 %v873_v1, %v866_v63  ;;  %v1660_v63 = vld [vmem:[#allocation16 + $0x9c8] sm:$0xff]  ;;  %v1659_v1 = vld [vmem:[#allocation16 + $0x9c0] sm:$0xff] }
 0x219   : > { %v870_v4 = vadd.f32 %v869_v2, %v868_v0  ;;  %v875_v5 = vrot.slane %v874_v3, 2  ;;  %v1403_v0 = vld [vmem:[#allocation16 + $0x1c0] sm:$0xff]  ;;  %v1396_v2 = vld [vmem:[#allocation16 + $0x188] sm:$0xff] }
 0x21b   : > { %v871_v6 = vrot.slane %v870_v4, 1  ;;  %v876_v7 = vadd.f32 %v875_v5, %v874_v3  ;;  %v1652_v3 = vld [vmem:[#allocation16 + $0x988] sm:$0xff]  ;;  %v1651_v5 = vld [vmem:[#allocation16 + $0x980] sm:$0xff] }
 0x21d   : > { %v872_v8 = vadd.f32 %v871_v6, %v870_v4  ;;  %v877_v9 = vrot.slane %v876_v7, 1  ;;  %v1395_v4 = vld [vmem:[#allocation16 + $0x180] sm:$0xff]  ;;  %v1388_v6 = vld [vmem:[#allocation16 + $0x148] sm:$0xff] }
 0x21f   : > { %v879_v10 = vmul.f32 0.125, %v872_v8  ;;  %v878_v11 = vadd.f32 %v877_v9, %v876_v7  ;;  %v1644_v7 = vld [vmem:[#allocation16 + $0x948] sm:$0xff]  ;;  %v1387_v8 = vld [vmem:[#allocation16 + $0x140] sm:$0xff] }
 0x220   : > { %v1643_v9 = vld [vmem:[#allocation16 + $0x940] sm:$0xff] }
 0x221   : > { %v882_v12 = vadd.f32 1e-05, %v879_v10  ;;  %v880_v13 = vmul.f32 0.125, %v878_v11  ;;  %v1380_v10 = vld [vmem:[#allocation16 + $0x108] sm:$0xff] }
 0x222   : > { %v1636_v11 = vld [vmem:[#allocation16 + $0x908] sm:$0xff] }
 0x223   : > { %16089 = vrsqrt.f32 %v882_v12  ;;  %v883_v14 = vadd.f32 1e-05, %v880_v13  ;;  %v1379_v12 = vld [vmem:[#allocation16 + $0x100] sm:$0xff] }
 0x224   : > { %v1635_v13 = vld [vmem:[#allocation16 + $0x900] sm:$0xff] }
 0x225   : > { %16091 = vrsqrt.f32 %v883_v14  ;;  %v1372_v14 = vld [vmem:[#allocation16 + $0xc8] sm:$0xff] }
 0x230   : > { %v16090_v16 = vpop.eup %16089 }
 0x231   : > { %v886_v20 = vmul.f32 %v16090_v16, %v863_v58  ;;  %v1412_v58 = vld [vmem:[#allocation16 + $0x208] sm:$0xff]  ;;  %v1371_v16 = vld [vmem:[#allocation16 + $0xc0] sm:$0xff] }
 0x232   : > { %v16092_v21 = vpop.eup %16091 }
 0x233   : > { %v887_v22 = vmul.f32 %v16092_v21, %v864_v61  ;;  %v899_v25 = vmul.f32 %v892_v17, %v886_v20  ;;  %v1667_v61 = vld [vmem:[#allocation16 + $0xa00] sm:$0xff] }
 0x234   : > { %v1627_v17 = vld [vmem:[#allocation16 + $0x8c0] sm:$0xff] }
 0x235   : > { %v900_v26 = vmul.f32 %v896_v18, %v887_v22  ;;  %v913_v28 = vadd.f32 %v906_v24, %v899_v25  ;;  %v1364_v18 = vld [vmem:[#allocation16 + $0x88] sm:$0xff]  ;;  %v1363_v20 = vld [vmem:[#allocation16 + $0x80] sm:$0xff] }
 0x236   : > { %v1619_v21 = vld [vmem:[#allocation16 + $0x880] sm:$0xff]  ;;  %v1356_v22 = vld [vmem:[#allocation16 + $0x48] sm:$0xff] }
 0x237   : > { %v914_v27 = vadd.f32 %v910_v23, %v900_v26  ;;  %v1612_v23 = vld [vmem:[#allocation16 + $0x848] sm:$0xff]  ;;  %v1355_v24 = vld [vmem:[#allocation16 + $0x40] sm:$0xff] }
 0x238   : > { %v1611_v25 = vld [vmem:[#allocation16 + $0x840] sm:$0xff]  ;;  %v1348_v26 = vld [vmem:[#allocation16 + $0x8] sm:$0xff] }
 0x239   : > { %1129 = vmatprep.mubr.f32.mxu1 %v914_v27  ;;  %1200 = vmatprep.mubr.f32.mxu0 %v914_v27  ;;  %v1604_v27 = vld [vmem:[#allocation16 + $0x808] sm:$0xff] }
 0x23a   : > { %1130 = vmatmul.mubr.f32.vlgmr.msra.gmra.mxu1 %v913_v28  ;;  %1201 = vmatmul.mubr.f32.vlgmr.msra.gmra.mxu0 %v913_v28  ;;  %v1347_v28 = vld [vmem:[#allocation16] sm:$0xff] }
 0x23b   : > { %1902 = vmatpush1.msra.mxu1 %v1467_v29  ;;  %1973 = vmatpush1.msra.mxu0 %v1723_v30  ;;  %v1603_v29 = vld [vmem:[#allocation16 + $0x800] sm:$0xff]  ;;  %v1596_v30 = vld [vmem:[#allocation16 + $0x7c8] sm:$0xff] }
 0x23c   : > { %1903 = vmatprep.subr.mxu1 %v1460_v33  ;;  %1974 = vmatprep.subr.mxu0 %v1716_v35  ;;  %v1852_v33 = vld [vmem:[#allocation16 + $0xfc8] sm:$0xff]  ;;  %v1595_v35 = vld [vmem:[#allocation16 + $0x7c0] sm:$0xff] }
 0x23d   : > { %1904 = vmatpush1.msra.mxu1 %v1459_v36  ;;  %1975 = vmatpush1.msra.mxu0 %v1715_v37  ;;  %v1851_v36 = vld [vmem:[#allocation16 + $0xfc0] sm:$0xff]  ;;  %v1588_v37 = vld [vmem:[#allocation16 + $0x788] sm:$0xff] }
 0x23e   : > { %1905 = vmatprep.subr.mxu1 %v1452_v38  ;;  %1976 = vmatprep.subr.mxu0 %v1708_v39  ;;  %v1844_v38 = vld [vmem:[#allocation16 + $0xf88] sm:$0xff]  ;;  %v1587_v39 = vld [vmem:[#allocation16 + $0x780] sm:$0xff] }
 0x23f   : > { %1906 = vmatpush1.msra.mxu1 %v1451_v40  ;;  %1977 = vmatpush1.msra.mxu0 %v1707_v41  ;;  %v1843_v40 = vld [vmem:[#allocation16 + $0xf80] sm:$0xff]  ;;  %v1580_v41 = vld [vmem:[#allocation16 + $0x748] sm:$0xff] }
 0x240   : > { %1907 = vmatprep.subr.mxu1 %v1444_v42  ;;  %1978 = vmatprep.subr.mxu0 %v1700_v43  ;;  %v1836_v42 = vld [vmem:[#allocation16 + $0xf48] sm:$0xff]  ;;  %v1579_v43 = vld [vmem:[#allocation16 + $0x740] sm:$0xff] }
 0x241   : > { %1908 = vmatpush1.msra.mxu1 %v1443_v44  ;;  %1979 = vmatpush1.msra.mxu0 %v1699_v45  ;;  %v1835_v44 = vld [vmem:[#allocation16 + $0xf40] sm:$0xff]  ;;  %v1572_v45 = vld [vmem:[#allocation16 + $0x708] sm:$0xff] }
 0x242   : > { %1909 = vmatprep.subr.mxu1 %v1436_v46  ;;  %1980 = vmatprep.subr.mxu0 %v1692_v47  ;;  %v1828_v46 = vld [vmem:[#allocation16 + $0xf08] sm:$0xff]  ;;  %v1571_v47 = vld [vmem:[#allocation16 + $0x700] sm:$0xff] }
 0x243   : > { %1910 = vmatpush1.msra.mxu1 %v1435_v48  ;;  %1981 = vmatpush1.msra.mxu0 %v1691_v49  ;;  %v1827_v48 = vld [vmem:[#allocation16 + $0xf00] sm:$0xff]  ;;  %v1564_v49 = vld [vmem:[#allocation16 + $0x6c8] sm:$0xff] }
 0x244   : > { %1911 = vmatprep.subr.mxu1 %v1428_v50  ;;  %1982 = vmatprep.subr.mxu0 %v1684_v51  ;;  %v1820_v50 = vld [vmem:[#allocation16 + $0xec8] sm:$0xff]  ;;  %v1563_v51 = vld [vmem:[#allocation16 + $0x6c0] sm:$0xff] }
 0x245   : > { %1912 = vmatpush1.msra.mxu1 %v1427_v52  ;;  %1983 = vmatpush1.msra.mxu0 %v1683_v53  ;;  %v1819_v52 = vld [vmem:[#allocation16 + $0xec0] sm:$0xff]  ;;  %v1556_v53 = vld [vmem:[#allocation16 + $0x688] sm:$0xff] }
 0x246   : > { %1913 = vmatprep.subr.mxu1 %v1420_v54  ;;  %1984 = vmatprep.subr.mxu0 %v1676_v55  ;;  %v1812_v54 = vld [vmem:[#allocation16 + $0xe88] sm:$0xff]  ;;  %v1555_v55 = vld [vmem:[#allocation16 + $0x680] sm:$0xff] }
 0x247   : > { %1914 = vmatpush1.msra.mxu1 %v1419_v56  ;;  %1985 = vmatpush1.msra.mxu0 %v1675_v57  ;;  %v1811_v56 = vld [vmem:[#allocation16 + $0xe80] sm:$0xff]  ;;  %v1548_v57 = vld [vmem:[#allocation16 + $0x648] sm:$0xff] }
 0x248   : > { %1915 = vmatprep.subr.mxu1 %v1412_v58  ;;  %1986 = vmatprep.subr.mxu0 %v1668_v59  ;;  %v1804_v58 = vld [vmem:[#allocation16 + $0xe48] sm:$0xff]  ;;  %v1547_v59 = vld [vmem:[#allocation16 + $0x640] sm:$0xff] }
 0x249   : > { %1916 = vmatpush1.msra.mxu1 %v1411_v60  ;;  %1987 = vmatpush1.msra.mxu0 %v1667_v61  ;;  %v1803_v60 = vld [vmem:[#allocation16 + $0xe40] sm:$0xff]  ;;  %v1540_v61 = vld [vmem:[#allocation16 + $0x608] sm:$0xff] }
 0x24a   : > { %1917 = vmatprep.subr.mxu1 %v1404_v62  ;;  %1988 = vmatprep.subr.mxu0 %v1660_v63  ;;  %v1796_v62 = vld [vmem:[#allocation16 + $0xe08] sm:$0xff]  ;;  %v1539_v63 = vld [vmem:[#allocation16 + $0x600] sm:$0xff] }
 0x24b   : > { %1918 = vmatpush1.msra.mxu1 %v1403_v0  ;;  %1989 = vmatpush1.msra.mxu0 %v1659_v1  ;;  %v1795_v0 = vld [vmem:[#allocation16 + $0xe00] sm:$0xff]  ;;  %v1532_v1 = vld [vmem:[#allocation16 + $0x5c8] sm:$0xff] }
 0x24c   : > { %1919 = vmatprep.subr.mxu1 %v1396_v2  ;;  %1990 = vmatprep.subr.mxu0 %v1652_v3  ;;  %v1788_v2 = vld [vmem:[#allocation16 + $0xdc8] sm:$0xff]  ;;  %v1531_v3 = vld [vmem:[#allocation16 + $0x5c0] sm:$0xff] }
 0x24d   : > { %1920 = vmatpush1.msra.mxu1 %v1395_v4  ;;  %1991 = vmatpush1.msra.mxu0 %v1651_v5  ;;  %v1787_v4 = vld [vmem:[#allocation16 + $0xdc0] sm:$0xff]  ;;  %v1524_v5 = vld [vmem:[#allocation16 + $0x588] sm:$0xff] }
 0x24e   : > { %1921 = vmatprep.subr.mxu1 %v1388_v6  ;;  %1992 = vmatprep.subr.mxu0 %v1644_v7  ;;  %v1780_v6 = vld [vmem:[#allocation16 + $0xd88] sm:$0xff]  ;;  %v1523_v7 = vld [vmem:[#allocation16 + $0x580] sm:$0xff] }
 0x24f   : > { %1922 = vmatpush1.msra.mxu1 %v1387_v8  ;;  %1993 = vmatpush1.msra.mxu0 %v1643_v9  ;;  %v1779_v8 = vld [vmem:[#allocation16 + $0xd80] sm:$0xff]  ;;  %v1516_v9 = vld [vmem:[#allocation16 + $0x548] sm:$0xff] }
 0x250   : > { %1923 = vmatprep.subr.mxu1 %v1380_v10  ;;  %1994 = vmatprep.subr.mxu0 %v1636_v11  ;;  %v1772_v10 = vld [vmem:[#allocation16 + $0xd48] sm:$0xff]  ;;  %v1515_v11 = vld [vmem:[#allocation16 + $0x540] sm:$0xff] }
 0x251   : > { %1924 = vmatpush1.msra.mxu1 %v1379_v12  ;;  %1995 = vmatpush1.msra.mxu0 %v1635_v13  ;;  %v1771_v12 = vld [vmem:[#allocation16 + $0xd40] sm:$0xff]  ;;  %v1508_v13 = vld [vmem:[#allocation16 + $0x508] sm:$0xff] }
 0x252   : > { %1925 = vmatprep.subr.mxu1 %v1372_v14  ;;  %1996 = vmatprep.subr.mxu0 %v1628_v15  ;;  %v1764_v14 = vld [vmem:[#allocation16 + $0xd08] sm:$0xff]  ;;  %v1507_v15 = vld [vmem:[#allocation16 + $0x500] sm:$0xff] }
 0x253   : > { %1926 = vmatpush1.msra.mxu1 %v1371_v16  ;;  %1997 = vmatpush1.msra.mxu0 %v1627_v17  ;;  %v1763_v16 = vld [vmem:[#allocation16 + $0xd00] sm:$0xff]  ;;  %v1500_v17 = vld [vmem:[#allocation16 + $0x4c8] sm:$0xff] }
 0x254   : > { %1927 = vmatprep.subr.mxu1 %v1364_v18  ;;  %1998 = vmatprep.subr.mxu0 %v1620_v19  ;;  %v1756_v18 = vld [vmem:[#allocation16 + $0xcc8] sm:$0xff]  ;;  %v1499_v19 = vld [vmem:[#allocation16 + $0x4c0] sm:$0xff] }
 0x255   : > { %1928 = vmatpush1.msra.mxu1 %v1363_v20  ;;  %1999 = vmatpush1.msra.mxu0 %v1619_v21  ;;  %v1755_v20 = vld [vmem:[#allocation16 + $0xcc0] sm:$0xff]  ;;  %v1492_v21 = vld [vmem:[#allocation16 + $0x488] sm:$0xff] }
 0x256   : > { %1929 = vmatprep.subr.mxu1 %v1356_v22  ;;  %2000 = vmatprep.subr.mxu0 %v1612_v23  ;;  %v1748_v22 = vld [vmem:[#allocation16 + $0xc88] sm:$0xff]  ;;  %v1491_v23 = vld [vmem:[#allocation16 + $0x480] sm:$0xff] }
 0x257   : > { %1930 = vmatpush1.msra.mxu1 %v1355_v24  ;;  %2001 = vmatpush1.msra.mxu0 %v1611_v25  ;;  %v1747_v24 = vld [vmem:[#allocation16 + $0xc80] sm:$0xff]  ;;  %v1484_v25 = vld [vmem:[#allocation16 + $0x448] sm:$0xff] }
 0x258   : > { %1931 = vmatprep.subr.mxu1 %v1348_v26  ;;  %2002 = vmatprep.subr.mxu0 %v1604_v27  ;;  %v1740_v26 = vld [vmem:[#allocation16 + $0xc48] sm:$0xff]  ;;  %v1483_v27 = vld [vmem:[#allocation16 + $0x440] sm:$0xff] }
 0x259   : > { %1932 = vmatpush1.msra.mxu1 %v1347_v28  ;;  %2003 = vmatpush1.msra.mxu0 %v1603_v29  ;;  %v1739_v28 = vld [vmem:[#allocation16 + $0xc40] sm:$0xff]  ;;  %v1476_v29 = vld [vmem:[#allocation16 + $0x408] sm:$0xff] }
 0x25a   : > { %1933 = vmatprep.subr.mxu1 %v1596_v30  ;;  %2004 = vmatprep.subr.mxu0 %v1852_v33  ;;  %v1732_v30 = vld [vmem:[#allocation16 + $0xc08] sm:$0xff]  ;;  %v1475_v33 = vld [vmem:[#allocation16 + $0x400] sm:$0xff] }
 0x25b   : > { %1934 = vmatpush2.msra.mxu1 %v1595_v35  ;;  %2005 = vmatpush2.msra.mxu0 %v1851_v36  ;;  %v1731_v35 = vld [vmem:[#allocation16 + $0xc00] sm:$0xff]  ;;  %v1470_v36 = vld [vmem:[#allocation16 + $0x3d8] sm:$0xff] }
 0x25c   : > { %1935 = vmatprep.subr.mxu1 %v1588_v37  ;;  %2006 = vmatprep.subr.mxu0 %v1844_v38  ;;  %v1726_v37 = vld [vmem:[#allocation16 + $0xbd8] sm:$0xff]  ;;  %v17016_v38 = vsub.s32 2, %v17001_v31 }
 0x25d   : > { %1936 = vmatpush2.msra.mxu1 %v1587_v39  ;;  %2007 = vmatpush2.msra.mxu0 %v1843_v40  ;;  %v1043_v39 = vld [vmem:[#allocation12] sm:$0xf]  ;;  %v17019_v40 = vsub.s32 3, %v17001_v31 }
 0x25e   : > { %1937 = vmatprep.subr.mxu1 %v1580_v41  ;;  %2008 = vmatprep.subr.mxu0 %v1836_v42  ;;  %v1048_v41 = vrot.slane %v1043_v39, %v17004_v32  ;;  %v1056_v42 = vrot.slane %v1043_v39, %v17016_v38 }
 0x25f   : > { %1938 = vmatpush2.msra.mxu1 %v1579_v43  ;;  %2009 = vmatpush2.msra.mxu0 %v1835_v44 }
 0x260   : > { %1939 = vmatprep.subr.mxu1 %v1572_v45  ;;  %2010 = vmatprep.subr.mxu0 %v1828_v46  ;;  %v1052_v45 = vrot.slane %v1043_v39, %v17007_v34  ;;  %v1060_v46 = vrot.slane %v1043_v39, %v17019_v40 }
 0x261   : > { %1940 = vmatpush2.msra.mxu1 %v1571_v47  ;;  %2011 = vmatpush2.msra.mxu0 %v1827_v48 }
 0x262   : > { %1941 = vmatprep.subr.mxu1 %v1564_v49  ;;  %2012 = vmatprep.subr.mxu0 %v1820_v50 }
 0x263   : > { %1942 = vmatpush2.msra.mxu1 %v1563_v51  ;;  %2013 = vmatpush2.msra.mxu0 %v1819_v52 }
 0x264   : > { %1943 = vmatprep.subr.mxu1 %v1556_v53  ;;  %2014 = vmatprep.subr.mxu0 %v1812_v54 }
 0x265   : > { %1944 = vmatpush2.msra.mxu1 %v1555_v55  ;;  %2015 = vmatpush2.msra.mxu0 %v1811_v56 }
 0x266   : > { %1945 = vmatprep.subr.mxu1 %v1548_v57  ;;  %2016 = vmatprep.subr.mxu0 %v1804_v58 }
 0x267   : > { %1946 = vmatpush2.msra.mxu1 %v1547_v59  ;;  %2017 = vmatpush2.msra.mxu0 %v1803_v60 }
 0x268   : > { %1947 = vmatprep.subr.mxu1 %v1540_v61  ;;  %2018 = vmatprep.subr.mxu0 %v1796_v62 }
 0x269   : > { %1948 = vmatpush2.msra.mxu1 %v1539_v63  ;;  %2019 = vmatpush2.msra.mxu0 %v1795_v0 }
 0x26a   : > { %1949 = vmatprep.subr.mxu1 %v1532_v1  ;;  %2020 = vmatprep.subr.mxu0 %v1788_v2 }
 0x26b   : > { %1950 = vmatpush2.msra.mxu1 %v1531_v3  ;;  %2021 = vmatpush2.msra.mxu0 %v1787_v4 }
 0x26c   : > { %1951 = vmatprep.subr.mxu1 %v1524_v5  ;;  %2022 = vmatprep.subr.mxu0 %v1780_v6 }
 0x26d   : > { %1952 = vmatpush2.msra.mxu1 %v1523_v7  ;;  %2023 = vmatpush2.msra.mxu0 %v1779_v8 }
 0x26e   : > { %1953 = vmatprep.subr.mxu1 %v1516_v9  ;;  %2024 = vmatprep.subr.mxu0 %v1772_v10 }
 0x26f   : > { %1954 = vmatpush2.msra.mxu1 %v1515_v11  ;;  %2025 = vmatpush2.msra.mxu0 %v1771_v12 }
 0x270   : > { %1955 = vmatprep.subr.mxu1 %v1508_v13  ;;  %2026 = vmatprep.subr.mxu0 %v1764_v14 }
 0x271   : > { %1956 = vmatpush2.msra.mxu1 %v1507_v15  ;;  %2027 = vmatpush2.msra.mxu0 %v1763_v16 }
 0x272   : > { %1957 = vmatprep.subr.mxu1 %v1500_v17  ;;  %2028 = vmatprep.subr.mxu0 %v1756_v18 }
 0x273   : > { %1958 = vmatpush2.msra.mxu1 %v1499_v19  ;;  %2029 = vmatpush2.msra.mxu0 %v1755_v20 }
 0x274   : > { %1959 = vmatprep.subr.mxu1 %v1492_v21  ;;  %2030 = vmatprep.subr.mxu0 %v1748_v22 }
 0x275   : > { %1960 = vmatpush2.msra.mxu1 %v1491_v23  ;;  %2031 = vmatpush2.msra.mxu0 %v1747_v24 }
 0x276   : > { %1961 = vmatprep.subr.mxu1 %v1484_v25  ;;  %2032 = vmatprep.subr.mxu0 %v1740_v26 }
 0x277   : > { %1962 = vmatpush2.msra.mxu1 %v1483_v27  ;;  %2033 = vmatpush2.msra.mxu0 %v1739_v28 }
 0x278   : > { %1963 = vmatprep.subr.mxu1 %v1476_v29  ;;  %2034 = vmatprep.subr.mxu0 %v1732_v30 }
 0x279   : > { %1964 = vmatpush2.msra.mxu1 %v1475_v33  ;;  %2035 = vmatpush2.msra.mxu0 %v1731_v35 }
 0x27a   : > { %2043 = vmatprep.subr.mxu1 %v1470_v36  ;;  %2114 = vmatprep.subr.mxu0 %v1726_v37 }
 0x2fa   : > { %v1131_v43 = vpop.f32.mrf.mxu1  ;;  %v1202_v44 = vpop.f32.mrf.mxu0 }
 0x2fb   : > { %v1132_v47 = vadd.f32 %v1131_v43, %v1048_v41  ;;  %v1203_v48 = vadd.f32 %v1202_v44, %v1056_v42 }
 0x2fc   : > { %v1133_v49 = vpop.f32.mrf.mxu1  ;;  %v1204_v50 = vpop.f32.mrf.mxu0 }
 0x2fd   : > { %vm1207_vm4 = vcmp.gt.f32.partialorder %v1132_v47, 0.0  ;;  %v1211_v51 = vmul.f32 0.2, %v1132_v47  ;;  %vm1209_vm5 = vcmp.gt.f32.partialorder %v1203_v48, 0.0  ;;  %v1213_v52 = vmul.f32 0.2, %v1203_v48 }
 0x2fe   : > { %v1134_v53 = vadd.f32 %v1133_v49, %v1052_v45  ;;  %v1205_v54 = vadd.f32 %v1204_v50, %v1060_v46 }
 0x2ff   : > { %v1215_v55 = vsel %vm1207_vm4, %v1132_v47, %v1211_v51  ;;  %v1217_v56 = vsel %vm1209_vm5, %v1203_v48, %v1213_v52 }
 0x300   : > { %v1219_v57 = vrot.slane %v1215_v55, 4  ;;  %v1231_v58 = vrot.slane %v1217_v56, 4  ;;  %vm1208_vm6 = vcmp.gt.f32.partialorder %v1134_v53, 0.0  ;;  %v1212_v59 = vmul.f32 0.2, %v1134_v53 }
 0x301   : > { %vm1210_vm7 = vcmp.gt.f32.partialorder %v1205_v54, 0.0  ;;  %v1214_v60 = vmul.f32 0.2, %v1205_v54 }
 0x302   : > { %v1220_v61 = vadd.f32 %v1219_v57, %v1215_v55  ;;  %v1232_v62 = vadd.f32 %v1231_v58, %v1217_v56  ;;  %v1216_v63 = vsel %vm1208_vm6, %v1134_v53, %v1212_v59 }
 0x303   : > { %v1225_v0 = vrot.slane %v1216_v63, 4  ;;  %v1218_v1 = vsel %vm1210_vm7, %v1205_v54, %v1214_v60 }
 0x304   : > { %v1221_v2 = vrot.slane %v1220_v61, 2  ;;  %v1233_v3 = vrot.slane %v1232_v62, 2  ;;  %v1237_v4 = vrot.slane %v1218_v1, 4 }
 0x305   : > { %v1226_v5 = vadd.f32 %v1225_v0, %v1216_v63 }
 0x306   : > { %v1222_v6 = vadd.f32 %v1221_v2, %v1220_v61  ;;  %v1234_v7 = vadd.f32 %v1233_v3, %v1232_v62  ;;  %v1238_v8 = vadd.f32 %v1237_v4, %v1218_v1 }
 0x307   : > { %v1227_v9 = vrot.slane %v1226_v5, 2 }
 0x308   : > { %v1223_v10 = vrot.slane %v1222_v6, 1  ;;  %v1235_v11 = vrot.slane %v1234_v7, 1  ;;  %v1239_v12 = vrot.slane %v1238_v8, 2 }
 0x309   : > { %v1228_v13 = vadd.f32 %v1227_v9, %v1226_v5 }
 0x30a   : > { %v1224_v14 = vadd.f32 %v1223_v10, %v1222_v6  ;;  %v1236_v15 = vadd.f32 %v1235_v11, %v1234_v7  ;;  %v1240_v16 = vadd.f32 %v1239_v12, %v1238_v8  ;;  %v1283_v6 = vld [vmem:[#allocation13] sm:$0xf] }
 0x30b   : > { %v1229_v17 = vrot.slane %v1228_v13, 1  ;;  %v1300_v10 = vrot.slane %v1283_v6, %v17004_v32  ;;  %v1304_v12 = vrot.slane %v1283_v6, %v17007_v34 }
 0x30c   : > { %v1243_v18 = vmul.f32 0.125, %v1224_v14  ;;  %v1245_v19 = vmul.f32 0.125, %v1236_v15  ;;  %v1241_v20 = vrot.slane %v1240_v16, 1  ;;  %v1308_v14 = vrot.slane %v1283_v6, %v17016_v38 }
 0x30d   : > { %v1230_v21 = vadd.f32 %v1229_v17, %v1228_v13  ;;  %v1321_v13 = vld [vmem:[#allocation15] sm:$0xf] }
 0x30e   : > { %v1247_v22 = vsub.f32 %v1215_v55, %v1243_v18  ;;  %v1249_v23 = vsub.f32 %v1217_v56, %v1245_v19  ;;  %v1242_v24 = vadd.f32 %v1241_v20, %v1240_v16  ;;  %v1312_v16 = vrot.slane %v1283_v6, %v17019_v40  ;;  %v1661_v6 = vld [vmem:[#allocation16 + $0x9d0] sm:$0xff] }
 0x30f   : > { %v1244_v25 = vmul.f32 0.125, %v1230_v21  ;;  %v1330_v19 = vrot.slane %v1321_v13, %v17007_v34  ;;  %v1338_v21 = vrot.slane %v1321_v13, %v17019_v40 }
 0x310   : > { %v1251_v26 = vmul.f32 %v1247_v22, %v1247_v22  ;;  %v1253_v27 = vmul.f32 %v1249_v23, %v1249_v23  ;;  %v1246_v28 = vmul.f32 0.125, %v1242_v24 }
 0x311   : > { %v1248_v29 = vsub.f32 %v1216_v63, %v1244_v25 }
 0x312   : > { %v1255_v30 = vrot.slane %v1251_v26, 4  ;;  %v1267_v33 = vrot.slane %v1253_v27, 4  ;;  %v1250_v35 = vsub.f32 %v1218_v1, %v1246_v28 }
 0x313   : > { %v1252_v36 = vmul.f32 %v1248_v29, %v1248_v29 }
 0x314   : > { %v1256_v37 = vadd.f32 %v1255_v30, %v1251_v26  ;;  %v1268_v39 = vadd.f32 %v1267_v33, %v1253_v27  ;;  %v1254_v41 = vmul.f32 %v1250_v35, %v1250_v35  ;;  %v1334_v26 = vrot.slane %v1321_v13, %v17016_v38 }
 0x315   : > { %v1261_v42 = vrot.slane %v1252_v36, 4 }
 0x316   : > { %v1257_v43 = vrot.slane %v1256_v37, 2  ;;  %v1269_v44 = vrot.slane %v1268_v39, 2  ;;  %v1273_v45 = vrot.slane %v1254_v41, 4 }
 0x317   : > { %v1262_v46 = vadd.f32 %v1261_v42, %v1252_v36  ;;  %v1725_v36 = vld [vmem:[#allocation16 + $0xbd0] sm:$0xff] }
 0x318   : > { %v1258_v47 = vadd.f32 %v1257_v43, %v1256_v37  ;;  %v1270_v48 = vadd.f32 %v1269_v44, %v1268_v39  ;;  %v1274_v49 = vadd.f32 %v1273_v45, %v1254_v41  ;;  %v1462_v37 = vld [vmem:[#allocation16 + $0x398] sm:$0xff]  ;;  %v1461_v41 = vld [vmem:[#allocation16 + $0x390] sm:$0xff] }
 0x319   : > { %v1263_v50 = vrot.slane %v1262_v46, 2  ;;  %v1718_v39 = vld [vmem:[#allocation16 + $0xb98] sm:$0xff]  ;;  %v1717_v42 = vld [vmem:[#allocation16 + $0xb90] sm:$0xff] }
 0x31a   : > { %v1259_v51 = vrot.slane %v1258_v47, 1  ;;  %v1271_v52 = vrot.slane %v1270_v48, 1  ;;  %v1275_v53 = vrot.slane %v1274_v49, 2  ;;  %v1454_v43 = vld [vmem:[#allocation16 + $0x358] sm:$0xff]  ;;  %v1453_v45 = vld [vmem:[#allocation16 + $0x350] sm:$0xff] }
 0x31b   : > { %v1264_v54 = vadd.f32 %v1263_v50, %v1262_v46  ;;  %v1710_v44 = vld [vmem:[#allocation16 + $0xb58] sm:$0xff]  ;;  %v1709_v46 = vld [vmem:[#allocation16 + $0xb50] sm:$0xff] }
 0x31c   : > { %v1260_v55 = vadd.f32 %v1259_v51, %v1258_v47  ;;  %v1272_v56 = vadd.f32 %v1271_v52, %v1270_v48  ;;  %v1276_v57 = vadd.f32 %v1275_v53, %v1274_v49  ;;  %v1446_v47 = vld [vmem:[#allocation16 + $0x318] sm:$0xff]  ;;  %v1445_v49 = vld [vmem:[#allocation16 + $0x310] sm:$0xff] }
 0x31d   : > { %v1265_v58 = vrot.slane %v1264_v54, 1  ;;  %v1702_v48 = vld [vmem:[#allocation16 + $0xb18] sm:$0xff]  ;;  %v1701_v50 = vld [vmem:[#allocation16 + $0xb10] sm:$0xff] }
 0x31e   : > { %v1279_v59 = vmul.f32 0.125, %v1260_v55  ;;  %v1281_v60 = vmul.f32 0.125, %v1272_v56  ;;  %v1277_v61 = vrot.slane %v1276_v57, 1  ;;  %v1438_v51 = vld [vmem:[#allocation16 + $0x2d8] sm:$0xff]  ;;  %v1437_v53 = vld [vmem:[#allocation16 + $0x2d0] sm:$0xff] }
 0x31f   : > { %v1266_v62 = vadd.f32 %v1265_v58, %v1264_v54  ;;  %v1694_v52 = vld [vmem:[#allocation16 + $0xad8] sm:$0xff]  ;;  %v1693_v54 = vld [vmem:[#allocation16 + $0xad0] sm:$0xff] }
 0x320   : > { %v1284_v63 = vadd.f32 1e-05, %v1279_v59  ;;  %v1286_v0 = vadd.f32 1e-05, %v1281_v60  ;;  %v1278_v1 = vadd.f32 %v1277_v61, %v1276_v57  ;;  %v1430_v55 = vld [vmem:[#allocation16 + $0x298] sm:$0xff]  ;;  %v1429_v57 = vld [vmem:[#allocation16 + $0x290] sm:$0xff] }
 0x321   : > { %v1280_v2 = vmul.f32 0.125, %v1266_v62  ;;  %v1686_v56 = vld [vmem:[#allocation16 + $0xa98] sm:$0xff]  ;;  %v1685_v58 = vld [vmem:[#allocation16 + $0xa90] sm:$0xff] }
 0x322   : > { %16093 = vrsqrt.f32 %v1284_v63  ;;  %v1282_v3 = vmul.f32 0.125, %v1278_v1  ;;  %v1422_v59 = vld [vmem:[#allocation16 + $0x258] sm:$0xff]  ;;  %v1421_v61 = vld [vmem:[#allocation16 + $0x250] sm:$0xff] }
 0x323   : > { %16095 = vrsqrt.f32 %v1286_v0  ;;  %v1285_v4 = vadd.f32 1e-05, %v1280_v2  ;;  %v1678_v60 = vld [vmem:[#allocation16 + $0xa58] sm:$0xff]  ;;  %v1677_v62 = vld [vmem:[#allocation16 + $0xa50] sm:$0xff] }
 0x324   : > { %v1287_v5 = vadd.f32 1e-05, %v1282_v3  ;;  %v1414_v63 = vld [vmem:[#allocation16 + $0x218] sm:$0xff]  ;;  %v1413_v1 = vld [vmem:[#allocation16 + $0x210] sm:$0xff] }
 0x325   : > { %16097 = vrsqrt.f32 %v1285_v4  ;;  %v1670_v0 = vld [vmem:[#allocation16 + $0xa18] sm:$0xff]  ;;  %v1669_v2 = vld [vmem:[#allocation16 + $0xa10] sm:$0xff] }
 0x326   : > { %16099 = vrsqrt.f32 %v1287_v5  ;;  %v1406_v3 = vld [vmem:[#allocation16 + $0x1d8] sm:$0xff]  ;;  %v1405_v5 = vld [vmem:[#allocation16 + $0x1d0] sm:$0xff] }
 0x327   : > { %v1662_v4 = vld [vmem:[#allocation16 + $0x9d8] sm:$0xff] }
 0x32f   : > { %v16094_v7 = vpop.eup %16093 }
 0x330   : > { %v16096_v8 = vpop.eup %16095  ;;  %v1292_v9 = vmul.f32 %v16094_v7, %v1247_v22  ;;  %v1326_v22 = vrot.slane %v1321_v13, %v17004_v32  ;;  %v1398_v7 = vld [vmem:[#allocation16 + $0x198] sm:$0xff]  ;;  %v1389_v13 = vld [vmem:[#allocation16 + $0x150] sm:$0xff] }
 0x331   : > { %v1294_v11 = vmul.f32 %v16096_v8, %v1249_v23  ;;  %v1654_v8 = vld [vmem:[#allocation16 + $0x998] sm:$0xff] }
 0x332   : > { %v16098_v15 = vpop.eup %16097  ;;  %v1317_v24 = vmul.f32 %v1300_v10, %v1292_v9  ;;  %v1397_v9 = vld [vmem:[#allocation16 + $0x190] sm:$0xff] }
 0x333   : > { %v16100_v17 = vpop.eup %16099  ;;  %v1293_v18 = vmul.f32 %v16098_v15, %v1248_v29  ;;  %v1319_v23 = vmul.f32 %v1308_v14, %v1294_v11  ;;  %v1469_v29 = vld [vmem:[#allocation16 + $0x3d0] sm:$0xff]  ;;  %v1390_v11 = vld [vmem:[#allocation16 + $0x158] sm:$0xff] }
 0x334   : > { %v1295_v20 = vmul.f32 %v16100_v17, %v1250_v35  ;;  %v17037_v33 = vadd.f32 %v1326_v22, %v1317_v24  ;;  %v1653_v10 = vld [vmem:[#allocation16 + $0x990] sm:$0xff]  ;;  %v1382_v15 = vld [vmem:[#allocation16 + $0x118] sm:$0xff] }
 0x335   : > { %v1318_v25 = vmul.f32 %v1304_v12, %v1293_v18  ;;  %v17040_v35 = vadd.f32 %v1334_v26, %v1319_v23  ;;  %v1646_v12 = vld [vmem:[#allocation16 + $0x958] sm:$0xff]  ;;  %v1645_v14 = vld [vmem:[#allocation16 + $0x950] sm:$0xff] }
 0x336   : > { %v1320_v27 = vmul.f32 %v1312_v16, %v1295_v20  ;;  %v1638_v16 = vld [vmem:[#allocation16 + $0x918] sm:$0xff]  ;;  %v1381_v17 = vld [vmem:[#allocation16 + $0x110] sm:$0xff] }
 0x337   : > { %v17033_v28 = vadd.f32 %v1330_v19, %v1318_v25  ;;  %v1637_v18 = vld [vmem:[#allocation16 + $0x910] sm:$0xff]  ;;  %v1374_v19 = vld [vmem:[#allocation16 + $0xd8] sm:$0xff] }
 0x338   : > { %v17035_v30 = vadd.f32 %v1338_v21, %v1320_v27  ;;  %v1630_v20 = vld [vmem:[#allocation16 + $0x8d8] sm:$0xff]  ;;  %v1373_v21 = vld [vmem:[#allocation16 + $0xd0] sm:$0xff] }
 0x339   : > { %1965 = vmatprep.mubr.f32.mxu1 %v17033_v28  ;;  %v1629_v24 = vld [vmem:[#allocation16 + $0x8d0] sm:$0xff]  ;;  %v1366_v22 = vld [vmem:[#allocation16 + $0x98] sm:$0xff] }
 0x33a   : > { %2036 = vmatprep.mubr.f32.mxu0 %v17035_v30  ;;  %1966 = vmatmul.mubr.f32.vlgmr.msra.gmra.mxu1 %v17037_v33  ;;  %v1622_v25 = vld [vmem:[#allocation16 + $0x898] sm:$0xff]  ;;  %v1365_v23 = vld [vmem:[#allocation16 + $0x90] sm:$0xff] }
 0x33b   : > { %2037 = vmatmul.mubr.f32.vlgmr.msra.gmra.mxu0 %v17040_v35  ;;  %2044 = vmatpush1.msra.mxu1 %v1469_v29  ;;  %v1621_v26 = vld [vmem:[#allocation16 + $0x890] sm:$0xff]  ;;  %v1358_v27 = vld [vmem:[#allocation16 + $0x58] sm:$0xff] }
 0x33c   : > { %2115 = vmatpush1.msra.mxu0 %v1725_v36  ;;  %2045 = vmatprep.subr.mxu1 %v1462_v37  ;;  %v1614_v29 = vld [vmem:[#allocation16 + $0x858] sm:$0xff]  ;;  %v1357_v36 = vld [vmem:[#allocation16 + $0x50] sm:$0xff] }
 0x33d   : > { %2107 = vmatprep.mubr.f32.mxu1 %v17033_v28  ;;  %2116 = vmatprep.subr.mxu0 %v1718_v39  ;;  %v1613_v37 = vld [vmem:[#allocation16 + $0x850] sm:$0xff]  ;;  %v1350_v39 = vld [vmem:[#allocation16 + $0x18] sm:$0xff] }
 0x33e   : > { %2178 = vmatprep.mubr.f32.mxu0 %v17035_v30  ;;  %2046 = vmatpush1.msra.mxu1 %v1461_v41  ;;  %v1606_v41 = vld [vmem:[#allocation16 + $0x818] sm:$0xff] }
 0x33f   : > { %2117 = vmatpush1.msra.mxu0 %v1717_v42  ;;  %2047 = vmatprep.subr.mxu1 %v1454_v43  ;;  %v1349_v42 = vld [vmem:[#allocation16 + $0x10] sm:$0xff] }
 0x340   : > { %2118 = vmatprep.subr.mxu0 %v1710_v44  ;;  %2048 = vmatpush1.msra.mxu1 %v1453_v45  ;;  %v1605_v43 = vld [vmem:[#allocation16 + $0x810] sm:$0xff]  ;;  %v1598_v44 = vld [vmem:[#allocation16 + $0x7d8] sm:$0xff] }
 0x341   : > { %2119 = vmatpush1.msra.mxu0 %v1709_v46  ;;  %2049 = vmatprep.subr.mxu1 %v1446_v47  ;;  %v1854_v45 = vld [vmem:[#allocation16 + $0xfd8] sm:$0xff]  ;;  %v1597_v46 = vld [vmem:[#allocation16 + $0x7d0] sm:$0xff] }
 0x342   : > { %2120 = vmatprep.subr.mxu0 %v1702_v48  ;;  %2050 = vmatpush1.msra.mxu1 %v1445_v49  ;;  %v1853_v47 = vld [vmem:[#allocation16 + $0xfd0] sm:$0xff]  ;;  %v1590_v48 = vld [vmem:[#allocation16 + $0x798] sm:$0xff] }
 0x343   : > { %2121 = vmatpush1.msra.mxu0 %v1701_v50  ;;  %2051 = vmatprep.subr.mxu1 %v1438_v51  ;;  %v1846_v49 = vld [vmem:[#allocation16 + $0xf98] sm:$0xff]  ;;  %v1589_v50 = vld [vmem:[#allocation16 + $0x790] sm:$0xff] }
 0x344   : > { %2122 = vmatprep.subr.mxu0 %v1694_v52  ;;  %2052 = vmatpush1.msra.mxu1 %v1437_v53  ;;  %v1845_v51 = vld [vmem:[#allocation16 + $0xf90] sm:$0xff]  ;;  %v1582_v52 = vld [vmem:[#allocation16 + $0x758] sm:$0xff] }
 0x345   : > { %2123 = vmatpush1.msra.mxu0 %v1693_v54  ;;  %2053 = vmatprep.subr.mxu1 %v1430_v55  ;;  %v1838_v53 = vld [vmem:[#allocation16 + $0xf58] sm:$0xff]  ;;  %v1581_v54 = vld [vmem:[#allocation16 + $0x750] sm:$0xff] }
 0x346   : > { %2124 = vmatprep.subr.mxu0 %v1686_v56  ;;  %2054 = vmatpush1.msra.mxu1 %v1429_v57  ;;  %v1837_v55 = vld [vmem:[#allocation16 + $0xf50] sm:$0xff]  ;;  %v1574_v56 = vld [vmem:[#allocation16 + $0x718] sm:$0xff] }
 0x347   : > { %2125 = vmatpush1.msra.mxu0 %v1685_v58  ;;  %2055 = vmatprep.subr.mxu1 %v1422_v59  ;;  %v1830_v57 = vld [vmem:[#allocation16 + $0xf18] sm:$0xff]  ;;  %v1573_v58 = vld [vmem:[#allocation16 + $0x710] sm:$0xff] }
 0x348   : > { %2126 = vmatprep.subr.mxu0 %v1678_v60  ;;  %2056 = vmatpush1.msra.mxu1 %v1421_v61  ;;  %v1829_v59 = vld [vmem:[#allocation16 + $0xf10] sm:$0xff]  ;;  %v1566_v60 = vld [vmem:[#allocation16 + $0x6d8] sm:$0xff] }
 0x349   : > { %2127 = vmatpush1.msra.mxu0 %v1677_v62  ;;  %2057 = vmatprep.subr.mxu1 %v1414_v63  ;;  %v1822_v61 = vld [vmem:[#allocation16 + $0xed8] sm:$0xff]  ;;  %v1565_v62 = vld [vmem:[#allocation16 + $0x6d0] sm:$0xff] }
 0x34a   : > { %2128 = vmatprep.subr.mxu0 %v1670_v0  ;;  %2058 = vmatpush1.msra.mxu1 %v1413_v1  ;;  %v1821_v63 = vld [vmem:[#allocation16 + $0xed0] sm:$0xff]  ;;  %v1558_v0 = vld [vmem:[#allocation16 + $0x698] sm:$0xff] }
 0x34b   : > { %2129 = vmatpush1.msra.mxu0 %v1669_v2  ;;  %2059 = vmatprep.subr.mxu1 %v1406_v3  ;;  %v1814_v1 = vld [vmem:[#allocation16 + $0xe98] sm:$0xff]  ;;  %v1557_v2 = vld [vmem:[#allocation16 + $0x690] sm:$0xff] }
 0x34c   : > { %2130 = vmatprep.subr.mxu0 %v1662_v4  ;;  %2060 = vmatpush1.msra.mxu1 %v1405_v5  ;;  %v1813_v3 = vld [vmem:[#allocation16 + $0xe90] sm:$0xff]  ;;  %v1550_v4 = vld [vmem:[#allocation16 + $0x658] sm:$0xff] }
 0x34d   : > { %2131 = vmatpush1.msra.mxu0 %v1661_v6  ;;  %2061 = vmatprep.subr.mxu1 %v1398_v7  ;;  %v1806_v5 = vld [vmem:[#allocation16 + $0xe58] sm:$0xff]  ;;  %v1549_v6 = vld [vmem:[#allocation16 + $0x650] sm:$0xff] }
 0x34e   : > { %2132 = vmatprep.subr.mxu0 %v1654_v8  ;;  %2062 = vmatpush1.msra.mxu1 %v1397_v9  ;;  %v1805_v7 = vld [vmem:[#allocation16 + $0xe50] sm:$0xff]  ;;  %v1542_v8 = vld [vmem:[#allocation16 + $0x618] sm:$0xff] }
 0x34f   : > { %2133 = vmatpush1.msra.mxu0 %v1653_v10  ;;  %2063 = vmatprep.subr.mxu1 %v1390_v11  ;;  %v1798_v9 = vld [vmem:[#allocation16 + $0xe18] sm:$0xff]  ;;  %v1541_v10 = vld [vmem:[#allocation16 + $0x610] sm:$0xff] }
 0x350   : > { %2134 = vmatprep.subr.mxu0 %v1646_v12  ;;  %2064 = vmatpush1.msra.mxu1 %v1389_v13  ;;  %v1797_v11 = vld [vmem:[#allocation16 + $0xe10] sm:$0xff]  ;;  %v1534_v12 = vld [vmem:[#allocation16 + $0x5d8] sm:$0xff] }
 0x351   : > { %2135 = vmatpush1.msra.mxu0 %v1645_v14  ;;  %2065 = vmatprep.subr.mxu1 %v1382_v15  ;;  %v1790_v13 = vld [vmem:[#allocation16 + $0xdd8] sm:$0xff]  ;;  %v1533_v14 = vld [vmem:[#allocation16 + $0x5d0] sm:$0xff] }
 0x352   : > { %2136 = vmatprep.subr.mxu0 %v1638_v16  ;;  %2066 = vmatpush1.msra.mxu1 %v1381_v17  ;;  %v1789_v15 = vld [vmem:[#allocation16 + $0xdd0] sm:$0xff]  ;;  %v1526_v16 = vld [vmem:[#allocation16 + $0x598] sm:$0xff] }
 0x353   : > { %2137 = vmatpush1.msra.mxu0 %v1637_v18  ;;  %2067 = vmatprep.subr.mxu1 %v1374_v19  ;;  %v1782_v17 = vld [vmem:[#allocation16 + $0xd98] sm:$0xff]  ;;  %v1525_v18 = vld [vmem:[#allocation16 + $0x590] sm:$0xff] }
 0x354   : > { %2138 = vmatprep.subr.mxu0 %v1630_v20  ;;  %2068 = vmatpush1.msra.mxu1 %v1373_v21  ;;  %v1781_v19 = vld [vmem:[#allocation16 + $0xd90] sm:$0xff]  ;;  %v1518_v20 = vld [vmem:[#allocation16 + $0x558] sm:$0xff] }
 0x355   : > { %2139 = vmatpush1.msra.mxu0 %v1629_v24  ;;  %2069 = vmatprep.subr.mxu1 %v1366_v22  ;;  %v1774_v21 = vld [vmem:[#allocation16 + $0xd58] sm:$0xff]  ;;  %v1517_v24 = vld [vmem:[#allocation16 + $0x550] sm:$0xff] }
 0x356   : > { %2140 = vmatprep.subr.mxu0 %v1622_v25  ;;  %2070 = vmatpush1.msra.mxu1 %v1365_v23  ;;  %v1773_v22 = vld [vmem:[#allocation16 + $0xd50] sm:$0xff]  ;;  %v1510_v25 = vld [vmem:[#allocation16 + $0x518] sm:$0xff] }
 0x357   : > { %2141 = vmatpush1.msra.mxu0 %v1621_v26  ;;  %2071 = vmatprep.subr.mxu1 %v1358_v27  ;;  %v1766_v23 = vld [vmem:[#allocation16 + $0xd18] sm:$0xff]  ;;  %v1509_v26 = vld [vmem:[#allocation16 + $0x510] sm:$0xff] }
 0x358   : > { %2142 = vmatprep.subr.mxu0 %v1614_v29  ;;  %2072 = vmatpush1.msra.mxu1 %v1357_v36  ;;  %v1765_v27 = vld [vmem:[#allocation16 + $0xd10] sm:$0xff]  ;;  %v1502_v29 = vld [vmem:[#allocation16 + $0x4d8] sm:$0xff] }
 0x359   : > { %2143 = vmatpush1.msra.mxu0 %v1613_v37  ;;  %2073 = vmatprep.subr.mxu1 %v1350_v39  ;;  %v1758_v36 = vld [vmem:[#allocation16 + $0xcd8] sm:$0xff]  ;;  %v1501_v37 = vld [vmem:[#allocation16 + $0x4d0] sm:$0xff] }
 0x35a   : > { %2144 = vmatprep.subr.mxu0 %v1606_v41  ;;  %2074 = vmatpush1.msra.mxu1 %v1349_v42  ;;  %v1757_v39 = vld [vmem:[#allocation16 + $0xcd0] sm:$0xff]  ;;  %v1494_v41 = vld [vmem:[#allocation16 + $0x498] sm:$0xff] }
 0x35b   : > { %2145 = vmatpush1.msra.mxu0 %v1605_v43  ;;  %2075 = vmatprep.subr.mxu1 %v1598_v44  ;;  %v1750_v42 = vld [vmem:[#allocation16 + $0xc98] sm:$0xff]  ;;  %v1493_v43 = vld [vmem:[#allocation16 + $0x490] sm:$0xff] }
 0x35c   : > { %2146 = vmatprep.subr.mxu0 %v1854_v45  ;;  %2076 = vmatpush2.msra.mxu1 %v1597_v46  ;;  %v1749_v44 = vld [vmem:[#allocation16 + $0xc90] sm:$0xff]  ;;  %v1486_v45 = vld [vmem:[#allocation16 + $0x458] sm:$0xff] }
 0x35d   : > { %2147 = vmatpush2.msra.mxu0 %v1853_v47  ;;  %2077 = vmatprep.subr.mxu1 %v1590_v48  ;;  %v1742_v46 = vld [vmem:[#allocation16 + $0xc58] sm:$0xff]  ;;  %v1485_v47 = vld [vmem:[#allocation16 + $0x450] sm:$0xff] }
 0x35e   : > { %2148 = vmatprep.subr.mxu0 %v1846_v49  ;;  %2078 = vmatpush2.msra.mxu1 %v1589_v50  ;;  %v1741_v48 = vld [vmem:[#allocation16 + $0xc50] sm:$0xff]  ;;  %v1478_v49 = vld [vmem:[#allocation16 + $0x418] sm:$0xff] }
 0x35f   : > { %2149 = vmatpush2.msra.mxu0 %v1845_v51  ;;  %2079 = vmatprep.subr.mxu1 %v1582_v52  ;;  %v1734_v50 = vld [vmem:[#allocation16 + $0xc18] sm:$0xff]  ;;  %v1477_v51 = vld [vmem:[#allocation16 + $0x410] sm:$0xff] }
 0x360   : > { %2150 = vmatprep.subr.mxu0 %v1838_v53  ;;  %2080 = vmatpush2.msra.mxu1 %v1581_v54  ;;  %v1733_v52 = vld [vmem:[#allocation16 + $0xc10] sm:$0xff]  ;;  %v1472_v53 = vld [vmem:[#allocation16 + $0x3e8] sm:$0xff] }
 0x361   : > { %2151 = vmatpush2.msra.mxu0 %v1837_v55  ;;  %2081 = vmatprep.subr.mxu1 %v1574_v56  ;;  %v1728_v54 = vld [vmem:[#allocation16 + $0xbe8] sm:$0xff]  ;;  %v1471_v55 = vld [vmem:[#allocation16 + $0x3e0] sm:$0xff] }
 0x362   : > { %2152 = vmatprep.subr.mxu0 %v1830_v57  ;;  %2082 = vmatpush2.msra.mxu1 %v1573_v58  ;;  %v1727_v56 = vld [vmem:[#allocation16 + $0xbe0] sm:$0xff]  ;;  %v1464_v57 = vld [vmem:[#allocation16 + $0x3a8] sm:$0xff] }
 0x363   : > { %2153 = vmatpush2.msra.mxu0 %v1829_v59  ;;  %2083 = vmatprep.subr.mxu1 %v1566_v60  ;;  %v1720_v58 = vld [vmem:[#allocation16 + $0xba8] sm:$0xff]  ;;  %v1463_v59 = vld [vmem:[#allocation16 + $0x3a0] sm:$0xff] }
 0x364   : > { %2154 = vmatprep.subr.mxu0 %v1822_v61  ;;  %2084 = vmatpush2.msra.mxu1 %v1565_v62  ;;  %v1719_v60 = vld [vmem:[#allocation16 + $0xba0] sm:$0xff]  ;;  %v1456_v61 = vld [vmem:[#allocation16 + $0x368] sm:$0xff] }
 0x365   : > { %2155 = vmatpush2.msra.mxu0 %v1821_v63  ;;  %2085 = vmatprep.subr.mxu1 %v1558_v0  ;;  %v1712_v62 = vld [vmem:[#allocation16 + $0xb68] sm:$0xff]  ;;  %v1455_v63 = vld [vmem:[#allocation16 + $0x360] sm:$0xff] }
 0x366   : > { %2156 = vmatprep.subr.mxu0 %v1814_v1  ;;  %2086 = vmatpush2.msra.mxu1 %v1557_v2  ;;  %v1711_v0 = vld [vmem:[#allocation16 + $0xb60] sm:$0xff]  ;;  %v1448_v1 = vld [vmem:[#allocation16 + $0x328] sm:$0xff] }
 0x367   : > { %2157 = vmatpush2.msra.mxu0 %v1813_v3  ;;  %2087 = vmatprep.subr.mxu1 %v1550_v4  ;;  %v1704_v2 = vld [vmem:[#allocation16 + $0xb28] sm:$0xff]  ;;  %v1447_v3 = vld [vmem:[#allocation16 + $0x320] sm:$0xff] }
 0x368   : > { %2158 = vmatprep.subr.mxu0 %v1806_v5  ;;  %2088 = vmatpush2.msra.mxu1 %v1549_v6  ;;  %v1703_v4 = vld [vmem:[#allocation16 + $0xb20] sm:$0xff]  ;;  %v1440_v5 = vld [vmem:[#allocation16 + $0x2e8] sm:$0xff] }
 0x369   : > { %2159 = vmatpush2.msra.mxu0 %v1805_v7  ;;  %2089 = vmatprep.subr.mxu1 %v1542_v8  ;;  %v1696_v6 = vld [vmem:[#allocation16 + $0xae8] sm:$0xff]  ;;  %v1439_v7 = vld [vmem:[#allocation16 + $0x2e0] sm:$0xff] }
 0x36a   : > { %2160 = vmatprep.subr.mxu0 %v1798_v9  ;;  %2090 = vmatpush2.msra.mxu1 %v1541_v10  ;;  %v1695_v8 = vld [vmem:[#allocation16 + $0xae0] sm:$0xff]  ;;  %v1432_v9 = vld [vmem:[#allocation16 + $0x2a8] sm:$0xff] }
 0x36b   : > { %2161 = vmatpush2.msra.mxu0 %v1797_v11  ;;  %2091 = vmatprep.subr.mxu1 %v1534_v12  ;;  %v1688_v10 = vld [vmem:[#allocation16 + $0xaa8] sm:$0xff]  ;;  %v1431_v11 = vld [vmem:[#allocation16 + $0x2a0] sm:$0xff] }
 0x36c   : > { %2162 = vmatprep.subr.mxu0 %v1790_v13  ;;  %2092 = vmatpush2.msra.mxu1 %v1533_v14  ;;  %v1687_v12 = vld [vmem:[#allocation16 + $0xaa0] sm:$0xff]  ;;  %v1424_v13 = vld [vmem:[#allocation16 + $0x268] sm:$0xff] }
 0x36d   : > { %2163 = vmatpush2.msra.mxu0 %v1789_v15  ;;  %2093 = vmatprep.subr.mxu1 %v1526_v16  ;;  %v1680_v14 = vld [vmem:[#allocation16 + $0xa68] sm:$0xff]  ;;  %v1423_v15 = vld [vmem:[#allocation16 + $0x260] sm:$0xff] }
 0x36e   : > { %2164 = vmatprep.subr.mxu0 %v1782_v17  ;;  %2094 = vmatpush2.msra.mxu1 %v1525_v18  ;;  %v1679_v16 = vld [vmem:[#allocation16 + $0xa60] sm:$0xff]  ;;  %v1416_v17 = vld [vmem:[#allocation16 + $0x228] sm:$0xff] }
 0x36f   : > { %2165 = vmatpush2.msra.mxu0 %v1781_v19  ;;  %2095 = vmatprep.subr.mxu1 %v1518_v20  ;;  %v1672_v18 = vld [vmem:[#allocation16 + $0xa28] sm:$0xff]  ;;  %v1415_v19 = vld [vmem:[#allocation16 + $0x220] sm:$0xff] }
 0x370   : > { %2166 = vmatprep.subr.mxu0 %v1774_v21  ;;  %2096 = vmatpush2.msra.mxu1 %v1517_v24  ;;  %v1671_v20 = vld [vmem:[#allocation16 + $0xa20] sm:$0xff]  ;;  %v1408_v21 = vld [vmem:[#allocation16 + $0x1e8] sm:$0xff] }
 0x371   : > { %2167 = vmatpush2.msra.mxu0 %v1773_v22  ;;  %2097 = vmatprep.subr.mxu1 %v1510_v25  ;;  %v1664_v24 = vld [vmem:[#allocation16 + $0x9e8] sm:$0xff]  ;;  %v1407_v22 = vld [vmem:[#allocation16 + $0x1e0] sm:$0xff] }
 0x372   : > { %2168 = vmatprep.subr.mxu0 %v1766_v23  ;;  %2098 = vmatpush2.msra.mxu1 %v1509_v26  ;;  %v1663_v25 = vld [vmem:[#allocation16 + $0x9e0] sm:$0xff]  ;;  %v1400_v23 = vld [vmem:[#allocation16 + $0x1a8] sm:$0xff] }
 0x373   : > { %2169 = vmatpush2.msra.mxu0 %v1765_v27  ;;  %2099 = vmatprep.subr.mxu1 %v1502_v29  ;;  %v1656_v26 = vld [vmem:[#allocation16 + $0x9a8] sm:$0xff]  ;;  %v1399_v27 = vld [vmem:[#allocation16 + $0x1a0] sm:$0xff] }
 0x374   : > { %2170 = vmatprep.subr.mxu0 %v1758_v36  ;;  %2100 = vmatpush2.msra.mxu1 %v1501_v37  ;;  %v1655_v29 = vld [vmem:[#allocation16 + $0x9a0] sm:$0xff]  ;;  %v1392_v36 = vld [vmem:[#allocation16 + $0x168] sm:$0xff] }
 0x375   : > { %2171 = vmatpush2.msra.mxu0 %v1757_v39  ;;  %2101 = vmatprep.subr.mxu1 %v1494_v41  ;;  %v1648_v37 = vld [vmem:[#allocation16 + $0x968] sm:$0xff]  ;;  %v1391_v39 = vld [vmem:[#allocation16 + $0x160] sm:$0xff] }
 0x376   : > { %2172 = vmatprep.subr.mxu0 %v1750_v42  ;;  %2102 = vmatpush2.msra.mxu1 %v1493_v43  ;;  %v1647_v41 = vld [vmem:[#allocation16 + $0x960] sm:$0xff]  ;;  %v1384_v42 = vld [vmem:[#allocation16 + $0x128] sm:$0xff] }
 0x377   : > { %2173 = vmatpush2.msra.mxu0 %v1749_v44  ;;  %2103 = vmatprep.subr.mxu1 %v1486_v45  ;;  %v1640_v43 = vld [vmem:[#allocation16 + $0x928] sm:$0xff]  ;;  %v1383_v44 = vld [vmem:[#allocation16 + $0x120] sm:$0xff] }
 0x378   : > { %2174 = vmatprep.subr.mxu0 %v1742_v46  ;;  %2104 = vmatpush2.msra.mxu1 %v1485_v47  ;;  %v1639_v45 = vld [vmem:[#allocation16 + $0x920] sm:$0xff]  ;;  %v1376_v46 = vld [vmem:[#allocation16 + $0xe8] sm:$0xff] }
 0x379   : > { %2175 = vmatpush2.msra.mxu0 %v1741_v48  ;;  %2105 = vmatprep.subr.mxu1 %v1478_v49  ;;  %v1632_v47 = vld [vmem:[#allocation16 + $0x8e8] sm:$0xff]  ;;  %v1375_v48 = vld [vmem:[#allocation16 + $0xe0] sm:$0xff] }
 0x37a   : > { %2176 = vmatprep.subr.mxu0 %v1734_v50  ;;  %2106 = vmatpush2.msra.mxu1 %v1477_v51  ;;  %v1631_v49 = vld [vmem:[#allocation16 + $0x8e0] sm:$0xff]  ;;  %v1368_v50 = vld [vmem:[#allocation16 + $0xa8] sm:$0xff] }
 0x37b   : > { %2177 = vmatpush2.msra.mxu0 %v1733_v52  ;;  %2108 = vmatmul.mubr.f32.vlgmr.msra.gmra.mxu1 %v17037_v33  ;;  %v1624_v51 = vld [vmem:[#allocation16 + $0x8a8] sm:$0xff]  ;;  %v1367_v52 = vld [vmem:[#allocation16 + $0xa0] sm:$0xff] }
 0x37c   : > { %2179 = vmatmul.mubr.f32.vlgmr.msra.gmra.mxu0 %v17040_v35  ;;  %2185 = vmatprep.subr.mxu1 %v1472_v53  ;;  %v1623_v53 = vld [vmem:[#allocation16 + $0x8a0] sm:$0xff] }
 0x37d   : > { %2256 = vmatprep.subr.mxu0 %v1728_v54  ;;  %2186 = vmatpush1.msra.mxu1 %v1471_v55  ;;  %v1360_v54 = vld [vmem:[#allocation16 + $0x68] sm:$0xff] }
 0x37e   : > { %2249 = vmatprep.mubr.f32.mxu1 %v17033_v28  ;;  %2257 = vmatpush1.msra.mxu0 %v1727_v56  ;;  %v1616_v55 = vld [vmem:[#allocation16 + $0x868] sm:$0xff]  ;;  %v1359_v56 = vld [vmem:[#allocation16 + $0x60] sm:$0xff] }
 0x37f   : > { %2320 = vmatprep.mubr.f32.mxu0 %v17035_v30  ;;  %2187 = vmatprep.subr.mxu1 %v1464_v57  ;;  %v1615_v57 = vld [vmem:[#allocation16 + $0x860] sm:$0xff] }
 0x380   : > { %2258 = vmatprep.subr.mxu0 %v1720_v58  ;;  %2188 = vmatpush1.msra.mxu1 %v1463_v59  ;;  %v1352_v58 = vld [vmem:[#allocation16 + $0x28] sm:$0xff] }
 0x381   : > { %2259 = vmatpush1.msra.mxu0 %v1719_v60  ;;  %2189 = vmatprep.subr.mxu1 %v1456_v61  ;;  %v1608_v59 = vld [vmem:[#allocation16 + $0x828] sm:$0xff]  ;;  %v1351_v60 = vld [vmem:[#allocation16 + $0x20] sm:$0xff] }
 0x382   : > { %2260 = vmatprep.subr.mxu0 %v1712_v62  ;;  %2190 = vmatpush1.msra.mxu1 %v1455_v63  ;;  %v1607_v61 = vld [vmem:[#allocation16 + $0x820] sm:$0xff]  ;;  %v1600_v62 = vld [vmem:[#allocation16 + $0x7e8] sm:$0xff] }
 0x383   : > { %2261 = vmatpush1.msra.mxu0 %v1711_v0  ;;  %2191 = vmatprep.subr.mxu1 %v1448_v1  ;;  %v1856_v63 = vld [vmem:[#allocation16 + $0xfe8] sm:$0xff]  ;;  %v1599_v0 = vld [vmem:[#allocation16 + $0x7e0] sm:$0xff] }
 0x384   : > { %2262 = vmatprep.subr.mxu0 %v1704_v2  ;;  %2192 = vmatpush1.msra.mxu1 %v1447_v3  ;;  %v1855_v1 = vld [vmem:[#allocation16 + $0xfe0] sm:$0xff]  ;;  %v1592_v2 = vld [vmem:[#allocation16 + $0x7a8] sm:$0xff] }
 0x385   : > { %2263 = vmatpush1.msra.mxu0 %v1703_v4  ;;  %2193 = vmatprep.subr.mxu1 %v1440_v5  ;;  %v1848_v3 = vld [vmem:[#allocation16 + $0xfa8] sm:$0xff]  ;;  %v1591_v4 = vld [vmem:[#allocation16 + $0x7a0] sm:$0xff] }
 0x386   : > { %2264 = vmatprep.subr.mxu0 %v1696_v6  ;;  %2194 = vmatpush1.msra.mxu1 %v1439_v7  ;;  %v1847_v5 = vld [vmem:[#allocation16 + $0xfa0] sm:$0xff]  ;;  %v1584_v6 = vld [vmem:[#allocation16 + $0x768] sm:$0xff] }
 0x387   : > { %2265 = vmatpush1.msra.mxu0 %v1695_v8  ;;  %2195 = vmatprep.subr.mxu1 %v1432_v9  ;;  %v1840_v7 = vld [vmem:[#allocation16 + $0xf68] sm:$0xff]  ;;  %v1583_v8 = vld [vmem:[#allocation16 + $0x760] sm:$0xff] }
 0x388   : > { %2266 = vmatprep.subr.mxu0 %v1688_v10  ;;  %2196 = vmatpush1.msra.mxu1 %v1431_v11  ;;  %v1839_v9 = vld [vmem:[#allocation16 + $0xf60] sm:$0xff]  ;;  %v1576_v10 = vld [vmem:[#allocation16 + $0x728] sm:$0xff] }
 0x389   : > { %2267 = vmatpush1.msra.mxu0 %v1687_v12  ;;  %2197 = vmatprep.subr.mxu1 %v1424_v13  ;;  %v1832_v11 = vld [vmem:[#allocation16 + $0xf28] sm:$0xff]  ;;  %v1575_v12 = vld [vmem:[#allocation16 + $0x720] sm:$0xff] }
 0x38a   : > { %2268 = vmatprep.subr.mxu0 %v1680_v14  ;;  %2198 = vmatpush1.msra.mxu1 %v1423_v15  ;;  %v1831_v13 = vld [vmem:[#allocation16 + $0xf20] sm:$0xff]  ;;  %v1568_v14 = vld [vmem:[#allocation16 + $0x6e8] sm:$0xff] }
 0x38b   : > { %2269 = vmatpush1.msra.mxu0 %v1679_v16  ;;  %2199 = vmatprep.subr.mxu1 %v1416_v17  ;;  %v1824_v15 = vld [vmem:[#allocation16 + $0xee8] sm:$0xff]  ;;  %v1567_v16 = vld [vmem:[#allocation16 + $0x6e0] sm:$0xff] }
 0x38c   : > { %2270 = vmatprep.subr.mxu0 %v1672_v18  ;;  %2200 = vmatpush1.msra.mxu1 %v1415_v19  ;;  %v1823_v17 = vld [vmem:[#allocation16 + $0xee0] sm:$0xff]  ;;  %v1560_v18 = vld [vmem:[#allocation16 + $0x6a8] sm:$0xff] }
 0x38d   : > { %2271 = vmatpush1.msra.mxu0 %v1671_v20  ;;  %2201 = vmatprep.subr.mxu1 %v1408_v21  ;;  %v1816_v19 = vld [vmem:[#allocation16 + $0xea8] sm:$0xff]  ;;  %v1559_v20 = vld [vmem:[#allocation16 + $0x6a0] sm:$0xff] }
 0x38e   : > { %2272 = vmatprep.subr.mxu0 %v1664_v24  ;;  %2202 = vmatpush1.msra.mxu1 %v1407_v22  ;;  %v1815_v21 = vld [vmem:[#allocation16 + $0xea0] sm:$0xff]  ;;  %v1552_v24 = vld [vmem:[#allocation16 + $0x668] sm:$0xff] }
 0x38f   : > { %2273 = vmatpush1.msra.mxu0 %v1663_v25  ;;  %2203 = vmatprep.subr.mxu1 %v1400_v23  ;;  %v1808_v22 = vld [vmem:[#allocation16 + $0xe68] sm:$0xff]  ;;  %v1551_v25 = vld [vmem:[#allocation16 + $0x660] sm:$0xff] }
 0x390   : > { %2274 = vmatprep.subr.mxu0 %v1656_v26  ;;  %2204 = vmatpush1.msra.mxu1 %v1399_v27  ;;  %v1807_v23 = vld [vmem:[#allocation16 + $0xe60] sm:$0xff]  ;;  %v1544_v26 = vld [vmem:[#allocation16 + $0x628] sm:$0xff] }
 0x391   : > { %2275 = vmatpush1.msra.mxu0 %v1655_v29  ;;  %2205 = vmatprep.subr.mxu1 %v1392_v36  ;;  %v1800_v27 = vld [vmem:[#allocation16 + $0xe28] sm:$0xff]  ;;  %v1543_v29 = vld [vmem:[#allocation16 + $0x620] sm:$0xff] }
 0x392   : > { %2276 = vmatprep.subr.mxu0 %v1648_v37  ;;  %2206 = vmatpush1.msra.mxu1 %v1391_v39  ;;  %v1799_v36 = vld [vmem:[#allocation16 + $0xe20] sm:$0xff]  ;;  %v1536_v37 = vld [vmem:[#allocation16 + $0x5e8] sm:$0xff] }
 0x393   : > { %2277 = vmatpush1.msra.mxu0 %v1647_v41  ;;  %2207 = vmatprep.subr.mxu1 %v1384_v42  ;;  %v1792_v39 = vld [vmem:[#allocation16 + $0xde8] sm:$0xff]  ;;  %v1535_v41 = vld [vmem:[#allocation16 + $0x5e0] sm:$0xff] }
 0x394   : > { %2278 = vmatprep.subr.mxu0 %v1640_v43  ;;  %2208 = vmatpush1.msra.mxu1 %v1383_v44  ;;  %v1791_v42 = vld [vmem:[#allocation16 + $0xde0] sm:$0xff]  ;;  %v1528_v43 = vld [vmem:[#allocation16 + $0x5a8] sm:$0xff] }
 0x395   : > { %2279 = vmatpush1.msra.mxu0 %v1639_v45  ;;  %2209 = vmatprep.subr.mxu1 %v1376_v46  ;;  %v1784_v44 = vld [vmem:[#allocation16 + $0xda8] sm:$0xff]  ;;  %v1527_v45 = vld [vmem:[#allocation16 + $0x5a0] sm:$0xff] }
 0x396   : > { %2280 = vmatprep.subr.mxu0 %v1632_v47  ;;  %2210 = vmatpush1.msra.mxu1 %v1375_v48  ;;  %v1783_v46 = vld [vmem:[#allocation16 + $0xda0] sm:$0xff]  ;;  %v1520_v47 = vld [vmem:[#allocation16 + $0x568] sm:$0xff] }
 0x397   : > { %2281 = vmatpush1.msra.mxu0 %v1631_v49  ;;  %2211 = vmatprep.subr.mxu1 %v1368_v50  ;;  %v1776_v48 = vld [vmem:[#allocation16 + $0xd68] sm:$0xff]  ;;  %v1519_v49 = vld [vmem:[#allocation16 + $0x560] sm:$0xff] }
 0x398   : > { %2282 = vmatprep.subr.mxu0 %v1624_v51  ;;  %2212 = vmatpush1.msra.mxu1 %v1367_v52  ;;  %v1775_v50 = vld [vmem:[#allocation16 + $0xd60] sm:$0xff]  ;;  %v1512_v51 = vld [vmem:[#allocation16 + $0x528] sm:$0xff] }
 0x399   : > { %2283 = vmatpush1.msra.mxu0 %v1623_v53  ;;  %2213 = vmatprep.subr.mxu1 %v1360_v54  ;;  %v1768_v52 = vld [vmem:[#allocation16 + $0xd28] sm:$0xff]  ;;  %v1511_v53 = vld [vmem:[#allocation16 + $0x520] sm:$0xff] }
 0x39a   : > { %2284 = vmatprep.subr.mxu0 %v1616_v55  ;;  %2214 = vmatpush1.msra.mxu1 %v1359_v56  ;;  %v1767_v54 = vld [vmem:[#allocation16 + $0xd20] sm:$0xff]  ;;  %v1504_v55 = vld [vmem:[#allocation16 + $0x4e8] sm:$0xff] }
 0x39b   : > { %2285 = vmatpush1.msra.mxu0 %v1615_v57  ;;  %2215 = vmatprep.subr.mxu1 %v1352_v58  ;;  %v1760_v56 = vld [vmem:[#allocation16 + $0xce8] sm:$0xff]  ;;  %v1503_v57 = vld [vmem:[#allocation16 + $0x4e0] sm:$0xff] }
 0x39c   : > { %2286 = vmatprep.subr.mxu0 %v1608_v59  ;;  %2216 = vmatpush1.msra.mxu1 %v1351_v60  ;;  %v1759_v58 = vld [vmem:[#allocation16 + $0xce0] sm:$0xff]  ;;  %v1496_v59 = vld [vmem:[#allocation16 + $0x4a8] sm:$0xff] }
 0x39d   : > { %2287 = vmatpush1.msra.mxu0 %v1607_v61  ;;  %2217 = vmatprep.subr.mxu1 %v1600_v62  ;;  %v1752_v60 = vld [vmem:[#allocation16 + $0xca8] sm:$0xff]  ;;  %v1495_v61 = vld [vmem:[#allocation16 + $0x4a0] sm:$0xff] }
 0x39e   : > { %2288 = vmatprep.subr.mxu0 %v1856_v63  ;;  %2218 = vmatpush2.msra.mxu1 %v1599_v0  ;;  %v1751_v62 = vld [vmem:[#allocation16 + $0xca0] sm:$0xff]  ;;  %v1488_v63 = vld [vmem:[#allocation16 + $0x468] sm:$0xff] }
 0x39f   : > { %2289 = vmatpush2.msra.mxu0 %v1855_v1  ;;  %2219 = vmatprep.subr.mxu1 %v1592_v2  ;;  %v1744_v0 = vld [vmem:[#allocation16 + $0xc68] sm:$0xff]  ;;  %v1487_v1 = vld [vmem:[#allocation16 + $0x460] sm:$0xff] }
 0x3a0   : > { %2290 = vmatprep.subr.mxu0 %v1848_v3  ;;  %2220 = vmatpush2.msra.mxu1 %v1591_v4  ;;  %v1743_v2 = vld [vmem:[#allocation16 + $0xc60] sm:$0xff]  ;;  %v1480_v3 = vld [vmem:[#allocation16 + $0x428] sm:$0xff] }
 0x3a1   : > { %2291 = vmatpush2.msra.mxu0 %v1847_v5  ;;  %2221 = vmatprep.subr.mxu1 %v1584_v6  ;;  %v1736_v4 = vld [vmem:[#allocation16 + $0xc28] sm:$0xff]  ;;  %v1479_v5 = vld [vmem:[#allocation16 + $0x420] sm:$0xff] }
 0x3a2   : > { %2292 = vmatprep.subr.mxu0 %v1840_v7  ;;  %2222 = vmatpush2.msra.mxu1 %v1583_v8  ;;  %v1735_v6 = vld [vmem:[#allocation16 + $0xc20] sm:$0xff]  ;;  %v1474_v7 = vld [vmem:[#allocation16 + $0x3f8] sm:$0xff] }
 0x3a3   : > { %2293 = vmatpush2.msra.mxu0 %v1839_v9  ;;  %2223 = vmatprep.subr.mxu1 %v1576_v10  ;;  %v1730_v8 = vld [vmem:[#allocation16 + $0xbf8] sm:$0xff]  ;;  %v1473_v9 = vld [vmem:[#allocation16 + $0x3f0] sm:$0xff] }
 0x3a4   : > { %2294 = vmatprep.subr.mxu0 %v1832_v11  ;;  %2224 = vmatpush2.msra.mxu1 %v1575_v12  ;;  %v1729_v10 = vld [vmem:[#allocation16 + $0xbf0] sm:$0xff]  ;;  %v1466_v11 = vld [vmem:[#allocation16 + $0x3b8] sm:$0xff] }
 0x3a5   : > { %2295 = vmatpush2.msra.mxu0 %v1831_v13  ;;  %2225 = vmatprep.subr.mxu1 %v1568_v14  ;;  %v1722_v12 = vld [vmem:[#allocation16 + $0xbb8] sm:$0xff]  ;;  %v1465_v13 = vld [vmem:[#allocation16 + $0x3b0] sm:$0xff] }
 0x3a6   : > { %2296 = vmatprep.subr.mxu0 %v1824_v15  ;;  %2226 = vmatpush2.msra.mxu1 %v1567_v16  ;;  %v1721_v14 = vld [vmem:[#allocation16 + $0xbb0] sm:$0xff]  ;;  %v1458_v15 = vld [vmem:[#allocation16 + $0x378] sm:$0xff] }
 0x3a7   : > { %2297 = vmatpush2.msra.mxu0 %v1823_v17  ;;  %2227 = vmatprep.subr.mxu1 %v1560_v18  ;;  %v1714_v16 = vld [vmem:[#allocation16 + $0xb78] sm:$0xff]  ;;  %v1457_v17 = vld [vmem:[#allocation16 + $0x370] sm:$0xff] }
 0x3a8   : > { %2298 = vmatprep.subr.mxu0 %v1816_v19  ;;  %2228 = vmatpush2.msra.mxu1 %v1559_v20  ;;  %v1713_v18 = vld [vmem:[#allocation16 + $0xb70] sm:$0xff]  ;;  %v1450_v19 = vld [vmem:[#allocation16 + $0x338] sm:$0xff] }
 0x3a9   : > { %2299 = vmatpush2.msra.mxu0 %v1815_v21  ;;  %2229 = vmatprep.subr.mxu1 %v1552_v24  ;;  %v1706_v20 = vld [vmem:[#allocation16 + $0xb38] sm:$0xff]  ;;  %v1449_v21 = vld [vmem:[#allocation16 + $0x330] sm:$0xff] }
 0x3aa   : > { %2300 = vmatprep.subr.mxu0 %v1808_v22  ;;  %2230 = vmatpush2.msra.mxu1 %v1551_v25  ;;  %v1705_v24 = vld [vmem:[#allocation16 + $0xb30] sm:$0xff]  ;;  %v1698_v22 = vld [vmem:[#allocation16 + $0xaf8] sm:$0xff] }
 0x3ab   : > { %2301 = vmatpush2.msra.mxu0 %v1807_v23  ;;  %2231 = vmatprep.subr.mxu1 %v1544_v26  ;;  %v1441_v25 = vld [vmem:[#allocation16 + $0x2f0] sm:$0xff]  ;;  %v1434_v23 = vld [vmem:[#allocation16 + $0x2b8] sm:$0xff] }
 0x3ac   : > { %2302 = vmatprep.subr.mxu0 %v1800_v27  ;;  %2232 = vmatpush2.msra.mxu1 %v1543_v29  ;;  %v1690_v26 = vld [vmem:[#allocation16 + $0xab8] sm:$0xff]  ;;  %v1433_v27 = vld [vmem:[#allocation16 + $0x2b0] sm:$0xff] }
 0x3ad   : > { %2303 = vmatpush2.msra.mxu0 %v1799_v36  ;;  %2233 = vmatprep.subr.mxu1 %v1536_v37  ;;  %v1689_v29 = vld [vmem:[#allocation16 + $0xab0] sm:$0xff]  ;;  %v1426_v36 = vld [vmem:[#allocation16 + $0x278] sm:$0xff] }
 0x3ae   : > { %2304 = vmatprep.subr.mxu0 %v1792_v39  ;;  %2234 = vmatpush2.msra.mxu1 %v1535_v41  ;;  %v1682_v37 = vld [vmem:[#allocation16 + $0xa78] sm:$0xff]  ;;  %v1425_v39 = vld [vmem:[#allocation16 + $0x270] sm:$0xff] }
 0x3af   : > { %2305 = vmatpush2.msra.mxu0 %v1791_v42  ;;  %2235 = vmatprep.subr.mxu1 %v1528_v43  ;;  %v1681_v41 = vld [vmem:[#allocation16 + $0xa70] sm:$0xff]  ;;  %v1418_v42 = vld [vmem:[#allocation16 + $0x238] sm:$0xff] }
 0x3b0   : > { %2306 = vmatprep.subr.mxu0 %v1784_v44  ;;  %2236 = vmatpush2.msra.mxu1 %v1527_v45  ;;  %v1674_v43 = vld [vmem:[#allocation16 + $0xa38] sm:$0xff]  ;;  %v1417_v44 = vld [vmem:[#allocation16 + $0x230] sm:$0xff] }
 0x3b1   : > { %2307 = vmatpush2.msra.mxu0 %v1783_v46  ;;  %2237 = vmatprep.subr.mxu1 %v1520_v47  ;;  %v1673_v45 = vld [vmem:[#allocation16 + $0xa30] sm:$0xff]  ;;  %v1410_v46 = vld [vmem:[#allocation16 + $0x1f8] sm:$0xff] }
 0x3b2   : > { %2308 = vmatprep.subr.mxu0 %v1776_v48  ;;  %2238 = vmatpush2.msra.mxu1 %v1519_v49  ;;  %v1666_v47 = vld [vmem:[#allocation16 + $0x9f8] sm:$0xff]  ;;  %v1409_v48 = vld [vmem:[#allocation16 + $0x1f0] sm:$0xff] }
 0x3b3   : > { %2309 = vmatpush2.msra.mxu0 %v1775_v50  ;;  %2239 = vmatprep.subr.mxu1 %v1512_v51  ;;  %v1665_v49 = vld [vmem:[#allocation16 + $0x9f0] sm:$0xff]  ;;  %v1402_v50 = vld [vmem:[#allocation16 + $0x1b8] sm:$0xff] }
 0x3b4   : > { %2310 = vmatprep.subr.mxu0 %v1768_v52  ;;  %2240 = vmatpush2.msra.mxu1 %v1511_v53  ;;  %v1658_v51 = vld [vmem:[#allocation16 + $0x9b8] sm:$0xff]  ;;  %v1401_v52 = vld [vmem:[#allocation16 + $0x1b0] sm:$0xff] }
 0x3b5   : > { %2311 = vmatpush2.msra.mxu0 %v1767_v54  ;;  %2241 = vmatprep.subr.mxu1 %v1504_v55  ;;  %v1657_v53 = vld [vmem:[#allocation16 + $0x9b0] sm:$0xff]  ;;  %v1394_v54 = vld [vmem:[#allocation16 + $0x178] sm:$0xff] }
 0x3b6   : > { %2312 = vmatprep.subr.mxu0 %v1760_v56  ;;  %2242 = vmatpush2.msra.mxu1 %v1503_v57  ;;  %v1650_v55 = vld [vmem:[#allocation16 + $0x978] sm:$0xff]  ;;  %v1393_v56 = vld [vmem:[#allocation16 + $0x170] sm:$0xff] }
 0x3b7   : > { %2313 = vmatpush2.msra.mxu0 %v1759_v58  ;;  %2243 = vmatprep.subr.mxu1 %v1496_v59  ;;  %v1649_v57 = vld [vmem:[#allocation16 + $0x970] sm:$0xff]  ;;  %v1386_v58 = vld [vmem:[#allocation16 + $0x138] sm:$0xff] }
 0x3b8   : > { %2314 = vmatprep.subr.mxu0 %v1752_v60  ;;  %2244 = vmatpush2.msra.mxu1 %v1495_v61  ;;  %v1642_v59 = vld [vmem:[#allocation16 + $0x938] sm:$0xff]  ;;  %v1385_v60 = vld [vmem:[#allocation16 + $0x130] sm:$0xff] }
 0x3b9   : > { %2315 = vmatpush2.msra.mxu0 %v1751_v62  ;;  %2245 = vmatprep.subr.mxu1 %v1488_v63  ;;  %v1641_v61 = vld [vmem:[#allocation16 + $0x930] sm:$0xff]  ;;  %v1378_v62 = vld [vmem:[#allocation16 + $0xf8] sm:$0xff] }
 0x3ba   : > { %2316 = vmatprep.subr.mxu0 %v1744_v0  ;;  %2246 = vmatpush2.msra.mxu1 %v1487_v1  ;;  %v1634_v63 = vld [vmem:[#allocation16 + $0x8f8] sm:$0xff]  ;;  %v1377_v0 = vld [vmem:[#allocation16 + $0xf0] sm:$0xff] }
 0x3bb   : > { %2317 = vmatpush2.msra.mxu0 %v1743_v2  ;;  %2247 = vmatprep.subr.mxu1 %v1480_v3  ;;  %v1633_v1 = vld [vmem:[#allocation16 + $0x8f0] sm:$0xff]  ;;  %v1370_v2 = vld [vmem:[#allocation16 + $0xb8] sm:$0xff] }
 0x3bc   : > { %2318 = vmatprep.subr.mxu0 %v1736_v4  ;;  %2248 = vmatpush2.msra.mxu1 %v1479_v5  ;;  %v1626_v3 = vld [vmem:[#allocation16 + $0x8b8] sm:$0xff]  ;;  %v1369_v4 = vld [vmem:[#allocation16 + $0xb0] sm:$0xff] }
 0x3bd   : > { %2319 = vmatpush2.msra.mxu0 %v1735_v6  ;;  %2250 = vmatmul.mubr.f32.vlgmr.msra.gmra.mxu1 %v17037_v33  ;;  %v1625_v5 = vld [vmem:[#allocation16 + $0x8b0] sm:$0xff]  ;;  %v1362_v6 = vld [vmem:[#allocation16 + $0x78] sm:$0xff] }
 0x3be   : > { %2321 = vmatmul.mubr.f32.vlgmr.msra.gmra.mxu0 %v17040_v35  ;;  %2327 = vmatprep.subr.mxu1 %v1474_v7  ;;  %v1618_v7 = vld [vmem:[#allocation16 + $0x878] sm:$0xff] }
 0x3bf   : > { %2398 = vmatprep.subr.mxu0 %v1730_v8  ;;  %2328 = vmatpush1.msra.mxu1 %v1473_v9  ;;  %v1361_v8 = vld [vmem:[#allocation16 + $0x70] sm:$0xff] }
 0x3c0   : > { %2391 = vmatprep.mubr.f32.mxu1 %v17033_v28  ;;  %2399 = vmatpush1.msra.mxu0 %v1729_v10  ;;  %v1442_v28 = vld [vmem:[#allocation16 + $0x2f8] sm:$0xff]  ;;  %v1617_v9 = vld [vmem:[#allocation16 + $0x870] sm:$0xff] }
 0x3c1   : > { %2462 = vmatprep.mubr.f32.mxu0 %v17035_v30  ;;  %2329 = vmatprep.subr.mxu1 %v1466_v11  ;;  %v1697_v30 = vld [vmem:[#allocation16 + $0xaf0] sm:$0xff]  ;;  %v1354_v10 = vld [vmem:[#allocation16 + $0x38] sm:$0xff] }
 0x3c2   : > { %2400 = vmatprep.subr.mxu0 %v1722_v12  ;;  %2330 = vmatpush1.msra.mxu1 %v1465_v13  ;;  %v1610_v11 = vld [vmem:[#allocation16 + $0x838] sm:$0xff]  ;;  %v1353_v12 = vld [vmem:[#allocation16 + $0x30] sm:$0xff] }
 0x3c3   : > { %2401 = vmatpush1.msra.mxu0 %v1721_v14  ;;  %2331 = vmatprep.subr.mxu1 %v1458_v15  ;;  %v1609_v13 = vld [vmem:[#allocation16 + $0x830] sm:$0xff]  ;;  %v1602_v14 = vld [vmem:[#allocation16 + $0x7f8] sm:$0xff] }
 0x3c4   : > { %2402 = vmatprep.subr.mxu0 %v1714_v16  ;;  %2332 = vmatpush1.msra.mxu1 %v1457_v17  ;;  %v1858_v15 = vld [vmem:[#allocation16 + $0xff8] sm:$0xff]  ;;  %v1601_v16 = vld [vmem:[#allocation16 + $0x7f0] sm:$0xff] }
 0x3c5   : > { %2403 = vmatpush1.msra.mxu0 %v1713_v18  ;;  %2333 = vmatprep.subr.mxu1 %v1450_v19  ;;  %v1857_v17 = vld [vmem:[#allocation16 + $0xff0] sm:$0xff]  ;;  %v1594_v18 = vld [vmem:[#allocation16 + $0x7b8] sm:$0xff] }
 0x3c6   : > { %2404 = vmatprep.subr.mxu0 %v1706_v20  ;;  %2334 = vmatpush1.msra.mxu1 %v1449_v21  ;;  %v1850_v19 = vld [vmem:[#allocation16 + $0xfb8] sm:$0xff]  ;;  %v1593_v20 = vld [vmem:[#allocation16 + $0x7b0] sm:$0xff] }
 0x3c7   : > { %2405 = vmatpush1.msra.mxu0 %v1705_v24  ;;  %2335 = vmatprep.subr.mxu1 %v1442_v28  ;;  %v1849_v21 = vld [vmem:[#allocation16 + $0xfb0] sm:$0xff]  ;;  %v1586_v24 = vld [vmem:[#allocation16 + $0x778] sm:$0xff] }
 0x3c8   : > { %2406 = vmatprep.subr.mxu0 %v1698_v22  ;;  %2336 = vmatpush1.msra.mxu1 %v1441_v25  ;;  %v1842_v28 = vld [vmem:[#allocation16 + $0xf78] sm:$0xff]  ;;  %v1585_v22 = vld [vmem:[#allocation16 + $0x770] sm:$0xff] }
 0x3c9   : > { %2407 = vmatpush1.msra.mxu0 %v1697_v30  ;;  %2337 = vmatprep.subr.mxu1 %v1434_v23  ;;  %v1841_v25 = vld [vmem:[#allocation16 + $0xf70] sm:$0xff]  ;;  %v1578_v30 = vld [vmem:[#allocation16 + $0x738] sm:$0xff] }
 0x3ca   : > { %2408 = vmatprep.subr.mxu0 %v1690_v26  ;;  %2338 = vmatpush1.msra.mxu1 %v1433_v27  ;;  %v1834_v23 = vld [vmem:[#allocation16 + $0xf38] sm:$0xff]  ;;  %v1577_v26 = vld [vmem:[#allocation16 + $0x730] sm:$0xff] }
 0x3cb   : > { %2409 = vmatpush1.msra.mxu0 %v1689_v29  ;;  %2339 = vmatprep.subr.mxu1 %v1426_v36  ;;  %v1833_v27 = vld [vmem:[#allocation16 + $0xf30] sm:$0xff]  ;;  %v1570_v29 = vld [vmem:[#allocation16 + $0x6f8] sm:$0xff] }
 0x3cc   : > { %2410 = vmatprep.subr.mxu0 %v1682_v37  ;;  %2340 = vmatpush1.msra.mxu1 %v1425_v39  ;;  %v1826_v36 = vld [vmem:[#allocation16 + $0xef8] sm:$0xff]  ;;  %v1569_v37 = vld [vmem:[#allocation16 + $0x6f0] sm:$0xff] }
 0x3cd   : > { %2411 = vmatpush1.msra.mxu0 %v1681_v41  ;;  %2341 = vmatprep.subr.mxu1 %v1418_v42  ;;  %v1825_v39 = vld [vmem:[#allocation16 + $0xef0] sm:$0xff]  ;;  %v1562_v41 = vld [vmem:[#allocation16 + $0x6b8] sm:$0xff] }
 0x3ce   : > { %2412 = vmatprep.subr.mxu0 %v1674_v43  ;;  %2342 = vmatpush1.msra.mxu1 %v1417_v44  ;;  %v1818_v42 = vld [vmem:[#allocation16 + $0xeb8] sm:$0xff]  ;;  %v1561_v43 = vld [vmem:[#allocation16 + $0x6b0] sm:$0xff] }
 0x3cf   : > { %2413 = vmatpush1.msra.mxu0 %v1673_v45  ;;  %2343 = vmatprep.subr.mxu1 %v1410_v46  ;;  %v1817_v44 = vld [vmem:[#allocation16 + $0xeb0] sm:$0xff]  ;;  %v1554_v45 = vld [vmem:[#allocation16 + $0x678] sm:$0xff] }
 0x3d0   : > { %2414 = vmatprep.subr.mxu0 %v1666_v47  ;;  %2344 = vmatpush1.msra.mxu1 %v1409_v48  ;;  %v1810_v46 = vld [vmem:[#allocation16 + $0xe78] sm:$0xff]  ;;  %v1553_v47 = vld [vmem:[#allocation16 + $0x670] sm:$0xff] }
 0x3d1   : > { %2415 = vmatpush1.msra.mxu0 %v1665_v49  ;;  %2345 = vmatprep.subr.mxu1 %v1402_v50  ;;  %v1809_v48 = vld [vmem:[#allocation16 + $0xe70] sm:$0xff]  ;;  %v1546_v49 = vld [vmem:[#allocation16 + $0x638] sm:$0xff] }
 0x3d2   : > { %2416 = vmatprep.subr.mxu0 %v1658_v51  ;;  %2346 = vmatpush1.msra.mxu1 %v1401_v52  ;;  %v1802_v50 = vld [vmem:[#allocation16 + $0xe38] sm:$0xff]  ;;  %v1545_v51 = vld [vmem:[#allocation16 + $0x630] sm:$0xff] }
 0x3d3   : > { %2417 = vmatpush1.msra.mxu0 %v1657_v53  ;;  %2347 = vmatprep.subr.mxu1 %v1394_v54  ;;  %v1801_v52 = vld [vmem:[#allocation16 + $0xe30] sm:$0xff]  ;;  %v1538_v53 = vld [vmem:[#allocation16 + $0x5f8] sm:$0xff] }
 0x3d4   : > { %2418 = vmatprep.subr.mxu0 %v1650_v55  ;;  %2348 = vmatpush1.msra.mxu1 %v1393_v56  ;;  %v1794_v54 = vld [vmem:[#allocation16 + $0xdf8] sm:$0xff]  ;;  %v1537_v55 = vld [vmem:[#allocation16 + $0x5f0] sm:$0xff] }
 0x3d5   : > { %2419 = vmatpush1.msra.mxu0 %v1649_v57  ;;  %2349 = vmatprep.subr.mxu1 %v1386_v58  ;;  %v1793_v56 = vld [vmem:[#allocation16 + $0xdf0] sm:$0xff]  ;;  %v1530_v57 = vld [vmem:[#allocation16 + $0x5b8] sm:$0xff] }
 0x3d6   : > { %2420 = vmatprep.subr.mxu0 %v1642_v59  ;;  %2350 = vmatpush1.msra.mxu1 %v1385_v60  ;;  %v1786_v58 = vld [vmem:[#allocation16 + $0xdb8] sm:$0xff]  ;;  %v1529_v59 = vld [vmem:[#allocation16 + $0x5b0] sm:$0xff] }
 0x3d7   : > { %2421 = vmatpush1.msra.mxu0 %v1641_v61  ;;  %2351 = vmatprep.subr.mxu1 %v1378_v62  ;;  %v1785_v60 = vld [vmem:[#allocation16 + $0xdb0] sm:$0xff]  ;;  %v1522_v61 = vld [vmem:[#allocation16 + $0x578] sm:$0xff] }
 0x3d8   : > { %2422 = vmatprep.subr.mxu0 %v1634_v63  ;;  %2352 = vmatpush1.msra.mxu1 %v1377_v0  ;;  %v1778_v62 = vld [vmem:[#allocation16 + $0xd78] sm:$0xff]  ;;  %v1521_v63 = vld [vmem:[#allocation16 + $0x570] sm:$0xff] }
 0x3d9   : > { %2423 = vmatpush1.msra.mxu0 %v1633_v1  ;;  %2353 = vmatprep.subr.mxu1 %v1370_v2  ;;  %v1777_v0 = vld [vmem:[#allocation16 + $0xd70] sm:$0xff]  ;;  %v1514_v1 = vld [vmem:[#allocation16 + $0x538] sm:$0xff] }
 0x3da   : > { %2424 = vmatprep.subr.mxu0 %v1626_v3  ;;  %2354 = vmatpush1.msra.mxu1 %v1369_v4  ;;  %v1770_v2 = vld [vmem:[#allocation16 + $0xd38] sm:$0xff]  ;;  %v1513_v3 = vld [vmem:[#allocation16 + $0x530] sm:$0xff] }
 0x3db   : > { %2425 = vmatpush1.msra.mxu0 %v1625_v5  ;;  %2355 = vmatprep.subr.mxu1 %v1362_v6  ;;  %v1769_v4 = vld [vmem:[#allocation16 + $0xd30] sm:$0xff]  ;;  %v1506_v5 = vld [vmem:[#allocation16 + $0x4f8] sm:$0xff]  ;;  %v17055_v6 = vld [vmem:[#allocation18] sm:$0xff] }
 0x3dc   : > { %2426 = vmatprep.subr.mxu0 %v1618_v7  ;;  %2356 = vmatpush1.msra.mxu1 %v1361_v8  ;;  %v1762_v7 = vld [vmem:[#allocation16 + $0xcf8] sm:$0xff]  ;;  %v1505_v8 = vld [vmem:[#allocation16 + $0x4f0] sm:$0xff] }
 0x3dd   : > { %2427 = vmatpush1.msra.mxu0 %v1617_v9  ;;  %2357 = vmatprep.subr.mxu1 %v1354_v10  ;;  %v1761_v9 = vld [vmem:[#allocation16 + $0xcf0] sm:$0xff]  ;;  %v1498_v10 = vld [vmem:[#allocation16 + $0x4b8] sm:$0xff] }
 0x3de   : > { %2428 = vmatprep.subr.mxu0 %v1610_v11  ;;  %2358 = vmatpush1.msra.mxu1 %v1353_v12  ;;  %v1754_v11 = vld [vmem:[#allocation16 + $0xcb8] sm:$0xff]  ;;  %v1497_v12 = vld [vmem:[#allocation16 + $0x4b0] sm:$0xff] }
 0x3df   : > { %2429 = vmatpush1.msra.mxu0 %v1609_v13  ;;  %2359 = vmatprep.subr.mxu1 %v1602_v14  ;;  %v1753_v13 = vld [vmem:[#allocation16 + $0xcb0] sm:$0xff]  ;;  %v1490_v14 = vld [vmem:[#allocation16 + $0x478] sm:$0xff] }
 0x3e0   : > { %2430 = vmatprep.subr.mxu0 %v1858_v15  ;;  %2360 = vmatpush2.msra.mxu1 %v1601_v16  ;;  %v1864_v15 = vrot.slane %v17055_v6, %v17004_v32  ;;  %v1746_v16 = vld [vmem:[#allocation16 + $0xc78] sm:$0xff] }
 0x3e1   : > { %2431 = vmatpush2.msra.mxu0 %v1857_v17  ;;  %2361 = vmatprep.subr.mxu1 %v1594_v18  ;;  %v1489_v17 = vld [vmem:[#allocation16 + $0x470] sm:$0xff] }
 0x3e2   : > { %2432 = vmatprep.subr.mxu0 %v1850_v19  ;;  %2362 = vmatpush2.msra.mxu1 %v1593_v20  ;;  %v1745_v18 = vld [vmem:[#allocation16 + $0xc70] sm:$0xff]  ;;  %v1482_v19 = vld [vmem:[#allocation16 + $0x438] sm:$0xff]  ;;  %v1868_v20 = vrot.slane %v17055_v6, %v17007_v34 }
 0x3e3   : > { %2433 = vmatpush2.msra.mxu0 %v1849_v21  ;;  %2363 = vmatprep.subr.mxu1 %v1586_v24  ;;  %v2921_v21 = vld [vmem:[%s16995_s26 + $0x540] sm:$0xff] }
 0x3e4   : > { %2434 = vmatprep.subr.mxu0 %v1842_v28  ;;  %2364 = vmatpush2.msra.mxu1 %v1585_v22  ;;  %v2933_v24 = vld [vmem:[%s16995_s26 + $0x5a0] sm:$0xff] }
 0x3e5   : > { %2435 = vmatpush2.msra.mxu0 %v1841_v25  ;;  %2365 = vmatprep.subr.mxu1 %v1578_v30  ;;  %v1738_v28 = vld [vmem:[#allocation16 + $0xc38] sm:$0xff] }
 0x3e6   : > { %2436 = vmatprep.subr.mxu0 %v1834_v23  ;;  %2366 = vmatpush2.msra.mxu1 %v1577_v26  ;;  %v3305_v25 = vld [vmem:[%s16995_s26 + $0x1140] sm:$0xff]  ;;  %v1481_v23 = vld [vmem:[#allocation16 + $0x430] sm:$0xff] }
 0x3e7   : > { %2437 = vmatpush2.msra.mxu0 %v1833_v27  ;;  %2367 = vmatprep.subr.mxu1 %v1570_v29  ;;  %v3317_v30 = vld [vmem:[%s16995_s26 + $0x11a0] sm:$0xff] }
 0x3e8   : > { %2438 = vmatprep.subr.mxu0 %v1826_v36  ;;  %2368 = vmatpush2.msra.mxu1 %v1569_v37  ;;  %v2897_v29 = vld [vmem:[%s16995_s26 + $0x480] sm:$0xff]  ;;  %v1737_v37 = vld [vmem:[#allocation16 + $0xc30] sm:$0xff] }
 0x3e9   : > { %2439 = vmatpush2.msra.mxu0 %v1825_v39  ;;  %2369 = vmatprep.subr.mxu1 %v1562_v41  ;;  %v2909_v36 = vld [vmem:[%s16995_s26 + $0x4e0] sm:$0xff]  ;;  %v14529_v41 = vcombine.low %v2921_v21, %v2933_v24 }
 0x3ea   : > { %2440 = vmatprep.subr.mxu0 %v1818_v42  ;;  %2370 = vmatpush2.msra.mxu1 %v1561_v43  ;;  %v14530_v42 = vcombine.high %v2921_v21, %v2933_v24  ;;  %v3281_v43 = vld [vmem:[%s16995_s26 + $0x1080] sm:$0xff] }
 0x3eb   : > { %2441 = vmatpush2.msra.mxu0 %v1817_v44  ;;  %2371 = vmatprep.subr.mxu1 %v1554_v45  ;;  %v3293_v44 = vld [vmem:[%s16995_s26 + $0x10e0] sm:$0xff] }
 0x3ec   : > { %2442 = vmatprep.subr.mxu0 %v1810_v46  ;;  %2372 = vmatpush2.msra.mxu1 %v1553_v47  ;;  %v14914_v47 = vcombine.high %v3305_v25, %v3317_v30 }
 0x3ed   : > { %2443 = vmatpush2.msra.mxu0 %v1809_v48  ;;  %2373 = vmatprep.subr.mxu1 %v1546_v49  ;;  %v14506_v49 = vcombine.high %v2897_v29, %v2909_v36 }
 0x3ee   : > { %2444 = vmatprep.subr.mxu0 %v1802_v50  ;;  %2374 = vmatpush2.msra.mxu1 %v1545_v51  ;;  %v14913_v50 = vcombine.low %v3305_v25, %v3317_v30  ;;  %v2813_v25 = vld [vmem:[%s16995_s26 + $0x1e0] sm:$0xff] }
 0x3ef   : > { %2445 = vmatpush2.msra.mxu0 %v1801_v52  ;;  %2375 = vmatprep.subr.mxu1 %v1538_v53  ;;  %v2873_v53 = vld [vmem:[%s16995_s26 + $0x3c0] sm:$0xff] }
 0x3f0   : > { %2446 = vmatprep.subr.mxu0 %v1794_v54  ;;  %2376 = vmatpush2.msra.mxu1 %v1537_v55  ;;  %v2885_v54 = vld [vmem:[%s16995_s26 + $0x420] sm:$0xff]  ;;  %v14890_v55 = vcombine.high %v3281_v43, %v3293_v44 }
 0x3f1   : > { %2447 = vmatpush2.msra.mxu0 %v1793_v56  ;;  %2377 = vmatprep.subr.mxu1 %v1530_v57  ;;  %v3257_v56 = vld [vmem:[%s16995_s26 + $0xfc0] sm:$0xff] }
 0x3f2   : > { %2448 = vmatprep.subr.mxu0 %v1786_v58  ;;  %2378 = vmatpush2.msra.mxu1 %v1529_v59  ;;  %v3269_v57 = vld [vmem:[%s16995_s26 + $0x1020] sm:$0xff] }
 0x3f3   : > { %2449 = vmatpush2.msra.mxu0 %v1785_v60  ;;  %2379 = vmatprep.subr.mxu1 %v1522_v61  ;;  %v14482_v61 = vcombine.high %v2873_v53, %v2885_v54 }
 0x3f4   : > { %2450 = vmatprep.subr.mxu0 %v1778_v62  ;;  %2380 = vmatpush2.msra.mxu1 %v1521_v63  ;;  %v2849_v63 = vld [vmem:[%s16995_s26 + $0x300] sm:$0xff] }
 0x3f5   : > { %2451 = vmatpush2.msra.mxu0 %v1777_v0  ;;  %2381 = vmatprep.subr.mxu1 %v1514_v1  ;;  %v2861_v0 = vld [vmem:[%s16995_s26 + $0x360] sm:$0xff]  ;;  %v14866_v1 = vcombine.high %v3257_v56, %v3269_v57 }
 0x3f6   : > { %2452 = vmatprep.subr.mxu0 %v1770_v2  ;;  %2382 = vmatpush2.msra.mxu1 %v1513_v3 }
 0x3f7   : > { %2453 = vmatpush2.msra.mxu0 %v1769_v4  ;;  %2383 = vmatprep.subr.mxu1 %v1506_v5  ;;  %v3233_v4 = vld [vmem:[%s16995_s26 + $0xf00] sm:$0xff] }
 0x3f8   : > { %2454 = vmatprep.subr.mxu0 %v1762_v7  ;;  %2384 = vmatpush2.msra.mxu1 %v1505_v8  ;;  %v3245_v5 = vld [vmem:[%s16995_s26 + $0xf60] sm:$0xff]  ;;  %v14481_v7 = vcombine.low %v2873_v53, %v2885_v54 }
 0x3f9   : > { %2455 = vmatpush2.msra.mxu0 %v1761_v9  ;;  %2385 = vmatprep.subr.mxu1 %v1498_v10  ;;  %v14458_v10 = vcombine.high %v2849_v63, %v2861_v0 }
 0x3fa   : > { %2456 = vmatprep.subr.mxu0 %v1754_v11  ;;  %2386 = vmatpush2.msra.mxu1 %v1497_v12  ;;  %v1967_v22 = vpop.f32.mrf.mxu1  ;;  %v14865_v11 = vcombine.low %v3257_v56, %v3269_v57  ;;  %v2825_v12 = vld [vmem:[%s16995_s26 + $0x240] sm:$0xff] }
 0x3fb   : > { %2457 = vmatpush2.msra.mxu0 %v1753_v13  ;;  %2387 = vmatprep.subr.mxu1 %v1490_v14  ;;  %v1968_v26 = vadd.f32 %v1967_v22, %v1864_v15  ;;  %v2038_v27 = vpop.f32.mrf.mxu0  ;;  %v2837_v13 = vld [vmem:[%s16995_s26 + $0x2a0] sm:$0xff]  ;;  %v14842_v14 = vcombine.high %v3233_v4, %v3245_v5 }
 0x3fc   : > { %2458 = vmatprep.subr.mxu0 %v1746_v16  ;;  %2388 = vmatpush2.msra.mxu1 %v1489_v17  ;;  %v1969_v39 = vpop.f32.mrf.mxu1  ;;  %v3209_v17 = vld [vmem:[%s16995_s26 + $0xe40] sm:$0xff]  ;;  %v14434_v24 = vcombine.high %v2825_v12, %v2837_v13 }
 0x3fd   : > { %2459 = vmatpush2.msra.mxu0 %v1745_v18  ;;  %2389 = vmatprep.subr.mxu1 %v1482_v19  ;;  %v2039_v45 = vadd.f32 %v2038_v27, %v1968_v26  ;;  %v1970_v46 = vadd.f32 %v1969_v39, %v1868_v20  ;;  %v2040_v48 = vpop.f32.mrf.mxu0  ;;  %v3221_v18 = vld [vmem:[%s16995_s26 + $0xea0] sm:$0xff]  ;;  %v14457_v19 = vcombine.low %v2849_v63, %v2861_v0 }
 0x3fe   : > { %2460 = vmatprep.subr.mxu0 %v1738_v28  ;;  %2390 = vmatpush2.msra.mxu1 %v1481_v23  ;;  %v14841_v28 = vcombine.low %v3233_v4, %v3245_v5  ;;  %v2801_v22 = vld [vmem:[%s16995_s26 + $0x180] sm:$0xff]  ;;  %v14818_v30 = vcombine.high %v3209_v17, %v3221_v18 }
 0x3ff   : > { %2461 = vmatpush2.msra.mxu0 %v1737_v37  ;;  %2392 = vmatmul.mubr.f32.vlgmr.msra.gmra.mxu1 %v17037_v33  ;;  %vm2469_vm8 = vcmp.gt.f32.partialorder %v2039_v45, 0.0  ;;  %v2477_v51 = vmul.f32 0.2, %v2039_v45  ;;  %v2041_v52 = vadd.f32 %v2040_v48, %v1970_v46  ;;  %v14505_v33 = vcombine.low %v2897_v29, %v2909_v36  ;;  %v3185_v27 = vld [vmem:[%s16995_s26 + $0xd80] sm:$0xff] }
 0x400   : > { %2463 = vmatmul.mubr.f32.vlgmr.msra.gmra.mxu0 %v17040_v35  ;;  %12095 = vmatprep.subr.bf16.mxu1 %v14530_v42  ;;  %v14889_v35 = vcombine.low %v3281_v43, %v3293_v44  ;;  %v3197_v29 = vld [vmem:[%s16995_s26 + $0xde0] sm:$0xff]  ;;  %v14433_v36 = vcombine.low %v2825_v12, %v2837_v13  ;;  %v14817_v44 = vcombine.low %v3209_v17, %v3221_v18 }
 0x401   : > { %v17075_v58 = vsel %vm2469_vm8, %v2039_v45, %v2477_v51  ;;  %vm2470_vm9 = vcmp.gt.f32.partialorder %v2041_v52, 0.0  ;;  %v2478_v59 = vmul.f32 0.2, %v2041_v52  ;;  %12096 = vmatpush1.bf16.msra.mxu1 %v14529_v41  ;;  %12136 = vmatprep.subr.bf16.mxu0 %v14914_v47  ;;  %v14410_v41 = vcombine.high %v2801_v22, %v2813_v25  ;;  %v2777_v42 = vld [vmem:[%s16995_s26 + $0xc0] sm:$0xff] }
 0x402   : > { %v2493_v60 = vrot.slane %v17075_v58, 4  ;;  %12097 = vmatprep.subr.bf16.mxu1 %v14506_v49  ;;  %12137 = vmatpush1.bf16.msra.mxu0 %v14913_v50  ;;  %v2789_v43 = vld [vmem:[%s16995_s26 + $0x120] sm:$0xff]  ;;  %v14794_v45 = vcombine.high %v3185_v27, %v3197_v29  ;;  %v14409_v50 = vcombine.low %v2801_v22, %v2813_v25  ;;  %v14793_v54 = vcombine.low %v3185_v27, %v3197_v29 }
 0x403   : > { %v2486_v62 = vsel %vm2470_vm9, %v2041_v52, %v2478_v59  ;;  %12138 = vmatprep.subr.bf16.mxu0 %v14890_v55  ;;  %v3161_v48 = vld [vmem:[%s16995_s26 + $0xcc0] sm:$0xff]  ;;  %v14386_v51 = vcombine.high %v2777_v42, %v2789_v43 }
 0x404   : > { %v2494_v2 = vadd.f32 %v2493_v60, %v17075_v58  ;;  %v2499_v3 = vrot.slane %v2486_v62, 4  ;;  %v3173_v49 = vld [vmem:[%s16995_s26 + $0xd20] sm:$0xff] }
 0x405   : > { %12098 = vmatpush1.bf16.msra.mxu1 %v14505_v33  ;;  %v2753_v55 = vld [vmem:[%s16995_s26] sm:$0xff]  ;;  %v14770_v57 = vcombine.high %v3161_v48, %v3173_v49  ;;  %v14769_v0 = vcombine.low %v3161_v48, %v3173_v49 }
 0x406   : > { %v2495_v8 = vrot.slane %v2494_v2, 2  ;;  %v2500_v9 = vadd.f32 %v2499_v3, %v2486_v62  ;;  %12099 = vmatprep.subr.bf16.mxu1 %v14482_v61  ;;  %12139 = vmatpush1.bf16.msra.mxu0 %v14889_v35  ;;  %v2765_v56 = vld [vmem:[%s16995_s26 + $0x60] sm:$0xff]  ;;  %v14385_v61 = vcombine.low %v2777_v42, %v2789_v43 }
 0x407   : > { %12140 = vmatprep.subr.bf16.mxu0 %v14866_v1  ;;  %v3137_v33 = vld [vmem:[%s16995_s26 + $0xc00] sm:$0xff]  ;;  %v14362_v63 = vcombine.high %v2753_v55, %v2765_v56 }
 0x408   : > { %v2496_v15 = vadd.f32 %v2495_v8, %v2494_v2  ;;  %v2501_v16 = vrot.slane %v2500_v9, 2  ;;  %v3149_v60 = vld [vmem:[%s16995_s26 + $0xc60] sm:$0xff] }
 0x409   : > { %12100 = vmatpush1.bf16.msra.mxu1 %v14481_v7  ;;  %v3113_v1 = vld [vmem:[%s16995_s26 + $0xb40] sm:$0xff]  ;;  %v14746_v3 = vcombine.high %v3137_v33, %v3149_v60  ;;  %v14745_v13 = vcombine.low %v3137_v33, %v3149_v60 }
 0x40a   : > { %v2497_v20 = vrot.slane %v2496_v15, 1  ;;  %v2502_v21 = vadd.f32 %v2501_v16, %v2500_v9  ;;  %12101 = vmatprep.subr.bf16.mxu1 %v14458_v10  ;;  %12141 = vmatpush1.bf16.msra.mxu0 %v14865_v11  ;;  %v3125_v2 = vld [vmem:[%s16995_s26 + $0xba0] sm:$0xff]  ;;  %v14361_v9 = vcombine.low %v2753_v55, %v2765_v56 }
 0x40b   : > { %12142 = vmatprep.subr.bf16.mxu0 %v14842_v14  ;;  %v3497_v7 = vld [vmem:[%s16995_s26 + $0x1740] sm:$0xff]  ;;  %v14722_v12 = vcombine.high %v3113_v1, %v3125_v2 }
 0x40c   : > { %v2498_v23 = vadd.f32 %v2497_v20, %v2496_v15  ;;  %v2503_v26 = vrot.slane %v2502_v21, 1  ;;  %v3509_v8 = vld [vmem:[%s16995_s26 + $0x17a0] sm:$0xff] }
 0x40d   : > { %12102 = vmatpush1.bf16.msra.mxu1 %v14457_v19  ;;  %v3089_v14 = vld [vmem:[%s16995_s26 + $0xa80] sm:$0xff]  ;;  %v15106_v16 = vcombine.high %v3497_v7, %v3509_v8  ;;  %v15105_v25 = vcombine.low %v3497_v7, %v3509_v8 }
 0x40e   : > { %v2541_v37 = vmul.f32 0.125, %v2498_v23  ;;  %v2504_v39 = vadd.f32 %v2503_v26, %v2502_v21  ;;  %12103 = vmatprep.subr.bf16.mxu1 %v14434_v24  ;;  %12143 = vmatpush1.bf16.msra.mxu0 %v14841_v28  ;;  %v3101_v15 = vld [vmem:[%s16995_s26 + $0xae0] sm:$0xff]  ;;  %v14721_v21 = vcombine.low %v3113_v1, %v3125_v2 }
 0x40f   : > { %12144 = vmatprep.subr.bf16.mxu0 %v14818_v30  ;;  %v3473_v19 = vld [vmem:[%s16995_s26 + $0x1680] sm:$0xff]  ;;  %v14698_v22 = vcombine.high %v3089_v14, %v3101_v15 }
 0x410   : > { %v17094_v46 = vsub.f32 %v17075_v58, %v2541_v37  ;;  %v2542_v47 = vmul.f32 0.125, %v2504_v39  ;;  %v3485_v20 = vld [vmem:[%s16995_s26 + $0x16e0] sm:$0xff]  ;;  %v14697_v39 = vcombine.low %v3089_v14, %v3101_v15 }
 0x411   : > { %12104 = vmatpush1.bf16.msra.mxu1 %v14433_v36  ;;  %v3065_v30 = vld [vmem:[%s16995_s26 + $0x9c0] sm:$0xff]  ;;  %v15082_v26 = vcombine.high %v3473_v19, %v3485_v20 }
 0x412   : > { %v2557_v52 = vmul.f32 %v17094_v46, %v17094_v46  ;;  %v17100_v53 = vsub.f32 %v2486_v62, %v2542_v47  ;;  %12105 = vmatprep.subr.bf16.mxu1 %v14410_v41  ;;  %12145 = vmatpush1.bf16.msra.mxu0 %v14817_v44  ;;  %v3077_v23 = vld [vmem:[%s16995_s26 + $0xa20] sm:$0xff]  ;;  %v15081_v44 = vcombine.low %v3473_v19, %v3485_v20 }
 0x413   : > { %12146 = vmatprep.subr.bf16.mxu0 %v14794_v45  ;;  %v3449_v36 = vld [vmem:[%s16995_s26 + $0x15c0] sm:$0xff]  ;;  %v14674_v43 = vcombine.high %v3065_v30, %v3077_v23 }
 0x414   : > { %v2565_v58 = vrot.slane %v2557_v52, 4  ;;  %v2558_v59 = vmul.f32 %v17100_v53, %v17100_v53  ;;  %v3461_v37 = vld [vmem:[%s16995_s26 + $0x1620] sm:$0xff] }
 0x415   : > { %12106 = vmatpush1.bf16.msra.mxu1 %v14409_v50  ;;  %v3041_v45 = vld [vmem:[%s16995_s26 + $0x900] sm:$0xff]  ;;  %v15058_v48 = vcombine.high %v3449_v36, %v3461_v37  ;;  %v15057_v55 = vcombine.low %v3449_v36, %v3461_v37 }
 0x416   : > { %v2566_v35 = vadd.f32 %v2565_v58, %v2557_v52  ;;  %v2571_v62 = vrot.slane %v2558_v59, 4  ;;  %12107 = vmatprep.subr.bf16.mxu1 %v14386_v51  ;;  %12147 = vmatpush1.bf16.msra.mxu0 %v14793_v54  ;;  %v3053_v47 = vld [vmem:[%s16995_s26 + $0x960] sm:$0xff]  ;;  %v14673_v52 = vcombine.low %v3065_v30, %v3077_v23 }
 0x417   : > { %12148 = vmatprep.subr.bf16.mxu0 %v14770_v57  ;;  %v3425_v50 = vld [vmem:[%s16995_s26 + $0x1500] sm:$0xff]  ;;  %v14650_v54 = vcombine.high %v3041_v45, %v3053_v47  ;;  %v14649_v60 = vcombine.low %v3041_v45, %v3053_v47  ;;  %v1876_v47 = vrot.slane %v17055_v6, %v17019_v40 }
 0x418   : > { %v2567_v4 = vrot.slane %v2566_v35, 2  ;;  %v2572_v5 = vadd.f32 %v2571_v62, %v2558_v59  ;;  %v3437_v51 = vld [vmem:[%s16995_s26 + $0x1560] sm:$0xff] }
 0x419   : > { %12108 = vmatpush1.bf16.msra.mxu1 %v14385_v61  ;;  %v3017_v56 = vld [vmem:[%s16995_s26 + $0x840] sm:$0xff]  ;;  %v15034_v58 = vcombine.high %v3425_v50, %v3437_v51 }
 0x41a   : > { %v2568_v10 = vadd.f32 %v2567_v4, %v2566_v35  ;;  %v2573_v11 = vrot.slane %v2572_v5, 2  ;;  %12109 = vmatprep.subr.bf16.mxu1 %v14362_v63  ;;  %12149 = vmatpush1.bf16.msra.mxu0 %v14769_v0  ;;  %v3029_v57 = vld [vmem:[%s16995_s26 + $0x8a0] sm:$0xff]  ;;  %v15033_v35 = vcombine.low %v3425_v50, %v3437_v51  ;;  %v17132_v4 = vld [vmem:[#allocation19] sm:$0xff] }
 0x41b   : > { %12150 = vmatprep.subr.bf16.mxu0 %v14746_v3  ;;  %v3401_v59 = vld [vmem:[%s16995_s26 + $0x1440] sm:$0xff]  ;;  %v14626_v61 = vcombine.high %v3017_v56, %v3029_v57  ;;  %v14625_v3 = vcombine.low %v3017_v56, %v3029_v57  ;;  %v2650_v14 = vrot.slane %v17132_v4, %v17004_v32  ;;  %v2654_v15 = vrot.slane %v17132_v4, %v17007_v34 }
 0x41c   : > { %v2569_v17 = vrot.slane %v2568_v10, 1  ;;  %v2574_v18 = vadd.f32 %v2573_v11, %v2572_v5  ;;  %v3413_v33 = vld [vmem:[%s16995_s26 + $0x14a0] sm:$0xff] }
 0x41d   : > { %12110 = vmatpush1.bf16.msra.mxu1 %v14361_v9  ;;  %v2993_v62 = vld [vmem:[%s16995_s26 + $0x780] sm:$0xff]  ;;  %v15010_v0 = vcombine.high %v3401_v59, %v3413_v33  ;;  %v15009_v7 = vcombine.low %v3401_v59, %v3413_v33 }
 0x41e   : > { %v2570_v24 = vadd.f32 %v2569_v17, %v2568_v10  ;;  %v2575_v28 = vrot.slane %v2574_v18, 1  ;;  %12111 = vmatprep.subr.bf16.mxu1 %v14722_v12  ;;  %12151 = vmatpush1.bf16.msra.mxu0 %v14745_v13  ;;  %v3005_v63 = vld [vmem:[%s16995_s26 + $0x7e0] sm:$0xff] }
 0x41f   : > { %12152 = vmatprep.subr.bf16.mxu0 %v15106_v16  ;;  %v3377_v1 = vld [vmem:[%s16995_s26 + $0x1380] sm:$0xff]  ;;  %v14602_v5 = vcombine.high %v2993_v62, %v3005_v63  ;;  %v14601_v16 = vcombine.low %v2993_v62, %v3005_v63 }
 0x420   : > { %v2613_v27 = vmul.f32 0.125, %v2570_v24  ;;  %v2576_v29 = vadd.f32 %v2575_v28, %v2574_v18  ;;  %v3389_v2 = vld [vmem:[%s16995_s26 + $0x13e0] sm:$0xff]  ;;  %v17143_v18 = vld [vmem:[#allocation21] sm:$0xff] }
 0x421   : > { %12112 = vmatpush2.bf16.msra.mxu1 %v14721_v21  ;;  %v2969_v8 = vld [vmem:[%s16995_s26 + $0x6c0] sm:$0xff]  ;;  %v14986_v10 = vcombine.high %v3377_v1, %v3389_v2  ;;  %v14985_v24 = vcombine.low %v3377_v1, %v3389_v2  ;;  %v2704_v30 = vrot.slane %v17143_v18, %v17007_v34 }
 0x422   : > { %v2622_v41 = vadd.f32 1e-05, %v2613_v27  ;;  %v2614_v42 = vmul.f32 0.125, %v2576_v29  ;;  %12113 = vmatprep.subr.bf16.mxu1 %v14698_v22  ;;  %12153 = vmatpush2.bf16.msra.mxu0 %v15105_v25  ;;  %v2981_v9 = vld [vmem:[%s16995_s26 + $0x720] sm:$0xff] }
 0x423   : > { %12154 = vmatprep.subr.bf16.mxu0 %v15082_v26  ;;  %v3353_v11 = vld [vmem:[%s16995_s26 + $0x12c0] sm:$0xff]  ;;  %v14578_v19 = vcombine.high %v2969_v8, %v2981_v9  ;;  %v2700_v26 = vrot.slane %v17143_v18, %v17004_v32  ;;  %v14577_v27 = vcombine.low %v2969_v8, %v2981_v9  ;;  %v17182_v9 = vld [vmem:[%s16995_s26 + $0x5a8] sm:$0xff] }
 0x424   : > { %16101 = vrsqrt.f32 %v2622_v41  ;;  %v2623_v49 = vadd.f32 1e-05, %v2614_v42  ;;  %v3365_v12 = vld [vmem:[%s16995_s26 + $0x1320] sm:$0xff] }
 0x425   : > { %12114 = vmatpush2.bf16.msra.mxu1 %v14697_v39  ;;  %v2945_v20 = vld [vmem:[%s16995_s26 + $0x600] sm:$0xff]  ;;  %v14962_v22 = vcombine.high %v3353_v11, %v3365_v12  ;;  %v14961_v39 = vcombine.low %v3353_v11, %v3365_v12 }
 0x426   : > { %16103 = vrsqrt.f32 %v2623_v49  ;;  %12115 = vmatprep.subr.bf16.mxu1 %v14674_v43  ;;  %12155 = vmatpush2.bf16.msra.mxu0 %v15081_v44  ;;  %v2957_v21 = vld [vmem:[%s16995_s26 + $0x660] sm:$0xff]  ;;  %v1872_v44 = vrot.slane %v17055_v6, %v17016_v38 }
 0x427   : > { %12156 = vmatprep.subr.bf16.mxu0 %v15058_v48  ;;  %v3329_v23 = vld [vmem:[%s16995_s26 + $0x1200] sm:$0xff]  ;;  %v14554_v29 = vcombine.high %v2945_v20, %v2957_v21  ;;  %v14553_v45 = vcombine.low %v2945_v20, %v2957_v21 }
 0x428   : > { %v3689_v41 = vld [vmem:[%s16995_s26 + $0x1d40] sm:$0xff] }
 0x429   : > { %12116 = vmatpush2.bf16.msra.mxu1 %v14673_v52  ;;  %v3701_v42 = vld [vmem:[%s16995_s26 + $0x1da0] sm:$0xff] }
 0x42a   : > { %12117 = vmatprep.subr.bf16.mxu1 %v14650_v54  ;;  %12157 = vmatpush2.bf16.msra.mxu0 %v15057_v55  ;;  %v15298_v51 = vcombine.high %v3689_v41, %v3701_v42  ;;  %v3665_v52 = vld [vmem:[%s16995_s26 + $0x1c80] sm:$0xff]  ;;  %v15297_v59 = vcombine.low %v3689_v41, %v3701_v42 }
 0x42b   : > { %12158 = vmatprep.subr.bf16.mxu0 %v15034_v58  ;;  %v3677_v54 = vld [vmem:[%s16995_s26 + $0x1ce0] sm:$0xff] }
 0x42c   : > { %v15274_v33 = vcombine.high %v3665_v52, %v3677_v54  ;;  %v3641_v62 = vld [vmem:[%s16995_s26 + $0x1bc0] sm:$0xff] }
 0x42d   : > { %12118 = vmatpush2.bf16.msra.mxu1 %v14649_v60  ;;  %v3653_v63 = vld [vmem:[%s16995_s26 + $0x1c20] sm:$0xff] }
 0x42e   : > { %12119 = vmatprep.subr.bf16.mxu1 %v14626_v61  ;;  %12159 = vmatpush2.bf16.msra.mxu0 %v15033_v35  ;;  %v17170_v1 = vld [vmem:[%s16995_s26 + $0x2940] sm:$0xff] }
 0x42f   : > { %12160 = vmatprep.subr.bf16.mxu0 %v15010_v0  ;;  %v17173_v2 = vld [vmem:[%s16995_s26 + $0x29a0] sm:$0xff] }
 0x430   : > { %v15682_v8 = vcombine.high %v17170_v1, %v17173_v2 }
 0x431   : > { %v16102_v13 = vpop.eup %16101  ;;  %12120 = vmatpush2.bf16.msra.mxu1 %v14625_v3  ;;  %v17176_v3 = vld [vmem:[%s16995_s26 + $0x548] sm:$0xff] }
 0x432   : > { %v2638_v17 = vmul.f32 %v16102_v13, %v17094_v46  ;;  %12121 = vmatprep.subr.bf16.mxu1 %v14602_v5  ;;  %12161 = vmatpush2.bf16.msra.mxu0 %v15009_v7  ;;  %v3341_v46 = vld [vmem:[%s16995_s26 + $0x1260] sm:$0xff]  ;;  %v14531_v11 = vcombine.low %v17176_v3, %v17182_v9 }
 0x433   : > { %v16104_v28 = vpop.eup %16103  ;;  %12162 = vmatprep.subr.bf16.mxu0 %v14986_v10  ;;  %v14937_v48 = vcombine.low %v3329_v23, %v3341_v46  ;;  %v15273_v10 = vcombine.low %v3665_v52, %v3677_v54 }
 0x434   : > { %v2639_v25 = vmul.f32 %v16104_v28, %v17100_v53  ;;  %v2687_v36 = vmul.f32 %v2650_v14, %v2638_v17  ;;  %v14938_v53 = vcombine.high %v3329_v23, %v3341_v46  ;;  %v15250_v14 = vcombine.high %v3641_v62, %v3653_v63  ;;  %v3629_v17 = vld [vmem:[%s16995_s26 + $0x1b60] sm:$0xff] }
 0x435   : > { %12122 = vmatpush2.bf16.msra.mxu1 %v14601_v16  ;;  %v3617_v16 = vld [vmem:[%s16995_s26 + $0x1b00] sm:$0xff] }
 0x436   : > { %v2688_v37 = vmul.f32 %v2654_v15, %v2639_v25  ;;  %12123 = vmatprep.subr.bf16.mxu1 %v14578_v19  ;;  %12163 = vmatpush2.bf16.msra.mxu0 %v14985_v24  ;;  %v2737_v49 = vadd.f32 %v2700_v26, %v2687_v36  ;;  %v15249_v24 = vcombine.low %v3641_v62, %v3653_v63  ;;  %v3605_v23 = vld [vmem:[%s16995_s26 + $0x1aa0] sm:$0xff] }
 0x437   : > { %12164 = vmatprep.subr.bf16.mxu0 %v14962_v22  ;;  %v15226_v28 = vcombine.high %v3617_v16, %v3629_v17 }
 0x438   : > { %v2738_v43 = vadd.f32 %v2704_v30, %v2688_v37  ;;  %v17165_v60 = vpack.c.bf16 %v2737_v49, %v2737_v49  ;;  %v3593_v30 = vld [vmem:[%s16995_s26 + $0x1a40] sm:$0xff] }
 0x439   : > { %12124 = vmatpush2.bf16.msra.mxu1 %v14577_v27  ;;  %v15225_v27 = vcombine.low %v3617_v16, %v3629_v17  ;;  %v3557_v49 = vld [vmem:[%s16995_s26 + $0x1920] sm:$0xff] }
 0x43a   : > { %v17160_v50 = vpack.c.bf16 %v2738_v43, %v2738_v43  ;;  %12125 = vmatprep.subr.bf16.mxu1 %v14554_v29  ;;  %12165 = vmatpush2.bf16.msra.mxu0 %v14961_v39  ;;  %v15202_v29 = vcombine.high %v3593_v30, %v3605_v23  ;;  %v3569_v39 = vld [vmem:[%s16995_s26 + $0x1980] sm:$0xff]  ;;  %v15201_v43 = vcombine.low %v3593_v30, %v3605_v23 }
 0x43b   : > { %v2109_v55 = vpop.f32.mrf.mxu1  ;;  %12166 = vmatprep.subr.bf16.mxu0 %v14938_v53  ;;  %v3581_v53 = vld [vmem:[%s16995_s26 + $0x19e0] sm:$0xff] }
 0x43c   : > { %v2110_v56 = vadd.f32 %v2109_v55, %v1872_v44  ;;  %v2180_v57 = vpop.f32.mrf.mxu0  ;;  %12127 = vmatprep.mubr.bf16.mxu1 %v17160_v50  ;;  %v15178_v44 = vcombine.high %v3569_v39, %v3581_v53  ;;  %v15177_v54 = vcombine.low %v3569_v39, %v3581_v53  ;;  %v3857_v16 = vld [vmem:[%s16995_s26 + $0x2280] sm:$0xff] }
 0x43d   : > { %12126 = vmatpush2.bf16.msra.mxu1 %v14553_v45  ;;  %v2111_v58 = vpop.f32.mrf.mxu1  ;;  %v3869_v17 = vld [vmem:[%s16995_s26 + $0x22e0] sm:$0xff] }
 0x43e   : > { %v2181_v61 = vadd.f32 %v2180_v57, %v2110_v56  ;;  %v2112_v35 = vadd.f32 %v2111_v58, %v1876_v47  ;;  %12167 = vmatpush2.bf16.msra.mxu0 %v14937_v48  ;;  %12177 = vmatprep.subr.bf16.mxu1 %v15298_v51  ;;  %v2182_v0 = vpop.f32.mrf.mxu0  ;;  %v3545_v48 = vld [vmem:[%s16995_s26 + $0x18c0] sm:$0xff] }
 0x43f   : > { %12218 = vmatprep.subr.bf16.mxu0 %v15682_v8  ;;  %v15154_v55 = vcombine.high %v3545_v48, %v3557_v49  ;;  %v3521_v58 = vld [vmem:[%s16995_s26 + $0x1800] sm:$0xff] }
 0x440   : > { %vm2471_vm10 = vcmp.gt.f32.partialorder %v2181_v61, 0.0  ;;  %v2479_v5 = vmul.f32 0.2, %v2181_v61  ;;  %v2183_v7 = vadd.f32 %v2182_v0, %v2112_v35  ;;  %12128 = vmatmul.mubr.bf16.vlgmr.msra.gmra.mxu1 %v17165_v60  ;;  %v15153_v35 = vcombine.low %v3545_v48, %v3557_v49  ;;  %v3845_v30 = vld [vmem:[%s16995_s26 + $0x2220] sm:$0xff] }
 0x441   : > { %12178 = vmatpush1.bf16.msra.mxu1 %v15297_v59  ;;  %v3533_v59 = vld [vmem:[%s16995_s26 + $0x1860] sm:$0xff] }
 0x442   : > { %v2487_v12 = vsel %vm2471_vm10, %v2181_v61, %v2479_v5  ;;  %vm2472_vm11 = vcmp.gt.f32.partialorder %v2183_v7, 0.0  ;;  %v2480_v13 = vmul.f32 0.2, %v2183_v7  ;;  %12179 = vmatprep.subr.bf16.mxu1 %v15274_v33  ;;  %v15130_v62 = vcombine.high %v3521_v58, %v3533_v59  ;;  %v3881_v5 = vld [vmem:[%s16995_s26 + $0x2340] sm:$0xff] }
 0x443   : > { %v2505_v15 = vrot.slane %v2487_v12, 4  ;;  %v3821_v39 = vld [vmem:[%s16995_s26 + $0x2160] sm:$0xff] }
 0x444   : > { %v2488_v19 = vsel %vm2472_vm11, %v2183_v7, %v2480_v13  ;;  %v3893_v7 = vld [vmem:[%s16995_s26 + $0x23a0] sm:$0xff] }
 0x445   : > { %v2506_v20 = vadd.f32 %v2505_v15, %v2487_v12  ;;  %v2511_v21 = vrot.slane %v2488_v19, 4  ;;  %12180 = vmatpush1.bf16.msra.mxu1 %v15273_v10  ;;  %v15490_v13 = vcombine.high %v3881_v5, %v3893_v7  ;;  %v3761_v48 = vld [vmem:[%s16995_s26 + $0x1f80] sm:$0xff] }
 0x446   : > { %12181 = vmatprep.subr.bf16.mxu1 %v15250_v14  ;;  %v3773_v49 = vld [vmem:[%s16995_s26 + $0x1fe0] sm:$0xff] }
 0x447   : > { %v2507_v22 = vrot.slane %v2506_v20, 2  ;;  %v2512_v25 = vadd.f32 %v2511_v21, %v2488_v19  ;;  %v15489_v21 = vcombine.low %v3881_v5, %v3893_v7  ;;  %v2708_v7 = vrot.slane %v17143_v18, %v17016_v38 }
 0x449   : > { %v2508_v46 = vadd.f32 %v2507_v22, %v2506_v20  ;;  %v2513_v26 = vrot.slane %v2512_v25, 2  ;;  %12182 = vmatpush1.bf16.msra.mxu1 %v15249_v24  ;;  %v15466_v24 = vcombine.high %v3857_v16, %v3869_v17 }
 0x44a   : > { %12183 = vmatprep.subr.bf16.mxu1 %v15226_v28 }
 0x44b   : > { %v2509_v36 = vrot.slane %v2508_v46, 1  ;;  %v2514_v37 = vadd.f32 %v2513_v26, %v2512_v25  ;;  %v3833_v25 = vld [vmem:[%s16995_s26 + $0x21c0] sm:$0xff]  ;;  %v15465_v26 = vcombine.low %v3857_v16, %v3869_v17  ;;  %v17234_v17 = vsub.s32 5, %v17001_v31 }
 0x44d   : > { %v2510_v41 = vadd.f32 %v2509_v36, %v2508_v46  ;;  %v2515_v42 = vrot.slane %v2514_v37, 1  ;;  %12184 = vmatpush1.bf16.msra.mxu1 %v15225_v27  ;;  %v15442_v27 = vcombine.high %v3833_v25, %v3845_v30 }
 0x44e   : > { %12185 = vmatprep.subr.bf16.mxu1 %v15202_v29 }
 0x44f   : > { %v2543_v45 = vmul.f32 0.125, %v2510_v41  ;;  %v2516_v47 = vadd.f32 %v2515_v42, %v2514_v37  ;;  %v3809_v37 = vld [vmem:[%s16995_s26 + $0x2100] sm:$0xff]  ;;  %v15441_v41 = vcombine.low %v3833_v25, %v3845_v30  ;;  %v15681_v25 = vcombine.low %v17170_v1, %v17173_v2 }
 0x450   : > { %v15418_v42 = vcombine.high %v3809_v37, %v3821_v39 }
 0x451   : > { %v17194_v51 = vsub.f32 %v2487_v12, %v2543_v45  ;;  %v2544_v52 = vmul.f32 0.125, %v2516_v47  ;;  %12186 = vmatpush1.bf16.msra.mxu1 %v15201_v43  ;;  %v15129_v12 = vcombine.low %v3521_v58, %v3533_v59  ;;  %v3785_v43 = vld [vmem:[%s16995_s26 + $0x2040] sm:$0xff]  ;;  %v15417_v45 = vcombine.low %v3809_v37, %v3821_v39  ;;  %v17255_v39 = vld [vmem:[%s16995_s26 + $0x1148] sm:$0xff] }
 0x452   : > { %12187 = vmatprep.subr.bf16.mxu1 %v15178_v44  ;;  %v3797_v44 = vld [vmem:[%s16995_s26 + $0x20a0] sm:$0xff]  ;;  %v2658_v58 = vrot.slane %v17132_v4, %v17016_v38  ;;  %v15369_v59 = vcombine.low %v3761_v48, %v3773_v49 }
 0x453   : > { %v2559_v56 = vmul.f32 %v17194_v51, %v17194_v51  ;;  %v17198_v57 = vsub.f32 %v2488_v19, %v2544_v52  ;;  %v15394_v47 = vcombine.high %v3785_v43, %v3797_v44  ;;  %v15393_v52 = vcombine.low %v3785_v43, %v3797_v44  ;;  %v4001_v44 = vld [vmem:[%s16995_s26 + $0x2700] sm:$0xff] }
 0x455   : > { %v2577_v33 = vrot.slane %v2559_v56, 4  ;;  %v2560_v61 = vmul.f32 %v17198_v57, %v17198_v57  ;;  %12188 = vmatpush1.bf16.msra.mxu1 %v15177_v54  ;;  %v15370_v54 = vcombine.high %v3761_v48, %v3773_v49 }
 0x456   : > { %12189 = vmatprep.subr.bf16.mxu1 %v15154_v55  ;;  %v3737_v55 = vld [vmem:[%s16995_s26 + $0x1ec0] sm:$0xff] }
 0x457   : > { %v2578_v63 = vadd.f32 %v2577_v33, %v2559_v56  ;;  %v2583_v0 = vrot.slane %v2560_v61, 4  ;;  %v3749_v56 = vld [vmem:[%s16995_s26 + $0x1f20] sm:$0xff] }
 0x459   : > { %v2579_v8 = vrot.slane %v2578_v63, 2  ;;  %v2584_v10 = vadd.f32 %v2583_v0, %v2560_v61  ;;  %12190 = vmatpush1.bf16.msra.mxu1 %v15153_v35  ;;  %v15346_v61 = vcombine.high %v3737_v55, %v3749_v56  ;;  %v3725_v0 = vld [vmem:[%s16995_s26 + $0x1e60] sm:$0xff] }
 0x45a   : > { %12191 = vmatprep.subr.bf16.mxu1 %v15130_v62  ;;  %v2662_v62 = vrot.slane %v17132_v4, %v17019_v40 }
 0x45b   : > { %v2580_v14 = vadd.f32 %v2579_v8, %v2578_v63  ;;  %v2585_v15 = vrot.slane %v2584_v10, 2  ;;  %v3713_v63 = vld [vmem:[%s16995_s26 + $0x1e00] sm:$0xff] }
 0x45d   : > { %v2581_v19 = vrot.slane %v2580_v14, 1  ;;  %v2586_v20 = vadd.f32 %v2585_v15, %v2584_v10  ;;  %12192 = vmatpush1.bf16.msra.mxu1 %v15129_v12  ;;  %v2712_v12 = vrot.slane %v17143_v18, %v17019_v40 }
 0x45e   : > { %12193 = vmatprep.subr.bf16.mxu1 %v15490_v13  ;;  %v15345_v13 = vcombine.low %v3737_v55, %v3749_v56 }
 0x45f   : > { %v2582_v28 = vadd.f32 %v2581_v19, %v2580_v14  ;;  %v2587_v22 = vrot.slane %v2586_v20, 1  ;;  %v15322_v14 = vcombine.high %v3713_v63, %v3725_v0 }
 0x461   : > { %v2615_v23 = vmul.f32 0.125, %v2582_v28  ;;  %v2588_v46 = vadd.f32 %v2587_v22, %v2586_v20  ;;  %12194 = vmatpush2.bf16.msra.mxu1 %v15489_v21  ;;  %v4049_v20 = vld [vmem:[%s16995_s26 + $0x2880] sm:$0xff]  ;;  %v14532_v28 = vcombine.high %v17176_v3, %v17182_v9 }
 0x462   : > { %12195 = vmatprep.subr.bf16.mxu1 %v15466_v24  ;;  %v4061_v21 = vld [vmem:[%s16995_s26 + $0x28e0] sm:$0xff] }
 0x463   : > { %v2624_v29 = vadd.f32 1e-05, %v2615_v23  ;;  %v2616_v36 = vmul.f32 0.125, %v2588_v46  ;;  %v1884_v23 = vrot.slane %v17055_v6, %v17234_v17  ;;  %v15658_v46 = vcombine.high %v4049_v20, %v4061_v21 }
 0x464   : > { %v15657_v2 = vcombine.low %v4049_v20, %v4061_v21  ;;  %v3941_v20 = vld [vmem:[%s16995_s26 + $0x2520] sm:$0xff] }
 0x465   : > { %16105 = vrsqrt.f32 %v2624_v29  ;;  %v2625_v53 = vadd.f32 1e-05, %v2616_v36  ;;  %12196 = vmatpush2.bf16.msra.mxu1 %v15465_v26  ;;  %v4037_v29 = vld [vmem:[%s16995_s26 + $0x2820] sm:$0xff] }
 0x466   : > { %12197 = vmatprep.subr.bf16.mxu1 %v15442_v27  ;;  %v4025_v27 = vld [vmem:[%s16995_s26 + $0x27c0] sm:$0xff] }
 0x467   : > { %16107 = vrsqrt.f32 %v2625_v53 }
 0x469   : > { %12198 = vmatpush2.bf16.msra.mxu1 %v15441_v41 }
 0x46a   : > { %12199 = vmatprep.subr.bf16.mxu1 %v15418_v42  ;;  %v15634_v42 = vcombine.high %v4025_v27, %v4037_v29 }
 0x46d   : > { %12200 = vmatpush2.bf16.msra.mxu1 %v15417_v45  ;;  %v4013_v45 = vld [vmem:[%s16995_s26 + $0x2760] sm:$0xff] }
 0x46e   : > { %12201 = vmatprep.subr.bf16.mxu1 %v15394_v47  ;;  %v15610_v56 = vcombine.high %v4001_v44, %v4013_v45 }
 0x471   : > { %12202 = vmatpush2.bf16.msra.mxu1 %v15393_v52  ;;  %v15633_v52 = vcombine.low %v4025_v27, %v4037_v29  ;;  %v3917_v27 = vld [vmem:[%s16995_s26 + $0x2460] sm:$0xff] }
 0x472   : > { %v16106_v33 = vpop.eup %16105  ;;  %12203 = vmatprep.subr.bf16.mxu1 %v15370_v54 }
 0x473   : > { %v2640_v35 = vmul.f32 %v16106_v33, %v17194_v51  ;;  %v17231_v51 = vsub.s32 4, %v17001_v31  ;;  %v3989_v33 = vld [vmem:[%s16995_s26 + $0x26a0] sm:$0xff] }
 0x474   : > { %v16108_v5 = vpop.eup %16107 }
 0x475   : > { %v2689_v8 = vmul.f32 %v2658_v58, %v2640_v35  ;;  %v2641_v10 = vmul.f32 %v16108_v5, %v17198_v57  ;;  %12204 = vmatpush2.bf16.msra.mxu1 %v15369_v59  ;;  %v15321_v57 = vcombine.low %v3713_v63, %v3725_v0  ;;  %v1880_v24 = vrot.slane %v17055_v6, %v17231_v51  ;;  %v17258_v6 = vld [vmem:[%s16995_s26 + $0x11a8] sm:$0xff]  ;;  %v3977_v59 = vld [vmem:[%s16995_s26 + $0x2640] sm:$0xff] }
 0x476   : > { %12205 = vmatprep.subr.bf16.mxu1 %v15346_v61  ;;  %v14915_v47 = vcombine.low %v17255_v39, %v17258_v6  ;;  %v15609_v63 = vcombine.low %v4001_v44, %v4013_v45  ;;  %v15586_v0 = vcombine.high %v3977_v59, %v3989_v33 }
 0x477   : > { %v2690_v15 = vmul.f32 %v2662_v62, %v2641_v10  ;;  %v2739_v16 = vadd.f32 %v2708_v7, %v2689_v8  ;;  %v3953_v8 = vld [vmem:[%s16995_s26 + $0x2580] sm:$0xff] }
 0x478   : > { %v3965_v10 = vld [vmem:[%s16995_s26 + $0x25e0] sm:$0xff] }
 0x479   : > { %v2740_v19 = vadd.f32 %v2712_v12, %v2690_v15  ;;  %12206 = vmatpush2.bf16.msra.mxu1 %v15345_v13  ;;  %v17246_v30 = vpack.c.bf16 %v2739_v16, %v2739_v16  ;;  %v15562_v15 = vcombine.high %v3953_v8, %v3965_v10 }
 0x47a   : > { %12207 = vmatprep.subr.bf16.mxu1 %v15322_v14  ;;  %v15585_v14 = vcombine.low %v3977_v59, %v3989_v33 }
 0x47b   : > { %v17242_v22 = vpack.c.bf16 %v2740_v19, %v2740_v19 }
 0x47d   : > { %v2251_v26 = vpop.f32.mrf.mxu1  ;;  %12168 = vmatprep.mubr.bf16.mxu0 %v17242_v22  ;;  %12208 = vmatpush2.bf16.msra.mxu1 %v15321_v57  ;;  %v3929_v57 = vld [vmem:[%s16995_s26 + $0x24c0] sm:$0xff] }
 0x47e   : > { %v2252_v36 = vadd.f32 %v2251_v26, %v1880_v24  ;;  %v2322_v37 = vpop.f32.mrf.mxu0  ;;  %12169 = vmatmul.mubr.bf16.vlgmr.msra.gmra.mxu0 %v17246_v30  ;;  %12259 = vmatprep.subr.bf16.mxu1 %v14532_v28  ;;  %v15561_v28 = vcombine.low %v3953_v8, %v3965_v10  ;;  %v3905_v26 = vld [vmem:[%s16995_s26 + $0x2400] sm:$0xff] }
 0x47f   : > { %v2253_v1 = vpop.f32.mrf.mxu1  ;;  %12219 = vmatpush1.bf16.msra.mxu0 %v15681_v25  ;;  %v15538_v25 = vcombine.high %v3929_v57, %v3941_v20  ;;  %v15513_v45 = vcombine.low %v3905_v26, %v3917_v27 }
 0x480   : > { %v2323_v53 = vadd.f32 %v2322_v37, %v2252_v36  ;;  %v2254_v41 = vadd.f32 %v2253_v1, %v1884_v23  ;;  %12220 = vmatprep.subr.bf16.mxu0 %v15658_v46  ;;  %v2324_v43 = vpop.f32.mrf.mxu0  ;;  %v15537_v37 = vcombine.low %v3929_v57, %v3941_v20  ;;  %v15514_v1 = vcombine.high %v3905_v26, %v3917_v27  ;;  %v4145_v26 = vld [vmem:[%s16995_s26 + $0x2b80] sm:$0xff] }
 0x481   : > { %v4157_v27 = vld [vmem:[%s16995_s26 + $0x2be0] sm:$0xff] }
 0x482   : > { %vm2473_vm12 = vcmp.gt.f32.partialorder %v2323_v53, 0.0  ;;  %v2481_v48 = vmul.f32 0.2, %v2323_v53  ;;  %v2325_v49 = vadd.f32 %v2324_v43, %v2254_v41  ;;  %v4265_v41 = vld [vmem:[%s16995_s26 + $0x2f40] sm:$0xff] }
 0x483   : > { %12221 = vmatpush1.bf16.msra.mxu0 %v15657_v2 }
 0x484   : > { %v2489_v54 = vsel %vm2473_vm12, %v2323_v53, %v2481_v48  ;;  %vm2474_vm13 = vcmp.gt.f32.partialorder %v2325_v49, 0.0  ;;  %v2482_v55 = vmul.f32 0.2, %v2325_v49  ;;  %12222 = vmatprep.subr.bf16.mxu0 %v15634_v42  ;;  %v4277_v42 = vld [vmem:[%s16995_s26 + $0x2fa0] sm:$0xff] }
 0x485   : > { %v2517_v58 = vrot.slane %v2489_v54, 4  ;;  %v15874_v48 = vcombine.high %v4265_v41, %v4277_v42  ;;  %v15873_v59 = vcombine.low %v4265_v41, %v4277_v42  ;;  %v15753_v41 = vcombine.low %v4145_v26, %v4157_v27 }
 0x486   : > { %v2490_v61 = vsel %vm2474_vm13, %v2325_v49, %v2482_v55  ;;  %v4253_v55 = vld [vmem:[%s16995_s26 + $0x2ee0] sm:$0xff] }
 0x487   : > { %v2518_v35 = vadd.f32 %v2517_v58, %v2489_v54  ;;  %v2523_v62 = vrot.slane %v2490_v61, 4  ;;  %12223 = vmatpush1.bf16.msra.mxu0 %v15633_v52 }
 0x488   : > { %12224 = vmatprep.subr.bf16.mxu0 %v15610_v56 }
 0x489   : > { %v2519_v5 = vrot.slane %v2518_v35, 2  ;;  %v2524_v7 = vadd.f32 %v2523_v62, %v2490_v61  ;;  %v4217_v62 = vld [vmem:[%s16995_s26 + $0x2dc0] sm:$0xff] }
 0x48b   : > { %v2520_v12 = vadd.f32 %v2519_v5, %v2518_v35  ;;  %v2525_v13 = vrot.slane %v2524_v7, 2  ;;  %12225 = vmatpush1.bf16.msra.mxu0 %v15609_v63  ;;  %v4229_v63 = vld [vmem:[%s16995_s26 + $0x2e20] sm:$0xff] }
 0x48c   : > { %12226 = vmatprep.subr.bf16.mxu0 %v15586_v0  ;;  %v15826_v8 = vcombine.high %v4217_v62, %v4229_v63 }
 0x48d   : > { %v2521_v16 = vrot.slane %v2520_v12, 1  ;;  %v2526_v19 = vadd.f32 %v2525_v13, %v2524_v7  ;;  %v4193_v13 = vld [vmem:[%s16995_s26 + $0x2d00] sm:$0xff] }
 0x48f   : > { %v2522_v21 = vadd.f32 %v2521_v16, %v2520_v12  ;;  %v2527_v24 = vrot.slane %v2526_v19, 1  ;;  %12227 = vmatpush1.bf16.msra.mxu0 %v15585_v14  ;;  %v4205_v14 = vld [vmem:[%s16995_s26 + $0x2d60] sm:$0xff] }
 0x490   : > { %12228 = vmatprep.subr.bf16.mxu0 %v15562_v15  ;;  %v15802_v57 = vcombine.high %v4193_v13, %v4205_v14 }
 0x491   : > { %v2545_v23 = vmul.f32 0.125, %v2522_v21  ;;  %v2528_v46 = vadd.f32 %v2527_v24, %v2526_v19  ;;  %v15825_v19 = vcombine.low %v4217_v62, %v4229_v63  ;;  %v4169_v24 = vld [vmem:[%s16995_s26 + $0x2c40] sm:$0xff]  ;;  %v17307_v62 = vsub.s32 6, %v17001_v31 }
 0x493   : > { %v17272_v29 = vsub.f32 %v2489_v54, %v2545_v23  ;;  %v2546_v36 = vmul.f32 0.125, %v2528_v46  ;;  %12229 = vmatpush1.bf16.msra.mxu0 %v15561_v28  ;;  %v4241_v54 = vld [vmem:[%s16995_s26 + $0x2e80] sm:$0xff]  ;;  %v15801_v23 = vcombine.low %v4193_v13, %v4205_v14 }
 0x494   : > { %12230 = vmatprep.subr.bf16.mxu0 %v15538_v25  ;;  %v15850_v33 = vcombine.high %v4241_v54, %v4253_v55  ;;  %v15849_v7 = vcombine.low %v4241_v54, %v4253_v55  ;;  %v4181_v28 = vld [vmem:[%s16995_s26 + $0x2ca0] sm:$0xff]  ;;  %v2670_v55 = vrot.slane %v17132_v4, %v17234_v17 }
 0x495   : > { %v2561_v2 = vmul.f32 %v17272_v29, %v17272_v29  ;;  %v17276_v53 = vsub.f32 %v2490_v61, %v2546_v36  ;;  %v15778_v46 = vcombine.high %v4169_v24, %v4181_v28  ;;  %v15777_v36 = vcombine.low %v4169_v24, %v4181_v28 }
 0x497   : > { %v2589_v43 = vrot.slane %v2561_v2, 4  ;;  %v2562_v44 = vmul.f32 %v17276_v53, %v17276_v53  ;;  %12231 = vmatpush1.bf16.msra.mxu0 %v15537_v37  ;;  %v15754_v37 = vcombine.high %v4145_v26, %v4157_v27  ;;  %v2862_v26 = vld [vmem:[%s16995_s26 + $0x368] sm:$0xff] }
 0x498   : > { %12232 = vmatprep.subr.bf16.mxu0 %v15514_v1  ;;  %v4121_v1 = vld [vmem:[%s16995_s26 + $0x2ac0] sm:$0xff] }
 0x499   : > { %v2590_v49 = vadd.f32 %v2589_v43, %v2561_v2  ;;  %v2595_v52 = vrot.slane %v2562_v44, 4  ;;  %v4133_v2 = vld [vmem:[%s16995_s26 + $0x2b20] sm:$0xff] }
 0x49a   : > { %v15730_v42 = vcombine.high %v4121_v1, %v4133_v2  ;;  %v4097_v43 = vld [vmem:[%s16995_s26 + $0x2a00] sm:$0xff] }
 0x49b   : > { %v2591_v56 = vrot.slane %v2590_v49, 2  ;;  %v2596_v58 = vadd.f32 %v2595_v52, %v2562_v44  ;;  %12233 = vmatpush1.bf16.msra.mxu0 %v15513_v45  ;;  %v4109_v44 = vld [vmem:[%s16995_s26 + $0x2a60] sm:$0xff]  ;;  %v2666_v45 = vrot.slane %v17132_v4, %v17231_v51  ;;  %v14916_v4 = vcombine.high %v17255_v39, %v17258_v6 }
 0x49c   : > { %12234 = vmatprep.subr.bf16.mxu0 %v15874_v48  ;;  %v15729_v48 = vcombine.low %v4121_v1, %v4133_v2  ;;  %v15706_v52 = vcombine.high %v4097_v43, %v4109_v44  ;;  %v2826_v2 = vld [vmem:[%s16995_s26 + $0x248] sm:$0xff] }
 0x49d   : > { %v2592_v61 = vadd.f32 %v2591_v56, %v2590_v49  ;;  %v2597_v35 = vrot.slane %v2596_v58, 2 }
 0x49f   : > { %v2593_v0 = vrot.slane %v2592_v61, 1  ;;  %v2598_v5 = vadd.f32 %v2597_v35, %v2596_v58  ;;  %12235 = vmatpush2.bf16.msra.mxu0 %v15873_v59  ;;  %v2716_v58 = vrot.slane %v17143_v18, %v17231_v51  ;;  %v15705_v35 = vcombine.low %v4097_v43, %v4109_v44 }
 0x4a0   : > { %12236 = vmatprep.subr.bf16.mxu0 %v15850_v33 }
 0x4a1   : > { %v2594_v10 = vadd.f32 %v2593_v0, %v2592_v61  ;;  %v2599_v12 = vrot.slane %v2598_v5, 1  ;;  %v2720_v61 = vrot.slane %v17143_v18, %v17234_v17  ;;  %v17312_v0 = vsub.s32 7, %v17001_v31  ;;  %v16165_v18 = vld [vmem:[#allocation18] sm:$0xff] }
 0x4a2   : > { %v2874_v31 = vld [vmem:[%s16995_s26 + $0x3c8] sm:$0xff] }
 0x4a3   : > { %v2617_v15 = vmul.f32 0.125, %v2594_v10  ;;  %v2600_v16 = vadd.f32 %v2599_v12, %v2598_v5  ;;  %12237 = vmatpush2.bf16.msra.mxu0 %v15849_v7  ;;  %v2898_v5 = vld [vmem:[%s16995_s26 + $0x488] sm:$0xff]  ;;  %v1892_v13 = vrot.slane %v16165_v18, %v17312_v0 }
 0x4a4   : > { %12238 = vmatprep.subr.bf16.mxu0 %v15826_v8  ;;  %v2910_v7 = vld [vmem:[%s16995_s26 + $0x4e8] sm:$0xff]  ;;  %v1888_v8 = vrot.slane %v16165_v18, %v17307_v62 }
 0x4a5   : > { %v2626_v20 = vadd.f32 1e-05, %v2617_v15  ;;  %v2618_v21 = vmul.f32 0.125, %v2600_v16  ;;  %v14508_v14 = vcombine.high %v2898_v5, %v2910_v7  ;;  %v2886_v16 = vld [vmem:[%s16995_s26 + $0x428] sm:$0xff] }
 0x4a7   : > { %16109 = vrsqrt.f32 %v2626_v20  ;;  %v2627_v25 = vadd.f32 1e-05, %v2618_v21  ;;  %12239 = vmatpush2.bf16.msra.mxu0 %v15825_v19  ;;  %v14507_v21 = vcombine.low %v2898_v5, %v2910_v7 }
 0x4a8   : > { %12240 = vmatprep.subr.bf16.mxu0 %v15802_v57 }
 0x4a9   : > { %16111 = vrsqrt.f32 %v2627_v25  ;;  %v14484_v25 = vcombine.high %v2874_v31, %v2886_v16 }
 0x4ab   : > { %12241 = vmatpush2.bf16.msra.mxu0 %v15801_v23 }
 0x4ac   : > { %12242 = vmatprep.subr.bf16.mxu0 %v15778_v46  ;;  %v2850_v46 = vld [vmem:[%s16995_s26 + $0x308] sm:$0xff] }
 0x4ad   : > { %v14460_v9 = vcombine.high %v2850_v46, %v2862_v26 }
 0x4af   : > { %12243 = vmatpush2.bf16.msra.mxu0 %v15777_v36 }
 0x4b0   : > { %12244 = vmatprep.subr.bf16.mxu0 %v15754_v37  ;;  %v14483_v37 = vcombine.low %v2874_v31, %v2886_v16 }
 0x4b3   : > { %12245 = vmatpush2.bf16.msra.mxu0 %v15753_v41  ;;  %v2838_v41 = vld [vmem:[%s16995_s26 + $0x2a8] sm:$0xff] }
 0x4b4   : > { %v16110_v49 = vpop.eup %16109  ;;  %12246 = vmatprep.subr.bf16.mxu0 %v15730_v42 }
 0x4b5   : > { %v2642_v54 = vmul.f32 %v16110_v49, %v17272_v29 }
 0x4b6   : > { %v16112_v56 = vpop.eup %16111 }
 0x4b7   : > { %v2691_v59 = vmul.f32 %v2666_v45, %v2642_v54  ;;  %v2643_v33 = vmul.f32 %v16112_v56, %v17276_v53  ;;  %12247 = vmatpush2.bf16.msra.mxu0 %v15729_v48  ;;  %v14459_v45 = vcombine.low %v2850_v46, %v2862_v26  ;;  %v14436_v48 = vcombine.high %v2826_v2, %v2838_v41  ;;  %v2802_v54 = vld [vmem:[%s16995_s26 + $0x188] sm:$0xff] }
 0x4b8   : > { %12248 = vmatprep.subr.bf16.mxu0 %v15706_v52 }
 0x4b9   : > { %v2692_v29 = vmul.f32 %v2670_v55, %v2643_v33  ;;  %v2741_v63 = vadd.f32 %v2716_v58, %v2691_v59  ;;  %v2814_v55 = vld [vmem:[%s16995_s26 + $0x1e8] sm:$0xff]  ;;  %v14435_v59 = vcombine.low %v2826_v2, %v2838_v41 }
 0x4ba   : > { %v14412_v33 = vcombine.high %v2802_v54, %v2814_v55  ;;  %v14411_v5 = vcombine.low %v2802_v54, %v2814_v55  ;;  %v3042_v55 = vld [vmem:[%s16995_s26 + $0x908] sm:$0xff] }
 0x4bb   : > { %v2742_v53 = vadd.f32 %v2720_v61, %v2692_v29  ;;  %12249 = vmatpush2.bf16.msra.mxu0 %v15705_v35  ;;  %v17319_v12 = vpack.c.bf16 %v2741_v63, %v2741_v63  ;;  %v2790_v29 = vld [vmem:[%s16995_s26 + $0x128] sm:$0xff] }
 0x4bc   : > { %12300 = vmatprep.subr.bf16.mxu0 %v14916_v4  ;;  %v2778_v4 = vld [vmem:[%s16995_s26 + $0xc8] sm:$0xff] }
 0x4bd   : > { %v17317_v10 = vpack.c.bf16 %v2742_v53, %v2742_v53  ;;  %v14388_v7 = vcombine.high %v2778_v4, %v2790_v29  ;;  %v14387_v16 = vcombine.low %v2778_v4, %v2790_v29  ;;  %v3018_v29 = vld [vmem:[%s16995_s26 + $0x848] sm:$0xff] }
 0x4bf   : > { %v2393_v15 = vpop.f32.mrf.mxu1  ;;  %12209 = vmatprep.mubr.bf16.mxu1 %v17317_v10 }
 0x4c0   : > { %v2394_v19 = vadd.f32 %v2393_v15, %v1888_v8  ;;  %v2464_v57 = vpop.f32.mrf.mxu0  ;;  %12210 = vmatmul.mubr.bf16.vlgmr.msra.gmra.mxu1 %v17319_v12 }
 0x4c1   : > { %v2395_v20 = vpop.f32.mrf.mxu1  ;;  %12260 = vmatpush1.bf16.msra.mxu1 %v14531_v11  ;;  %12291 = vmatprep.mubr.bf16.mxu1 %v17160_v50 }
 0x4c2   : > { %v2465_v24 = vadd.f32 %v2464_v57, %v2394_v19  ;;  %v2396_v28 = vadd.f32 %v2395_v20, %v1892_v13  ;;  %12261 = vmatprep.subr.bf16.mxu1 %v14508_v14  ;;  %v2466_v23 = vpop.f32.mrf.mxu0  ;;  %v2754_v13 = vld [vmem:[%s16995_s26 + $0x8] sm:$0xff] }
 0x4c3   : > { %v2766_v14 = vld [vmem:[%s16995_s26 + $0x68] sm:$0xff] }
 0x4c4   : > { %vm2475_vm14 = vcmp.gt.f32.partialorder %v2465_v24, 0.0  ;;  %v2483_v27 = vmul.f32 0.2, %v2465_v24  ;;  %v2467_v36 = vadd.f32 %v2466_v23, %v2396_v28  ;;  %v14364_v19 = vcombine.high %v2754_v13, %v2766_v14 }
 0x4c5   : > { %12262 = vmatpush1.bf16.msra.mxu1 %v14507_v21  ;;  %v3114_v21 = vld [vmem:[%s16995_s26 + $0xb48] sm:$0xff]  ;;  %v14363_v23 = vcombine.low %v2754_v13, %v2766_v14 }
 0x4c6   : > { %v2491_v1 = vsel %vm2475_vm14, %v2465_v24, %v2483_v27  ;;  %vm2476_vm15 = vcmp.gt.f32.partialorder %v2467_v36, 0.0  ;;  %v2484_v3 = vmul.f32 0.2, %v2467_v36  ;;  %12263 = vmatprep.subr.bf16.mxu1 %v14484_v25  ;;  %v3126_v24 = vld [vmem:[%s16995_s26 + $0xba8] sm:$0xff] }
 0x4c7   : > { %v2529_v11 = vrot.slane %v2491_v1, 4  ;;  %v14724_v46 = vcombine.high %v3114_v21, %v3126_v24 }
 0x4c8   : > { %v2492_v42 = vsel %vm2476_vm15, %v2467_v36, %v2484_v3  ;;  %v3090_v36 = vld [vmem:[%s16995_s26 + $0xa88] sm:$0xff] }
 0x4c9   : > { %v2530_v43 = vadd.f32 %v2529_v11, %v2491_v1  ;;  %v2535_v44 = vrot.slane %v2492_v42, 4  ;;  %12264 = vmatpush1.bf16.msra.mxu1 %v14483_v37  ;;  %v3102_v37 = vld [vmem:[%s16995_s26 + $0xae8] sm:$0xff] }
 0x4ca   : > { %12265 = vmatprep.subr.bf16.mxu1 %v14460_v9  ;;  %v14723_v9 = vcombine.low %v3114_v21, %v3126_v24  ;;  %v14700_v11 = vcombine.high %v3090_v36, %v3102_v37  ;;  %v2946_v21 = vld [vmem:[%s16995_s26 + $0x608] sm:$0xff] }
 0x4cb   : > { %v2531_v49 = vrot.slane %v2530_v43, 2  ;;  %v2536_v52 = vadd.f32 %v2535_v44, %v2492_v42  ;;  %v2958_v24 = vld [vmem:[%s16995_s26 + $0x668] sm:$0xff] }
 0x4cd   : > { %v2532_v56 = vadd.f32 %v2531_v49, %v2530_v43  ;;  %v2537_v58 = vrot.slane %v2536_v52, 2  ;;  %12266 = vmatpush1.bf16.msra.mxu1 %v14459_v45  ;;  %v3078_v43 = vld [vmem:[%s16995_s26 + $0xa28] sm:$0xff] }
 0x4ce   : > { %12267 = vmatprep.subr.bf16.mxu1 %v14436_v48  ;;  %v14699_v48 = vcombine.low %v3090_v36, %v3102_v37  ;;  %v3690_v37 = vld [vmem:[%s16995_s26 + $0x1d48] sm:$0xff] }
 0x4cf   : > { %v2533_v61 = vrot.slane %v2532_v56, 1  ;;  %v2538_v35 = vadd.f32 %v2537_v58, %v2536_v52 }
 0x4d1   : > { %v2534_v63 = vadd.f32 %v2533_v61, %v2532_v56  ;;  %v2539_v53 = vrot.slane %v2538_v35, 1  ;;  %12268 = vmatpush1.bf16.msra.mxu1 %v14435_v59  ;;  %v3054_v56 = vld [vmem:[%s16995_s26 + $0x968] sm:$0xff] }
 0x4d2   : > { %12269 = vmatprep.subr.bf16.mxu1 %v14412_v33  ;;  %v14652_v61 = vcombine.high %v3042_v55, %v3054_v56 }
 0x4d3   : > { %v2547_v18 = vmul.f32 0.125, %v2534_v63  ;;  %v2540_v8 = vadd.f32 %v2539_v53, %v2538_v35  ;;  %v3030_v63 = vld [vmem:[%s16995_s26 + $0x8a8] sm:$0xff] }
 0x4d4   : > { %v14627_v13 = vcombine.low %v3018_v29, %v3030_v63 }
 0x4d5   : > { %v17340_v15 = vsub.f32 %v2491_v1, %v2547_v18  ;;  %v2548_v31 = vmul.f32 0.125, %v2540_v8  ;;  %12270 = vmatpush1.bf16.msra.mxu1 %v14411_v5  ;;  %v14651_v5 = vcombine.low %v3042_v55, %v3054_v56  ;;  %v2994_v18 = vld [vmem:[%s16995_s26 + $0x788] sm:$0xff] }
 0x4d6   : > { %12271 = vmatprep.subr.bf16.mxu1 %v14388_v7  ;;  %v14628_v7 = vcombine.high %v3018_v29, %v3030_v63  ;;  %v3006_v8 = vld [vmem:[%s16995_s26 + $0x7e8] sm:$0xff] }
 0x4d7   : > { %v2563_v57 = vmul.f32 %v17340_v15, %v17340_v15  ;;  %v17344_v20 = vsub.f32 %v2492_v42, %v2548_v31  ;;  %v3066_v42 = vld [vmem:[%s16995_s26 + $0x9c8] sm:$0xff]  ;;  %v14604_v14 = vcombine.high %v2994_v18, %v3006_v8 }
 0x4d8   : > { %v14676_v49 = vcombine.high %v3066_v42, %v3078_v43  ;;  %v14675_v33 = vcombine.low %v3066_v42, %v3078_v43  ;;  %v2970_v31 = vld [vmem:[%s16995_s26 + $0x6c8] sm:$0xff] }
 0x4d9   : > { %v2601_v28 = vrot.slane %v2563_v57, 4  ;;  %v2564_v25 = vmul.f32 %v17344_v20, %v17344_v20  ;;  %12272 = vmatpush1.bf16.msra.mxu1 %v14387_v16  ;;  %v2982_v16 = vld [vmem:[%s16995_s26 + $0x728] sm:$0xff] }
 0x4da   : > { %12273 = vmatprep.subr.bf16.mxu1 %v14364_v19  ;;  %v14603_v19 = vcombine.low %v2994_v18, %v3006_v8  ;;  %v3666_v55 = vld [vmem:[%s16995_s26 + $0x1c88] sm:$0xff] }
 0x4db   : > { %v2602_v26 = vadd.f32 %v2601_v28, %v2563_v57  ;;  %v2607_v27 = vrot.slane %v2564_v25, 4  ;;  %v14580_v57 = vcombine.high %v2970_v31, %v2982_v16  ;;  %v16166_v28 = vld [vmem:[#allocation19] sm:$0xff]  ;;  %v3678_v56 = vld [vmem:[%s16995_s26 + $0x1ce8] sm:$0xff] }
 0x4dc   : > { %v2678_v36 = vrot.slane %v16166_v28, %v17312_v0  ;;  %v15275_v29 = vcombine.low %v3666_v55, %v3678_v56  ;;  %v3258_v63 = vld [vmem:[%s16995_s26 + $0xfc8] sm:$0xff] }
 0x4dd   : > { %v2603_v1 = vrot.slane %v2602_v26, 2  ;;  %v2608_v3 = vadd.f32 %v2607_v27, %v2564_v25  ;;  %12274 = vmatpush1.bf16.msra.mxu1 %v14363_v23  ;;  %v2674_v25 = vrot.slane %v16166_v28, %v17307_v62  ;;  %v14579_v23 = vcombine.low %v2970_v31, %v2982_v16  ;;  %v3618_v8 = vld [vmem:[%s16995_s26 + $0x1b08] sm:$0xff] }
 0x4de   : > { %12275 = vmatprep.subr.bf16.mxu1 %v14724_v46 }
 0x4df   : > { %v2604_v2 = vadd.f32 %v2603_v1, %v2602_v26  ;;  %v2609_v41 = vrot.slane %v2608_v3, 2  ;;  %v14556_v26 = vcombine.high %v2946_v21, %v2958_v24  ;;  %v3702_v1 = vld [vmem:[%s16995_s26 + $0x1da8] sm:$0xff] }
 0x4e0   : > { %v15300_v43 = vcombine.high %v3690_v37, %v3702_v1 }
 0x4e1   : > { %v2605_v44 = vrot.slane %v2604_v2, 1  ;;  %v2610_v45 = vadd.f32 %v2609_v41, %v2608_v3  ;;  %12276 = vmatpush2.bf16.msra.mxu1 %v14723_v9  ;;  %v16167_v9 = vld [vmem:[#allocation21] sm:$0xff] }
 0x4e2   : > { %12277 = vmatprep.subr.bf16.mxu1 %v14700_v11  ;;  %v2724_v11 = vrot.slane %v16167_v9, %v17307_v62  ;;  %v2728_v42 = vrot.slane %v16167_v9, %v17312_v0  ;;  %v3186_v9 = vld [vmem:[%s16995_s26 + $0xd88] sm:$0xff] }
 0x4e3   : > { %v2606_v52 = vadd.f32 %v2605_v44, %v2604_v2  ;;  %v2611_v54 = vrot.slane %v2610_v45, 1 }
 0x4e5   : > { %v2619_v58 = vmul.f32 0.125, %v2606_v52  ;;  %v2612_v59 = vadd.f32 %v2611_v54, %v2610_v45  ;;  %12278 = vmatpush2.bf16.msra.mxu1 %v14699_v48  ;;  %v3282_v48 = vld [vmem:[%s16995_s26 + $0x1088] sm:$0xff]  ;;  %v15299_v52 = vcombine.low %v3690_v37, %v3702_v1 }
 0x4e6   : > { %12279 = vmatprep.subr.bf16.mxu1 %v14676_v49  ;;  %v3294_v54 = vld [vmem:[%s16995_s26 + $0x10e8] sm:$0xff] }
 0x4e7   : > { %v2628_v35 = vadd.f32 1e-05, %v2619_v58  ;;  %v2620_v4 = vmul.f32 0.125, %v2612_v59  ;;  %v3642_v58 = vld [vmem:[%s16995_s26 + $0x1bc8] sm:$0xff]  ;;  %v14891_v18 = vcombine.low %v3282_v48, %v3294_v54 }
 0x4e8   : > { %v3654_v59 = vld [vmem:[%s16995_s26 + $0x1c28] sm:$0xff] }
 0x4e9   : > { %16113 = vrsqrt.f32 %v2628_v35  ;;  %v2629_v53 = vadd.f32 1e-05, %v2620_v4  ;;  %12280 = vmatpush2.bf16.msra.mxu1 %v14675_v33  ;;  %v14892_v35 = vcombine.high %v3282_v48, %v3294_v54  ;;  %v15276_v4 = vcombine.high %v3666_v55, %v3678_v56  ;;  %v3582_v37 = vld [vmem:[%s16995_s26 + $0x19e8] sm:$0xff] }
 0x4ea   : > { %12281 = vmatprep.subr.bf16.mxu1 %v14652_v61  ;;  %v15251_v16 = vcombine.low %v3642_v58, %v3654_v59  ;;  %v3174_v48 = vld [vmem:[%s16995_s26 + $0xd28] sm:$0xff] }
 0x4eb   : > { %16115 = vrsqrt.f32 %v2629_v53  ;;  %v3270_v53 = vld [vmem:[%s16995_s26 + $0x1028] sm:$0xff] }
 0x4ec   : > { %v14868_v31 = vcombine.high %v3258_v63, %v3270_v53  ;;  %v14867_v6 = vcombine.low %v3258_v63, %v3270_v53  ;;  %v3522_v54 = vld [vmem:[%s16995_s26 + $0x1808] sm:$0xff] }
 0x4ed   : > { %12282 = vmatpush2.bf16.msra.mxu1 %v14651_v5  ;;  %v3534_v55 = vld [vmem:[%s16995_s26 + $0x1868] sm:$0xff] }
 0x4ee   : > { %12283 = vmatprep.subr.bf16.mxu1 %v14628_v7  ;;  %v15252_v7 = vcombine.high %v3642_v58, %v3654_v59  ;;  %v3138_v59 = vld [vmem:[%s16995_s26 + $0xc08] sm:$0xff] }
 0x4ef   : > { %v3882_v63 = vld [vmem:[%s16995_s26 + $0x2348] sm:$0xff] }
 0x4f0   : > { %v3894_v53 = vld [vmem:[%s16995_s26 + $0x23a8] sm:$0xff] }
 0x4f1   : > { %12284 = vmatpush2.bf16.msra.mxu1 %v14627_v13  ;;  %v3630_v13 = vld [vmem:[%s16995_s26 + $0x1b68] sm:$0xff] }
 0x4f2   : > { %12285 = vmatprep.subr.bf16.mxu1 %v14604_v14  ;;  %v15228_v39 = vcombine.high %v3618_v8, %v3630_v13 }
 0x4f5   : > { %12286 = vmatpush2.bf16.msra.mxu1 %v14603_v19  ;;  %v3234_v19 = vld [vmem:[%s16995_s26 + $0xf08] sm:$0xff] }
 0x4f6   : > { %v16114_v46 = vpop.eup %16113  ;;  %12287 = vmatprep.subr.bf16.mxu1 %v14580_v57  ;;  %v3246_v57 = vld [vmem:[%s16995_s26 + $0xf68] sm:$0xff] }
 0x4f7   : > { %v2644_v27 = vmul.f32 %v16114_v46, %v17340_v15  ;;  %v14555_v15 = vcombine.low %v2946_v21, %v2958_v24  ;;  %v3606_v24 = vld [vmem:[%s16995_s26 + $0x1aa8] sm:$0xff]  ;;  %v14844_v28 = vcombine.high %v3234_v19, %v3246_v57 }
 0x4f8   : > { %v16116_v3 = vpop.eup %16115  ;;  %v3222_v46 = vld [vmem:[%s16995_s26 + $0xea8] sm:$0xff] }
 0x4f9   : > { %v2693_v2 = vmul.f32 %v2674_v25, %v2644_v27  ;;  %v2645_v41 = vmul.f32 %v16116_v3, %v17344_v20  ;;  %12288 = vmatpush2.bf16.msra.mxu1 %v14579_v23  ;;  %v15227_v25 = vcombine.low %v3618_v8, %v3630_v13  ;;  %v3210_v23 = vld [vmem:[%s16995_s26 + $0xe48] sm:$0xff]  ;;  %v14843_v27 = vcombine.low %v3234_v19, %v3246_v57 }
 0x4fa   : > { %12289 = vmatprep.subr.bf16.mxu1 %v14556_v26  ;;  %v14820_v1 = vcombine.high %v3210_v23, %v3222_v46  ;;  %v3498_v8 = vld [vmem:[%s16995_s26 + $0x1748] sm:$0xff] }
 0x4fb   : > { %v2694_v44 = vmul.f32 %v2678_v36, %v2645_v41  ;;  %v2743_v45 = vadd.f32 %v2724_v11, %v2693_v2  ;;  %v3570_v36 = vld [vmem:[%s16995_s26 + $0x1988] sm:$0xff]  ;;  %v14819_v41 = vcombine.low %v3210_v23, %v3222_v46 }
 0x4fc   : > { %v3198_v11 = vld [vmem:[%s16995_s26 + $0xde8] sm:$0xff]  ;;  %v15180_v2 = vcombine.high %v3570_v36, %v3582_v37 }
 0x4fd   : > { %v2744_v49 = vadd.f32 %v2728_v42, %v2694_v44  ;;  %12290 = vmatpush2.bf16.msra.mxu1 %v14555_v15  ;;  %v17380_v33 = vpack.c.bf16 %v2743_v45, %v2743_v45  ;;  %v3546_v42 = vld [vmem:[%s16995_s26 + $0x18c8] sm:$0xff]  ;;  %v15179_v44 = vcombine.low %v3570_v36, %v3582_v37 }
 0x4fe   : > { %12341 = vmatprep.subr.bf16.mxu1 %v15300_v43  ;;  %v3558_v15 = vld [vmem:[%s16995_s26 + $0x1928] sm:$0xff]  ;;  %v14796_v43 = vcombine.high %v3186_v9, %v3198_v11 }
 0x4ff   : > { %v17376_v20 = vpack.c.bf16 %v2744_v49, %v2744_v49  ;;  %v3162_v45 = vld [vmem:[%s16995_s26 + $0xcc8] sm:$0xff]  ;;  %v15156_v49 = vcombine.high %v3546_v42, %v3558_v15  ;;  %v15155_v58 = vcombine.low %v3546_v42, %v3558_v15 }
 0x500   : > { %12292 = vmatmul.mubr.bf16.vlgmr.msra.gmra.mxu1 %v17165_v60  ;;  %v17383_v61 = vpop.f32.mrf.mxu1  ;;  %v14772_v56 = vcombine.high %v3162_v45, %v3174_v48  ;;  %v3510_v13 = vld [vmem:[%s16995_s26 + $0x17a8] sm:$0xff] }
 0x501   : > { %12250 = vmatprep.mubr.bf16.mxu0 %v17376_v20  ;;  %12342 = vmatpush1.bf16.msra.mxu1 %v15299_v52  ;;  %v14795_v52 = vcombine.low %v3186_v9, %v3198_v11  ;;  %v3870_v19 = vld [vmem:[%s16995_s26 + $0x22e8] sm:$0xff]  ;;  %v15108_v57 = vcombine.high %v3498_v8, %v3510_v13 }
 0x502   : > { %12251 = vmatmul.mubr.bf16.vlgmr.msra.gmra.mxu0 %v17380_v33  ;;  %12373 = vmatprep.mubr.bf16.mxu1 %v17317_v10  ;;  %v17390_v5 = vpop.f32.mrf.mxu1 }
 0x503   : > { %12301 = vmatpush1.bf16.msra.mxu0 %v14915_v47  ;;  %12332 = vmatprep.mubr.bf16.mxu0 %v17242_v22  ;;  %v3594_v47 = vld [vmem:[%s16995_s26 + $0x1a48] sm:$0xff] }
 0x504   : > { %12302 = vmatprep.subr.bf16.mxu0 %v14892_v35  ;;  %12343 = vmatprep.subr.bf16.mxu1 %v15276_v4  ;;  %v12133_v14 = vpop.f32.mrf.mxu1  ;;  %v15204_v26 = vcombine.high %v3594_v47, %v3606_v24  ;;  %v15203_v3 = vcombine.low %v3594_v47, %v3606_v24  ;;  %v3150_v35 = vld [vmem:[%s16995_s26 + $0xc68] sm:$0xff]  ;;  %v15132_v4 = vcombine.high %v3522_v54, %v3534_v55 }
 0x505   : > { %12344 = vmatpush1.bf16.msra.mxu1 %v15275_v29  ;;  %v14771_v29 = vcombine.low %v3162_v45, %v3174_v48  ;;  %v15492_v14 = vcombine.high %v3882_v63, %v3894_v53  ;;  %v15107_v24 = vcombine.low %v3498_v8, %v3510_v13 }
 0x506   : > { %v12134_v21 = vpop.f32.mrf.mxu1  ;;  %12345 = vmatprep.subr.bf16.mxu1 %v15252_v7  ;;  %v14748_v7 = vcombine.high %v3138_v59, %v3150_v35 }
 0x507   : > { %12303 = vmatpush1.bf16.msra.mxu0 %v14891_v18  ;;  %v15131_v18 = vcombine.low %v3522_v54, %v3534_v55  ;;  %v15491_v21 = vcombine.low %v3882_v63, %v3894_v53 }
 0x508   : > { %12304 = vmatprep.subr.bf16.mxu0 %v14868_v31  ;;  %v14747_v31 = vcombine.low %v3138_v59, %v3150_v35 }
 0x509   : > { %12346 = vmatpush1.bf16.msra.mxu1 %v15251_v16  ;;  %v3858_v16 = vld [vmem:[%s16995_s26 + $0x2288] sm:$0xff] }
 0x50a   : > { %12347 = vmatprep.subr.bf16.mxu1 %v15228_v39  ;;  %v3474_v39 = vld [vmem:[%s16995_s26 + $0x1688] sm:$0xff]  ;;  %v15468_v47 = vcombine.high %v3858_v16, %v3870_v19  ;;  %v15467_v46 = vcombine.low %v3858_v16, %v3870_v19 }
 0x50b   : > { %12305 = vmatpush1.bf16.msra.mxu0 %v14867_v6  ;;  %v3486_v6 = vld [vmem:[%s16995_s26 + $0x16e8] sm:$0xff] }
 0x50c   : > { %12306 = vmatprep.subr.bf16.mxu0 %v14844_v28  ;;  %v3834_v28 = vld [vmem:[%s16995_s26 + $0x21c8] sm:$0xff]  ;;  %v15084_v23 = vcombine.high %v3474_v39, %v3486_v6  ;;  %v15083_v37 = vcombine.low %v3474_v39, %v3486_v6 }
 0x50d   : > { %12348 = vmatpush1.bf16.msra.mxu1 %v15227_v25  ;;  %v3846_v25 = vld [vmem:[%s16995_s26 + $0x2228] sm:$0xff] }
 0x50e   : > { %12349 = vmatprep.subr.bf16.mxu1 %v15204_v26  ;;  %v3450_v26 = vld [vmem:[%s16995_s26 + $0x15c8] sm:$0xff]  ;;  %v15444_v36 = vcombine.high %v3834_v28, %v3846_v25  ;;  %v15443_v11 = vcombine.low %v3834_v28, %v3846_v25  ;;  %v4289_v28 = vld [vmem:[%s17450_s1] sm:$0xff] }
 0x50f   : > { %12307 = vmatpush1.bf16.msra.mxu0 %v14843_v27  ;;  %v3462_v27 = vld [vmem:[%s16995_s26 + $0x1628] sm:$0xff] }
 0x510   : > { %12308 = vmatprep.subr.bf16.mxu0 %v14820_v1  ;;  %v3810_v1 = vld [vmem:[%s16995_s26 + $0x2108] sm:$0xff]  ;;  %v15060_v9 = vcombine.high %v3450_v26, %v3462_v27  ;;  %v15059_v15 = vcombine.low %v3450_v26, %v3462_v27  ;;  %v2935_v26 = vld [vmem:[%s16995_s26 + $0x5b0] sm:$0xff] }
 0x511   : > { %12350 = vmatpush1.bf16.msra.mxu1 %v15203_v3  ;;  %v3822_v3 = vld [vmem:[%s16995_s26 + $0x2168] sm:$0xff] }
 0x512   : > { %12351 = vmatprep.subr.bf16.mxu1 %v15180_v2  ;;  %v3426_v2 = vld [vmem:[%s16995_s26 + $0x1508] sm:$0xff]  ;;  %v15420_v42 = vcombine.high %v3810_v1, %v3822_v3  ;;  %v15419_v48 = vcombine.low %v3810_v1, %v3822_v3 }
 0x513   : > { %12309 = vmatpush1.bf16.msra.mxu0 %v14819_v41  ;;  %v3438_v41 = vld [vmem:[%s16995_s26 + $0x1568] sm:$0xff] }
 0x514   : > { %12310 = vmatprep.subr.bf16.mxu0 %v14796_v43  ;;  %v3786_v43 = vld [vmem:[%s16995_s26 + $0x2048] sm:$0xff]  ;;  %v15036_v45 = vcombine.high %v3426_v2, %v3438_v41  ;;  %v15035_v55 = vcombine.low %v3426_v2, %v3438_v41  ;;  %v2899_v41 = vld [vmem:[%s16995_s26 + $0x490] sm:$0xff] }
 0x515   : > { %12352 = vmatpush1.bf16.msra.mxu1 %v15179_v44  ;;  %v3798_v44 = vld [vmem:[%s16995_s26 + $0x20a8] sm:$0xff] }
 0x516   : > { %12353 = vmatprep.subr.bf16.mxu1 %v15156_v49  ;;  %v3402_v49 = vld [vmem:[%s16995_s26 + $0x1448] sm:$0xff]  ;;  %v15396_v54 = vcombine.high %v3786_v43, %v3798_v44  ;;  %v15395_v35 = vcombine.low %v3786_v43, %v3798_v44 }
 0x517   : > { %12311 = vmatpush1.bf16.msra.mxu0 %v14795_v52  ;;  %v3414_v52 = vld [vmem:[%s16995_s26 + $0x14a8] sm:$0xff] }
 0x518   : > { %12312 = vmatprep.subr.bf16.mxu0 %v14772_v56  ;;  %v3762_v56 = vld [vmem:[%s16995_s26 + $0x1f88] sm:$0xff]  ;;  %v15012_v59 = vcombine.high %v3402_v49, %v3414_v52  ;;  %v15011_v53 = vcombine.low %v3402_v49, %v3414_v52 }
 0x519   : > { %12354 = vmatpush1.bf16.msra.mxu1 %v15155_v58  ;;  %v3774_v58 = vld [vmem:[%s16995_s26 + $0x1fe8] sm:$0xff] }
 0x51a   : > { %12355 = vmatprep.subr.bf16.mxu1 %v15132_v4  ;;  %v3378_v4 = vld [vmem:[%s16995_s26 + $0x1388] sm:$0xff]  ;;  %v15372_v63 = vcombine.high %v3762_v56, %v3774_v58  ;;  %v15371_v13 = vcombine.low %v3762_v56, %v3774_v58  ;;  %v2875_v58 = vld [vmem:[%s16995_s26 + $0x3d0] sm:$0xff] }
 0x51b   : > { %12313 = vmatpush1.bf16.msra.mxu0 %v14771_v29  ;;  %v3390_v29 = vld [vmem:[%s16995_s26 + $0x13e8] sm:$0xff] }
 0x51c   : > { %12314 = vmatprep.subr.bf16.mxu0 %v14748_v7  ;;  %v3738_v7 = vld [vmem:[%s16995_s26 + $0x1ec8] sm:$0xff]  ;;  %v14988_v8 = vcombine.high %v3378_v4, %v3390_v29  ;;  %v14987_v19 = vcombine.low %v3378_v4, %v3390_v29 }
 0x51d   : > { %12356 = vmatpush1.bf16.msra.mxu1 %v15131_v18  ;;  %v3750_v18 = vld [vmem:[%s16995_s26 + $0x1f28] sm:$0xff] }
 0x51e   : > { %12357 = vmatprep.subr.bf16.mxu1 %v15492_v14  ;;  %v3354_v14 = vld [vmem:[%s16995_s26 + $0x12c8] sm:$0xff]  ;;  %v15348_v16 = vcombine.high %v3738_v7, %v3750_v18  ;;  %v15347_v6 = vcombine.low %v3738_v7, %v3750_v18 }
 0x51f   : > { %12315 = vmatpush1.bf16.msra.mxu0 %v14747_v31  ;;  %v3366_v31 = vld [vmem:[%s16995_s26 + $0x1328] sm:$0xff] }
 0x520   : > { %12316 = vmatprep.subr.bf16.mxu0 %v15108_v57  ;;  %v3714_v57 = vld [vmem:[%s16995_s26 + $0x1e08] sm:$0xff]  ;;  %v14964_v39 = vcombine.high %v3354_v14, %v3366_v31 }
 0x521   : > { %12358 = vmatpush2.bf16.msra.mxu1 %v15491_v21  ;;  %v3726_v21 = vld [vmem:[%s16995_s26 + $0x1e68] sm:$0xff] }
 0x522   : > { %12359 = vmatprep.subr.bf16.mxu1 %v15468_v47  ;;  %v3330_v47 = vld [vmem:[%s16995_s26 + $0x1208] sm:$0xff]  ;;  %v15324_v25 = vcombine.high %v3714_v57, %v3726_v21 }
 0x523   : > { %12317 = vmatpush2.bf16.msra.mxu0 %v15107_v24  ;;  %v3342_v24 = vld [vmem:[%s16995_s26 + $0x1268] sm:$0xff] }
 0x524   : > { %12318 = vmatprep.subr.bf16.mxu0 %v15084_v23  ;;  %v14963_v23 = vcombine.low %v3354_v14, %v3366_v31  ;;  %v14940_v27 = vcombine.high %v3330_v47, %v3342_v24  ;;  %v4074_v1 = vld [vmem:[%s16995_s26 + $0x2948] sm:$0xff]  ;;  %v14939_v2 = vcombine.low %v3330_v47, %v3342_v24  ;;  %v2839_v47 = vld [vmem:[%s16995_s26 + $0x2b0] sm:$0xff] }
 0x525   : > { %12360 = vmatpush2.bf16.msra.mxu1 %v15467_v46  ;;  %v2923_v46 = vld [vmem:[%s16995_s26 + $0x550] sm:$0xff]  ;;  %v4086_v3 = vld [vmem:[%s16995_s26 + $0x29a8] sm:$0xff] }
 0x526   : > { %12361 = vmatprep.subr.bf16.mxu1 %v15444_v36  ;;  %v4298_v36 = vrot.slane %v4289_v28, %v17004_v32  ;;  %v14533_v44 = vcombine.low %v2923_v46, %v2935_v26 }
 0x527   : > { %12319 = vmatpush2.bf16.msra.mxu0 %v15083_v37  ;;  %v15323_v37 = vcombine.low %v3714_v57, %v3726_v21  ;;  %v4014_v57 = vld [vmem:[%s16995_s26 + $0x2768] sm:$0xff] }
 0x528   : > { %12320 = vmatprep.subr.bf16.mxu0 %v15060_v9  ;;  %v14534_v9 = vcombine.high %v2923_v46, %v2935_v26  ;;  %v12130_v43 = vadd.f32 %v17383_v61, %v4298_v36  ;;  %v2815_v36 = vld [vmem:[%s16995_s26 + $0x1f0] sm:$0xff] }
 0x529   : > { %12362 = vmatpush2.bf16.msra.mxu1 %v15443_v11  ;;  %v4302_v11 = vrot.slane %v4289_v28, %v17007_v34 }
 0x52a   : > { %12363 = vmatprep.subr.bf16.mxu1 %v15420_v42  ;;  %v2911_v42 = vld [vmem:[%s16995_s26 + $0x4f0] sm:$0xff] }
 0x52b   : > { %12321 = vmatpush2.bf16.msra.mxu0 %v15059_v15  ;;  %v15684_v15 = vcombine.high %v4074_v1, %v4086_v3  ;;  %v14510_v52 = vcombine.high %v2899_v41, %v2911_v42  ;;  %v14509_v29 = vcombine.low %v2899_v41, %v2911_v42  ;;  %v2779_v41 = vld [vmem:[%s16995_s26 + $0xd0] sm:$0xff] }
 0x52c   : > { %12322 = vmatprep.subr.bf16.mxu0 %v15036_v45  ;;  %v4050_v45 = vld [vmem:[%s16995_s26 + $0x2888] sm:$0xff]  ;;  %v2791_v42 = vld [vmem:[%s16995_s26 + $0x130] sm:$0xff] }
 0x52d   : > { %12364 = vmatpush2.bf16.msra.mxu1 %v15419_v48  ;;  %v4062_v48 = vld [vmem:[%s16995_s26 + $0x28e8] sm:$0xff] }
 0x52e   : > { %12365 = vmatprep.subr.bf16.mxu1 %v15396_v54  ;;  %v12132_v54 = vadd.f32 %v17390_v5, %v4302_v11  ;;  %v4026_v5 = vld [vmem:[%s16995_s26 + $0x27c8] sm:$0xff]  ;;  %v15659_v18 = vcombine.low %v4050_v45, %v4062_v48 }
 0x52f   : > { %12323 = vmatpush2.bf16.msra.mxu0 %v15035_v55  ;;  %v15683_v55 = vcombine.low %v4074_v1, %v4086_v3  ;;  %v3954_v3 = vld [vmem:[%s16995_s26 + $0x2588] sm:$0xff] }
 0x530   : > { %12324 = vmatprep.subr.bf16.mxu0 %v15012_v59  ;;  %v2887_v59 = vld [vmem:[%s16995_s26 + $0x430] sm:$0xff] }
 0x531   : > { %12366 = vmatpush2.bf16.msra.mxu1 %v15395_v35  ;;  %v15660_v35 = vcombine.high %v4050_v45, %v4062_v48  ;;  %v14486_v7 = vcombine.high %v2875_v58, %v2887_v59  ;;  %v3942_v45 = vld [vmem:[%s16995_s26 + $0x2528] sm:$0xff]  ;;  %v14390_v48 = vcombine.high %v2779_v41, %v2791_v42 }
 0x532   : > { %12367 = vmatprep.subr.bf16.mxu1 %v15372_v63  ;;  %v4038_v63 = vld [vmem:[%s16995_s26 + $0x2828] sm:$0xff] }
 0x533   : > { %12325 = vmatpush2.bf16.msra.mxu0 %v15011_v53  ;;  %v15636_v31 = vcombine.high %v4026_v5, %v4038_v63 }
 0x534   : > { %12326 = vmatprep.subr.bf16.mxu0 %v14988_v8  ;;  %v2851_v8 = vld [vmem:[%s16995_s26 + $0x310] sm:$0xff] }
 0x535   : > { %12368 = vmatpush2.bf16.msra.mxu1 %v15371_v13  ;;  %v2863_v13 = vld [vmem:[%s16995_s26 + $0x370] sm:$0xff] }
 0x536   : > { %12369 = vmatprep.subr.bf16.mxu1 %v15348_v16  ;;  %v14485_v16 = vcombine.low %v2875_v58, %v2887_v59  ;;  %v14462_v21 = vcombine.high %v2851_v8, %v2863_v13  ;;  %v14461_v28 = vcombine.low %v2851_v8, %v2863_v13  ;;  %v14389_v58 = vcombine.low %v2779_v41, %v2791_v42  ;;  %v3906_v59 = vld [vmem:[%s16995_s26 + $0x2408] sm:$0xff] }
 0x537   : > { %12327 = vmatpush2.bf16.msra.mxu0 %v14987_v19  ;;  %v4002_v19 = vld [vmem:[%s16995_s26 + $0x2708] sm:$0xff] }
 0x538   : > { %12328 = vmatprep.subr.bf16.mxu0 %v14964_v39  ;;  %v15635_v39 = vcombine.low %v4026_v5, %v4038_v63  ;;  %v15612_v24 = vcombine.high %v4002_v19, %v4014_v57  ;;  %v15611_v26 = vcombine.low %v4002_v19, %v4014_v57  ;;  %v3115_v5 = vld [vmem:[%s16995_s26 + $0xb50] sm:$0xff]  ;;  %v4278_v8 = vld [vmem:[%s16995_s26 + $0x2fa8] sm:$0xff] }
 0x539   : > { %12370 = vmatpush2.bf16.msra.mxu1 %v15347_v6  ;;  %v2827_v6 = vld [vmem:[%s16995_s26 + $0x250] sm:$0xff] }
 0x53a   : > { %12371 = vmatprep.subr.bf16.mxu1 %v15324_v25  ;;  %v3978_v25 = vld [vmem:[%s16995_s26 + $0x2648] sm:$0xff]  ;;  %v14438_v46 = vcombine.high %v2827_v6, %v2839_v47  ;;  %v14437_v1 = vcombine.low %v2827_v6, %v2839_v47  ;;  %v3127_v63 = vld [vmem:[%s16995_s26 + $0xbb0] sm:$0xff] }
 0x53b   : > { %12329 = vmatpush2.bf16.msra.mxu0 %v14963_v23  ;;  %v3990_v23 = vld [vmem:[%s16995_s26 + $0x26a8] sm:$0xff]  ;;  %v14726_v13 = vcombine.high %v3115_v5, %v3127_v63  ;;  %v14725_v57 = vcombine.low %v3115_v5, %v3127_v63 }
 0x53c   : > { %12330 = vmatprep.subr.bf16.mxu0 %v14940_v27  ;;  %v2803_v27 = vld [vmem:[%s16995_s26 + $0x190] sm:$0xff] }
 0x53d   : > { %12372 = vmatpush2.bf16.msra.mxu1 %v15323_v37  ;;  %v15588_v37 = vcombine.high %v3978_v25, %v3990_v23  ;;  %v14414_v11 = vcombine.high %v2803_v27, %v2815_v36 }
 0x53e   : > { %12423 = vmatprep.subr.bf16.mxu1 %v14534_v9  ;;  %v12170_v49 = vpop.f32.mrf.mxu0  ;;  %v3966_v9 = vld [vmem:[%s16995_s26 + $0x25e8] sm:$0xff] }
 0x53f   : > { %12331 = vmatpush2.bf16.msra.mxu0 %v14939_v2  ;;  %v17465_v56 = vadd.f32 %v12170_v49, %v12130_v43  ;;  %v15587_v2 = vcombine.low %v3978_v25, %v3990_v23  ;;  %v14413_v43 = vcombine.low %v2803_v27, %v2815_v36  ;;  %v15563_v49 = vcombine.low %v3954_v3, %v3966_v9 }
 0x540   : > { %12374 = vmatmul.mubr.bf16.vlgmr.msra.gmra.mxu1 %v17319_v12  ;;  %12382 = vmatprep.subr.bf16.mxu0 %v15684_v15  ;;  %v12172_v61 = vpop.f32.mrf.mxu0  ;;  %v15564_v15 = vcombine.high %v3954_v3, %v3966_v9 }
 0x541   : > { %12424 = vmatpush1.bf16.msra.mxu1 %v14533_v44  ;;  %12455 = vmatprep.mubr.bf16.mxu1 %v17160_v50  ;;  %v17471_v4 = vadd.f32 %v12172_v61, %v12132_v54  ;;  %v3930_v44 = vld [vmem:[%s16995_s26 + $0x24c8] sm:$0xff]  ;;  %v2767_v54 = vld [vmem:[%s16995_s26 + $0x70] sm:$0xff] }
 0x542   : > { %12333 = vmatmul.mubr.bf16.vlgmr.msra.gmra.mxu0 %v17246_v30  ;;  %12425 = vmatprep.subr.bf16.mxu1 %v14510_v52  ;;  %v12174_v53 = vpop.f32.mrf.mxu0  ;;  %v2755_v52 = vld [vmem:[%s16995_s26 + $0x10] sm:$0xff]  ;;  %v3918_v61 = vld [vmem:[%s16995_s26 + $0x2468] sm:$0xff] }
 0x543   : > { %12383 = vmatpush1.bf16.msra.mxu0 %v15683_v55  ;;  %12414 = vmatprep.mubr.bf16.mxu0 %v17376_v20  ;;  %v15540_v55 = vcombine.high %v3930_v44, %v3942_v45  ;;  %v15516_v53 = vcombine.high %v3906_v59, %v3918_v61 }
 0x544   : > { %12384 = vmatprep.subr.bf16.mxu0 %v15660_v35  ;;  %v12175_v14 = vpop.f32.mrf.mxu0  ;;  %v14366_v35 = vcombine.high %v2755_v52, %v2767_v54 }
 0x545   : > { %12426 = vmatpush1.bf16.msra.mxu1 %v14509_v29  ;;  %v15539_v29 = vcombine.low %v3930_v44, %v3942_v45  ;;  %v15515_v14 = vcombine.low %v3906_v59, %v3918_v61 }
 0x546   : > { %12427 = vmatprep.subr.bf16.mxu1 %v14486_v7  ;;  %v14365_v7 = vcombine.low %v2755_v52, %v2767_v54 }
 0x547   : > { %12385 = vmatpush1.bf16.msra.mxu0 %v15659_v18  ;;  %v4266_v18 = vld [vmem:[%s16995_s26 + $0x2f48] sm:$0xff] }
 0x548   : > { %12386 = vmatprep.subr.bf16.mxu0 %v15636_v31  ;;  %v3091_v31 = vld [vmem:[%s16995_s26 + $0xa90] sm:$0xff]  ;;  %v15876_v19 = vcombine.high %v4266_v18, %v4278_v8  ;;  %v15875_v47 = vcombine.low %v4266_v18, %v4278_v8 }
 0x549   : > { %12428 = vmatpush1.bf16.msra.mxu1 %v14485_v16  ;;  %v3103_v16 = vld [vmem:[%s16995_s26 + $0xaf0] sm:$0xff] }
 0x54a   : > { %12429 = vmatprep.subr.bf16.mxu1 %v14462_v21  ;;  %v4242_v21 = vld [vmem:[%s16995_s26 + $0x2e88] sm:$0xff]  ;;  %v14702_v6 = vcombine.high %v3091_v31, %v3103_v16  ;;  %v14701_v23 = vcombine.low %v3091_v31, %v3103_v16 }
 0x54b   : > { %12387 = vmatpush1.bf16.msra.mxu0 %v15635_v39  ;;  %v4254_v39 = vld [vmem:[%s16995_s26 + $0x2ee8] sm:$0xff] }
 0x54c   : > { %12388 = vmatprep.subr.bf16.mxu0 %v15612_v24  ;;  %v3067_v24 = vld [vmem:[%s16995_s26 + $0x9d0] sm:$0xff]  ;;  %v15852_v25 = vcombine.high %v4242_v21, %v4254_v39  ;;  %v15851_v36 = vcombine.low %v4242_v21, %v4254_v39 }
 0x54d   : > { %12430 = vmatpush1.bf16.msra.mxu1 %v14461_v28  ;;  %v3079_v28 = vld [vmem:[%s16995_s26 + $0xa30] sm:$0xff] }
 0x54e   : > { %12431 = vmatprep.subr.bf16.mxu1 %v14438_v46  ;;  %v4218_v46 = vld [vmem:[%s16995_s26 + $0x2dc8] sm:$0xff]  ;;  %v14678_v27 = vcombine.high %v3067_v24, %v3079_v28  ;;  %v14677_v9 = vcombine.low %v3067_v24, %v3079_v28 }
 0x54f   : > { %12389 = vmatpush1.bf16.msra.mxu0 %v15611_v26  ;;  %v4230_v26 = vld [vmem:[%s16995_s26 + $0x2e28] sm:$0xff] }
 0x550   : > { %12390 = vmatprep.subr.bf16.mxu0 %v15588_v37  ;;  %v3043_v37 = vld [vmem:[%s16995_s26 + $0x910] sm:$0xff]  ;;  %v15828_v3 = vcombine.high %v4218_v46, %v4230_v26  ;;  %v15827_v42 = vcombine.low %v4218_v46, %v4230_v26 }
 0x551   : > { %12432 = vmatpush1.bf16.msra.mxu1 %v14437_v1  ;;  %v3055_v1 = vld [vmem:[%s16995_s26 + $0x970] sm:$0xff] }
 0x552   : > { %12433 = vmatprep.subr.bf16.mxu1 %v14414_v11  ;;  %v4194_v11 = vld [vmem:[%s16995_s26 + $0x2d08] sm:$0xff]  ;;  %v14654_v41 = vcombine.high %v3043_v37, %v3055_v1  ;;  %v14653_v45 = vcombine.low %v3043_v37, %v3055_v1 }
 0x553   : > { %12391 = vmatpush1.bf16.msra.mxu0 %v15587_v2  ;;  %v4206_v2 = vld [vmem:[%s16995_s26 + $0x2d68] sm:$0xff] }
 0x554   : > { %12392 = vmatprep.subr.bf16.mxu0 %v15564_v15  ;;  %v3019_v15 = vld [vmem:[%s16995_s26 + $0x850] sm:$0xff]  ;;  %v15804_v44 = vcombine.high %v4194_v11, %v4206_v2  ;;  %v15803_v54 = vcombine.low %v4194_v11, %v4206_v2 }
 0x555   : > { %12434 = vmatpush1.bf16.msra.mxu1 %v14413_v43  ;;  %v3031_v43 = vld [vmem:[%s16995_s26 + $0x8b0] sm:$0xff] }
 0x556   : > { %12435 = vmatprep.subr.bf16.mxu1 %v14390_v48  ;;  %v4170_v48 = vld [vmem:[%s16995_s26 + $0x2c48] sm:$0xff]  ;;  %v14630_v52 = vcombine.high %v3019_v15, %v3031_v43  ;;  %v14629_v61 = vcombine.low %v3019_v15, %v3031_v43 }
 0x557   : > { %12393 = vmatpush1.bf16.msra.mxu0 %v15563_v49  ;;  %v4182_v49 = vld [vmem:[%s16995_s26 + $0x2ca8] sm:$0xff] }
 0x558   : > { %12394 = vmatprep.subr.bf16.mxu0 %v15540_v55  ;;  %v2995_v55 = vld [vmem:[%s16995_s26 + $0x790] sm:$0xff]  ;;  %v15780_v59 = vcombine.high %v4170_v48, %v4182_v49  ;;  %v15779_v63 = vcombine.low %v4170_v48, %v4182_v49 }
 0x559   : > { %12436 = vmatpush1.bf16.msra.mxu1 %v14389_v58  ;;  %v3007_v58 = vld [vmem:[%s16995_s26 + $0x7f0] sm:$0xff] }
 0x55a   : > { %12437 = vmatprep.subr.bf16.mxu1 %v14366_v35  ;;  %v4146_v35 = vld [vmem:[%s16995_s26 + $0x2b88] sm:$0xff]  ;;  %v14606_v5 = vcombine.high %v2995_v55, %v3007_v58  ;;  %v14605_v8 = vcombine.low %v2995_v55, %v3007_v58  ;;  %v3259_v55 = vld [vmem:[%s16995_s26 + $0xfd0] sm:$0xff] }
 0x55b   : > { %12395 = vmatpush1.bf16.msra.mxu0 %v15539_v29  ;;  %v4158_v29 = vld [vmem:[%s16995_s26 + $0x2be8] sm:$0xff]  ;;  %v3271_v58 = vld [vmem:[%s16995_s26 + $0x1030] sm:$0xff] }
 0x55c   : > { %12396 = vmatprep.subr.bf16.mxu0 %v15516_v53  ;;  %v2971_v53 = vld [vmem:[%s16995_s26 + $0x6d0] sm:$0xff]  ;;  %v15756_v18 = vcombine.high %v4146_v35, %v4158_v29  ;;  %v15755_v16 = vcombine.low %v4146_v35, %v4158_v29 }
 0x55d   : > { %12438 = vmatpush1.bf16.msra.mxu1 %v14365_v7  ;;  %v2983_v7 = vld [vmem:[%s16995_s26 + $0x730] sm:$0xff] }
 0x55e   : > { %12439 = vmatprep.subr.bf16.mxu1 %v14726_v13  ;;  %v4122_v13 = vld [vmem:[%s16995_s26 + $0x2ac8] sm:$0xff]  ;;  %v14582_v31 = vcombine.high %v2971_v53, %v2983_v7  ;;  %v14581_v39 = vcombine.low %v2971_v53, %v2983_v7  ;;  %v3619_v29 = vld [vmem:[%s16995_s26 + $0x1b10] sm:$0xff]  ;;  %v14870_v53 = vcombine.high %v3259_v55, %v3271_v58 }
 0x55f   : > { %12397 = vmatpush1.bf16.msra.mxu0 %v15515_v14  ;;  %v4134_v14 = vld [vmem:[%s16995_s26 + $0x2b28] sm:$0xff] }
 0x560   : > { %12398 = vmatprep.subr.bf16.mxu0 %v15876_v19  ;;  %v2947_v19 = vld [vmem:[%s16995_s26 + $0x610] sm:$0xff]  ;;  %v15732_v21 = vcombine.high %v4122_v13, %v4134_v14  ;;  %v15731_v28 = vcombine.low %v4122_v13, %v4134_v14 }
 0x561   : > { %12440 = vmatpush2.bf16.msra.mxu1 %v14725_v57  ;;  %v2959_v57 = vld [vmem:[%s16995_s26 + $0x670] sm:$0xff] }
 0x562   : > { %12441 = vmatprep.subr.bf16.mxu1 %v14702_v6  ;;  %v4098_v6 = vld [vmem:[%s16995_s26 + $0x2a08] sm:$0xff]  ;;  %v14558_v24 = vcombine.high %v2947_v19, %v2959_v57  ;;  %v14557_v26 = vcombine.low %v2947_v19, %v2959_v57 }
 0x563   : > { %12399 = vmatpush2.bf16.msra.mxu0 %v15875_v47  ;;  %v4110_v47 = vld [vmem:[%s16995_s26 + $0x2a68] sm:$0xff] }
 0x564   : > { %12400 = vmatprep.subr.bf16.mxu0 %v15852_v25  ;;  %v3691_v25 = vld [vmem:[%s16995_s26 + $0x1d50] sm:$0xff]  ;;  %v15708_v46 = vcombine.high %v4098_v6, %v4110_v47  ;;  %v15707_v1 = vcombine.low %v4098_v6, %v4110_v47 }
 0x565   : > { %12442 = vmatpush2.bf16.msra.mxu1 %v14701_v23  ;;  %v3703_v23 = vld [vmem:[%s16995_s26 + $0x1db0] sm:$0xff] }
 0x566   : > { %12443 = vmatprep.subr.bf16.mxu1 %v14678_v27  ;;  %v3307_v27 = vld [vmem:[%s16995_s26 + $0x1150] sm:$0xff]  ;;  %v15302_v37 = vcombine.high %v3691_v25, %v3703_v23  ;;  %v15301_v2 = vcombine.low %v3691_v25, %v3703_v23 }
 0x567   : > { %12401 = vmatpush2.bf16.msra.mxu0 %v15851_v36  ;;  %v3319_v36 = vld [vmem:[%s16995_s26 + $0x11b0] sm:$0xff] }
 0x568   : > { %12402 = vmatprep.subr.bf16.mxu0 %v15828_v3  ;;  %v3667_v3 = vld [vmem:[%s16995_s26 + $0x1c90] sm:$0xff]  ;;  %v14918_v11 = vcombine.high %v3307_v27, %v3319_v36  ;;  %v14917_v43 = vcombine.low %v3307_v27, %v3319_v36 }
 0x569   : > { %12444 = vmatpush2.bf16.msra.mxu1 %v14677_v9  ;;  %v3679_v9 = vld [vmem:[%s16995_s26 + $0x1cf0] sm:$0xff] }
 0x56a   : > { %12445 = vmatprep.subr.bf16.mxu1 %v14654_v41  ;;  %v3283_v41 = vld [vmem:[%s16995_s26 + $0x1090] sm:$0xff]  ;;  %v15278_v15 = vcombine.high %v3667_v3, %v3679_v9 }
 0x56b   : > { %12403 = vmatpush2.bf16.msra.mxu0 %v15827_v42  ;;  %v3295_v42 = vld [vmem:[%s16995_s26 + $0x10f0] sm:$0xff] }
 0x56c   : > { %12404 = vmatprep.subr.bf16.mxu0 %v15804_v44  ;;  %v3643_v44 = vld [vmem:[%s16995_s26 + $0x1bd0] sm:$0xff]  ;;  %v14894_v49 = vcombine.high %v3283_v41, %v3295_v42 }
 0x56d   : > { %12446 = vmatpush2.bf16.msra.mxu1 %v14653_v45  ;;  %v3655_v45 = vld [vmem:[%s16995_s26 + $0x1c30] sm:$0xff] }
 0x56e   : > { %12447 = vmatprep.subr.bf16.mxu1 %v14630_v52  ;;  %v15253_v7 = vcombine.low %v3643_v44, %v3655_v45 }
 0x56f   : > { %12405 = vmatpush2.bf16.msra.mxu0 %v15803_v54  ;;  %v15277_v54 = vcombine.low %v3667_v3, %v3679_v9 }
 0x570   : > { %12406 = vmatprep.subr.bf16.mxu0 %v15780_v59 }
 0x571   : > { %12448 = vmatpush2.bf16.msra.mxu1 %v14629_v61  ;;  %v15254_v61 = vcombine.high %v3643_v44, %v3655_v45 }
 0x572   : > { %12449 = vmatprep.subr.bf16.mxu1 %v14606_v5  ;;  %v3631_v5 = vld [vmem:[%s16995_s26 + $0x1b70] sm:$0xff] }
 0x573   : > { %12407 = vmatpush2.bf16.msra.mxu0 %v15779_v63  ;;  %v15230_v14 = vcombine.high %v3619_v29, %v3631_v5  ;;  %v15229_v57 = vcombine.low %v3619_v29, %v3631_v5  ;;  %v3499_v29 = vld [vmem:[%s16995_s26 + $0x1750] sm:$0xff] }
 0x574   : > { %12408 = vmatprep.subr.bf16.mxu0 %v15756_v18  ;;  %v3235_v18 = vld [vmem:[%s16995_s26 + $0xf10] sm:$0xff] }
 0x575   : > { %12450 = vmatpush2.bf16.msra.mxu1 %v14605_v8  ;;  %v3247_v8 = vld [vmem:[%s16995_s26 + $0xf70] sm:$0xff] }
 0x576   : > { %12451 = vmatprep.subr.bf16.mxu1 %v14582_v31  ;;  %v3595_v31 = vld [vmem:[%s16995_s26 + $0x1a50] sm:$0xff]  ;;  %v14846_v19 = vcombine.high %v3235_v18, %v3247_v8  ;;  %v14845_v47 = vcombine.low %v3235_v18, %v3247_v8 }
 0x577   : > { %12409 = vmatpush2.bf16.msra.mxu0 %v15755_v16  ;;  %v3607_v16 = vld [vmem:[%s16995_s26 + $0x1ab0] sm:$0xff] }
 0x578   : > { %12410 = vmatprep.subr.bf16.mxu0 %v15732_v21  ;;  %v3211_v21 = vld [vmem:[%s16995_s26 + $0xe50] sm:$0xff]  ;;  %v15206_v6 = vcombine.high %v3595_v31, %v3607_v16  ;;  %v15205_v23 = vcombine.low %v3595_v31, %v3607_v16 }
 0x579   : > { %12452 = vmatpush2.bf16.msra.mxu1 %v14581_v39  ;;  %v3223_v39 = vld [vmem:[%s16995_s26 + $0xeb0] sm:$0xff] }
 0x57a   : > { %12453 = vmatprep.subr.bf16.mxu1 %v14558_v24  ;;  %v3571_v24 = vld [vmem:[%s16995_s26 + $0x1990] sm:$0xff]  ;;  %v14822_v25 = vcombine.high %v3211_v21, %v3223_v39  ;;  %v14821_v36 = vcombine.low %v3211_v21, %v3223_v39 }
 0x57b   : > { %12411 = vmatpush2.bf16.msra.mxu0 %v15731_v28  ;;  %v3583_v28 = vld [vmem:[%s16995_s26 + $0x19f0] sm:$0xff] }
 0x57c   : > { %12412 = vmatprep.subr.bf16.mxu0 %v15708_v46  ;;  %v3187_v46 = vld [vmem:[%s16995_s26 + $0xd90] sm:$0xff]  ;;  %v15182_v27 = vcombine.high %v3571_v24, %v3583_v28  ;;  %v15181_v9 = vcombine.low %v3571_v24, %v3583_v28 }
 0x57d   : > { %12454 = vmatpush2.bf16.msra.mxu1 %v14557_v26  ;;  %v3199_v26 = vld [vmem:[%s16995_s26 + $0xdf0] sm:$0xff] }
 0x57e   : > { %12505 = vmatprep.subr.bf16.mxu1 %v15302_v37  ;;  %v3547_v37 = vld [vmem:[%s16995_s26 + $0x18d0] sm:$0xff]  ;;  %v14798_v3 = vcombine.high %v3187_v46, %v3199_v26 }
 0x57f   : > { %12413 = vmatpush2.bf16.msra.mxu0 %v15707_v1  ;;  %v3559_v1 = vld [vmem:[%s16995_s26 + $0x1930] sm:$0xff] }
 0x580   : > { %12456 = vmatmul.mubr.bf16.vlgmr.msra.gmra.mxu1 %v17165_v60  ;;  %12464 = vmatprep.subr.bf16.mxu0 %v14918_v11  ;;  %v12211_v48 = vpop.f32.mrf.mxu1  ;;  %v3163_v11 = vld [vmem:[%s16995_s26 + $0xcd0] sm:$0xff]  ;;  %v15157_v45 = vcombine.low %v3547_v37, %v3559_v1 }
 0x581   : > { %v17541_v52 = vadd.f32 %v12211_v48, %v17465_v56  ;;  %12506 = vmatpush1.bf16.msra.mxu1 %v15301_v2  ;;  %12537 = vmatprep.mubr.bf16.mxu1 %v17317_v10  ;;  %v14893_v56 = vcombine.low %v3283_v41, %v3295_v42  ;;  %v3175_v2 = vld [vmem:[%s16995_s26 + $0xd30] sm:$0xff]  ;;  %v15158_v41 = vcombine.high %v3547_v37, %v3559_v1 }
 0x582   : > { %12415 = vmatmul.mubr.bf16.vlgmr.msra.gmra.mxu0 %v17380_v33  ;;  %v12213_v59 = vpop.f32.mrf.mxu1  ;;  %12507 = vmatprep.subr.bf16.mxu1 %v15278_v15  ;;  %v14797_v42 = vcombine.low %v3187_v46, %v3199_v26  ;;  %v3523_v15 = vld [vmem:[%s16995_s26 + $0x1810] sm:$0xff]  ;;  %v14774_v44 = vcombine.high %v3163_v11, %v3175_v2 }
 0x583   : > { %12465 = vmatpush1.bf16.msra.mxu0 %v14917_v43  ;;  %12496 = vmatprep.mubr.bf16.mxu0 %v17242_v22  ;;  %v17549_v35 = vadd.f32 %v12213_v59, %v17471_v4  ;;  %v14869_v4 = vcombine.low %v3259_v55, %v3271_v58  ;;  %v3535_v43 = vld [vmem:[%s16995_s26 + $0x1870] sm:$0xff]  ;;  %v14773_v55 = vcombine.low %v3163_v11, %v3175_v2 }
 0x584   : > { %12466 = vmatprep.subr.bf16.mxu0 %v14894_v49  ;;  %v12215_v63 = vpop.f32.mrf.mxu1  ;;  %v3139_v48 = vld [vmem:[%s16995_s26 + $0xc10] sm:$0xff] }
 0x585   : > { %12508 = vmatpush1.bf16.msra.mxu1 %v15277_v54  ;;  %v3151_v49 = vld [vmem:[%s16995_s26 + $0xc70] sm:$0xff]  ;;  %v15134_v54 = vcombine.high %v3523_v15, %v3535_v43 }
 0x586   : > { %v12216_v13 = vpop.f32.mrf.mxu1  ;;  %12509 = vmatprep.subr.bf16.mxu1 %v15254_v61  ;;  %v3883_v58 = vld [vmem:[%s16995_s26 + $0x2350] sm:$0xff]  ;;  %v14750_v61 = vcombine.high %v3139_v48, %v3151_v49 }
 0x587   : > { %12467 = vmatpush1.bf16.msra.mxu0 %v14893_v56  ;;  %v3895_v59 = vld [vmem:[%s16995_s26 + $0x23b0] sm:$0xff]  ;;  %v15133_v56 = vcombine.low %v3523_v15, %v3535_v43 }
 0x588   : > { %12468 = vmatprep.subr.bf16.mxu0 %v14870_v53  ;;  %v3511_v5 = vld [vmem:[%s16995_s26 + $0x17b0] sm:$0xff]  ;;  %v15494_v63 = vcombine.high %v3883_v58, %v3895_v59  ;;  %v14749_v53 = vcombine.low %v3139_v48, %v3151_v49  ;;  %v15493_v13 = vcombine.low %v3883_v58, %v3895_v59 }
 0x589   : > { %12510 = vmatpush1.bf16.msra.mxu1 %v15253_v7  ;;  %v3859_v7 = vld [vmem:[%s16995_s26 + $0x2290] sm:$0xff]  ;;  %v15110_v8 = vcombine.high %v3499_v29, %v3511_v5  ;;  %v15109_v16 = vcombine.low %v3499_v29, %v3511_v5 }
 0x58a   : > { %12511 = vmatprep.subr.bf16.mxu1 %v15230_v14  ;;  %v3871_v18 = vld [vmem:[%s16995_s26 + $0x22f0] sm:$0xff] }
 0x58b   : > { %12469 = vmatpush1.bf16.msra.mxu0 %v14869_v4  ;;  %v3475_v14 = vld [vmem:[%s16995_s26 + $0x1690] sm:$0xff]  ;;  %v15470_v31 = vcombine.high %v3859_v7, %v3871_v18  ;;  %v15469_v39 = vcombine.low %v3859_v7, %v3871_v18 }
 0x58c   : > { %12470 = vmatprep.subr.bf16.mxu0 %v14846_v19  ;;  %v3487_v4 = vld [vmem:[%s16995_s26 + $0x16f0] sm:$0xff] }
 0x58d   : > { %12512 = vmatpush1.bf16.msra.mxu1 %v15229_v57  ;;  %v3835_v19 = vld [vmem:[%s16995_s26 + $0x21d0] sm:$0xff]  ;;  %v15086_v21 = vcombine.high %v3475_v14, %v3487_v4  ;;  %v15085_v28 = vcombine.low %v3475_v14, %v3487_v4 }
 0x58e   : > { %12513 = vmatprep.subr.bf16.mxu1 %v15206_v6  ;;  %v3847_v57 = vld [vmem:[%s16995_s26 + $0x2230] sm:$0xff] }
 0x58f   : > { %12471 = vmatpush1.bf16.msra.mxu0 %v14845_v47  ;;  %v3451_v6 = vld [vmem:[%s16995_s26 + $0x15d0] sm:$0xff]  ;;  %v15446_v24 = vcombine.high %v3835_v19, %v3847_v57  ;;  %v15445_v26 = vcombine.low %v3835_v19, %v3847_v57 }
 0x590   : > { %12472 = vmatprep.subr.bf16.mxu0 %v14822_v25  ;;  %v3463_v47 = vld [vmem:[%s16995_s26 + $0x1630] sm:$0xff] }
 0x591   : > { %12514 = vmatpush1.bf16.msra.mxu1 %v15205_v23  ;;  %v3811_v25 = vld [vmem:[%s16995_s26 + $0x2110] sm:$0xff]  ;;  %v15062_v46 = vcombine.high %v3451_v6, %v3463_v47  ;;  %v15061_v1 = vcombine.low %v3451_v6, %v3463_v47 }
 0x592   : > { %12515 = vmatprep.subr.bf16.mxu1 %v15182_v27  ;;  %v3823_v23 = vld [vmem:[%s16995_s26 + $0x2170] sm:$0xff] }
 0x593   : > { %12473 = vmatpush1.bf16.msra.mxu0 %v14821_v36  ;;  %v3427_v27 = vld [vmem:[%s16995_s26 + $0x1510] sm:$0xff]  ;;  %v15422_v37 = vcombine.high %v3811_v25, %v3823_v23  ;;  %v15421_v2 = vcombine.low %v3811_v25, %v3823_v23 }
 0x594   : > { %12474 = vmatprep.subr.bf16.mxu0 %v14798_v3  ;;  %v3439_v36 = vld [vmem:[%s16995_s26 + $0x1570] sm:$0xff] }
 0x595   : > { %12516 = vmatpush1.bf16.msra.mxu1 %v15181_v9  ;;  %v3787_v3 = vld [vmem:[%s16995_s26 + $0x2050] sm:$0xff]  ;;  %v15038_v11 = vcombine.high %v3427_v27, %v3439_v36  ;;  %v15037_v43 = vcombine.low %v3427_v27, %v3439_v36 }
 0x596   : > { %12517 = vmatprep.subr.bf16.mxu1 %v15158_v41  ;;  %v3799_v9 = vld [vmem:[%s16995_s26 + $0x20b0] sm:$0xff] }
 0x597   : > { %12475 = vmatpush1.bf16.msra.mxu0 %v14797_v42  ;;  %v3403_v41 = vld [vmem:[%s16995_s26 + $0x1450] sm:$0xff]  ;;  %v15398_v15 = vcombine.high %v3787_v3, %v3799_v9  ;;  %v15397_v49 = vcombine.low %v3787_v3, %v3799_v9 }
 0x598   : > { %12476 = vmatprep.subr.bf16.mxu0 %v14774_v44  ;;  %v3415_v42 = vld [vmem:[%s16995_s26 + $0x14b0] sm:$0xff] }
 0x599   : > { %12518 = vmatpush1.bf16.msra.mxu1 %v15157_v45  ;;  %v3763_v44 = vld [vmem:[%s16995_s26 + $0x1f90] sm:$0xff]  ;;  %v15014_v48 = vcombine.high %v3403_v41, %v3415_v42  ;;  %v15013_v59 = vcombine.low %v3403_v41, %v3415_v42 }
 0x59a   : > { %12519 = vmatprep.subr.bf16.mxu1 %v15134_v54  ;;  %v3775_v45 = vld [vmem:[%s16995_s26 + $0x1ff0] sm:$0xff] }
 0x59b   : > { %12477 = vmatpush1.bf16.msra.mxu0 %v14773_v55  ;;  %v3379_v54 = vld [vmem:[%s16995_s26 + $0x1390] sm:$0xff]  ;;  %v15374_v58 = vcombine.high %v3763_v44, %v3775_v45  ;;  %v15373_v5 = vcombine.low %v3763_v44, %v3775_v45 }
 0x59c   : > { %12478 = vmatprep.subr.bf16.mxu0 %v14750_v61  ;;  %v3391_v55 = vld [vmem:[%s16995_s26 + $0x13f0] sm:$0xff] }
 0x59d   : > { %12520 = vmatpush1.bf16.msra.mxu1 %v15133_v56  ;;  %v3739_v61 = vld [vmem:[%s16995_s26 + $0x1ed0] sm:$0xff]  ;;  %v14990_v29 = vcombine.high %v3379_v54, %v3391_v55  ;;  %v14989_v18 = vcombine.low %v3379_v54, %v3391_v55 }
 0x59e   : > { %12521 = vmatprep.subr.bf16.mxu1 %v15494_v63  ;;  %v3751_v56 = vld [vmem:[%s16995_s26 + $0x1f30] sm:$0xff] }
 0x59f   : > { %12479 = vmatpush1.bf16.msra.mxu0 %v14749_v53  ;;  %v3355_v63 = vld [vmem:[%s16995_s26 + $0x12d0] sm:$0xff]  ;;  %v15350_v7 = vcombine.high %v3739_v61, %v3751_v56  ;;  %v15349_v4 = vcombine.low %v3739_v61, %v3751_v56 }
 0x5a0   : > { %12480 = vmatprep.subr.bf16.mxu0 %v15110_v8  ;;  %v3367_v53 = vld [vmem:[%s16995_s26 + $0x1330] sm:$0xff] }
 0x5a1   : > { %12522 = vmatpush2.bf16.msra.mxu1 %v15493_v13  ;;  %v3715_v8 = vld [vmem:[%s16995_s26 + $0x1e10] sm:$0xff]  ;;  %v14966_v14 = vcombine.high %v3355_v63, %v3367_v53  ;;  %v14965_v57 = vcombine.low %v3355_v63, %v3367_v53 }
 0x5a2   : > { %12523 = vmatprep.subr.bf16.mxu1 %v15470_v31  ;;  %v3727_v13 = vld [vmem:[%s16995_s26 + $0x1e70] sm:$0xff] }
 0x5a3   : > { %12481 = vmatpush2.bf16.msra.mxu0 %v15109_v16  ;;  %v3331_v31 = vld [vmem:[%s16995_s26 + $0x1210] sm:$0xff]  ;;  %v15326_v19 = vcombine.high %v3715_v8, %v3727_v13  ;;  %v15325_v47 = vcombine.low %v3715_v8, %v3727_v13 }
 0x5a4   : > { %12482 = vmatprep.subr.bf16.mxu0 %v15086_v21  ;;  %v3343_v16 = vld [vmem:[%s16995_s26 + $0x1270] sm:$0xff]  ;;  %v2924_v21 = vld [vmem:[%s16995_s26 + $0x558] sm:$0xff] }
 0x5a5   : > { %12524 = vmatpush2.bf16.msra.mxu1 %v15469_v39  ;;  %v2936_v39 = vld [vmem:[%s16995_s26 + $0x5b8] sm:$0xff]  ;;  %v14942_v6 = vcombine.high %v3331_v31, %v3343_v16  ;;  %v14941_v23 = vcombine.low %v3331_v31, %v3343_v16  ;;  %v4039_v44 = vld [vmem:[%s16995_s26 + $0x2830] sm:$0xff] }
 0x5a6   : > { %12525 = vmatprep.subr.bf16.mxu1 %v15446_v24  ;;  %v4075_v24 = vld [vmem:[%s16995_s26 + $0x2950] sm:$0xff]  ;;  %v14536_v25 = vcombine.high %v2924_v21, %v2936_v39  ;;  %v14535_v36 = vcombine.low %v2924_v21, %v2936_v39 }
 0x5a7   : > { %12483 = vmatpush2.bf16.msra.mxu0 %v15085_v28  ;;  %v4087_v28 = vld [vmem:[%s16995_s26 + $0x29b0] sm:$0xff] }
 0x5a8   : > { %12484 = vmatprep.subr.bf16.mxu0 %v15062_v46  ;;  %v2900_v46 = vld [vmem:[%s16995_s26 + $0x498] sm:$0xff]  ;;  %v15686_v27 = vcombine.high %v4075_v24, %v4087_v28  ;;  %v15685_v9 = vcombine.low %v4075_v24, %v4087_v28  ;;  %v4003_v63 = vld [vmem:[%s16995_s26 + $0x2710] sm:$0xff] }
 0x5a9   : > { %12526 = vmatpush2.bf16.msra.mxu1 %v15445_v26  ;;  %v2912_v26 = vld [vmem:[%s16995_s26 + $0x4f8] sm:$0xff]  ;;  %v4015_v53 = vld [vmem:[%s16995_s26 + $0x2770] sm:$0xff] }
 0x5aa   : > { %12527 = vmatprep.subr.bf16.mxu1 %v15422_v37  ;;  %v4051_v37 = vld [vmem:[%s16995_s26 + $0x2890] sm:$0xff]  ;;  %v14512_v3 = vcombine.high %v2900_v46, %v2912_v26  ;;  %v15614_v31 = vcombine.high %v4003_v63, %v4015_v53  ;;  %v15613_v39 = vcombine.low %v4003_v63, %v4015_v53 }
 0x5ab   : > { %12485 = vmatpush2.bf16.msra.mxu0 %v15061_v1  ;;  %v4063_v1 = vld [vmem:[%s16995_s26 + $0x28f0] sm:$0xff] }
 0x5ac   : > { %12486 = vmatprep.subr.bf16.mxu0 %v15038_v11  ;;  %v2876_v11 = vld [vmem:[%s16995_s26 + $0x3d8] sm:$0xff]  ;;  %v15662_v42 = vcombine.high %v4051_v37, %v4063_v1  ;;  %v15661_v55 = vcombine.low %v4051_v37, %v4063_v1  ;;  %v4279_v63 = vld [vmem:[%s16995_s26 + $0x2fb0] sm:$0xff] }
 0x5ad   : > { %12528 = vmatpush2.bf16.msra.mxu1 %v15421_v2  ;;  %v2888_v2 = vld [vmem:[%s16995_s26 + $0x438] sm:$0xff] }
 0x5ae   : > { %12529 = vmatprep.subr.bf16.mxu1 %v15398_v15  ;;  %v14511_v15 = vcombine.low %v2900_v46, %v2912_v26 }
 0x5af   : > { %12487 = vmatpush2.bf16.msra.mxu0 %v15037_v43  ;;  %v4027_v43 = vld [vmem:[%s16995_s26 + $0x27d0] sm:$0xff] }
 0x5b0   : > { %12488 = vmatprep.subr.bf16.mxu0 %v15014_v48  ;;  %v15637_v13 = vcombine.low %v4027_v43, %v4039_v44 }
 0x5b1   : > { %12530 = vmatpush2.bf16.msra.mxu1 %v15397_v49  ;;  %v14488_v49 = vcombine.high %v2876_v11, %v2888_v2 }
 0x5b2   : > { %12531 = vmatprep.subr.bf16.mxu1 %v15374_v58  ;;  %v2852_v58 = vld [vmem:[%s16995_s26 + $0x318] sm:$0xff] }
 0x5b3   : > { %12489 = vmatpush2.bf16.msra.mxu0 %v15013_v59  ;;  %v2864_v59 = vld [vmem:[%s16995_s26 + $0x378] sm:$0xff] }
 0x5b4   : > { %12490 = vmatprep.subr.bf16.mxu0 %v14990_v29  ;;  %v15638_v29 = vcombine.high %v4027_v43, %v4039_v44  ;;  %v14464_v8 = vcombine.high %v2852_v58, %v2864_v59  ;;  %v14463_v16 = vcombine.low %v2852_v58, %v2864_v59  ;;  %v2768_v43 = vld [vmem:[%s16995_s26 + $0x78] sm:$0xff] }
 0x5b5   : > { %12532 = vmatpush2.bf16.msra.mxu1 %v15373_v5  ;;  %v14487_v5 = vcombine.low %v2876_v11, %v2888_v2 }
 0x5b6   : > { %12533 = vmatprep.subr.bf16.mxu1 %v15350_v7 }
 0x5b7   : > { %12491 = vmatpush2.bf16.msra.mxu0 %v14989_v18 }
 0x5b8   : > { %12492 = vmatprep.subr.bf16.mxu0 %v14966_v14  ;;  %v2828_v14 = vld [vmem:[%s16995_s26 + $0x258] sm:$0xff] }
 0x5b9   : > { %12534 = vmatpush2.bf16.msra.mxu1 %v15349_v4  ;;  %v2840_v4 = vld [vmem:[%s16995_s26 + $0x2b8] sm:$0xff] }
 0x5ba   : > { %12535 = vmatprep.subr.bf16.mxu1 %v15326_v19  ;;  %v3979_v19 = vld [vmem:[%s16995_s26 + $0x2650] sm:$0xff]  ;;  %v14440_v21 = vcombine.high %v2828_v14, %v2840_v4  ;;  %v14439_v28 = vcombine.low %v2828_v14, %v2840_v4 }
 0x5bb   : > { %12493 = vmatpush2.bf16.msra.mxu0 %v14965_v57  ;;  %v3991_v57 = vld [vmem:[%s16995_s26 + $0x26b0] sm:$0xff] }
 0x5bc   : > { %12494 = vmatprep.subr.bf16.mxu0 %v14942_v6  ;;  %v2804_v6 = vld [vmem:[%s16995_s26 + $0x198] sm:$0xff]  ;;  %v15590_v24 = vcombine.high %v3979_v19, %v3991_v57  ;;  %v15589_v26 = vcombine.low %v3979_v19, %v3991_v57  ;;  %v4243_v4 = vld [vmem:[%s16995_s26 + $0x2e90] sm:$0xff] }
 0x5bd   : > { %12536 = vmatpush2.bf16.msra.mxu1 %v15325_v47  ;;  %v2816_v47 = vld [vmem:[%s16995_s26 + $0x1f8] sm:$0xff] }
 0x5be   : > { %12587 = vmatprep.subr.bf16.mxu1 %v14536_v25  ;;  %v3955_v25 = vld [vmem:[%s16995_s26 + $0x2590] sm:$0xff]  ;;  %v14416_v46 = vcombine.high %v2804_v6, %v2816_v47  ;;  %v14415_v1 = vcombine.low %v2804_v6, %v2816_v47  ;;  %v3068_v19 = vld [vmem:[%s16995_s26 + $0x9d8] sm:$0xff] }
 0x5bf   : > { %12495 = vmatpush2.bf16.msra.mxu0 %v14941_v23  ;;  %v3967_v23 = vld [vmem:[%s16995_s26 + $0x25f0] sm:$0xff]  ;;  %v3080_v57 = vld [vmem:[%s16995_s26 + $0xa38] sm:$0xff] }
 0x5c0   : > { %v17613_v41 = vpop.f32.mrf.mxu1  ;;  %12538 = vmatmul.mubr.bf16.vlgmr.msra.gmra.mxu1 %v17319_v12  ;;  %12546 = vmatprep.subr.bf16.mxu0 %v15686_v27  ;;  %v2780_v27 = vld [vmem:[%s16995_s26 + $0xd8] sm:$0xff]  ;;  %v15566_v37 = vcombine.high %v3955_v25, %v3967_v23  ;;  %v4219_v6 = vld [vmem:[%s16995_s26 + $0x2dd0] sm:$0xff] }
 0x5c1   : > { %12588 = vmatpush1.bf16.msra.mxu1 %v14535_v36  ;;  %12619 = vmatprep.mubr.bf16.mxu1 %v17160_v50  ;;  %v2792_v36 = vld [vmem:[%s16995_s26 + $0x138] sm:$0xff]  ;;  %v4231_v47 = vld [vmem:[%s16995_s26 + $0x2e30] sm:$0xff] }
 0x5c2   : > { %12497 = vmatmul.mubr.bf16.vlgmr.msra.gmra.mxu0 %v17246_v30  ;;  %v12252_v45 = vpop.f32.mrf.mxu0  ;;  %v17621_v48 = vpop.f32.mrf.mxu1  ;;  %12589 = vmatprep.subr.bf16.mxu1 %v14512_v3  ;;  %v3931_v3 = vld [vmem:[%s16995_s26 + $0x24d0] sm:$0xff]  ;;  %v14392_v2 = vcombine.high %v2780_v27, %v2792_v36 }
 0x5c3   : > { %v12253_v54 = vadd.f32 %v12252_v45, %v17541_v52  ;;  %12547 = vmatpush1.bf16.msra.mxu0 %v15685_v9  ;;  %12578 = vmatprep.mubr.bf16.mxu0 %v17376_v20  ;;  %v3943_v9 = vld [vmem:[%s16995_s26 + $0x2530] sm:$0xff] }
 0x5c4   : > { %v12254_v61 = vpop.f32.mrf.mxu0  ;;  %v12297_v56 = vpop.f32.mrf.mxu1  ;;  %12548 = vmatprep.subr.bf16.mxu0 %v15662_v42  ;;  %v15565_v42 = vcombine.low %v3955_v25, %v3967_v23  ;;  %v15542_v45 = vcombine.high %v3931_v3, %v3943_v9  ;;  %v15541_v59 = vcombine.low %v3931_v3, %v3943_v9  ;;  %v3044_v25 = vld [vmem:[%s16995_s26 + $0x918] sm:$0xff] }
 0x5c5   : > { %16117 = vtanh.f32 %v12253_v54  ;;  %v12255_v52 = vadd.f32 %v12254_v61, %v17549_v35  ;;  %12590 = vmatpush1.bf16.msra.mxu1 %v14511_v15  ;;  %v2756_v15 = vld [vmem:[%s16995_s26 + $0x18] sm:$0xff]  ;;  %v3907_v54 = vld [vmem:[%s16995_s26 + $0x2410] sm:$0xff] }
 0x5c6   : > { %v12256_v7 = vpop.f32.mrf.mxu0  ;;  %v12298_v18 = vpop.f32.mrf.mxu1  ;;  %12591 = vmatprep.subr.bf16.mxu1 %v14488_v49  ;;  %v14391_v49 = vcombine.low %v2780_v27, %v2792_v36  ;;  %v14368_v58 = vcombine.high %v2756_v15, %v2768_v43  ;;  %v3116_v61 = vld [vmem:[%s16995_s26 + $0xb58] sm:$0xff]  ;;  %v4195_v27 = vld [vmem:[%s16995_s26 + $0x2d10] sm:$0xff] }
 0x5c7   : > { %16119 = vtanh.f32 %v12255_v52  ;;  %12549 = vmatpush1.bf16.msra.mxu0 %v15661_v55  ;;  %v3919_v55 = vld [vmem:[%s16995_s26 + $0x2470] sm:$0xff]  ;;  %v3128_v56 = vld [vmem:[%s16995_s26 + $0xbb8] sm:$0xff]  ;;  %v14367_v52 = vcombine.low %v2756_v15, %v2768_v43 }
 0x5c8   : > { %v12257_v35 = vpop.f32.mrf.mxu0  ;;  %12550 = vmatprep.subr.bf16.mxu0 %v15638_v29  ;;  %v15518_v29 = vcombine.high %v3907_v54, %v3919_v55  ;;  %v14728_v53 = vcombine.high %v3116_v61, %v3128_v56  ;;  %v15517_v7 = vcombine.low %v3907_v54, %v3919_v55  ;;  %v3092_v18 = vld [vmem:[%s16995_s26 + $0xa98] sm:$0xff]  ;;  %v14727_v14 = vcombine.low %v3116_v61, %v3128_v56  ;;  %v4207_v36 = vld [vmem:[%s16995_s26 + $0x2d70] sm:$0xff] }
 0x5c9   : > { %12592 = vmatpush1.bf16.msra.mxu1 %v14487_v5  ;;  %v4267_v5 = vld [vmem:[%s16995_s26 + $0x2f50] sm:$0xff]  ;;  %v3056_v23 = vld [vmem:[%s16995_s26 + $0x978] sm:$0xff] }
 0x5ca   : > { %12593 = vmatprep.subr.bf16.mxu1 %v14464_v8  ;;  %v3104_v8 = vld [vmem:[%s16995_s26 + $0xaf8] sm:$0xff]  ;;  %v4255_v35 = vld [vmem:[%s16995_s26 + $0x2ef0] sm:$0xff] }
 0x5cb   : > { %12551 = vmatpush1.bf16.msra.mxu0 %v15637_v13  ;;  %v15878_v13 = vcombine.high %v4267_v5, %v4279_v63  ;;  %v3020_v3 = vld [vmem:[%s16995_s26 + $0x858] sm:$0xff]  ;;  %v4183_v15 = vld [vmem:[%s16995_s26 + $0x2cb0] sm:$0xff] }
 0x5cc   : > { %12552 = vmatprep.subr.bf16.mxu0 %v15614_v31  ;;  %v14704_v31 = vcombine.high %v3092_v18, %v3104_v8  ;;  %v3032_v9 = vld [vmem:[%s16995_s26 + $0x8b8] sm:$0xff] }
 0x5cd   : > { %12594 = vmatpush1.bf16.msra.mxu1 %v14463_v16  ;;  %v15877_v16 = vcombine.low %v4267_v5, %v4279_v63  ;;  %v14632_v43 = vcombine.high %v3020_v3, %v3032_v9  ;;  %v14631_v55 = vcombine.low %v3020_v3, %v3032_v9  ;;  %v3284_v3 = vld [vmem:[%s16995_s26 + $0x1098] sm:$0xff] }
 0x5ce   : > { %12595 = vmatprep.subr.bf16.mxu1 %v14440_v21  ;;  %v15854_v21 = vcombine.high %v4243_v4, %v4255_v35  ;;  %v3296_v9 = vld [vmem:[%s16995_s26 + $0x10f8] sm:$0xff] }
 0x5cf   : > { %12553 = vmatpush1.bf16.msra.mxu0 %v15613_v39  ;;  %v14703_v39 = vcombine.low %v3092_v18, %v3104_v8 }
 0x5d0   : > { %12554 = vmatprep.subr.bf16.mxu0 %v15590_v24  ;;  %v14680_v24 = vcombine.high %v3068_v19, %v3080_v57 }
 0x5d1   : > { %12596 = vmatpush1.bf16.msra.mxu1 %v14439_v28  ;;  %v15853_v28 = vcombine.low %v4243_v4, %v4255_v35 }
 0x5d2   : > { %v16118_v11 = vpop.eup %16117  ;;  %12597 = vmatprep.subr.bf16.mxu1 %v14416_v46  ;;  %v15830_v46 = vcombine.high %v4219_v6, %v4231_v47 }
 0x5d3   : > { %14087 = vst [vmem:[%s17653_s5] sm:$0xff] %v16118_v11  ;;  %12555 = vmatpush1.bf16.msra.mxu0 %v15589_v26  ;;  %v14679_v26 = vcombine.low %v3068_v19, %v3080_v57  ;;  %v15806_v11 = vcombine.high %v4195_v27, %v4207_v36 }
 0x5d4   : > { %v16120_v44 = vpop.eup %16119  ;;  %12556 = vmatprep.subr.bf16.mxu0 %v15566_v37  ;;  %v14656_v37 = vcombine.high %v3044_v25, %v3056_v23 }
 0x5d5   : > { %14088 = vst [vmem:[%s17653_s5 + $0x8] sm:$0xff] %v16120_v44  ;;  %12598 = vmatpush1.bf16.msra.mxu1 %v14415_v1  ;;  %v15829_v1 = vcombine.low %v4219_v6, %v4231_v47  ;;  %v15805_v44 = vcombine.low %v4195_v27, %v4207_v36  ;;  %v17702_v36 = vld [vmem:[%s17450_s1] sm:$0xff] }
 0x5d6   : > { %12599 = vmatprep.subr.bf16.mxu1 %v14392_v2  ;;  %v14655_v2 = vcombine.low %v3044_v25, %v3056_v23 }
 0x5d7   : > { %12557 = vmatpush1.bf16.msra.mxu0 %v15565_v42  ;;  %v4171_v42 = vld [vmem:[%s16995_s26 + $0x2c50] sm:$0xff] }
 0x5d8   : > { %12558 = vmatprep.subr.bf16.mxu0 %v15542_v45  ;;  %v2996_v45 = vld [vmem:[%s16995_s26 + $0x798] sm:$0xff]  ;;  %v15782_v54 = vcombine.high %v4171_v42, %v4183_v15  ;;  %v15781_v56 = vcombine.low %v4171_v42, %v4183_v15 }
 0x5d9   : > { %12600 = vmatpush1.bf16.msra.mxu1 %v14391_v49  ;;  %v3008_v49 = vld [vmem:[%s16995_s26 + $0x7f8] sm:$0xff] }
 0x5da   : > { %12601 = vmatprep.subr.bf16.mxu1 %v14368_v58  ;;  %v4147_v58 = vld [vmem:[%s16995_s26 + $0x2b90] sm:$0xff]  ;;  %v14608_v61 = vcombine.high %v2996_v45, %v3008_v49  ;;  %v14607_v63 = vcombine.low %v2996_v45, %v3008_v49  ;;  %v3644_v15 = vld [vmem:[%s16995_s26 + $0x1bd8] sm:$0xff]  ;;  %v14896_v45 = vcombine.high %v3284_v3, %v3296_v9 }
 0x5db   : > { %12559 = vmatpush1.bf16.msra.mxu0 %v15541_v59  ;;  %v4159_v59 = vld [vmem:[%s16995_s26 + $0x2bf0] sm:$0xff] }
 0x5dc   : > { %12560 = vmatprep.subr.bf16.mxu0 %v15518_v29  ;;  %v2972_v29 = vld [vmem:[%s16995_s26 + $0x6d8] sm:$0xff]  ;;  %v15758_v5 = vcombine.high %v4147_v58, %v4159_v59  ;;  %v15757_v8 = vcombine.low %v4147_v58, %v4159_v59 }
 0x5dd   : > { %12602 = vmatpush1.bf16.msra.mxu1 %v14367_v52  ;;  %v2984_v52 = vld [vmem:[%s16995_s26 + $0x738] sm:$0xff] }
 0x5de   : > { %12603 = vmatprep.subr.bf16.mxu1 %v14728_v53  ;;  %v4123_v53 = vld [vmem:[%s16995_s26 + $0x2ad0] sm:$0xff]  ;;  %v14584_v18 = vcombine.high %v2972_v29, %v2984_v52  ;;  %v14583_v35 = vcombine.low %v2972_v29, %v2984_v52  ;;  %v3272_v58 = vld [vmem:[%s16995_s26 + $0x1038] sm:$0xff] }
 0x5df   : > { %12561 = vmatpush1.bf16.msra.mxu0 %v15517_v7  ;;  %v4135_v7 = vld [vmem:[%s16995_s26 + $0x2b30] sm:$0xff] }
 0x5e0   : > { %12562 = vmatprep.subr.bf16.mxu0 %v15878_v13  ;;  %v2948_v13 = vld [vmem:[%s16995_s26 + $0x618] sm:$0xff]  ;;  %v15734_v4 = vcombine.high %v4123_v53, %v4135_v7  ;;  %v15733_v57 = vcombine.low %v4123_v53, %v4135_v7 }
 0x5e1   : > { %12604 = vmatpush2.bf16.msra.mxu1 %v14727_v14  ;;  %v2960_v14 = vld [vmem:[%s16995_s26 + $0x678] sm:$0xff] }
 0x5e2   : > { %12605 = vmatprep.subr.bf16.mxu1 %v14704_v31  ;;  %v4099_v31 = vld [vmem:[%s16995_s26 + $0x2a10] sm:$0xff]  ;;  %v14560_v19 = vcombine.high %v2948_v13, %v2960_v14  ;;  %v14559_v47 = vcombine.low %v2948_v13, %v2960_v14 }
 0x5e3   : > { %12563 = vmatpush2.bf16.msra.mxu0 %v15877_v16  ;;  %v4111_v16 = vld [vmem:[%s16995_s26 + $0x2a70] sm:$0xff] }
 0x5e4   : > { %12564 = vmatprep.subr.bf16.mxu0 %v15854_v21  ;;  %v3692_v21 = vld [vmem:[%s16995_s26 + $0x1d58] sm:$0xff]  ;;  %v15710_v6 = vcombine.high %v4099_v31, %v4111_v16  ;;  %v15709_v23 = vcombine.low %v4099_v31, %v4111_v16 }
 0x5e5   : > { %12606 = vmatpush2.bf16.msra.mxu1 %v14703_v39  ;;  %v3704_v39 = vld [vmem:[%s16995_s26 + $0x1db8] sm:$0xff] }
 0x5e6   : > { %12607 = vmatprep.subr.bf16.mxu1 %v14680_v24  ;;  %v3308_v24 = vld [vmem:[%s16995_s26 + $0x1158] sm:$0xff]  ;;  %v15304_v25 = vcombine.high %v3692_v21, %v3704_v39 }
 0x5e7   : > { %12565 = vmatpush2.bf16.msra.mxu0 %v15853_v28  ;;  %v3320_v28 = vld [vmem:[%s16995_s26 + $0x11b8] sm:$0xff] }
 0x5e8   : > { %12566 = vmatprep.subr.bf16.mxu0 %v15830_v46  ;;  %v3668_v46 = vld [vmem:[%s16995_s26 + $0x1c98] sm:$0xff]  ;;  %v14920_v27 = vcombine.high %v3308_v24, %v3320_v28  ;;  %v14919_v42 = vcombine.low %v3308_v24, %v3320_v28 }
 0x5e9   : > { %12608 = vmatpush2.bf16.msra.mxu1 %v14679_v26  ;;  %v3680_v26 = vld [vmem:[%s16995_s26 + $0x1cf8] sm:$0xff] }
 0x5ea   : > { %12609 = vmatprep.subr.bf16.mxu1 %v14656_v37  ;;  %v4306_v37 = vrot.slane %v17702_v36, %v17016_v38  ;;  %v3212_v28 = vld [vmem:[%s16995_s26 + $0xe58] sm:$0xff] }
 0x5eb   : > { %12567 = vmatpush2.bf16.msra.mxu0 %v15829_v1  ;;  %v15303_v1 = vcombine.low %v3692_v21, %v3704_v39  ;;  %v3596_v21 = vld [vmem:[%s16995_s26 + $0x1a58] sm:$0xff] }
 0x5ec   : > { %12568 = vmatprep.subr.bf16.mxu0 %v15806_v11  ;;  %v15280_v11 = vcombine.high %v3668_v46, %v3680_v26  ;;  %v12294_v49 = vadd.f32 %v17613_v41, %v4306_v37  ;;  %v14895_v41 = vcombine.low %v3284_v3, %v3296_v9  ;;  %v3608_v39 = vld [vmem:[%s16995_s26 + $0x1ab8] sm:$0xff] }
 0x5ed   : > { %12610 = vmatpush2.bf16.msra.mxu1 %v14655_v2  ;;  %v4310_v2 = vrot.slane %v17702_v36, %v17019_v40  ;;  %v3188_v3 = vld [vmem:[%s16995_s26 + $0xd98] sm:$0xff] }
 0x5ee   : > { %12611 = vmatprep.subr.bf16.mxu1 %v14632_v43  ;;  %v3656_v43 = vld [vmem:[%s16995_s26 + $0x1c38] sm:$0xff] }
 0x5ef   : > { %12569 = vmatpush2.bf16.msra.mxu0 %v15805_v44  ;;  %v12296_v29 = vadd.f32 %v17621_v48, %v4310_v2  ;;  %v15255_v14 = vcombine.low %v3644_v15, %v3656_v43  ;;  %v3236_v48 = vld [vmem:[%s16995_s26 + $0xf18] sm:$0xff] }
 0x5f0   : > { %12570 = vmatprep.subr.bf16.mxu0 %v15782_v54  ;;  %v15279_v54 = vcombine.low %v3668_v46, %v3680_v26  ;;  %v3572_v26 = vld [vmem:[%s16995_s26 + $0x1998] sm:$0xff] }
 0x5f1   : > { %12612 = vmatpush2.bf16.msra.mxu1 %v14631_v55  ;;  %v3260_v55 = vld [vmem:[%s16995_s26 + $0xfd8] sm:$0xff] }
 0x5f2   : > { %12613 = vmatprep.subr.bf16.mxu1 %v14608_v61  ;;  %v3200_v9 = vld [vmem:[%s16995_s26 + $0xdf8] sm:$0xff] }
 0x5f3   : > { %12571 = vmatpush2.bf16.msra.mxu0 %v15781_v56  ;;  %v15256_v56 = vcombine.high %v3644_v15, %v3656_v43  ;;  %v3560_v15 = vld [vmem:[%s16995_s26 + $0x1938] sm:$0xff]  ;;  %v14800_v43 = vcombine.high %v3188_v3, %v3200_v9 }
 0x5f4   : > { %12572 = vmatprep.subr.bf16.mxu0 %v15758_v5  ;;  %v3620_v5 = vld [vmem:[%s16995_s26 + $0x1b18] sm:$0xff] }
 0x5f5   : > { %12614 = vmatpush2.bf16.msra.mxu1 %v14607_v63  ;;  %v3632_v63 = vld [vmem:[%s16995_s26 + $0x1b78] sm:$0xff] }
 0x5f6   : > { %12615 = vmatprep.subr.bf16.mxu1 %v14584_v18  ;;  %v14872_v18 = vcombine.high %v3260_v55, %v3272_v58  ;;  %v15232_v16 = vcombine.high %v3620_v5, %v3632_v63  ;;  %v15231_v24 = vcombine.low %v3620_v5, %v3632_v63  ;;  %v3884_v63 = vld [vmem:[%s16995_s26 + $0x2358] sm:$0xff] }
 0x5f7   : > { %12573 = vmatpush2.bf16.msra.mxu0 %v15757_v8 }
 0x5f8   : > { %12574 = vmatprep.subr.bf16.mxu0 %v15734_v4  ;;  %v3248_v4 = vld [vmem:[%s16995_s26 + $0xf78] sm:$0xff] }
 0x5f9   : > { %12616 = vmatpush2.bf16.msra.mxu1 %v14583_v35  ;;  %v14847_v46 = vcombine.low %v3236_v48, %v3248_v4 }
 0x5fa   : > { %12617 = vmatprep.subr.bf16.mxu1 %v14560_v19 }
 0x5fb   : > { %12575 = vmatpush2.bf16.msra.mxu0 %v15733_v57  ;;  %v14871_v57 = vcombine.low %v3260_v55, %v3272_v58  ;;  %v14799_v55 = vcombine.low %v3188_v3, %v3200_v9  ;;  %v3524_v58 = vld [vmem:[%s16995_s26 + $0x1818] sm:$0xff] }
 0x5fc   : > { %12576 = vmatprep.subr.bf16.mxu0 %v15710_v6  ;;  %v3824_v3 = vld [vmem:[%s16995_s26 + $0x2178] sm:$0xff] }
 0x5fd   : > { %12618 = vmatpush2.bf16.msra.mxu1 %v14559_v47  ;;  %v14848_v47 = vcombine.high %v3236_v48, %v3248_v4 }
 0x5fe   : > { %12669 = vmatprep.subr.bf16.mxu1 %v15304_v25  ;;  %v3224_v25 = vld [vmem:[%s16995_s26 + $0xeb8] sm:$0xff] }
 0x5ff   : > { %12577 = vmatpush2.bf16.msra.mxu0 %v15709_v23  ;;  %v15208_v23 = vcombine.high %v3596_v21, %v3608_v39  ;;  %v14824_v37 = vcombine.high %v3212_v28, %v3224_v25  ;;  %v14823_v2 = vcombine.low %v3212_v28, %v3224_v25  ;;  %v3848_v28 = vld [vmem:[%s16995_s26 + $0x2238] sm:$0xff] }
 0x600   : > { %v12375_v44 = vpop.f32.mrf.mxu1  ;;  %12620 = vmatmul.mubr.bf16.vlgmr.msra.gmra.mxu1 %v17165_v60  ;;  %12628 = vmatprep.subr.bf16.mxu0 %v14920_v27  ;;  %v3584_v27 = vld [vmem:[%s16995_s26 + $0x19f8] sm:$0xff] }
 0x601   : > { %12670 = vmatpush1.bf16.msra.mxu1 %v15303_v1  ;;  %12701 = vmatprep.mubr.bf16.mxu1 %v17317_v10  ;;  %v15207_v1 = vcombine.low %v3596_v21, %v3608_v39  ;;  %v3476_v21 = vld [vmem:[%s16995_s26 + $0x1698] sm:$0xff] }
 0x602   : > { %v12334_v59 = vpop.f32.mrf.mxu0  ;;  %12579 = vmatmul.mubr.bf16.vlgmr.msra.gmra.mxu0 %v17380_v33  ;;  %v12377_v61 = vpop.f32.mrf.mxu1  ;;  %12671 = vmatprep.subr.bf16.mxu1 %v15280_v11  ;;  %v15184_v11 = vcombine.high %v3572_v26, %v3584_v27  ;;  %v3488_v39 = vld [vmem:[%s16995_s26 + $0x16f8] sm:$0xff] }
 0x603   : > { %v12335_v52 = vadd.f32 %v12334_v59, %v12294_v49  ;;  %12629 = vmatpush1.bf16.msra.mxu0 %v14919_v42  ;;  %12660 = vmatprep.mubr.bf16.mxu0 %v17242_v22  ;;  %v3548_v42 = vld [vmem:[%s16995_s26 + $0x18d8] sm:$0xff]  ;;  %v15088_v25 = vcombine.high %v3476_v21, %v3488_v39 }
 0x604   : > { %v12336_v53 = vpop.f32.mrf.mxu0  ;;  %v12379_v7 = vpop.f32.mrf.mxu1  ;;  %12630 = vmatprep.subr.bf16.mxu0 %v14896_v45  ;;  %v3164_v45 = vld [vmem:[%s16995_s26 + $0xcd8] sm:$0xff] }
 0x605   : > { %v17722_v8 = vadd.f32 %v12375_v44, %v12335_v52  ;;  %v12337_v13 = vadd.f32 %v12336_v53, %v12296_v29  ;;  %12672 = vmatpush1.bf16.msra.mxu1 %v15279_v54  ;;  %v15183_v44 = vcombine.low %v3572_v26, %v3584_v27  ;;  %v3176_v49 = vld [vmem:[%s16995_s26 + $0xd38] sm:$0xff]  ;;  %v15160_v54 = vcombine.high %v3548_v42, %v3560_v15 }
 0x606   : > { %v12338_v35 = vpop.f32.mrf.mxu0  ;;  %v12380_v31 = vpop.f32.mrf.mxu1  ;;  %12673 = vmatprep.subr.bf16.mxu1 %v15256_v56  ;;  %v3536_v59 = vld [vmem:[%s16995_s26 + $0x1878] sm:$0xff]  ;;  %v15159_v56 = vcombine.low %v3548_v42, %v3560_v15  ;;  %v14775_v5 = vcombine.low %v3164_v45, %v3176_v49 }
 0x607   : > { %v17726_v19 = vadd.f32 %v12377_v61, %v12337_v13  ;;  %12631 = vmatpush1.bf16.msra.mxu0 %v14895_v41  ;;  %v14776_v61 = vcombine.high %v3164_v45, %v3176_v49  ;;  %v3140_v29 = vld [vmem:[%s16995_s26 + $0xc18] sm:$0xff]  ;;  %v15136_v41 = vcombine.high %v3524_v58, %v3536_v59 }
 0x608   : > { %v12339_v6 = vpop.f32.mrf.mxu0  ;;  %12632 = vmatprep.subr.bf16.mxu0 %v14872_v18  ;;  %v3152_v52 = vld [vmem:[%s16995_s26 + $0xc78] sm:$0xff]  ;;  %v15135_v18 = vcombine.low %v3524_v58, %v3536_v59 }
 0x609   : > { %12674 = vmatpush1.bf16.msra.mxu1 %v15255_v14  ;;  %v3896_v53 = vld [vmem:[%s16995_s26 + $0x23b8] sm:$0xff]  ;;  %v14752_v7 = vcombine.high %v3140_v29, %v3152_v52  ;;  %v14751_v4 = vcombine.low %v3140_v29, %v3152_v52 }
 0x60a   : > { %12675 = vmatprep.subr.bf16.mxu1 %v15232_v16  ;;  %v3500_v13 = vld [vmem:[%s16995_s26 + $0x1758] sm:$0xff]  ;;  %v15496_v48 = vcombine.high %v3884_v63, %v3896_v53 }
 0x60b   : > { %12633 = vmatpush1.bf16.msra.mxu0 %v14871_v57  ;;  %v3512_v14 = vld [vmem:[%s16995_s26 + $0x17b8] sm:$0xff]  ;;  %v15495_v57 = vcombine.low %v3884_v63, %v3896_v53 }
 0x60c   : > { %12634 = vmatprep.subr.bf16.mxu0 %v14848_v47  ;;  %v3860_v35 = vld [vmem:[%s16995_s26 + $0x2298] sm:$0xff]  ;;  %v15112_v16 = vcombine.high %v3500_v13, %v3512_v14  ;;  %v15111_v47 = vcombine.low %v3500_v13, %v3512_v14 }
 0x60d   : > { %12676 = vmatpush1.bf16.msra.mxu1 %v15231_v24  ;;  %v3872_v31 = vld [vmem:[%s16995_s26 + $0x22f8] sm:$0xff] }
 0x60e   : > { %12677 = vmatprep.subr.bf16.mxu1 %v15208_v23  ;;  %v15472_v6 = vcombine.high %v3860_v35, %v3872_v31  ;;  %v3836_v24 = vld [vmem:[%s16995_s26 + $0x21d8] sm:$0xff]  ;;  %v15471_v23 = vcombine.low %v3860_v35, %v3872_v31 }
 0x60f   : > { %12635 = vmatpush1.bf16.msra.mxu0 %v14847_v46  ;;  %v3452_v46 = vld [vmem:[%s16995_s26 + $0x15d8] sm:$0xff]  ;;  %v15448_v27 = vcombine.high %v3836_v24, %v3848_v28 }
 0x610   : > { %12636 = vmatprep.subr.bf16.mxu0 %v14824_v37  ;;  %v3464_v26 = vld [vmem:[%s16995_s26 + $0x1638] sm:$0xff]  ;;  %v15087_v37 = vcombine.low %v3476_v21, %v3488_v39 }
 0x611   : > { %12678 = vmatpush1.bf16.msra.mxu1 %v15207_v1  ;;  %v3812_v1 = vld [vmem:[%s16995_s26 + $0x2118] sm:$0xff]  ;;  %v15064_v9 = vcombine.high %v3452_v46, %v3464_v26 }
 0x612   : > { %12679 = vmatprep.subr.bf16.mxu1 %v15184_v11  ;;  %v15447_v11 = vcombine.low %v3836_v24, %v3848_v28  ;;  %v3440_v42 = vld [vmem:[%s16995_s26 + $0x1578] sm:$0xff]  ;;  %v15424_v15 = vcombine.high %v3812_v1, %v3824_v3 }
 0x613   : > { %12637 = vmatpush1.bf16.msra.mxu0 %v14823_v2  ;;  %v3428_v2 = vld [vmem:[%s16995_s26 + $0x1518] sm:$0xff] }
 0x614   : > { %12638 = vmatprep.subr.bf16.mxu0 %v14800_v43  ;;  %v15063_v43 = vcombine.low %v3452_v46, %v3464_v26  ;;  %v3800_v45 = vld [vmem:[%s16995_s26 + $0x20b8] sm:$0xff]  ;;  %v15040_v49 = vcombine.high %v3428_v2, %v3440_v42  ;;  %v2937_v46 = vld [vmem:[%s16995_s26 + $0x5c0] sm:$0xff] }
 0x615   : > { %12680 = vmatpush1.bf16.msra.mxu1 %v15183_v44  ;;  %v3788_v44 = vld [vmem:[%s16995_s26 + $0x2058] sm:$0xff] }
 0x616   : > { %12681 = vmatprep.subr.bf16.mxu1 %v15160_v54  ;;  %v15423_v54 = vcombine.low %v3812_v1, %v3824_v3  ;;  %v3416_v58 = vld [vmem:[%s16995_s26 + $0x14b8] sm:$0xff]  ;;  %v15400_v59 = vcombine.high %v3788_v44, %v3800_v45 }
 0x617   : > { %12639 = vmatpush1.bf16.msra.mxu0 %v14799_v55  ;;  %v3404_v55 = vld [vmem:[%s16995_s26 + $0x1458] sm:$0xff] }
 0x618   : > { %12640 = vmatprep.subr.bf16.mxu0 %v14776_v61  ;;  %v15039_v61 = vcombine.low %v3428_v2, %v3440_v42  ;;  %v3776_v29 = vld [vmem:[%s16995_s26 + $0x1ff8] sm:$0xff]  ;;  %v15016_v52 = vcombine.high %v3404_v55, %v3416_v58  ;;  %v2913_v2 = vld [vmem:[%s16995_s26 + $0x500] sm:$0xff] }
 0x619   : > { %12682 = vmatpush1.bf16.msra.mxu1 %v15159_v56  ;;  %v3764_v56 = vld [vmem:[%s16995_s26 + $0x1f98] sm:$0xff] }
 0x61a   : > { %12683 = vmatprep.subr.bf16.mxu1 %v15136_v41  ;;  %v15399_v41 = vcombine.low %v3788_v44, %v3800_v45  ;;  %v3392_v63 = vld [vmem:[%s16995_s26 + $0x13f8] sm:$0xff]  ;;  %v15376_v53 = vcombine.high %v3764_v56, %v3776_v29 }
 0x61b   : > { %12641 = vmatpush1.bf16.msra.mxu0 %v14775_v5  ;;  %v3380_v5 = vld [vmem:[%s16995_s26 + $0x1398] sm:$0xff] }
 0x61c   : > { %12642 = vmatprep.subr.bf16.mxu0 %v14752_v7  ;;  %v15015_v7 = vcombine.low %v3404_v55, %v3416_v58  ;;  %v3752_v13 = vld [vmem:[%s16995_s26 + $0x1f38] sm:$0xff]  ;;  %v14992_v14 = vcombine.high %v3380_v5, %v3392_v63  ;;  %v2889_v55 = vld [vmem:[%s16995_s26 + $0x440] sm:$0xff] }
 0x61d   : > { %12684 = vmatpush1.bf16.msra.mxu1 %v15135_v18  ;;  %v3740_v18 = vld [vmem:[%s16995_s26 + $0x1ed8] sm:$0xff] }
 0x61e   : > { %12685 = vmatprep.subr.bf16.mxu1 %v15496_v48  ;;  %v15375_v48 = vcombine.low %v3764_v56, %v3776_v29  ;;  %v3368_v35 = vld [vmem:[%s16995_s26 + $0x1338] sm:$0xff]  ;;  %v15352_v31 = vcombine.high %v3740_v18, %v3752_v13 }
 0x61f   : > { %12643 = vmatpush1.bf16.msra.mxu0 %v14751_v4  ;;  %v3356_v4 = vld [vmem:[%s16995_s26 + $0x12d8] sm:$0xff] }
 0x620   : > { %12644 = vmatprep.subr.bf16.mxu0 %v15112_v16  ;;  %v14991_v16 = vcombine.low %v3380_v5, %v3392_v63  ;;  %v3728_v21 = vld [vmem:[%s16995_s26 + $0x1e78] sm:$0xff]  ;;  %v14968_v39 = vcombine.high %v3356_v4, %v3368_v35 }
 0x621   : > { %12686 = vmatpush2.bf16.msra.mxu1 %v15495_v57  ;;  %v3716_v57 = vld [vmem:[%s16995_s26 + $0x1e18] sm:$0xff] }
 0x622   : > { %12687 = vmatprep.subr.bf16.mxu1 %v15472_v6  ;;  %v15351_v6 = vcombine.low %v3740_v18, %v3752_v13  ;;  %v3344_v24 = vld [vmem:[%s16995_s26 + $0x1278] sm:$0xff]  ;;  %v15328_v28 = vcombine.high %v3716_v57, %v3728_v21  ;;  %v2865_v18 = vld [vmem:[%s16995_s26 + $0x380] sm:$0xff] }
 0x623   : > { %12645 = vmatpush2.bf16.msra.mxu0 %v15111_v47  ;;  %v3332_v47 = vld [vmem:[%s16995_s26 + $0x1218] sm:$0xff] }
 0x624   : > { %12646 = vmatprep.subr.bf16.mxu0 %v15088_v25  ;;  %v14967_v25 = vcombine.low %v3356_v4, %v3368_v35  ;;  %v14944_v26 = vcombine.high %v3332_v47, %v3344_v24  ;;  %v4088_v1 = vld [vmem:[%s16995_s26 + $0x29b8] sm:$0xff] }
 0x625   : > { %12688 = vmatpush2.bf16.msra.mxu1 %v15471_v23  ;;  %v2925_v23 = vld [vmem:[%s16995_s26 + $0x560] sm:$0xff]  ;;  %v4064_v44 = vld [vmem:[%s16995_s26 + $0x28f8] sm:$0xff] }
 0x626   : > { %12689 = vmatprep.subr.bf16.mxu1 %v15448_v27  ;;  %v15327_v27 = vcombine.low %v3716_v57, %v3728_v21  ;;  %v14538_v3 = vcombine.high %v2925_v23, %v2937_v46  ;;  %v4028_v56 = vld [vmem:[%s16995_s26 + $0x27d8] sm:$0xff] }
 0x627   : > { %12647 = vmatpush2.bf16.msra.mxu0 %v15087_v37  ;;  %v4076_v37 = vld [vmem:[%s16995_s26 + $0x2958] sm:$0xff] }
 0x628   : > { %12648 = vmatprep.subr.bf16.mxu0 %v15064_v9  ;;  %v14943_v9 = vcombine.low %v3332_v47, %v3344_v24  ;;  %v15688_v42 = vcombine.high %v4076_v37, %v4088_v1  ;;  %v4040_v29 = vld [vmem:[%s16995_s26 + $0x2838] sm:$0xff]  ;;  %v2841_v47 = vld [vmem:[%s16995_s26 + $0x2c0] sm:$0xff] }
 0x629   : > { %12690 = vmatpush2.bf16.msra.mxu1 %v15447_v11  ;;  %v2901_v11 = vld [vmem:[%s16995_s26 + $0x4a0] sm:$0xff] }
 0x62a   : > { %12691 = vmatprep.subr.bf16.mxu1 %v15424_v15  ;;  %v14537_v15 = vcombine.low %v2925_v23, %v2937_v46  ;;  %v14514_v45 = vcombine.high %v2901_v11, %v2913_v2  ;;  %v3992_v23 = vld [vmem:[%s16995_s26 + $0x26b8] sm:$0xff] }
 0x62b   : > { %12649 = vmatpush2.bf16.msra.mxu0 %v15063_v43  ;;  %v4052_v43 = vld [vmem:[%s16995_s26 + $0x2898] sm:$0xff] }
 0x62c   : > { %12650 = vmatprep.subr.bf16.mxu0 %v15040_v49  ;;  %v15687_v49 = vcombine.low %v4076_v37, %v4088_v1  ;;  %v2817_v37 = vld [vmem:[%s16995_s26 + $0x200] sm:$0xff] }
 0x62d   : > { %12692 = vmatpush2.bf16.msra.mxu1 %v15423_v54  ;;  %v2877_v54 = vld [vmem:[%s16995_s26 + $0x3e0] sm:$0xff] }
 0x62e   : > { %12693 = vmatprep.subr.bf16.mxu1 %v15400_v59  ;;  %v15664_v59 = vcombine.high %v4052_v43, %v4064_v44  ;;  %v14490_v5 = vcombine.high %v2877_v54, %v2889_v55  ;;  %v14489_v35 = vcombine.low %v2877_v54, %v2889_v55  ;;  %v3944_v54 = vld [vmem:[%s16995_s26 + $0x2538] sm:$0xff] }
 0x62f   : > { %12651 = vmatpush2.bf16.msra.mxu0 %v15039_v61  ;;  %v14513_v61 = vcombine.low %v2901_v11, %v2913_v2  ;;  %v3968_v11 = vld [vmem:[%s16995_s26 + $0x25f8] sm:$0xff] }
 0x630   : > { %12652 = vmatprep.subr.bf16.mxu0 %v15016_v52 }
 0x631   : > { %12694 = vmatpush2.bf16.msra.mxu1 %v15399_v41 }
 0x632   : > { %12695 = vmatprep.subr.bf16.mxu1 %v15376_v53  ;;  %v15663_v53 = vcombine.low %v4052_v43, %v4064_v44  ;;  %v2793_v43 = vld [vmem:[%s16995_s26 + $0x140] sm:$0xff] }
 0x633   : > { %12653 = vmatpush2.bf16.msra.mxu0 %v15015_v7  ;;  %v2853_v7 = vld [vmem:[%s16995_s26 + $0x320] sm:$0xff] }
 0x634   : > { %12654 = vmatprep.subr.bf16.mxu0 %v14992_v14  ;;  %v14466_v21 = vcombine.high %v2853_v7, %v2865_v18 }
 0x635   : > { %12696 = vmatpush2.bf16.msra.mxu1 %v15375_v48  ;;  %v15640_v48 = vcombine.high %v4028_v56, %v4040_v29 }
 0x636   : > { %12697 = vmatprep.subr.bf16.mxu1 %v15352_v31  ;;  %v4004_v31 = vld [vmem:[%s16995_s26 + $0x2718] sm:$0xff] }
 0x637   : > { %12655 = vmatpush2.bf16.msra.mxu0 %v14991_v16 }
 0x638   : > { %12656 = vmatprep.subr.bf16.mxu0 %v14968_v39  ;;  %v15639_v39 = vcombine.low %v4028_v56, %v4040_v29  ;;  %v2757_v56 = vld [vmem:[%s16995_s26 + $0x20] sm:$0xff] }
 0x639   : > { %12698 = vmatpush2.bf16.msra.mxu1 %v15351_v6  ;;  %v2829_v6 = vld [vmem:[%s16995_s26 + $0x260] sm:$0xff] }
 0x63a   : > { %12699 = vmatprep.subr.bf16.mxu1 %v15328_v28  ;;  %v14465_v28 = vcombine.low %v2853_v7, %v2865_v18  ;;  %v14442_v46 = vcombine.high %v2829_v6, %v2841_v47  ;;  %v2769_v29 = vld [vmem:[%s16995_s26 + $0x80] sm:$0xff]  ;;  %v3920_v7 = vld [vmem:[%s16995_s26 + $0x2478] sm:$0xff] }
 0x63b   : > { %12657 = vmatpush2.bf16.msra.mxu0 %v14967_v25  ;;  %v3980_v25 = vld [vmem:[%s16995_s26 + $0x2658] sm:$0xff]  ;;  %v14370_v18 = vcombine.high %v2757_v56, %v2769_v29 }
 0x63c   : > { %12658 = vmatprep.subr.bf16.mxu0 %v14944_v26  ;;  %v15592_v1 = vcombine.high %v3980_v25, %v3992_v23 }
 0x63d   : > { %12700 = vmatpush2.bf16.msra.mxu1 %v15327_v27  ;;  %v2805_v27 = vld [vmem:[%s16995_s26 + $0x1a0] sm:$0xff] }
 0x63e   : > { %12751 = vmatprep.subr.bf16.mxu1 %v14538_v3  ;;  %v14441_v3 = vcombine.low %v2829_v6, %v2841_v47  ;;  %v14418_v2 = vcombine.high %v2805_v27, %v2817_v37 }
 0x63f   : > { %12659 = vmatpush2.bf16.msra.mxu0 %v14943_v9  ;;  %v3956_v9 = vld [vmem:[%s16995_s26 + $0x2598] sm:$0xff] }
 0x640   : > { %v17786_v58 = vpop.f32.mrf.mxu1  ;;  %12702 = vmatmul.mubr.bf16.vlgmr.msra.gmra.mxu1 %v17319_v12  ;;  %12710 = vmatprep.subr.bf16.mxu0 %v15688_v42  ;;  %v15591_v42 = vcombine.low %v3980_v25, %v3992_v23  ;;  %v15568_v44 = vcombine.high %v3956_v9, %v3968_v11  ;;  %v3069_v23 = vld [vmem:[%s16995_s26 + $0x9e0] sm:$0xff] }
 0x641   : > { %12752 = vmatpush1.bf16.msra.mxu1 %v14537_v15  ;;  %12783 = vmatprep.mubr.bf16.mxu1 %v17160_v50  ;;  %v2781_v15 = vld [vmem:[%s16995_s26 + $0xe0] sm:$0xff] }
 0x642   : > { %v12416_v52 = vpop.f32.mrf.mxu0  ;;  %12661 = vmatmul.mubr.bf16.vlgmr.msra.gmra.mxu0 %v17246_v30  ;;  %v17793_v41 = vpop.f32.mrf.mxu1  ;;  %12753 = vmatprep.subr.bf16.mxu1 %v14514_v45  ;;  %v14417_v45 = vcombine.low %v2805_v27, %v2817_v37  ;;  %v4220_v37 = vld [vmem:[%s16995_s26 + $0x2dd8] sm:$0xff] }
 0x643   : > { %v12417_v63 = vadd.f32 %v12416_v52, %v17722_v8  ;;  %12711 = vmatpush1.bf16.msra.mxu0 %v15687_v49  ;;  %12742 = vmatprep.mubr.bf16.mxu0 %v17376_v20  ;;  %v4016_v8 = vld [vmem:[%s16995_s26 + $0x2778] sm:$0xff] }
 0x644   : > { %v12418_v13 = vpop.f32.mrf.mxu0  ;;  %v12461_v14 = vpop.f32.mrf.mxu1  ;;  %12712 = vmatprep.subr.bf16.mxu0 %v15664_v59  ;;  %v15615_v26 = vcombine.low %v4004_v31, %v4016_v8  ;;  %v3932_v49 = vld [vmem:[%s16995_s26 + $0x24d8] sm:$0xff]  ;;  %v14394_v59 = vcombine.high %v2781_v15, %v2793_v43 }
 0x645   : > { %16121 = vtanh.f32 %v12417_v63  ;;  %v12419_v4 = vadd.f32 %v12418_v13, %v17726_v19  ;;  %12754 = vmatpush1.bf16.msra.mxu1 %v14513_v61  ;;  %v15616_v19 = vcombine.high %v4004_v31, %v4016_v8  ;;  %v15567_v61 = vcombine.low %v3956_v9, %v3968_v11  ;;  %v3117_v14 = vld [vmem:[%s16995_s26 + $0xb60] sm:$0xff]  ;;  %v4268_v31 = vld [vmem:[%s16995_s26 + $0x2f58] sm:$0xff] }
 0x646   : > { %v12420_v16 = vpop.f32.mrf.mxu0  ;;  %v12462_v57 = vpop.f32.mrf.mxu1  ;;  %12755 = vmatprep.subr.bf16.mxu1 %v14490_v5  ;;  %v15544_v5 = vcombine.high %v3932_v49, %v3944_v54  ;;  %v14393_v63 = vcombine.low %v2781_v15, %v2793_v43  ;;  %v15543_v13 = vcombine.low %v3932_v49, %v3944_v54  ;;  %v4280_v8 = vld [vmem:[%s16995_s26 + $0x2fb8] sm:$0xff]  ;;  %v3045_v11 = vld [vmem:[%s16995_s26 + $0x920] sm:$0xff] }
 0x647   : > { %16123 = vtanh.f32 %v12419_v4  ;;  %12713 = vmatpush1.bf16.msra.mxu0 %v15663_v53  ;;  %v3908_v53 = vld [vmem:[%s16995_s26 + $0x2418] sm:$0xff]  ;;  %v15880_v6 = vcombine.high %v4268_v31, %v4280_v8  ;;  %v15879_v25 = vcombine.low %v4268_v31, %v4280_v8  ;;  %v3021_v54 = vld [vmem:[%s16995_s26 + $0x860] sm:$0xff] }
 0x648   : > { %v12421_v24 = vpop.f32.mrf.mxu0  ;;  %12714 = vmatprep.subr.bf16.mxu0 %v15640_v48  ;;  %v3129_v48 = vld [vmem:[%s16995_s26 + $0xbc0] sm:$0xff]  ;;  %v15520_v4 = vcombine.high %v3908_v53, %v3920_v7  ;;  %v15519_v57 = vcombine.low %v3908_v53, %v3920_v7  ;;  %v4196_v43 = vld [vmem:[%s16995_s26 + $0x2d18] sm:$0xff] }
 0x649   : > { %12756 = vmatpush1.bf16.msra.mxu1 %v14489_v35  ;;  %v14369_v35 = vcombine.low %v2757_v56, %v2769_v29  ;;  %v14730_v16 = vcombine.high %v3117_v14, %v3129_v48  ;;  %v14729_v47 = vcombine.low %v3117_v14, %v3129_v48  ;;  %v4244_v24 = vld [vmem:[%s16995_s26 + $0x2e98] sm:$0xff]  ;;  %v3009_v53 = vld [vmem:[%s16995_s26 + $0x800] sm:$0xff] }
 0x64a   : > { %12757 = vmatprep.subr.bf16.mxu1 %v14466_v21  ;;  %v3093_v21 = vld [vmem:[%s16995_s26 + $0xaa0] sm:$0xff]  ;;  %v4172_v56 = vld [vmem:[%s16995_s26 + $0x2c58] sm:$0xff] }
 0x64b   : > { %12715 = vmatpush1.bf16.msra.mxu0 %v15639_v39  ;;  %v3105_v39 = vld [vmem:[%s16995_s26 + $0xb00] sm:$0xff]  ;;  %v4184_v29 = vld [vmem:[%s16995_s26 + $0x2cb8] sm:$0xff] }
 0x64c   : > { %12716 = vmatprep.subr.bf16.mxu0 %v15616_v19  ;;  %v4256_v19 = vld [vmem:[%s16995_s26 + $0x2ef8] sm:$0xff]  ;;  %v14705_v27 = vcombine.low %v3093_v21, %v3105_v39  ;;  %v15784_v7 = vcombine.high %v4172_v56, %v4184_v29  ;;  %v2985_v31 = vld [vmem:[%s16995_s26 + $0x740] sm:$0xff] }
 0x64d   : > { %12758 = vmatpush1.bf16.msra.mxu1 %v14465_v28  ;;  %v14706_v28 = vcombine.high %v3093_v21, %v3105_v39  ;;  %v15855_v9 = vcombine.low %v4244_v24, %v4256_v19  ;;  %v4160_v14 = vld [vmem:[%s16995_s26 + $0x2bf8] sm:$0xff] }
 0x64e   : > { %12759 = vmatprep.subr.bf16.mxu1 %v14442_v46  ;;  %v3081_v46 = vld [vmem:[%s16995_s26 + $0xa40] sm:$0xff]  ;;  %v4136_v21 = vld [vmem:[%s16995_s26 + $0x2b38] sm:$0xff] }
 0x64f   : > { %12717 = vmatpush1.bf16.msra.mxu0 %v15615_v26  ;;  %v15856_v26 = vcombine.high %v4244_v24, %v4256_v19  ;;  %v14681_v15 = vcombine.low %v3069_v23, %v3081_v46  ;;  %v2961_v24 = vld [vmem:[%s16995_s26 + $0x680] sm:$0xff] }
 0x650   : > { %12718 = vmatprep.subr.bf16.mxu0 %v15592_v1  ;;  %v4232_v1 = vld [vmem:[%s16995_s26 + $0x2e38] sm:$0xff] }
 0x651   : > { %12760 = vmatpush1.bf16.msra.mxu1 %v14441_v3  ;;  %v14682_v3 = vcombine.high %v3069_v23, %v3081_v46  ;;  %v15831_v49 = vcombine.low %v4220_v37, %v4232_v1  ;;  %v4112_v23 = vld [vmem:[%s16995_s26 + $0x2a78] sm:$0xff] }
 0x652   : > { %v16122_v55 = vpop.eup %16121  ;;  %12761 = vmatprep.subr.bf16.mxu1 %v14418_v2  ;;  %v3057_v2 = vld [vmem:[%s16995_s26 + $0x980] sm:$0xff] }
 0x653   : > { %14089 = vst [vmem:[%s17653_s5 + $0x10] sm:$0xff] %v16122_v55  ;;  %12719 = vmatpush1.bf16.msra.mxu0 %v15591_v42  ;;  %v15832_v42 = vcombine.high %v4220_v37, %v4232_v1  ;;  %v3033_v55 = vld [vmem:[%s16995_s26 + $0x8c0] sm:$0xff] }
 0x654   : > { %v16124_v52 = vpop.eup %16123  ;;  %12720 = vmatprep.subr.bf16.mxu0 %v15568_v44  ;;  %v4208_v44 = vld [vmem:[%s16995_s26 + $0x2d78] sm:$0xff]  ;;  %v3705_v37 = vld [vmem:[%s16995_s26 + $0x1dc0] sm:$0xff] }
 0x655   : > { %14090 = vst [vmem:[%s17653_s5 + $0x18] sm:$0xff] %v16124_v52  ;;  %12762 = vmatpush1.bf16.msra.mxu1 %v14417_v45  ;;  %v14658_v45 = vcombine.high %v3045_v11, %v3057_v2  ;;  %v14634_v52 = vcombine.high %v3021_v54, %v3033_v55 }
 0x656   : > { %12763 = vmatprep.subr.bf16.mxu1 %v14394_v59  ;;  %v15808_v59 = vcombine.high %v4196_v43, %v4208_v44 }
 0x657   : > { %12721 = vmatpush1.bf16.msra.mxu0 %v15567_v61  ;;  %v14657_v61 = vcombine.low %v3045_v11, %v3057_v2  ;;  %v3321_v11 = vld [vmem:[%s16995_s26 + $0x11c0] sm:$0xff] }
 0x658   : > { %12722 = vmatprep.subr.bf16.mxu0 %v15544_v5  ;;  %v15807_v5 = vcombine.low %v4196_v43, %v4208_v44  ;;  %v3681_v43 = vld [vmem:[%s16995_s26 + $0x1d00] sm:$0xff] }
 0x659   : > { %12764 = vmatpush1.bf16.msra.mxu1 %v14393_v63  ;;  %v2997_v63 = vld [vmem:[%s16995_s26 + $0x7a0] sm:$0xff] }
 0x65a   : > { %12765 = vmatprep.subr.bf16.mxu1 %v14370_v18  ;;  %v14633_v18 = vcombine.low %v3021_v54, %v3033_v55  ;;  %v14610_v48 = vcombine.high %v2997_v63, %v3009_v53  ;;  %v3285_v54 = vld [vmem:[%s16995_s26 + $0x10a0] sm:$0xff] }
 0x65b   : > { %12723 = vmatpush1.bf16.msra.mxu0 %v15543_v13  ;;  %v4148_v13 = vld [vmem:[%s16995_s26 + $0x2b98] sm:$0xff]  ;;  %v3297_v55 = vld [vmem:[%s16995_s26 + $0x1100] sm:$0xff] }
 0x65c   : > { %12724 = vmatprep.subr.bf16.mxu0 %v15520_v4  ;;  %v15783_v4 = vcombine.low %v4172_v56, %v4184_v29  ;;  %v15760_v8 = vcombine.high %v4148_v13, %v4160_v14  ;;  %v3645_v29 = vld [vmem:[%s16995_s26 + $0x1be0] sm:$0xff] }
 0x65d   : > { %12766 = vmatpush1.bf16.msra.mxu1 %v14369_v35  ;;  %v2973_v35 = vld [vmem:[%s16995_s26 + $0x6e0] sm:$0xff] }
 0x65e   : > { %12767 = vmatprep.subr.bf16.mxu1 %v14730_v16  ;;  %v14609_v16 = vcombine.low %v2997_v63, %v3009_v53  ;;  %v14586_v39 = vcombine.high %v2973_v35, %v2985_v31  ;;  %v14898_v63 = vcombine.high %v3285_v54, %v3297_v55 }
 0x65f   : > { %12725 = vmatpush1.bf16.msra.mxu0 %v15519_v57  ;;  %v4124_v57 = vld [vmem:[%s16995_s26 + $0x2ad8] sm:$0xff] }
 0x660   : > { %12726 = vmatprep.subr.bf16.mxu0 %v15880_v6  ;;  %v15759_v6 = vcombine.low %v4148_v13, %v4160_v14  ;;  %v15736_v19 = vcombine.high %v4124_v57, %v4136_v21  ;;  %v3273_v13 = vld [vmem:[%s16995_s26 + $0x1040] sm:$0xff] }
 0x661   : > { %12768 = vmatpush2.bf16.msra.mxu1 %v14729_v47  ;;  %v2949_v47 = vld [vmem:[%s16995_s26 + $0x620] sm:$0xff] }
 0x662   : > { %12769 = vmatprep.subr.bf16.mxu1 %v14706_v28  ;;  %v14585_v28 = vcombine.low %v2973_v35, %v2985_v31  ;;  %v14562_v46 = vcombine.high %v2949_v47, %v2961_v24  ;;  %v3621_v31 = vld [vmem:[%s16995_s26 + $0x1b20] sm:$0xff] }
 0x663   : > { %12727 = vmatpush2.bf16.msra.mxu0 %v15879_v25  ;;  %v4100_v25 = vld [vmem:[%s16995_s26 + $0x2a18] sm:$0xff] }
 0x664   : > { %12728 = vmatprep.subr.bf16.mxu0 %v15856_v26  ;;  %v15735_v26 = vcombine.low %v4124_v57, %v4136_v21  ;;  %v15712_v1 = vcombine.high %v4100_v25, %v4112_v23 }
 0x665   : > { %12770 = vmatpush2.bf16.msra.mxu1 %v14705_v27  ;;  %v3693_v27 = vld [vmem:[%s16995_s26 + $0x1d60] sm:$0xff] }
 0x666   : > { %12771 = vmatprep.subr.bf16.mxu1 %v14682_v3  ;;  %v14561_v3 = vcombine.low %v2949_v47, %v2961_v24  ;;  %v15306_v2 = vcombine.high %v3693_v27, %v3705_v37  ;;  %v3249_v24 = vld [vmem:[%s16995_s26 + $0xf80] sm:$0xff] }
 0x667   : > { %12729 = vmatpush2.bf16.msra.mxu0 %v15855_v9  ;;  %v3309_v9 = vld [vmem:[%s16995_s26 + $0x1160] sm:$0xff] }
 0x668   : > { %12730 = vmatprep.subr.bf16.mxu0 %v15832_v42  ;;  %v15711_v42 = vcombine.low %v4100_v25, %v4112_v23  ;;  %v14922_v44 = vcombine.high %v3309_v9, %v3321_v11  ;;  %v14921_v56 = vcombine.low %v3309_v9, %v3321_v11  ;;  %v3213_v9 = vld [vmem:[%s16995_s26 + $0xe60] sm:$0xff] }
 0x669   : > { %12772 = vmatpush2.bf16.msra.mxu1 %v14681_v15  ;;  %v3669_v15 = vld [vmem:[%s16995_s26 + $0x1ca0] sm:$0xff] }
 0x66a   : > { %12773 = vmatprep.subr.bf16.mxu1 %v14658_v45  ;;  %v4314_v45 = vrot.slane %v17702_v36, %v17231_v51  ;;  %v3225_v11 = vld [vmem:[%s16995_s26 + $0xec0] sm:$0xff] }
 0x66b   : > { %12731 = vmatpush2.bf16.msra.mxu0 %v15831_v49  ;;  %v15305_v49 = vcombine.low %v3693_v27, %v3705_v37  ;;  %v3609_v27 = vld [vmem:[%s16995_s26 + $0x1ac0] sm:$0xff] }
 0x66c   : > { %12732 = vmatprep.subr.bf16.mxu0 %v15808_v59  ;;  %v15282_v59 = vcombine.high %v3669_v15, %v3681_v43  ;;  %v12458_v53 = vadd.f32 %v17786_v58, %v4314_v45  ;;  %v14897_v58 = vcombine.low %v3285_v54, %v3297_v55  ;;  %v3201_v54 = vld [vmem:[%s16995_s26 + $0xe00] sm:$0xff] }
 0x66d   : > { %12774 = vmatpush2.bf16.msra.mxu1 %v14657_v61  ;;  %v4318_v61 = vrot.slane %v17702_v36, %v17234_v17 }
 0x66e   : > { %12775 = vmatprep.subr.bf16.mxu1 %v14634_v52  ;;  %v3657_v52 = vld [vmem:[%s16995_s26 + $0x1c40] sm:$0xff] }
 0x66f   : > { %12733 = vmatpush2.bf16.msra.mxu0 %v15807_v5  ;;  %v15257_v47 = vcombine.low %v3645_v29, %v3657_v52 }
 0x670   : > { %12734 = vmatprep.subr.bf16.mxu0 %v15784_v7  ;;  %v15281_v7 = vcombine.low %v3669_v15, %v3681_v43  ;;  %v3573_v15 = vld [vmem:[%s16995_s26 + $0x19a0] sm:$0xff] }
 0x671   : > { %12776 = vmatpush2.bf16.msra.mxu1 %v14633_v18  ;;  %v3261_v18 = vld [vmem:[%s16995_s26 + $0xfe0] sm:$0xff] }
 0x672   : > { %12777 = vmatprep.subr.bf16.mxu1 %v14610_v48  ;;  %v15258_v48 = vcombine.high %v3645_v29, %v3657_v52  ;;  %v14874_v21 = vcombine.high %v3261_v18, %v3273_v13  ;;  %v3585_v43 = vld [vmem:[%s16995_s26 + $0x1a00] sm:$0xff] }
 0x673   : > { %12735 = vmatpush2.bf16.msra.mxu0 %v15783_v4  ;;  %v12460_v4 = vadd.f32 %v17793_v41, %v4318_v61  ;;  %v3237_v41 = vld [vmem:[%s16995_s26 + $0xf20] sm:$0xff]  ;;  %v15186_v55 = vcombine.high %v3573_v15, %v3585_v43  ;;  %v15185_v52 = vcombine.low %v3573_v15, %v3585_v43 }
 0x674   : > { %12736 = vmatprep.subr.bf16.mxu0 %v15760_v8  ;;  %v3633_v8 = vld [vmem:[%s16995_s26 + $0x1b80] sm:$0xff] }
 0x675   : > { %12778 = vmatpush2.bf16.msra.mxu1 %v14609_v16  ;;  %v15234_v25 = vcombine.high %v3621_v31, %v3633_v8  ;;  %v3549_v61 = vld [vmem:[%s16995_s26 + $0x18e0] sm:$0xff] }
 0x676   : > { %12779 = vmatprep.subr.bf16.mxu1 %v14586_v39 }
 0x677   : > { %12737 = vmatpush2.bf16.msra.mxu0 %v15759_v6 }
 0x678   : > { %12738 = vmatprep.subr.bf16.mxu0 %v15736_v19 }
 0x679   : > { %12780 = vmatpush2.bf16.msra.mxu1 %v14585_v28 }
 0x67a   : > { %12781 = vmatprep.subr.bf16.mxu1 %v14562_v46  ;;  %v14873_v46 = vcombine.low %v3261_v18, %v3273_v13  ;;  %v3525_v18 = vld [vmem:[%s16995_s26 + $0x1820] sm:$0xff] }
 0x67b   : > { %12739 = vmatpush2.bf16.msra.mxu0 %v15735_v26  ;;  %v3597_v26 = vld [vmem:[%s16995_s26 + $0x1a60] sm:$0xff] }
 0x67c   : > { %12740 = vmatprep.subr.bf16.mxu0 %v15712_v1  ;;  %v14850_v1 = vcombine.high %v3237_v41, %v3249_v24  ;;  %v15209_v45 = vcombine.low %v3597_v26, %v3609_v27  ;;  %v3537_v13 = vld [vmem:[%s16995_s26 + $0x1880] sm:$0xff] }
 0x67d   : > { %12782 = vmatpush2.bf16.msra.mxu1 %v14561_v3  ;;  %v15233_v3 = vcombine.low %v3621_v31, %v3633_v8  ;;  %v3885_v31 = vld [vmem:[%s16995_s26 + $0x2360] sm:$0xff] }
 0x67e   : > { %12833 = vmatprep.subr.bf16.mxu1 %v15306_v2  ;;  %v15210_v2 = vcombine.high %v3597_v26, %v3609_v27  ;;  %v3897_v8 = vld [vmem:[%s16995_s26 + $0x23c0] sm:$0xff] }
 0x67f   : > { %12741 = vmatpush2.bf16.msra.mxu0 %v15711_v42  ;;  %v14849_v42 = vcombine.low %v3237_v41, %v3249_v24  ;;  %v3861_v24 = vld [vmem:[%s16995_s26 + $0x22a0] sm:$0xff] }
 0x680   : > { %v12539_v5 = vpop.f32.mrf.mxu1  ;;  %12784 = vmatmul.mubr.bf16.vlgmr.msra.gmra.mxu1 %v17165_v60  ;;  %12792 = vmatprep.subr.bf16.mxu0 %v14922_v44  ;;  %v14826_v44 = vcombine.high %v3213_v9, %v3225_v11  ;;  %v3489_v26 = vld [vmem:[%s16995_s26 + $0x1700] sm:$0xff] }
 0x681   : > { %12834 = vmatpush1.bf16.msra.mxu1 %v15305_v49  ;;  %12865 = vmatprep.mubr.bf16.mxu1 %v17317_v10  ;;  %v3189_v49 = vld [vmem:[%s16995_s26 + $0xda0] sm:$0xff] }
 0x682   : > { %v12498_v36 = vpop.f32.mrf.mxu0  ;;  %12743 = vmatmul.mubr.bf16.vlgmr.msra.gmra.mxu0 %v17380_v33  ;;  %v12541_v14 = vpop.f32.mrf.mxu1  ;;  %12835 = vmatprep.subr.bf16.mxu1 %v15282_v59  ;;  %v14825_v59 = vcombine.low %v3213_v9, %v3225_v11  ;;  %v14802_v29 = vcombine.high %v3189_v49, %v3201_v54 }
 0x683   : > { %v12499_v35 = vadd.f32 %v12498_v36, %v12458_v53  ;;  %12793 = vmatpush1.bf16.msra.mxu0 %v14921_v56  ;;  %12824 = vmatprep.mubr.bf16.mxu0 %v17242_v22  ;;  %v3561_v56 = vld [vmem:[%s16995_s26 + $0x1940] sm:$0xff] }
 0x684   : > { %v12500_v16 = vpop.f32.mrf.mxu0  ;;  %v12543_v57 = vpop.f32.mrf.mxu1  ;;  %12794 = vmatprep.subr.bf16.mxu0 %v14898_v63  ;;  %v3177_v63 = vld [vmem:[%s16995_s26 + $0xd40] sm:$0xff]  ;;  %v15162_v53 = vcombine.high %v3549_v61, %v3561_v56 }
 0x685   : > { %v17876_v39 = vadd.f32 %v12539_v5, %v12499_v35  ;;  %v12501_v6 = vadd.f32 %v12500_v16, %v12460_v4  ;;  %12836 = vmatpush1.bf16.msra.mxu1 %v15281_v7  ;;  %v3165_v5 = vld [vmem:[%s16995_s26 + $0xce0] sm:$0xff]  ;;  %v14801_v7 = vcombine.low %v3189_v49, %v3201_v54  ;;  %v15138_v35 = vcombine.high %v3525_v18, %v3537_v13 }
 0x686   : > { %v12502_v19 = vpop.f32.mrf.mxu0  ;;  %v12544_v28 = vpop.f32.mrf.mxu1  ;;  %12837 = vmatprep.subr.bf16.mxu1 %v15258_v48  ;;  %v14778_v36 = vcombine.high %v3165_v5, %v3177_v63  ;;  %v3141_v48 = vld [vmem:[%s16995_s26 + $0xc20] sm:$0xff]  ;;  %v15137_v57 = vcombine.low %v3525_v18, %v3537_v13 }
 0x687   : > { %v17880_v23 = vadd.f32 %v12541_v14, %v12501_v6  ;;  %12795 = vmatpush1.bf16.msra.mxu0 %v14897_v58  ;;  %v15161_v14 = vcombine.low %v3549_v61, %v3561_v56  ;;  %v3153_v4 = vld [vmem:[%s16995_s26 + $0xc80] sm:$0xff]  ;;  %v14777_v58 = vcombine.low %v3165_v5, %v3177_v63 }
 0x688   : > { %v12503_v37 = vpop.f32.mrf.mxu0  ;;  %12796 = vmatprep.subr.bf16.mxu0 %v14874_v21  ;;  %v14754_v16 = vcombine.high %v3141_v48, %v3153_v4  ;;  %v3501_v21 = vld [vmem:[%s16995_s26 + $0x1760] sm:$0xff]  ;;  %v14753_v41 = vcombine.low %v3141_v48, %v3153_v4 }
 0x689   : > { %12838 = vmatpush1.bf16.msra.mxu1 %v15257_v47  ;;  %v3513_v6 = vld [vmem:[%s16995_s26 + $0x17c0] sm:$0xff]  ;;  %v15498_v47 = vcombine.high %v3885_v31, %v3897_v8 }
 0x68a   : > { %12839 = vmatprep.subr.bf16.mxu1 %v15234_v25  ;;  %v3873_v19 = vld [vmem:[%s16995_s26 + $0x2300] sm:$0xff]  ;;  %v15114_v28 = vcombine.high %v3501_v21, %v3513_v6  ;;  %v15497_v25 = vcombine.low %v3885_v31, %v3897_v8  ;;  %v15113_v37 = vcombine.low %v3501_v21, %v3513_v6 }
 0x68b   : > { %12797 = vmatpush1.bf16.msra.mxu0 %v14873_v46  ;;  %v3477_v46 = vld [vmem:[%s16995_s26 + $0x16a0] sm:$0xff]  ;;  %v15474_v27 = vcombine.high %v3861_v24, %v3873_v19  ;;  %v15473_v11 = vcombine.low %v3861_v24, %v3873_v19 }
 0x68c   : > { %12798 = vmatprep.subr.bf16.mxu0 %v14850_v1  ;;  %v3837_v1 = vld [vmem:[%s16995_s26 + $0x21e0] sm:$0xff]  ;;  %v15090_v9 = vcombine.high %v3477_v46, %v3489_v26  ;;  %v15089_v43 = vcombine.low %v3477_v46, %v3489_v26 }
 0x68d   : > { %12840 = vmatpush1.bf16.msra.mxu1 %v15233_v3  ;;  %v3849_v3 = vld [vmem:[%s16995_s26 + $0x2240] sm:$0xff] }
 0x68e   : > { %12841 = vmatprep.subr.bf16.mxu1 %v15210_v2  ;;  %v3453_v2 = vld [vmem:[%s16995_s26 + $0x15e0] sm:$0xff]  ;;  %v15450_v15 = vcombine.high %v3837_v1, %v3849_v3  ;;  %v15449_v54 = vcombine.low %v3837_v1, %v3849_v3 }
 0x68f   : > { %12799 = vmatpush1.bf16.msra.mxu0 %v14849_v42  ;;  %v3465_v42 = vld [vmem:[%s16995_s26 + $0x1640] sm:$0xff] }
 0x690   : > { %12800 = vmatprep.subr.bf16.mxu0 %v14826_v44  ;;  %v3813_v44 = vld [vmem:[%s16995_s26 + $0x2120] sm:$0xff]  ;;  %v15066_v49 = vcombine.high %v3453_v2, %v3465_v42  ;;  %v15065_v56 = vcombine.low %v3453_v2, %v3465_v42 }
 0x691   : > { %12842 = vmatpush1.bf16.msra.mxu1 %v15209_v45  ;;  %v3825_v45 = vld [vmem:[%s16995_s26 + $0x2180] sm:$0xff] }
 0x692   : > { %12843 = vmatprep.subr.bf16.mxu1 %v15186_v55  ;;  %v3429_v55 = vld [vmem:[%s16995_s26 + $0x1520] sm:$0xff]  ;;  %v15426_v61 = vcombine.high %v3813_v44, %v3825_v45  ;;  %v15425_v63 = vcombine.low %v3813_v44, %v3825_v45 }
 0x693   : > { %12801 = vmatpush1.bf16.msra.mxu0 %v14825_v59  ;;  %v3441_v59 = vld [vmem:[%s16995_s26 + $0x1580] sm:$0xff] }
 0x694   : > { %12802 = vmatprep.subr.bf16.mxu0 %v14802_v29  ;;  %v3789_v29 = vld [vmem:[%s16995_s26 + $0x2060] sm:$0xff]  ;;  %v15042_v5 = vcombine.high %v3429_v55, %v3441_v59  ;;  %v15041_v13 = vcombine.low %v3429_v55, %v3441_v59 }
 0x695   : > { %12844 = vmatpush1.bf16.msra.mxu1 %v15185_v52  ;;  %v3801_v52 = vld [vmem:[%s16995_s26 + $0x20c0] sm:$0xff] }
 0x696   : > { %12845 = vmatprep.subr.bf16.mxu1 %v15162_v53  ;;  %v3405_v53 = vld [vmem:[%s16995_s26 + $0x1460] sm:$0xff]  ;;  %v15402_v18 = vcombine.high %v3789_v29, %v3801_v52  ;;  %v15401_v4 = vcombine.low %v3789_v29, %v3801_v52 }
 0x697   : > { %12803 = vmatpush1.bf16.msra.mxu0 %v14801_v7  ;;  %v3417_v7 = vld [vmem:[%s16995_s26 + $0x14c0] sm:$0xff] }
 0x698   : > { %12804 = vmatprep.subr.bf16.mxu0 %v14778_v36  ;;  %v3765_v36 = vld [vmem:[%s16995_s26 + $0x1fa0] sm:$0xff]  ;;  %v15018_v48 = vcombine.high %v3405_v53, %v3417_v7  ;;  %v15017_v8 = vcombine.low %v3405_v53, %v3417_v7 }
 0x699   : > { %12846 = vmatpush1.bf16.msra.mxu1 %v15161_v14  ;;  %v3777_v14 = vld [vmem:[%s16995_s26 + $0x2000] sm:$0xff] }
 0x69a   : > { %12847 = vmatprep.subr.bf16.mxu1 %v15138_v35  ;;  %v3381_v35 = vld [vmem:[%s16995_s26 + $0x13a0] sm:$0xff]  ;;  %v15378_v31 = vcombine.high %v3765_v36, %v3777_v14  ;;  %v15377_v6 = vcombine.low %v3765_v36, %v3777_v14 }
 0x69b   : > { %12805 = vmatpush1.bf16.msra.mxu0 %v14777_v58  ;;  %v3393_v58 = vld [vmem:[%s16995_s26 + $0x1400] sm:$0xff] }
 0x69c   : > { %12806 = vmatprep.subr.bf16.mxu0 %v14754_v16  ;;  %v3741_v16 = vld [vmem:[%s16995_s26 + $0x1ee0] sm:$0xff]  ;;  %v14994_v21 = vcombine.high %v3381_v35, %v3393_v58  ;;  %v14993_v19 = vcombine.low %v3381_v35, %v3393_v58 }
 0x69d   : > { %12848 = vmatpush1.bf16.msra.mxu1 %v15137_v57  ;;  %v3753_v57 = vld [vmem:[%s16995_s26 + $0x1f40] sm:$0xff] }
 0x69e   : > { %12849 = vmatprep.subr.bf16.mxu1 %v15498_v47  ;;  %v3357_v47 = vld [vmem:[%s16995_s26 + $0x12e0] sm:$0xff]  ;;  %v15354_v24 = vcombine.high %v3741_v16, %v3753_v57  ;;  %v15353_v26 = vcombine.low %v3741_v16, %v3753_v57 }
 0x69f   : > { %12807 = vmatpush1.bf16.msra.mxu0 %v14753_v41  ;;  %v3369_v41 = vld [vmem:[%s16995_s26 + $0x1340] sm:$0xff] }
 0x6a0   : > { %12808 = vmatprep.subr.bf16.mxu0 %v15114_v28  ;;  %v3717_v28 = vld [vmem:[%s16995_s26 + $0x1e20] sm:$0xff]  ;;  %v14970_v46 = vcombine.high %v3357_v47, %v3369_v41  ;;  %v14969_v3 = vcombine.low %v3357_v47, %v3369_v41 }
 0x6a1   : > { %12850 = vmatpush2.bf16.msra.mxu1 %v15497_v25  ;;  %v3729_v25 = vld [vmem:[%s16995_s26 + $0x1e80] sm:$0xff] }
 0x6a2   : > { %12851 = vmatprep.subr.bf16.mxu1 %v15474_v27  ;;  %v3333_v27 = vld [vmem:[%s16995_s26 + $0x1220] sm:$0xff]  ;;  %v15330_v1 = vcombine.high %v3717_v28, %v3729_v25  ;;  %v15329_v42 = vcombine.low %v3717_v28, %v3729_v25 }
 0x6a3   : > { %12809 = vmatpush2.bf16.msra.mxu0 %v15113_v37  ;;  %v3345_v37 = vld [vmem:[%s16995_s26 + $0x1280] sm:$0xff] }
 0x6a4   : > { %12810 = vmatprep.subr.bf16.mxu0 %v15090_v9  ;;  %v2926_v9 = vld [vmem:[%s16995_s26 + $0x568] sm:$0xff]  ;;  %v14946_v2 = vcombine.high %v3333_v27, %v3345_v37  ;;  %v14945_v45 = vcombine.low %v3333_v27, %v3345_v37  ;;  %v4041_v36 = vld [vmem:[%s16995_s26 + $0x2840] sm:$0xff] }
 0x6a5   : > { %12852 = vmatpush2.bf16.msra.mxu1 %v15473_v11  ;;  %v2938_v11 = vld [vmem:[%s16995_s26 + $0x5c8] sm:$0xff]  ;;  %v4005_v41 = vld [vmem:[%s16995_s26 + $0x2720] sm:$0xff] }
 0x6a6   : > { %12853 = vmatprep.subr.bf16.mxu1 %v15450_v15  ;;  %v4077_v15 = vld [vmem:[%s16995_s26 + $0x2960] sm:$0xff]  ;;  %v14540_v44 = vcombine.high %v2926_v9, %v2938_v11  ;;  %v14539_v59 = vcombine.low %v2926_v9, %v2938_v11 }
 0x6a7   : > { %12811 = vmatpush2.bf16.msra.mxu0 %v15089_v43  ;;  %v4089_v43 = vld [vmem:[%s16995_s26 + $0x29c0] sm:$0xff] }
 0x6a8   : > { %12812 = vmatprep.subr.bf16.mxu0 %v15066_v49  ;;  %v2902_v49 = vld [vmem:[%s16995_s26 + $0x4a8] sm:$0xff]  ;;  %v15690_v55 = vcombine.high %v4077_v15, %v4089_v43  ;;  %v15689_v52 = vcombine.low %v4077_v15, %v4089_v43 }
 0x6a9   : > { %12854 = vmatpush2.bf16.msra.mxu1 %v15449_v54  ;;  %v2914_v54 = vld [vmem:[%s16995_s26 + $0x508] sm:$0xff] }
 0x6aa   : > { %12855 = vmatprep.subr.bf16.mxu1 %v15426_v61  ;;  %v4053_v61 = vld [vmem:[%s16995_s26 + $0x28a0] sm:$0xff]  ;;  %v14516_v29 = vcombine.high %v2902_v49, %v2914_v54 }
 0x6ab   : > { %12813 = vmatpush2.bf16.msra.mxu0 %v15065_v56  ;;  %v4065_v56 = vld [vmem:[%s16995_s26 + $0x2900] sm:$0xff] }
 0x6ac   : > { %12814 = vmatprep.subr.bf16.mxu0 %v15042_v5  ;;  %v2878_v5 = vld [vmem:[%s16995_s26 + $0x3e8] sm:$0xff]  ;;  %v15666_v7 = vcombine.high %v4053_v61, %v4065_v56  ;;  %v15665_v58 = vcombine.low %v4053_v61, %v4065_v56 }
 0x6ad   : > { %12856 = vmatpush2.bf16.msra.mxu1 %v15425_v63  ;;  %v2890_v63 = vld [vmem:[%s16995_s26 + $0x448] sm:$0xff] }
 0x6ae   : > { %12857 = vmatprep.subr.bf16.mxu1 %v15402_v18  ;;  %v14515_v18 = vcombine.low %v2902_v49, %v2914_v54  ;;  %v14491_v47 = vcombine.low %v2878_v5, %v2890_v63 }
 0x6af   : > { %12815 = vmatpush2.bf16.msra.mxu0 %v15041_v13  ;;  %v4029_v13 = vld [vmem:[%s16995_s26 + $0x27e0] sm:$0xff] }
 0x6b0   : > { %12816 = vmatprep.subr.bf16.mxu0 %v15018_v48  ;;  %v15641_v25 = vcombine.low %v4029_v13, %v4041_v36 }
 0x6b1   : > { %12858 = vmatpush2.bf16.msra.mxu1 %v15401_v4  ;;  %v14492_v4 = vcombine.high %v2878_v5, %v2890_v63 }
 0x6b2   : > { %12859 = vmatprep.subr.bf16.mxu1 %v15378_v31  ;;  %v2854_v31 = vld [vmem:[%s16995_s26 + $0x328] sm:$0xff] }
 0x6b3   : > { %12817 = vmatpush2.bf16.msra.mxu0 %v15017_v8  ;;  %v2866_v8 = vld [vmem:[%s16995_s26 + $0x388] sm:$0xff] }
 0x6b4   : > { %12818 = vmatprep.subr.bf16.mxu0 %v14994_v21  ;;  %v15642_v21 = vcombine.high %v4029_v13, %v4041_v36  ;;  %v14468_v28 = vcombine.high %v2854_v31, %v2866_v8  ;;  %v14467_v37 = vcombine.low %v2854_v31, %v2866_v8  ;;  %v2770_v13 = vld [vmem:[%s16995_s26 + $0x88] sm:$0xff] }
 0x6b5   : > { %12860 = vmatpush2.bf16.msra.mxu1 %v15377_v6 }
 0x6b6   : > { %12861 = vmatprep.subr.bf16.mxu1 %v15354_v24 }
 0x6b7   : > { %12819 = vmatpush2.bf16.msra.mxu0 %v14993_v19 }
 0x6b8   : > { %12820 = vmatprep.subr.bf16.mxu0 %v14970_v46  ;;  %v2830_v46 = vld [vmem:[%s16995_s26 + $0x268] sm:$0xff] }
 0x6b9   : > { %12862 = vmatpush2.bf16.msra.mxu1 %v15353_v26  ;;  %v2842_v26 = vld [vmem:[%s16995_s26 + $0x2c8] sm:$0xff] }
 0x6ba   : > { %12863 = vmatprep.subr.bf16.mxu1 %v15330_v1  ;;  %v3981_v1 = vld [vmem:[%s16995_s26 + $0x2660] sm:$0xff]  ;;  %v14444_v9 = vcombine.high %v2830_v46, %v2842_v26  ;;  %v14443_v43 = vcombine.low %v2830_v46, %v2842_v26 }
 0x6bb   : > { %12821 = vmatpush2.bf16.msra.mxu0 %v14969_v3  ;;  %v3993_v3 = vld [vmem:[%s16995_s26 + $0x26c0] sm:$0xff] }
 0x6bc   : > { %12822 = vmatprep.subr.bf16.mxu0 %v14946_v2  ;;  %v2806_v2 = vld [vmem:[%s16995_s26 + $0x1a8] sm:$0xff]  ;;  %v15594_v15 = vcombine.high %v3981_v1, %v3993_v3  ;;  %v15593_v54 = vcombine.low %v3981_v1, %v3993_v3  ;;  %v4245_v26 = vld [vmem:[%s16995_s26 + $0x2ea0] sm:$0xff] }
 0x6bd   : > { %12864 = vmatpush2.bf16.msra.mxu1 %v15329_v42  ;;  %v2818_v42 = vld [vmem:[%s16995_s26 + $0x208] sm:$0xff] }
 0x6be   : > { %12915 = vmatprep.subr.bf16.mxu1 %v14540_v44  ;;  %v3957_v44 = vld [vmem:[%s16995_s26 + $0x25a0] sm:$0xff]  ;;  %v14420_v49 = vcombine.high %v2806_v2, %v2818_v42  ;;  %v14419_v56 = vcombine.low %v2806_v2, %v2818_v42  ;;  %v3070_v1 = vld [vmem:[%s16995_s26 + $0x9e8] sm:$0xff] }
 0x6bf   : > { %12823 = vmatpush2.bf16.msra.mxu0 %v14945_v45  ;;  %v3969_v45 = vld [vmem:[%s16995_s26 + $0x2600] sm:$0xff]  ;;  %v3082_v3 = vld [vmem:[%s16995_s26 + $0xa48] sm:$0xff] }
 0x6c0   : > { %v17940_v53 = vpop.f32.mrf.mxu1  ;;  %12866 = vmatmul.mubr.bf16.vlgmr.msra.gmra.mxu1 %v17319_v12  ;;  %12874 = vmatprep.subr.bf16.mxu0 %v15690_v55  ;;  %v2782_v55 = vld [vmem:[%s16995_s26 + $0xe8] sm:$0xff]  ;;  %v15570_v61 = vcombine.high %v3957_v44, %v3969_v45  ;;  %v4221_v2 = vld [vmem:[%s16995_s26 + $0x2de0] sm:$0xff] }
 0x6c1   : > { %12916 = vmatpush1.bf16.msra.mxu1 %v14539_v59  ;;  %12947 = vmatprep.mubr.bf16.mxu1 %v17160_v50  ;;  %v2794_v59 = vld [vmem:[%s16995_s26 + $0x148] sm:$0xff]  ;;  %v4233_v42 = vld [vmem:[%s16995_s26 + $0x2e40] sm:$0xff] }
 0x6c2   : > { %v12580_v14 = vpop.f32.mrf.mxu0  ;;  %12825 = vmatmul.mubr.bf16.vlgmr.msra.gmra.mxu0 %v17246_v30  ;;  %v17947_v48 = vpop.f32.mrf.mxu1  ;;  %12917 = vmatprep.subr.bf16.mxu1 %v14516_v29  ;;  %v3933_v29 = vld [vmem:[%s16995_s26 + $0x24e0] sm:$0xff]  ;;  %v14396_v63 = vcombine.high %v2782_v55, %v2794_v59 }
 0x6c3   : > { %v12581_v35 = vadd.f32 %v12580_v14, %v17876_v39  ;;  %12875 = vmatpush1.bf16.msra.mxu0 %v15689_v52  ;;  %12906 = vmatprep.mubr.bf16.mxu0 %v17376_v20  ;;  %v4017_v39 = vld [vmem:[%s16995_s26 + $0x2780] sm:$0xff] }
 0x6c4   : > { %v12582_v16 = vpop.f32.mrf.mxu0  ;;  %v12625_v57 = vpop.f32.mrf.mxu1  ;;  %12876 = vmatprep.subr.bf16.mxu0 %v15666_v7  ;;  %v15617_v11 = vcombine.low %v4005_v41, %v4017_v39  ;;  %v3945_v52 = vld [vmem:[%s16995_s26 + $0x2540] sm:$0xff]  ;;  %v15569_v7 = vcombine.low %v3957_v44, %v3969_v45  ;;  %v3046_v44 = vld [vmem:[%s16995_s26 + $0x928] sm:$0xff] }
 0x6c5   : > { %16125 = vtanh.f32 %v12581_v35  ;;  %v12583_v6 = vadd.f32 %v12582_v16, %v17880_v23  ;;  %12918 = vmatpush1.bf16.msra.mxu1 %v14515_v18  ;;  %v15618_v23 = vcombine.high %v4005_v41, %v4017_v39  ;;  %v2758_v18 = vld [vmem:[%s16995_s26 + $0x28] sm:$0xff]  ;;  %v15546_v14 = vcombine.high %v3933_v29, %v3945_v52  ;;  %v3909_v35 = vld [vmem:[%s16995_s26 + $0x2420] sm:$0xff] }
 0x6c6   : > { %v12584_v24 = vpop.f32.mrf.mxu0  ;;  %v12626_v19 = vpop.f32.mrf.mxu1  ;;  %12919 = vmatprep.subr.bf16.mxu1 %v14492_v4  ;;  %v14395_v4 = vcombine.low %v2782_v55, %v2794_v59  ;;  %v14372_v31 = vcombine.high %v2758_v18, %v2770_v13  ;;  %v15545_v8 = vcombine.low %v3933_v29, %v3945_v52  ;;  %v3118_v16 = vld [vmem:[%s16995_s26 + $0xb68] sm:$0xff]  ;;  %v4281_v41 = vld [vmem:[%s16995_s26 + $0x2fc0] sm:$0xff] }
 0x6c7   : > { %16127 = vtanh.f32 %v12583_v6  ;;  %12877 = vmatpush1.bf16.msra.mxu0 %v15665_v58  ;;  %v3921_v58 = vld [vmem:[%s16995_s26 + $0x2480] sm:$0xff]  ;;  %v3130_v57 = vld [vmem:[%s16995_s26 + $0xbc8] sm:$0xff]  ;;  %v14371_v6 = vcombine.low %v2758_v18, %v2770_v13 }
 0x6c8   : > { %v12585_v27 = vpop.f32.mrf.mxu0  ;;  %12878 = vmatprep.subr.bf16.mxu0 %v15642_v21  ;;  %v15522_v21 = vcombine.high %v3909_v35, %v3921_v58  ;;  %v14732_v39 = vcombine.high %v3118_v16, %v3130_v57  ;;  %v15521_v24 = vcombine.low %v3909_v35, %v3921_v58  ;;  %v3094_v19 = vld [vmem:[%s16995_s26 + $0xaa8] sm:$0xff]  ;;  %v14731_v46 = vcombine.low %v3118_v16, %v3130_v57  ;;  %v4197_v55 = vld [vmem:[%s16995_s26 + $0x2d20] sm:$0xff] }
 0x6c9   : > { %12920 = vmatpush1.bf16.msra.mxu1 %v14491_v47  ;;  %v4269_v47 = vld [vmem:[%s16995_s26 + $0x2f60] sm:$0xff]  ;;  %v3058_v45 = vld [vmem:[%s16995_s26 + $0x988] sm:$0xff] }
 0x6ca   : > { %12921 = vmatprep.subr.bf16.mxu1 %v14468_v28  ;;  %v3106_v28 = vld [vmem:[%s16995_s26 + $0xb08] sm:$0xff]  ;;  %v4257_v27 = vld [vmem:[%s16995_s26 + $0x2f00] sm:$0xff] }
 0x6cb   : > { %12879 = vmatpush1.bf16.msra.mxu0 %v15641_v25  ;;  %v15882_v25 = vcombine.high %v4269_v47, %v4281_v41  ;;  %v4209_v59 = vld [vmem:[%s16995_s26 + $0x2d80] sm:$0xff]  ;;  %v3022_v29 = vld [vmem:[%s16995_s26 + $0x868] sm:$0xff] }
 0x6cc   : > { %12880 = vmatprep.subr.bf16.mxu0 %v15618_v23  ;;  %v14708_v23 = vcombine.high %v3094_v19, %v3106_v28  ;;  %v3034_v52 = vld [vmem:[%s16995_s26 + $0x8c8] sm:$0xff]  ;;  %v4185_v18 = vld [vmem:[%s16995_s26 + $0x2cc0] sm:$0xff] }
 0x6cd   : > { %12922 = vmatpush1.bf16.msra.mxu1 %v14467_v37  ;;  %v15881_v37 = vcombine.low %v4269_v47, %v4281_v41  ;;  %v14636_v13 = vcombine.high %v3022_v29, %v3034_v52  ;;  %v14635_v58 = vcombine.low %v3022_v29, %v3034_v52  ;;  %v3286_v29 = vld [vmem:[%s16995_s26 + $0x10a8] sm:$0xff] }
 0x6ce   : > { %12923 = vmatprep.subr.bf16.mxu1 %v14444_v9  ;;  %v15858_v9 = vcombine.high %v4245_v26, %v4257_v27  ;;  %v3298_v52 = vld [vmem:[%s16995_s26 + $0x1108] sm:$0xff] }
 0x6cf   : > { %12881 = vmatpush1.bf16.msra.mxu0 %v15617_v11  ;;  %v14707_v11 = vcombine.low %v3094_v19, %v3106_v28 }
 0x6d0   : > { %12882 = vmatprep.subr.bf16.mxu0 %v15594_v15  ;;  %v14684_v15 = vcombine.high %v3070_v1, %v3082_v3 }
 0x6d1   : > { %12924 = vmatpush1.bf16.msra.mxu1 %v14443_v43  ;;  %v15857_v43 = vcombine.low %v4245_v26, %v4257_v27 }
 0x6d2   : > { %v16126_v5 = vpop.eup %16125  ;;  %12925 = vmatprep.subr.bf16.mxu1 %v14420_v49  ;;  %v15834_v49 = vcombine.high %v4221_v2, %v4233_v42 }
 0x6d3   : > { %14091 = vst [vmem:[%s17653_s5 + $0x20] sm:$0xff] %v16126_v5  ;;  %12883 = vmatpush1.bf16.msra.mxu0 %v15593_v54  ;;  %v14683_v54 = vcombine.low %v3070_v1, %v3082_v3  ;;  %v15810_v5 = vcombine.high %v4197_v55, %v4209_v59 }
 0x6d4   : > { %v16128_v36 = vpop.eup %16127  ;;  %12884 = vmatprep.subr.bf16.mxu0 %v15570_v61  ;;  %v14660_v61 = vcombine.high %v3046_v44, %v3058_v45 }
 0x6d5   : > { %14092 = vst [vmem:[%s17653_s5 + $0x28] sm:$0xff] %v16128_v36  ;;  %12926 = vmatpush1.bf16.msra.mxu1 %v14419_v56  ;;  %v15833_v56 = vcombine.low %v4221_v2, %v4233_v42  ;;  %v15809_v36 = vcombine.low %v4197_v55, %v4209_v59  ;;  %v16169_v59 = vld [vmem:[%s17450_s1] sm:$0xff] }
 0x6d6   : > { %12927 = vmatprep.subr.bf16.mxu1 %v14396_v63  ;;  %v14659_v63 = vcombine.low %v3046_v44, %v3058_v45 }
 0x6d7   : > { %12885 = vmatpush1.bf16.msra.mxu0 %v15569_v7  ;;  %v4173_v7 = vld [vmem:[%s16995_s26 + $0x2c60] sm:$0xff] }
 0x6d8   : > { %12886 = vmatprep.subr.bf16.mxu0 %v15546_v14  ;;  %v2998_v14 = vld [vmem:[%s16995_s26 + $0x7a8] sm:$0xff]  ;;  %v15786_v35 = vcombine.high %v4173_v7, %v4185_v18  ;;  %v15785_v57 = vcombine.low %v4173_v7, %v4185_v18 }
 0x6d9   : > { %12928 = vmatpush1.bf16.msra.mxu1 %v14395_v4  ;;  %v3010_v4 = vld [vmem:[%s16995_s26 + $0x808] sm:$0xff] }
 0x6da   : > { %12929 = vmatprep.subr.bf16.mxu1 %v14372_v31  ;;  %v4149_v31 = vld [vmem:[%s16995_s26 + $0x2ba0] sm:$0xff]  ;;  %v14612_v16 = vcombine.high %v2998_v14, %v3010_v4  ;;  %v14611_v41 = vcombine.low %v2998_v14, %v3010_v4  ;;  %v3646_v18 = vld [vmem:[%s16995_s26 + $0x1be8] sm:$0xff]  ;;  %v14900_v14 = vcombine.high %v3286_v29, %v3298_v52 }
 0x6db   : > { %12887 = vmatpush1.bf16.msra.mxu0 %v15545_v8  ;;  %v4161_v8 = vld [vmem:[%s16995_s26 + $0x2c00] sm:$0xff] }
 0x6dc   : > { %12888 = vmatprep.subr.bf16.mxu0 %v15522_v21  ;;  %v2974_v21 = vld [vmem:[%s16995_s26 + $0x6e8] sm:$0xff]  ;;  %v15762_v47 = vcombine.high %v4149_v31, %v4161_v8  ;;  %v15761_v28 = vcombine.low %v4149_v31, %v4161_v8 }
 0x6dd   : > { %12930 = vmatpush1.bf16.msra.mxu1 %v14371_v6  ;;  %v2986_v6 = vld [vmem:[%s16995_s26 + $0x748] sm:$0xff] }
 0x6de   : > { %12931 = vmatprep.subr.bf16.mxu1 %v14732_v39  ;;  %v4125_v39 = vld [vmem:[%s16995_s26 + $0x2ae0] sm:$0xff]  ;;  %v14588_v19 = vcombine.high %v2974_v21, %v2986_v6  ;;  %v14587_v27 = vcombine.low %v2974_v21, %v2986_v6  ;;  %v3274_v31 = vld [vmem:[%s16995_s26 + $0x1048] sm:$0xff] }
 0x6df   : > { %12889 = vmatpush1.bf16.msra.mxu0 %v15521_v24  ;;  %v4137_v24 = vld [vmem:[%s16995_s26 + $0x2b40] sm:$0xff] }
 0x6e0   : > { %12890 = vmatprep.subr.bf16.mxu0 %v15882_v25  ;;  %v2950_v25 = vld [vmem:[%s16995_s26 + $0x628] sm:$0xff]  ;;  %v15738_v26 = vcombine.high %v4125_v39, %v4137_v24  ;;  %v15737_v3 = vcombine.low %v4125_v39, %v4137_v24 }
 0x6e1   : > { %12932 = vmatpush2.bf16.msra.mxu1 %v14731_v46  ;;  %v2962_v46 = vld [vmem:[%s16995_s26 + $0x688] sm:$0xff] }
 0x6e2   : > { %12933 = vmatprep.subr.bf16.mxu1 %v14708_v23  ;;  %v4101_v23 = vld [vmem:[%s16995_s26 + $0x2a20] sm:$0xff]  ;;  %v14564_v1 = vcombine.high %v2950_v25, %v2962_v46  ;;  %v14563_v42 = vcombine.low %v2950_v25, %v2962_v46 }
 0x6e3   : > { %12891 = vmatpush2.bf16.msra.mxu0 %v15881_v37  ;;  %v4113_v37 = vld [vmem:[%s16995_s26 + $0x2a80] sm:$0xff] }
 0x6e4   : > { %12892 = vmatprep.subr.bf16.mxu0 %v15858_v9  ;;  %v3694_v9 = vld [vmem:[%s16995_s26 + $0x1d68] sm:$0xff]  ;;  %v15714_v2 = vcombine.high %v4101_v23, %v4113_v37  ;;  %v15713_v45 = vcombine.low %v4101_v23, %v4113_v37 }
 0x6e5   : > { %12934 = vmatpush2.bf16.msra.mxu1 %v14707_v11  ;;  %v3706_v11 = vld [vmem:[%s16995_s26 + $0x1dc8] sm:$0xff] }
 0x6e6   : > { %12935 = vmatprep.subr.bf16.mxu1 %v14684_v15  ;;  %v3310_v15 = vld [vmem:[%s16995_s26 + $0x1168] sm:$0xff]  ;;  %v15308_v44 = vcombine.high %v3694_v9, %v3706_v11 }
 0x6e7   : > { %12893 = vmatpush2.bf16.msra.mxu0 %v15857_v43  ;;  %v3322_v43 = vld [vmem:[%s16995_s26 + $0x11c8] sm:$0xff] }
 0x6e8   : > { %12894 = vmatprep.subr.bf16.mxu0 %v15834_v49  ;;  %v3670_v49 = vld [vmem:[%s16995_s26 + $0x1ca8] sm:$0xff]  ;;  %v14924_v55 = vcombine.high %v3310_v15, %v3322_v43  ;;  %v14923_v7 = vcombine.low %v3310_v15, %v3322_v43 }
 0x6e9   : > { %12936 = vmatpush2.bf16.msra.mxu1 %v14683_v54  ;;  %v3682_v54 = vld [vmem:[%s16995_s26 + $0x1d08] sm:$0xff] }
 0x6ea   : > { %12937 = vmatprep.subr.bf16.mxu1 %v14660_v61  ;;  %v4322_v61 = vrot.slane %v16169_v59, %v17307_v62  ;;  %v3214_v43 = vld [vmem:[%s16995_s26 + $0xe68] sm:$0xff] }
 0x6eb   : > { %12895 = vmatpush2.bf16.msra.mxu0 %v15833_v56  ;;  %v15307_v56 = vcombine.low %v3694_v9, %v3706_v11  ;;  %v3598_v9 = vld [vmem:[%s16995_s26 + $0x1a68] sm:$0xff] }
 0x6ec   : > { %12896 = vmatprep.subr.bf16.mxu0 %v15810_v5  ;;  %v15284_v5 = vcombine.high %v3670_v49, %v3682_v54  ;;  %v12622_v4 = vadd.f32 %v17940_v53, %v4322_v61  ;;  %v14899_v53 = vcombine.low %v3286_v29, %v3298_v52  ;;  %v3610_v11 = vld [vmem:[%s16995_s26 + $0x1ac8] sm:$0xff] }
 0x6ed   : > { %12938 = vmatpush2.bf16.msra.mxu1 %v14659_v63  ;;  %v4326_v63 = vrot.slane %v16169_v59, %v17312_v0  ;;  %v15211_v61 = vcombine.low %v3598_v9, %v3610_v11  ;;  %v3202_v29 = vld [vmem:[%s16995_s26 + $0xe08] sm:$0xff] }
 0x6ee   : > { %12939 = vmatprep.subr.bf16.mxu1 %v14636_v13  ;;  %v3658_v13 = vld [vmem:[%s16995_s26 + $0x1c48] sm:$0xff] }
 0x6ef   : > { %12897 = vmatpush2.bf16.msra.mxu0 %v15809_v36  ;;  %v12624_v21 = vadd.f32 %v17947_v48, %v4326_v63  ;;  %v15259_v46 = vcombine.low %v3646_v18, %v3658_v13  ;;  %v3238_v48 = vld [vmem:[%s16995_s26 + $0xf28] sm:$0xff] }
 0x6f0   : > { %12898 = vmatprep.subr.bf16.mxu0 %v15786_v35  ;;  %v15283_v35 = vcombine.low %v3670_v49, %v3682_v54  ;;  %v3574_v54 = vld [vmem:[%s16995_s26 + $0x19a8] sm:$0xff] }
 0x6f1   : > { %12940 = vmatpush2.bf16.msra.mxu1 %v14635_v58  ;;  %v3262_v58 = vld [vmem:[%s16995_s26 + $0xfe8] sm:$0xff] }
 0x6f2   : > { %12941 = vmatprep.subr.bf16.mxu1 %v14612_v16  ;;  %v3550_v63 = vld [vmem:[%s16995_s26 + $0x18e8] sm:$0xff] }
 0x6f3   : > { %12899 = vmatpush2.bf16.msra.mxu0 %v15785_v57  ;;  %v15260_v57 = vcombine.high %v3646_v18, %v3658_v13 }
 0x6f4   : > { %12900 = vmatprep.subr.bf16.mxu0 %v15762_v47  ;;  %v3622_v47 = vld [vmem:[%s16995_s26 + $0x1b28] sm:$0xff] }
 0x6f5   : > { %12942 = vmatpush2.bf16.msra.mxu1 %v14611_v41  ;;  %v3634_v41 = vld [vmem:[%s16995_s26 + $0x1b88] sm:$0xff] }
 0x6f6   : > { %12943 = vmatprep.subr.bf16.mxu1 %v14588_v19  ;;  %v14876_v19 = vcombine.high %v3262_v58, %v3274_v31  ;;  %v15236_v37 = vcombine.high %v3622_v47, %v3634_v41  ;;  %v15235_v15 = vcombine.low %v3622_v47, %v3634_v41  ;;  %v3886_v47 = vld [vmem:[%s16995_s26 + $0x2368] sm:$0xff] }
 0x6f7   : > { %12901 = vmatpush2.bf16.msra.mxu0 %v15761_v28  ;;  %v3898_v41 = vld [vmem:[%s16995_s26 + $0x23c8] sm:$0xff] }
 0x6f8   : > { %12902 = vmatprep.subr.bf16.mxu0 %v15738_v26  ;;  %v3250_v26 = vld [vmem:[%s16995_s26 + $0xf88] sm:$0xff] }
 0x6f9   : > { %12944 = vmatpush2.bf16.msra.mxu1 %v14587_v27  ;;  %v14851_v49 = vcombine.low %v3238_v48, %v3250_v26 }
 0x6fa   : > { %12945 = vmatprep.subr.bf16.mxu1 %v14564_v1 }
 0x6fb   : > { %12903 = vmatpush2.bf16.msra.mxu0 %v15737_v3  ;;  %v14875_v3 = vcombine.low %v3262_v58, %v3274_v31  ;;  %v3526_v58 = vld [vmem:[%s16995_s26 + $0x1828] sm:$0xff] }
 0x6fc   : > { %12904 = vmatprep.subr.bf16.mxu0 %v15714_v2  ;;  %v3538_v31 = vld [vmem:[%s16995_s26 + $0x1888] sm:$0xff] }
 0x6fd   : > { %12946 = vmatpush2.bf16.msra.mxu1 %v14563_v42  ;;  %v14852_v42 = vcombine.high %v3238_v48, %v3250_v26  ;;  %v3862_v26 = vld [vmem:[%s16995_s26 + $0x22a8] sm:$0xff] }
 0x6fe   : > { %12997 = vmatprep.subr.bf16.mxu1 %v15308_v44  ;;  %v3226_v44 = vld [vmem:[%s16995_s26 + $0xec8] sm:$0xff] }
 0x6ff   : > { %12905 = vmatpush2.bf16.msra.mxu0 %v15713_v45  ;;  %v15212_v45 = vcombine.high %v3598_v9, %v3610_v11  ;;  %v14828_v59 = vcombine.high %v3214_v43, %v3226_v44  ;;  %v3490_v9 = vld [vmem:[%s16995_s26 + $0x1708] sm:$0xff] }
 0x700   : > { %v12703_v36 = vpop.f32.mrf.mxu1  ;;  %12948 = vmatmul.mubr.bf16.vlgmr.msra.gmra.mxu1 %v17165_v60  ;;  %12956 = vmatprep.subr.bf16.mxu0 %v14924_v55  ;;  %v3586_v55 = vld [vmem:[%s16995_s26 + $0x1a08] sm:$0xff] }
 0x701   : > { %12998 = vmatpush1.bf16.msra.mxu1 %v15307_v56  ;;  %13029 = vmatprep.mubr.bf16.mxu1 %v17317_v10  ;;  %v3190_v56 = vld [vmem:[%s16995_s26 + $0xda8] sm:$0xff]  ;;  %v15188_v52 = vcombine.high %v3574_v54, %v3586_v55  ;;  %v15187_v13 = vcombine.low %v3574_v54, %v3586_v55 }
 0x702   : > { %v12662_v8 = vpop.f32.mrf.mxu0  ;;  %12907 = vmatmul.mubr.bf16.vlgmr.msra.gmra.mxu0 %v17380_v33  ;;  %v12705_v16 = vpop.f32.mrf.mxu1  ;;  %12999 = vmatprep.subr.bf16.mxu1 %v15284_v5  ;;  %v14827_v5 = vcombine.low %v3214_v43, %v3226_v44  ;;  %v14804_v18 = vcombine.high %v3190_v56, %v3202_v29 }
 0x703   : > { %v12663_v6 = vadd.f32 %v12662_v8, %v12622_v4  ;;  %12957 = vmatpush1.bf16.msra.mxu0 %v14923_v7  ;;  %12988 = vmatprep.mubr.bf16.mxu0 %v17242_v22  ;;  %v3562_v7 = vld [vmem:[%s16995_s26 + $0x1948] sm:$0xff] }
 0x704   : > { %v12664_v39 = vpop.f32.mrf.mxu0  ;;  %v12707_v24 = vpop.f32.mrf.mxu1  ;;  %12958 = vmatprep.subr.bf16.mxu0 %v14900_v14  ;;  %v3178_v14 = vld [vmem:[%s16995_s26 + $0xd48] sm:$0xff]  ;;  %v15164_v4 = vcombine.high %v3550_v63, %v3562_v7 }
 0x705   : > { %v18029_v28 = vadd.f32 %v12703_v36, %v12663_v6  ;;  %v12665_v25 = vadd.f32 %v12664_v39, %v12624_v21  ;;  %13000 = vmatpush1.bf16.msra.mxu1 %v15283_v35  ;;  %v3166_v36 = vld [vmem:[%s16995_s26 + $0xce8] sm:$0xff]  ;;  %v14803_v35 = vcombine.low %v3190_v56, %v3202_v29  ;;  %v15140_v6 = vcombine.high %v3526_v58, %v3538_v31 }
 0x706   : > { %v12666_v27 = vpop.f32.mrf.mxu0  ;;  %v12708_v23 = vpop.f32.mrf.mxu1  ;;  %13001 = vmatprep.subr.bf16.mxu1 %v15260_v57  ;;  %v14780_v8 = vcombine.high %v3166_v36, %v3178_v14  ;;  %v3142_v57 = vld [vmem:[%s16995_s26 + $0xc28] sm:$0xff]  ;;  %v15139_v24 = vcombine.low %v3526_v58, %v3538_v31 }
 0x707   : > { %v18033_v1 = vadd.f32 %v12705_v16, %v12665_v25  ;;  %12959 = vmatpush1.bf16.msra.mxu0 %v14899_v53  ;;  %v15163_v16 = vcombine.low %v3550_v63, %v3562_v7  ;;  %v3154_v21 = vld [vmem:[%s16995_s26 + $0xc88] sm:$0xff]  ;;  %v14779_v53 = vcombine.low %v3166_v36, %v3178_v14 }
 0x708   : > { %v12667_v2 = vpop.f32.mrf.mxu0  ;;  %12960 = vmatprep.subr.bf16.mxu0 %v14876_v19  ;;  %v14756_v39 = vcombine.high %v3142_v57, %v3154_v21  ;;  %v3502_v19 = vld [vmem:[%s16995_s26 + $0x1768] sm:$0xff]  ;;  %v14755_v48 = vcombine.low %v3142_v57, %v3154_v21 }
 0x709   : > { %13002 = vmatpush1.bf16.msra.mxu1 %v15259_v46  ;;  %v3514_v25 = vld [vmem:[%s16995_s26 + $0x17c8] sm:$0xff]  ;;  %v15500_v46 = vcombine.high %v3886_v47, %v3898_v41 }
 0x70a   : > { %13003 = vmatprep.subr.bf16.mxu1 %v15236_v37  ;;  %v3874_v27 = vld [vmem:[%s16995_s26 + $0x2308] sm:$0xff]  ;;  %v15116_v23 = vcombine.high %v3502_v19, %v3514_v25  ;;  %v15499_v37 = vcombine.low %v3886_v47, %v3898_v41  ;;  %v15115_v2 = vcombine.low %v3502_v19, %v3514_v25 }
 0x70b   : > { %12961 = vmatpush1.bf16.msra.mxu0 %v14875_v3  ;;  %v3478_v3 = vld [vmem:[%s16995_s26 + $0x16a8] sm:$0xff]  ;;  %v15476_v11 = vcombine.high %v3862_v26, %v3874_v27  ;;  %v15475_v44 = vcombine.low %v3862_v26, %v3874_v27 }
 0x70c   : > { %12962 = vmatprep.subr.bf16.mxu0 %v14852_v42  ;;  %v3838_v42 = vld [vmem:[%s16995_s26 + $0x21e8] sm:$0xff]  ;;  %v15092_v43 = vcombine.high %v3478_v3, %v3490_v9  ;;  %v15091_v55 = vcombine.low %v3478_v3, %v3490_v9 }
 0x70d   : > { %13004 = vmatpush1.bf16.msra.mxu1 %v15235_v15  ;;  %v3850_v15 = vld [vmem:[%s16995_s26 + $0x2248] sm:$0xff] }
 0x70e   : > { %13005 = vmatprep.subr.bf16.mxu1 %v15212_v45  ;;  %v3454_v45 = vld [vmem:[%s16995_s26 + $0x15e8] sm:$0xff]  ;;  %v15452_v54 = vcombine.high %v3838_v42, %v3850_v15  ;;  %v15451_v29 = vcombine.low %v3838_v42, %v3850_v15 }
 0x70f   : > { %12963 = vmatpush1.bf16.msra.mxu0 %v14851_v49  ;;  %v3466_v49 = vld [vmem:[%s16995_s26 + $0x1648] sm:$0xff] }
 0x710   : > { %12964 = vmatprep.subr.bf16.mxu0 %v14828_v59  ;;  %v3814_v59 = vld [vmem:[%s16995_s26 + $0x2128] sm:$0xff]  ;;  %v15068_v56 = vcombine.high %v3454_v45, %v3466_v49  ;;  %v15067_v7 = vcombine.low %v3454_v45, %v3466_v49 }
 0x711   : > { %13006 = vmatpush1.bf16.msra.mxu1 %v15211_v61  ;;  %v3826_v61 = vld [vmem:[%s16995_s26 + $0x2188] sm:$0xff] }
 0x712   : > { %13007 = vmatprep.subr.bf16.mxu1 %v15188_v52  ;;  %v3430_v52 = vld [vmem:[%s16995_s26 + $0x1528] sm:$0xff]  ;;  %v15428_v63 = vcombine.high %v3814_v59, %v3826_v61  ;;  %v15427_v14 = vcombine.low %v3814_v59, %v3826_v61 }
 0x713   : > { %12965 = vmatpush1.bf16.msra.mxu0 %v14827_v5  ;;  %v3442_v5 = vld [vmem:[%s16995_s26 + $0x1588] sm:$0xff] }
 0x714   : > { %12966 = vmatprep.subr.bf16.mxu0 %v14804_v18  ;;  %v3790_v18 = vld [vmem:[%s16995_s26 + $0x2068] sm:$0xff]  ;;  %v15044_v36 = vcombine.high %v3430_v52, %v3442_v5  ;;  %v15043_v31 = vcombine.low %v3430_v52, %v3442_v5 }
 0x715   : > { %13008 = vmatpush1.bf16.msra.mxu1 %v15187_v13  ;;  %v3802_v13 = vld [vmem:[%s16995_s26 + $0x20c8] sm:$0xff] }
 0x716   : > { %13009 = vmatprep.subr.bf16.mxu1 %v15164_v4  ;;  %v3406_v4 = vld [vmem:[%s16995_s26 + $0x1468] sm:$0xff]  ;;  %v15404_v58 = vcombine.high %v3790_v18, %v3802_v13  ;;  %v15403_v21 = vcombine.low %v3790_v18, %v3802_v13 }
 0x717   : > { %12967 = vmatpush1.bf16.msra.mxu0 %v14803_v35  ;;  %v3418_v35 = vld [vmem:[%s16995_s26 + $0x14c8] sm:$0xff] }
 0x718   : > { %12968 = vmatprep.subr.bf16.mxu0 %v14780_v8  ;;  %v3766_v8 = vld [vmem:[%s16995_s26 + $0x1fa8] sm:$0xff]  ;;  %v15020_v57 = vcombine.high %v3406_v4, %v3418_v35  ;;  %v15019_v41 = vcombine.low %v3406_v4, %v3418_v35 }
 0x719   : > { %13010 = vmatpush1.bf16.msra.mxu1 %v15163_v16  ;;  %v3778_v16 = vld [vmem:[%s16995_s26 + $0x2008] sm:$0xff] }
 0x71a   : > { %13011 = vmatprep.subr.bf16.mxu1 %v15140_v6  ;;  %v3382_v6 = vld [vmem:[%s16995_s26 + $0x13a8] sm:$0xff]  ;;  %v15380_v47 = vcombine.high %v3766_v8, %v3778_v16  ;;  %v15379_v25 = vcombine.low %v3766_v8, %v3778_v16 }
 0x71b   : > { %12969 = vmatpush1.bf16.msra.mxu0 %v14779_v53  ;;  %v3394_v53 = vld [vmem:[%s16995_s26 + $0x1408] sm:$0xff] }
 0x71c   : > { %12970 = vmatprep.subr.bf16.mxu0 %v14756_v39  ;;  %v3742_v39 = vld [vmem:[%s16995_s26 + $0x1ee8] sm:$0xff]  ;;  %v14996_v19 = vcombine.high %v3382_v6, %v3394_v53  ;;  %v14995_v27 = vcombine.low %v3382_v6, %v3394_v53 }
 0x71d   : > { %13012 = vmatpush1.bf16.msra.mxu1 %v15139_v24  ;;  %v3754_v24 = vld [vmem:[%s16995_s26 + $0x1f48] sm:$0xff] }
 0x71e   : > { %13013 = vmatprep.subr.bf16.mxu1 %v15500_v46  ;;  %v3358_v46 = vld [vmem:[%s16995_s26 + $0x12e8] sm:$0xff]  ;;  %v15356_v26 = vcombine.high %v3742_v39, %v3754_v24  ;;  %v15355_v9 = vcombine.low %v3742_v39, %v3754_v24 }
 0x71f   : > { %12971 = vmatpush1.bf16.msra.mxu0 %v14755_v48  ;;  %v3370_v48 = vld [vmem:[%s16995_s26 + $0x1348] sm:$0xff] }
 0x720   : > { %12972 = vmatprep.subr.bf16.mxu0 %v15116_v23  ;;  %v3718_v23 = vld [vmem:[%s16995_s26 + $0x1e28] sm:$0xff]  ;;  %v14972_v3 = vcombine.high %v3358_v46, %v3370_v48  ;;  %v14971_v15 = vcombine.low %v3358_v46, %v3370_v48 }
 0x721   : > { %13014 = vmatpush2.bf16.msra.mxu1 %v15499_v37  ;;  %v3730_v37 = vld [vmem:[%s16995_s26 + $0x1e88] sm:$0xff] }
 0x722   : > { %13015 = vmatprep.subr.bf16.mxu1 %v15476_v11  ;;  %v3334_v11 = vld [vmem:[%s16995_s26 + $0x1228] sm:$0xff]  ;;  %v15332_v42 = vcombine.high %v3718_v23, %v3730_v37  ;;  %v15331_v49 = vcombine.low %v3718_v23, %v3730_v37 }
 0x723   : > { %12973 = vmatpush2.bf16.msra.mxu0 %v15115_v2  ;;  %v3346_v2 = vld [vmem:[%s16995_s26 + $0x1288] sm:$0xff] }
 0x724   : > { %12974 = vmatprep.subr.bf16.mxu0 %v15092_v43  ;;  %v2927_v43 = vld [vmem:[%s16995_s26 + $0x570] sm:$0xff]  ;;  %v14948_v45 = vcombine.high %v3334_v11, %v3346_v2  ;;  %v14947_v61 = vcombine.low %v3334_v11, %v3346_v2  ;;  %v4042_v8 = vld [vmem:[%s16995_s26 + $0x2848] sm:$0xff] }
 0x725   : > { %13016 = vmatpush2.bf16.msra.mxu1 %v15475_v44  ;;  %v2939_v44 = vld [vmem:[%s16995_s26 + $0x5d0] sm:$0xff]  ;;  %v4006_v48 = vld [vmem:[%s16995_s26 + $0x2728] sm:$0xff] }
 0x726   : > { %13017 = vmatprep.subr.bf16.mxu1 %v15452_v54  ;;  %v4078_v54 = vld [vmem:[%s16995_s26 + $0x2968] sm:$0xff]  ;;  %v14542_v59 = vcombine.high %v2927_v43, %v2939_v44  ;;  %v14541_v5 = vcombine.low %v2927_v43, %v2939_v44 }
 0x727   : > { %12975 = vmatpush2.bf16.msra.mxu0 %v15091_v55  ;;  %v4090_v55 = vld [vmem:[%s16995_s26 + $0x29c8] sm:$0xff] }
 0x728   : > { %12976 = vmatprep.subr.bf16.mxu0 %v15068_v56  ;;  %v2903_v56 = vld [vmem:[%s16995_s26 + $0x4b0] sm:$0xff]  ;;  %v15692_v52 = vcombine.high %v4078_v54, %v4090_v55  ;;  %v15691_v13 = vcombine.low %v4078_v54, %v4090_v55 }
 0x729   : > { %13018 = vmatpush2.bf16.msra.mxu1 %v15451_v29  ;;  %v2915_v29 = vld [vmem:[%s16995_s26 + $0x510] sm:$0xff] }
 0x72a   : > { %13019 = vmatprep.subr.bf16.mxu1 %v15428_v63  ;;  %v4054_v63 = vld [vmem:[%s16995_s26 + $0x28a8] sm:$0xff]  ;;  %v14518_v18 = vcombine.high %v2903_v56, %v2915_v29 }
 0x72b   : > { %12977 = vmatpush2.bf16.msra.mxu0 %v15067_v7  ;;  %v4066_v7 = vld [vmem:[%s16995_s26 + $0x2908] sm:$0xff] }
 0x72c   : > { %12978 = vmatprep.subr.bf16.mxu0 %v15044_v36  ;;  %v2879_v36 = vld [vmem:[%s16995_s26 + $0x3f0] sm:$0xff]  ;;  %v15668_v35 = vcombine.high %v4054_v63, %v4066_v7  ;;  %v15667_v53 = vcombine.low %v4054_v63, %v4066_v7 }
 0x72d   : > { %13020 = vmatpush2.bf16.msra.mxu1 %v15427_v14  ;;  %v2891_v14 = vld [vmem:[%s16995_s26 + $0x450] sm:$0xff] }
 0x72e   : > { %13021 = vmatprep.subr.bf16.mxu1 %v15404_v58  ;;  %v14517_v58 = vcombine.low %v2903_v56, %v2915_v29  ;;  %v14493_v46 = vcombine.low %v2879_v36, %v2891_v14 }
 0x72f   : > { %12979 = vmatpush2.bf16.msra.mxu0 %v15043_v31  ;;  %v4030_v31 = vld [vmem:[%s16995_s26 + $0x27e8] sm:$0xff] }
 0x730   : > { %12980 = vmatprep.subr.bf16.mxu0 %v15020_v57  ;;  %v15643_v37 = vcombine.low %v4030_v31, %v4042_v8 }
 0x731   : > { %13022 = vmatpush2.bf16.msra.mxu1 %v15403_v21  ;;  %v14494_v21 = vcombine.high %v2879_v36, %v2891_v14 }
 0x732   : > { %13023 = vmatprep.subr.bf16.mxu1 %v15380_v47  ;;  %v2855_v47 = vld [vmem:[%s16995_s26 + $0x330] sm:$0xff] }
 0x733   : > { %12981 = vmatpush2.bf16.msra.mxu0 %v15019_v41  ;;  %v2867_v41 = vld [vmem:[%s16995_s26 + $0x390] sm:$0xff] }
 0x734   : > { %12982 = vmatprep.subr.bf16.mxu0 %v14996_v19  ;;  %v15644_v19 = vcombine.high %v4030_v31, %v4042_v8  ;;  %v14470_v23 = vcombine.high %v2855_v47, %v2867_v41  ;;  %v14469_v2 = vcombine.low %v2855_v47, %v2867_v41  ;;  %v2771_v31 = vld [vmem:[%s16995_s26 + $0x90] sm:$0xff] }
 0x735   : > { %13024 = vmatpush2.bf16.msra.mxu1 %v15379_v25 }
 0x736   : > { %13025 = vmatprep.subr.bf16.mxu1 %v15356_v26 }
 0x737   : > { %12983 = vmatpush2.bf16.msra.mxu0 %v14995_v27 }
 0x738   : > { %12984 = vmatprep.subr.bf16.mxu0 %v14972_v3  ;;  %v2831_v3 = vld [vmem:[%s16995_s26 + $0x270] sm:$0xff] }
 0x739   : > { %13026 = vmatpush2.bf16.msra.mxu1 %v15355_v9  ;;  %v2843_v9 = vld [vmem:[%s16995_s26 + $0x2d0] sm:$0xff] }
 0x73a   : > { %13027 = vmatprep.subr.bf16.mxu1 %v15332_v42  ;;  %v3982_v42 = vld [vmem:[%s16995_s26 + $0x2668] sm:$0xff]  ;;  %v14446_v43 = vcombine.high %v2831_v3, %v2843_v9  ;;  %v14445_v55 = vcombine.low %v2831_v3, %v2843_v9 }
 0x73b   : > { %12985 = vmatpush2.bf16.msra.mxu0 %v14971_v15  ;;  %v3994_v15 = vld [vmem:[%s16995_s26 + $0x26c8] sm:$0xff] }
 0x73c   : > { %12986 = vmatprep.subr.bf16.mxu0 %v14948_v45  ;;  %v2807_v45 = vld [vmem:[%s16995_s26 + $0x1b0] sm:$0xff]  ;;  %v15596_v54 = vcombine.high %v3982_v42, %v3994_v15  ;;  %v15595_v29 = vcombine.low %v3982_v42, %v3994_v15  ;;  %v4246_v9 = vld [vmem:[%s16995_s26 + $0x2ea8] sm:$0xff] }
 0x73d   : > { %13028 = vmatpush2.bf16.msra.mxu1 %v15331_v49  ;;  %v2819_v49 = vld [vmem:[%s16995_s26 + $0x210] sm:$0xff] }
 0x73e   : > { %13079 = vmatprep.subr.bf16.mxu1 %v14542_v59  ;;  %v3958_v59 = vld [vmem:[%s16995_s26 + $0x25a8] sm:$0xff]  ;;  %v14422_v56 = vcombine.high %v2807_v45, %v2819_v49  ;;  %v14421_v7 = vcombine.low %v2807_v45, %v2819_v49  ;;  %v3071_v42 = vld [vmem:[%s16995_s26 + $0x9f0] sm:$0xff] }
 0x73f   : > { %12987 = vmatpush2.bf16.msra.mxu0 %v14947_v61  ;;  %v3970_v61 = vld [vmem:[%s16995_s26 + $0x2608] sm:$0xff]  ;;  %v3083_v15 = vld [vmem:[%s16995_s26 + $0xa50] sm:$0xff] }
 0x740   : > { %v18093_v4 = vpop.f32.mrf.mxu1  ;;  %13030 = vmatmul.mubr.bf16.vlgmr.msra.gmra.mxu1 %v17319_v12  ;;  %13038 = vmatprep.subr.bf16.mxu0 %v15692_v52  ;;  %v2783_v52 = vld [vmem:[%s16995_s26 + $0xf0] sm:$0xff]  ;;  %v15572_v63 = vcombine.high %v3958_v59, %v3970_v61  ;;  %v4222_v45 = vld [vmem:[%s16995_s26 + $0x2de8] sm:$0xff] }
 0x741   : > { %13080 = vmatpush1.bf16.msra.mxu1 %v14541_v5  ;;  %13111 = vmatprep.mubr.bf16.mxu1 %v17160_v50  ;;  %v2795_v5 = vld [vmem:[%s16995_s26 + $0x150] sm:$0xff]  ;;  %v4234_v49 = vld [vmem:[%s16995_s26 + $0x2e48] sm:$0xff] }
 0x742   : > { %v12744_v16 = vpop.f32.mrf.mxu0  ;;  %12989 = vmatmul.mubr.bf16.vlgmr.msra.gmra.mxu0 %v17246_v30  ;;  %v18100_v57 = vpop.f32.mrf.mxu1  ;;  %13081 = vmatprep.subr.bf16.mxu1 %v14518_v18  ;;  %v3934_v18 = vld [vmem:[%s16995_s26 + $0x24e8] sm:$0xff]  ;;  %v14398_v14 = vcombine.high %v2783_v52, %v2795_v5 }
 0x743   : > { %v12745_v6 = vadd.f32 %v12744_v16, %v18029_v28  ;;  %13039 = vmatpush1.bf16.msra.mxu0 %v15691_v13  ;;  %13070 = vmatprep.mubr.bf16.mxu0 %v17376_v20  ;;  %v4018_v28 = vld [vmem:[%s16995_s26 + $0x2788] sm:$0xff] }
 0x744   : > { %v12746_v39 = vpop.f32.mrf.mxu0  ;;  %v12789_v24 = vpop.f32.mrf.mxu1  ;;  %13040 = vmatprep.subr.bf16.mxu0 %v15668_v35  ;;  %v15619_v44 = vcombine.low %v4006_v48, %v4018_v28  ;;  %v3946_v13 = vld [vmem:[%s16995_s26 + $0x2548] sm:$0xff]  ;;  %v15571_v35 = vcombine.low %v3958_v59, %v3970_v61  ;;  %v3047_v59 = vld [vmem:[%s16995_s26 + $0x930] sm:$0xff] }
 0x745   : > { %16129 = vtanh.f32 %v12745_v6  ;;  %v12747_v25 = vadd.f32 %v12746_v39, %v18033_v1  ;;  %13082 = vmatpush1.bf16.msra.mxu1 %v14517_v58  ;;  %v15620_v1 = vcombine.high %v4006_v48, %v4018_v28  ;;  %v2759_v58 = vld [vmem:[%s16995_s26 + $0x30] sm:$0xff]  ;;  %v15548_v16 = vcombine.high %v3934_v18, %v3946_v13  ;;  %v3910_v6 = vld [vmem:[%s16995_s26 + $0x2428] sm:$0xff] }
 0x746   : > { %v12748_v26 = vpop.f32.mrf.mxu0  ;;  %v12790_v27 = vpop.f32.mrf.mxu1  ;;  %13083 = vmatprep.subr.bf16.mxu1 %v14494_v21  ;;  %v14397_v21 = vcombine.low %v2783_v52, %v2795_v5  ;;  %v14374_v47 = vcombine.high %v2759_v58, %v2771_v31  ;;  %v15547_v41 = vcombine.low %v3934_v18, %v3946_v13  ;;  %v3119_v39 = vld [vmem:[%s16995_s26 + $0xb70] sm:$0xff]  ;;  %v4282_v48 = vld [vmem:[%s16995_s26 + $0x2fc8] sm:$0xff] }
 0x747   : > { %16131 = vtanh.f32 %v12747_v25  ;;  %13041 = vmatpush1.bf16.msra.mxu0 %v15667_v53  ;;  %v3922_v53 = vld [vmem:[%s16995_s26 + $0x2488] sm:$0xff]  ;;  %v3131_v24 = vld [vmem:[%s16995_s26 + $0xbd0] sm:$0xff]  ;;  %v14373_v25 = vcombine.low %v2759_v58, %v2771_v31 }
 0x748   : > { %v12749_v11 = vpop.f32.mrf.mxu0  ;;  %13042 = vmatprep.subr.bf16.mxu0 %v15644_v19  ;;  %v15524_v19 = vcombine.high %v3910_v6, %v3922_v53  ;;  %v14734_v28 = vcombine.high %v3119_v39, %v3131_v24  ;;  %v15523_v26 = vcombine.low %v3910_v6, %v3922_v53  ;;  %v3095_v27 = vld [vmem:[%s16995_s26 + $0xab0] sm:$0xff]  ;;  %v14733_v3 = vcombine.low %v3119_v39, %v3131_v24  ;;  %v4198_v52 = vld [vmem:[%s16995_s26 + $0x2d28] sm:$0xff] }
 0x749   : > { %13084 = vmatpush1.bf16.msra.mxu1 %v14493_v46  ;;  %v4270_v46 = vld [vmem:[%s16995_s26 + $0x2f68] sm:$0xff]  ;;  %v3059_v61 = vld [vmem:[%s16995_s26 + $0x990] sm:$0xff] }
 0x74a   : > { %13085 = vmatprep.subr.bf16.mxu1 %v14470_v23  ;;  %v3107_v23 = vld [vmem:[%s16995_s26 + $0xb10] sm:$0xff]  ;;  %v4258_v11 = vld [vmem:[%s16995_s26 + $0x2f08] sm:$0xff] }
 0x74b   : > { %13043 = vmatpush1.bf16.msra.mxu0 %v15643_v37  ;;  %v15884_v37 = vcombine.high %v4270_v46, %v4282_v48  ;;  %v4210_v5 = vld [vmem:[%s16995_s26 + $0x2d88] sm:$0xff]  ;;  %v3023_v18 = vld [vmem:[%s16995_s26 + $0x870] sm:$0xff] }
 0x74c   : > { %13044 = vmatprep.subr.bf16.mxu0 %v15620_v1  ;;  %v14710_v1 = vcombine.high %v3095_v27, %v3107_v23  ;;  %v3035_v13 = vld [vmem:[%s16995_s26 + $0x8d0] sm:$0xff]  ;;  %v4186_v58 = vld [vmem:[%s16995_s26 + $0x2cc8] sm:$0xff] }
 0x74d   : > { %13086 = vmatpush1.bf16.msra.mxu1 %v14469_v2  ;;  %v15883_v2 = vcombine.low %v4270_v46, %v4282_v48  ;;  %v14638_v31 = vcombine.high %v3023_v18, %v3035_v13  ;;  %v14637_v53 = vcombine.low %v3023_v18, %v3035_v13  ;;  %v3287_v18 = vld [vmem:[%s16995_s26 + $0x10b0] sm:$0xff] }
 0x74e   : > { %13087 = vmatprep.subr.bf16.mxu1 %v14446_v43  ;;  %v15860_v43 = vcombine.high %v4246_v9, %v4258_v11  ;;  %v3299_v13 = vld [vmem:[%s16995_s26 + $0x1110] sm:$0xff] }
 0x74f   : > { %13045 = vmatpush1.bf16.msra.mxu0 %v15619_v44  ;;  %v14709_v44 = vcombine.low %v3095_v27, %v3107_v23 }
 0x750   : > { %13046 = vmatprep.subr.bf16.mxu0 %v15596_v54  ;;  %v14686_v54 = vcombine.high %v3071_v42, %v3083_v15 }
 0x751   : > { %13088 = vmatpush1.bf16.msra.mxu1 %v14445_v55  ;;  %v15859_v55 = vcombine.low %v4246_v9, %v4258_v11 }
 0x752   : > { %v16130_v36 = vpop.eup %16129  ;;  %13089 = vmatprep.subr.bf16.mxu1 %v14422_v56  ;;  %v15836_v56 = vcombine.high %v4222_v45, %v4234_v49 }
 0x753   : > { %14093 = vst [vmem:[%s17653_s5 + $0x30] sm:$0xff] %v16130_v36  ;;  %13047 = vmatpush1.bf16.msra.mxu0 %v15595_v29  ;;  %v14685_v29 = vcombine.low %v3071_v42, %v3083_v15  ;;  %v15812_v36 = vcombine.high %v4198_v52, %v4210_v5 }
 0x754   : > { %v16132_v8 = vpop.eup %16131  ;;  %13048 = vmatprep.subr.bf16.mxu0 %v15572_v63  ;;  %v14662_v63 = vcombine.high %v3047_v59, %v3059_v61 }
 0x755   : > { %14094 = vst [vmem:[%s17653_s5 + $0x38] sm:$0xff] %v16132_v8  ;;  %13090 = vmatpush1.bf16.msra.mxu1 %v14421_v7  ;;  %v15835_v7 = vcombine.low %v4222_v45, %v4234_v49  ;;  %v15811_v8 = vcombine.low %v4198_v52, %v4210_v5  ;;  %v3683_v52 = vld [vmem:[%s16995_s26 + $0x1d10] sm:$0xff] }
 0x756   : > { %13091 = vmatprep.subr.bf16.mxu1 %v14398_v14  ;;  %v14661_v14 = vcombine.low %v3047_v59, %v3059_v61  ;;  %v18164_v59 = vld [vmem:[%s17450_s1 + $0x8] sm:$0xff] }
 0x757   : > { %13049 = vmatpush1.bf16.msra.mxu0 %v15571_v35  ;;  %v4174_v35 = vld [vmem:[%s16995_s26 + $0x2c68] sm:$0xff] }
 0x758   : > { %13050 = vmatprep.subr.bf16.mxu0 %v15548_v16  ;;  %v2999_v16 = vld [vmem:[%s16995_s26 + $0x7b0] sm:$0xff]  ;;  %v15788_v6 = vcombine.high %v4174_v35, %v4186_v58  ;;  %v15787_v24 = vcombine.low %v4174_v35, %v4186_v58 }
 0x759   : > { %13092 = vmatpush1.bf16.msra.mxu1 %v14397_v21  ;;  %v3011_v21 = vld [vmem:[%s16995_s26 + $0x810] sm:$0xff] }
 0x75a   : > { %13093 = vmatprep.subr.bf16.mxu1 %v14374_v47  ;;  %v4150_v47 = vld [vmem:[%s16995_s26 + $0x2ba8] sm:$0xff]  ;;  %v14614_v39 = vcombine.high %v2999_v16, %v3011_v21  ;;  %v14613_v48 = vcombine.low %v2999_v16, %v3011_v21  ;;  %v3647_v58 = vld [vmem:[%s16995_s26 + $0x1bf0] sm:$0xff]  ;;  %v14902_v16 = vcombine.high %v3287_v18, %v3299_v13 }
 0x75b   : > { %13051 = vmatpush1.bf16.msra.mxu0 %v15547_v41  ;;  %v4162_v41 = vld [vmem:[%s16995_s26 + $0x2c08] sm:$0xff] }
 0x75c   : > { %13052 = vmatprep.subr.bf16.mxu0 %v15524_v19  ;;  %v2975_v19 = vld [vmem:[%s16995_s26 + $0x6f0] sm:$0xff]  ;;  %v15764_v46 = vcombine.high %v4150_v47, %v4162_v41  ;;  %v15763_v23 = vcombine.low %v4150_v47, %v4162_v41 }
 0x75d   : > { %13094 = vmatpush1.bf16.msra.mxu1 %v14373_v25  ;;  %v2987_v25 = vld [vmem:[%s16995_s26 + $0x750] sm:$0xff] }
 0x75e   : > { %13095 = vmatprep.subr.bf16.mxu1 %v14734_v28  ;;  %v4126_v28 = vld [vmem:[%s16995_s26 + $0x2ae8] sm:$0xff]  ;;  %v14590_v27 = vcombine.high %v2975_v19, %v2987_v25  ;;  %v14589_v11 = vcombine.low %v2975_v19, %v2987_v25  ;;  %v3275_v47 = vld [vmem:[%s16995_s26 + $0x1050] sm:$0xff] }
 0x75f   : > { %13053 = vmatpush1.bf16.msra.mxu0 %v15523_v26  ;;  %v4138_v26 = vld [vmem:[%s16995_s26 + $0x2b48] sm:$0xff] }
 0x760   : > { %13054 = vmatprep.subr.bf16.mxu0 %v15884_v37  ;;  %v2951_v37 = vld [vmem:[%s16995_s26 + $0x630] sm:$0xff]  ;;  %v15740_v9 = vcombine.high %v4126_v28, %v4138_v26  ;;  %v15739_v15 = vcombine.low %v4126_v28, %v4138_v26 }
 0x761   : > { %13096 = vmatpush2.bf16.msra.mxu1 %v14733_v3  ;;  %v2963_v3 = vld [vmem:[%s16995_s26 + $0x690] sm:$0xff] }
 0x762   : > { %13097 = vmatprep.subr.bf16.mxu1 %v14710_v1  ;;  %v4102_v1 = vld [vmem:[%s16995_s26 + $0x2a28] sm:$0xff]  ;;  %v14566_v42 = vcombine.high %v2951_v37, %v2963_v3  ;;  %v14565_v49 = vcombine.low %v2951_v37, %v2963_v3 }
 0x763   : > { %13055 = vmatpush2.bf16.msra.mxu0 %v15883_v2  ;;  %v4114_v2 = vld [vmem:[%s16995_s26 + $0x2a88] sm:$0xff] }
 0x764   : > { %13056 = vmatprep.subr.bf16.mxu0 %v15860_v43  ;;  %v3695_v43 = vld [vmem:[%s16995_s26 + $0x1d70] sm:$0xff]  ;;  %v15716_v45 = vcombine.high %v4102_v1, %v4114_v2 }
 0x765   : > { %13098 = vmatpush2.bf16.msra.mxu1 %v14709_v44  ;;  %v3707_v44 = vld [vmem:[%s16995_s26 + $0x1dd0] sm:$0xff] }
 0x766   : > { %13099 = vmatprep.subr.bf16.mxu1 %v14686_v54  ;;  %v3311_v54 = vld [vmem:[%s16995_s26 + $0x1170] sm:$0xff]  ;;  %v15310_v61 = vcombine.high %v3695_v43, %v3707_v44 }
 0x767   : > { %13057 = vmatpush2.bf16.msra.mxu0 %v15859_v55  ;;  %v3323_v55 = vld [vmem:[%s16995_s26 + $0x11d0] sm:$0xff] }
 0x768   : > { %13058 = vmatprep.subr.bf16.mxu0 %v15836_v56  ;;  %v15715_v56 = vcombine.low %v4102_v1, %v4114_v2  ;;  %v14926_v5 = vcombine.high %v3311_v54, %v3323_v55  ;;  %v14925_v35 = vcombine.low %v3311_v54, %v3323_v55  ;;  %v3215_v55 = vld [vmem:[%s16995_s26 + $0xe70] sm:$0xff] }
 0x769   : > { %13100 = vmatpush2.bf16.msra.mxu1 %v14685_v29  ;;  %v3671_v29 = vld [vmem:[%s16995_s26 + $0x1cb0] sm:$0xff] }
 0x76a   : > { %13101 = vmatprep.subr.bf16.mxu1 %v14662_v63  ;;  %v4330_v63 = vrot.slane %v18164_v59, %v17004_v32 }
 0x76b   : > { %13059 = vmatpush2.bf16.msra.mxu0 %v15835_v7  ;;  %v15309_v7 = vcombine.low %v3695_v43, %v3707_v44  ;;  %v3599_v43 = vld [vmem:[%s16995_s26 + $0x1a70] sm:$0xff] }
 0x76c   : > { %13060 = vmatprep.subr.bf16.mxu0 %v15812_v36  ;;  %v15286_v36 = vcombine.high %v3671_v29, %v3683_v52  ;;  %v12786_v21 = vadd.f32 %v18093_v4, %v4330_v63  ;;  %v14901_v4 = vcombine.low %v3287_v18, %v3299_v13  ;;  %v3611_v44 = vld [vmem:[%s16995_s26 + $0x1ad0] sm:$0xff] }
 0x76d   : > { %13102 = vmatpush2.bf16.msra.mxu1 %v14661_v14  ;;  %v4334_v14 = vrot.slane %v18164_v59, %v17007_v34  ;;  %v3191_v18 = vld [vmem:[%s16995_s26 + $0xdb0] sm:$0xff] }
 0x76e   : > { %13103 = vmatprep.subr.bf16.mxu1 %v14638_v31  ;;  %v3659_v31 = vld [vmem:[%s16995_s26 + $0x1c50] sm:$0xff] }
 0x76f   : > { %13061 = vmatpush2.bf16.msra.mxu0 %v15811_v8  ;;  %v12788_v19 = vadd.f32 %v18100_v57, %v4334_v14  ;;  %v15261_v3 = vcombine.low %v3647_v58, %v3659_v31  ;;  %v3239_v57 = vld [vmem:[%s16995_s26 + $0xf30] sm:$0xff] }
 0x770   : > { %13062 = vmatprep.subr.bf16.mxu0 %v15788_v6  ;;  %v15285_v6 = vcombine.low %v3671_v29, %v3683_v52  ;;  %v3575_v52 = vld [vmem:[%s16995_s26 + $0x19b0] sm:$0xff] }
 0x771   : > { %13104 = vmatpush2.bf16.msra.mxu1 %v14637_v53  ;;  %v3263_v53 = vld [vmem:[%s16995_s26 + $0xff0] sm:$0xff] }
 0x772   : > { %13105 = vmatprep.subr.bf16.mxu1 %v14614_v39  ;;  %v3203_v13 = vld [vmem:[%s16995_s26 + $0xe10] sm:$0xff] }
 0x773   : > { %13063 = vmatpush2.bf16.msra.mxu0 %v15787_v24  ;;  %v15262_v24 = vcombine.high %v3647_v58, %v3659_v31  ;;  %v3563_v58 = vld [vmem:[%s16995_s26 + $0x1950] sm:$0xff]  ;;  %v14806_v31 = vcombine.high %v3191_v18, %v3203_v13 }
 0x774   : > { %13064 = vmatprep.subr.bf16.mxu0 %v15764_v46  ;;  %v3623_v46 = vld [vmem:[%s16995_s26 + $0x1b30] sm:$0xff] }
 0x775   : > { %13106 = vmatpush2.bf16.msra.mxu1 %v14613_v48  ;;  %v3635_v48 = vld [vmem:[%s16995_s26 + $0x1b90] sm:$0xff] }
 0x776   : > { %13107 = vmatprep.subr.bf16.mxu1 %v14590_v27  ;;  %v14878_v27 = vcombine.high %v3263_v53, %v3275_v47  ;;  %v15238_v2 = vcombine.high %v3623_v46, %v3635_v48  ;;  %v15237_v54 = vcombine.low %v3623_v46, %v3635_v48  ;;  %v3887_v48 = vld [vmem:[%s16995_s26 + $0x2370] sm:$0xff] }
 0x777   : > { %13065 = vmatpush2.bf16.msra.mxu0 %v15763_v23 }
 0x778   : > { %13066 = vmatprep.subr.bf16.mxu0 %v15740_v9  ;;  %v3251_v9 = vld [vmem:[%s16995_s26 + $0xf90] sm:$0xff] }
 0x779   : > { %13108 = vmatpush2.bf16.msra.mxu1 %v14589_v11  ;;  %v14853_v29 = vcombine.low %v3239_v57, %v3251_v9 }
 0x77a   : > { %13109 = vmatprep.subr.bf16.mxu1 %v14566_v42 }
 0x77b   : > { %13067 = vmatpush2.bf16.msra.mxu0 %v15739_v15  ;;  %v14877_v15 = vcombine.low %v3263_v53, %v3275_v47  ;;  %v14805_v53 = vcombine.low %v3191_v18, %v3203_v13  ;;  %v3527_v47 = vld [vmem:[%s16995_s26 + $0x1830] sm:$0xff] }
 0x77c   : > { %13068 = vmatprep.subr.bf16.mxu0 %v15716_v45  ;;  %v3827_v18 = vld [vmem:[%s16995_s26 + $0x2190] sm:$0xff] }
 0x77d   : > { %13110 = vmatpush2.bf16.msra.mxu1 %v14565_v49  ;;  %v14854_v49 = vcombine.high %v3239_v57, %v3251_v9 }
 0x77e   : > { %13161 = vmatprep.subr.bf16.mxu1 %v15310_v61  ;;  %v3227_v61 = vld [vmem:[%s16995_s26 + $0xed0] sm:$0xff] }
 0x77f   : > { %13069 = vmatpush2.bf16.msra.mxu0 %v15715_v56  ;;  %v15214_v56 = vcombine.high %v3599_v43, %v3611_v44  ;;  %v14830_v63 = vcombine.high %v3215_v55, %v3227_v61  ;;  %v14829_v14 = vcombine.low %v3215_v55, %v3227_v61  ;;  %v3851_v55 = vld [vmem:[%s16995_s26 + $0x2250] sm:$0xff] }
 0x780   : > { %v12867_v8 = vpop.f32.mrf.mxu1  ;;  %13112 = vmatmul.mubr.bf16.vlgmr.msra.gmra.mxu1 %v17165_v60  ;;  %13120 = vmatprep.subr.bf16.mxu0 %v14926_v5  ;;  %v3587_v5 = vld [vmem:[%s16995_s26 + $0x1a10] sm:$0xff] }
 0x781   : > { %13162 = vmatpush1.bf16.msra.mxu1 %v15309_v7  ;;  %13193 = vmatprep.mubr.bf16.mxu1 %v17317_v10  ;;  %v15213_v7 = vcombine.low %v3599_v43, %v3611_v44  ;;  %v3479_v43 = vld [vmem:[%s16995_s26 + $0x16b0] sm:$0xff] }
 0x782   : > { %v12826_v41 = vpop.f32.mrf.mxu0  ;;  %13071 = vmatmul.mubr.bf16.vlgmr.msra.gmra.mxu0 %v17380_v33  ;;  %v12869_v39 = vpop.f32.mrf.mxu1  ;;  %13163 = vmatprep.subr.bf16.mxu1 %v15286_v36  ;;  %v15190_v36 = vcombine.high %v3575_v52, %v3587_v5  ;;  %v3491_v44 = vld [vmem:[%s16995_s26 + $0x1710] sm:$0xff] }
 0x783   : > { %v12827_v25 = vadd.f32 %v12826_v41, %v12786_v21  ;;  %13121 = vmatpush1.bf16.msra.mxu0 %v14925_v35  ;;  %13152 = vmatprep.mubr.bf16.mxu0 %v17242_v22  ;;  %v3551_v35 = vld [vmem:[%s16995_s26 + $0x18f0] sm:$0xff]  ;;  %v15094_v61 = vcombine.high %v3479_v43, %v3491_v44 }
 0x784   : > { %v12828_v28 = vpop.f32.mrf.mxu0  ;;  %v12871_v26 = vpop.f32.mrf.mxu1  ;;  %13122 = vmatprep.subr.bf16.mxu0 %v14902_v16  ;;  %v3167_v16 = vld [vmem:[%s16995_s26 + $0xcf0] sm:$0xff] }
 0x785   : > { %v18186_v23 = vadd.f32 %v12867_v8, %v12827_v25  ;;  %v12829_v37 = vadd.f32 %v12828_v28, %v12788_v19  ;;  %13164 = vmatpush1.bf16.msra.mxu1 %v15285_v6  ;;  %v15189_v8 = vcombine.low %v3575_v52, %v3587_v5  ;;  %v3179_v21 = vld [vmem:[%s16995_s26 + $0xd50] sm:$0xff]  ;;  %v15166_v6 = vcombine.high %v3551_v35, %v3563_v58 }
 0x786   : > { %v12830_v11 = vpop.f32.mrf.mxu0  ;;  %v12872_v1 = vpop.f32.mrf.mxu1  ;;  %13165 = vmatprep.subr.bf16.mxu1 %v15262_v24  ;;  %v3539_v41 = vld [vmem:[%s16995_s26 + $0x1890] sm:$0xff]  ;;  %v15165_v24 = vcombine.low %v3551_v35, %v3563_v58  ;;  %v14781_v46 = vcombine.low %v3167_v16, %v3179_v21 }
 0x787   : > { %v18190_v42 = vadd.f32 %v12869_v39, %v12829_v37  ;;  %13123 = vmatpush1.bf16.msra.mxu0 %v14901_v4  ;;  %v14782_v39 = vcombine.high %v3167_v16, %v3179_v21  ;;  %v3143_v19 = vld [vmem:[%s16995_s26 + $0xc30] sm:$0xff]  ;;  %v15142_v4 = vcombine.high %v3527_v47, %v3539_v41 }
 0x788   : > { %v12831_v45 = vpop.f32.mrf.mxu0  ;;  %13124 = vmatprep.subr.bf16.mxu0 %v14878_v27  ;;  %v3155_v25 = vld [vmem:[%s16995_s26 + $0xc90] sm:$0xff]  ;;  %v15141_v27 = vcombine.low %v3527_v47, %v3539_v41 }
 0x789   : > { %13166 = vmatpush1.bf16.msra.mxu1 %v15261_v3  ;;  %v3899_v28 = vld [vmem:[%s16995_s26 + $0x23d0] sm:$0xff]  ;;  %v14758_v26 = vcombine.high %v3143_v19, %v3155_v25  ;;  %v14757_v9 = vcombine.low %v3143_v19, %v3155_v25 }
 0x78a   : > { %13167 = vmatprep.subr.bf16.mxu1 %v15238_v2  ;;  %v3503_v37 = vld [vmem:[%s16995_s26 + $0x1770] sm:$0xff]  ;;  %v15502_v57 = vcombine.high %v3887_v48, %v3899_v28 }
 0x78b   : > { %13125 = vmatpush1.bf16.msra.mxu0 %v14877_v15  ;;  %v3515_v3 = vld [vmem:[%s16995_s26 + $0x17d0] sm:$0xff]  ;;  %v15501_v15 = vcombine.low %v3887_v48, %v3899_v28 }
 0x78c   : > { %13126 = vmatprep.subr.bf16.mxu0 %v14854_v49  ;;  %v3863_v11 = vld [vmem:[%s16995_s26 + $0x22b0] sm:$0xff]  ;;  %v15118_v2 = vcombine.high %v3503_v37, %v3515_v3  ;;  %v15117_v49 = vcombine.low %v3503_v37, %v3515_v3 }
 0x78d   : > { %13168 = vmatpush1.bf16.msra.mxu1 %v15237_v54  ;;  %v3875_v1 = vld [vmem:[%s16995_s26 + $0x2310] sm:$0xff] }
 0x78e   : > { %13169 = vmatprep.subr.bf16.mxu1 %v15214_v56  ;;  %v15478_v45 = vcombine.high %v3863_v11, %v3875_v1  ;;  %v3839_v54 = vld [vmem:[%s16995_s26 + $0x21f0] sm:$0xff]  ;;  %v15477_v56 = vcombine.low %v3863_v11, %v3875_v1 }
 0x78f   : > { %13127 = vmatpush1.bf16.msra.mxu0 %v14853_v29  ;;  %v3455_v29 = vld [vmem:[%s16995_s26 + $0x15f0] sm:$0xff]  ;;  %v15454_v5 = vcombine.high %v3839_v54, %v3851_v55 }
 0x790   : > { %13128 = vmatprep.subr.bf16.mxu0 %v14830_v63  ;;  %v3467_v52 = vld [vmem:[%s16995_s26 + $0x1650] sm:$0xff]  ;;  %v15093_v63 = vcombine.low %v3479_v43, %v3491_v44 }
 0x791   : > { %13170 = vmatpush1.bf16.msra.mxu1 %v15213_v7  ;;  %v3815_v7 = vld [vmem:[%s16995_s26 + $0x2130] sm:$0xff]  ;;  %v15070_v13 = vcombine.high %v3455_v29, %v3467_v52 }
 0x792   : > { %13171 = vmatprep.subr.bf16.mxu1 %v15190_v36  ;;  %v15453_v36 = vcombine.low %v3839_v54, %v3851_v55  ;;  %v3443_v35 = vld [vmem:[%s16995_s26 + $0x1590] sm:$0xff]  ;;  %v15430_v58 = vcombine.high %v3815_v7, %v3827_v18 }
 0x793   : > { %13129 = vmatpush1.bf16.msra.mxu0 %v14829_v14  ;;  %v3431_v14 = vld [vmem:[%s16995_s26 + $0x1530] sm:$0xff] }
 0x794   : > { %13130 = vmatprep.subr.bf16.mxu0 %v14806_v31  ;;  %v15069_v31 = vcombine.low %v3455_v29, %v3467_v52  ;;  %v3803_v16 = vld [vmem:[%s16995_s26 + $0x20d0] sm:$0xff]  ;;  %v15046_v21 = vcombine.high %v3431_v14, %v3443_v35  ;;  %v2940_v29 = vld [vmem:[%s16995_s26 + $0x5d8] sm:$0xff] }
 0x795   : > { %13172 = vmatpush1.bf16.msra.mxu1 %v15189_v8  ;;  %v3791_v8 = vld [vmem:[%s16995_s26 + $0x2070] sm:$0xff] }
 0x796   : > { %13173 = vmatprep.subr.bf16.mxu1 %v15166_v6  ;;  %v15429_v6 = vcombine.low %v3815_v7, %v3827_v18  ;;  %v3419_v47 = vld [vmem:[%s16995_s26 + $0x14d0] sm:$0xff]  ;;  %v15406_v41 = vcombine.high %v3791_v8, %v3803_v16 }
 0x797   : > { %13131 = vmatpush1.bf16.msra.mxu0 %v14805_v53  ;;  %v3407_v53 = vld [vmem:[%s16995_s26 + $0x1470] sm:$0xff] }
 0x798   : > { %13132 = vmatprep.subr.bf16.mxu0 %v14782_v39  ;;  %v15045_v39 = vcombine.low %v3431_v14, %v3443_v35  ;;  %v3779_v19 = vld [vmem:[%s16995_s26 + $0x2010] sm:$0xff]  ;;  %v15022_v25 = vcombine.high %v3407_v53, %v3419_v47  ;;  %v2916_v14 = vld [vmem:[%s16995_s26 + $0x518] sm:$0xff] }
 0x799   : > { %13174 = vmatpush1.bf16.msra.mxu1 %v15165_v24  ;;  %v3767_v24 = vld [vmem:[%s16995_s26 + $0x1fb0] sm:$0xff] }
 0x79a   : > { %13175 = vmatprep.subr.bf16.mxu1 %v15142_v4  ;;  %v15405_v4 = vcombine.low %v3791_v8, %v3803_v16  ;;  %v3395_v48 = vld [vmem:[%s16995_s26 + $0x1410] sm:$0xff]  ;;  %v15382_v28 = vcombine.high %v3767_v24, %v3779_v19 }
 0x79b   : > { %13133 = vmatpush1.bf16.msra.mxu0 %v14781_v46  ;;  %v3383_v46 = vld [vmem:[%s16995_s26 + $0x13b0] sm:$0xff] }
 0x79c   : > { %13134 = vmatprep.subr.bf16.mxu0 %v14758_v26  ;;  %v15021_v26 = vcombine.low %v3407_v53, %v3419_v47  ;;  %v3755_v37 = vld [vmem:[%s16995_s26 + $0x1f50] sm:$0xff]  ;;  %v14998_v3 = vcombine.high %v3383_v46, %v3395_v48  ;;  %v2892_v53 = vld [vmem:[%s16995_s26 + $0x458] sm:$0xff] }
 0x79d   : > { %13176 = vmatpush1.bf16.msra.mxu1 %v15141_v27  ;;  %v3743_v27 = vld [vmem:[%s16995_s26 + $0x1ef0] sm:$0xff] }
 0x79e   : > { %13177 = vmatprep.subr.bf16.mxu1 %v15502_v57  ;;  %v15381_v57 = vcombine.low %v3767_v24, %v3779_v19  ;;  %v3371_v11 = vld [vmem:[%s16995_s26 + $0x1350] sm:$0xff]  ;;  %v15358_v1 = vcombine.high %v3743_v27, %v3755_v37 }
 0x79f   : > { %13135 = vmatpush1.bf16.msra.mxu0 %v14757_v9  ;;  %v3359_v9 = vld [vmem:[%s16995_s26 + $0x12f0] sm:$0xff] }
 0x7a0   : > { %13136 = vmatprep.subr.bf16.mxu0 %v15118_v2  ;;  %v14997_v2 = vcombine.low %v3383_v46, %v3395_v48  ;;  %v3731_v43 = vld [vmem:[%s16995_s26 + $0x1e90] sm:$0xff]  ;;  %v14974_v44 = vcombine.high %v3359_v9, %v3371_v11 }
 0x7a1   : > { %13178 = vmatpush2.bf16.msra.mxu1 %v15501_v15  ;;  %v3719_v15 = vld [vmem:[%s16995_s26 + $0x1e30] sm:$0xff] }
 0x7a2   : > { %13179 = vmatprep.subr.bf16.mxu1 %v15478_v45  ;;  %v15357_v45 = vcombine.low %v3743_v27, %v3755_v37  ;;  %v3347_v54 = vld [vmem:[%s16995_s26 + $0x1290] sm:$0xff]  ;;  %v15334_v55 = vcombine.high %v3719_v15, %v3731_v43  ;;  %v2868_v27 = vld [vmem:[%s16995_s26 + $0x398] sm:$0xff] }
 0x7a3   : > { %13137 = vmatpush2.bf16.msra.mxu0 %v15117_v49  ;;  %v3335_v49 = vld [vmem:[%s16995_s26 + $0x1230] sm:$0xff] }
 0x7a4   : > { %13138 = vmatprep.subr.bf16.mxu0 %v15094_v61  ;;  %v14973_v61 = vcombine.low %v3359_v9, %v3371_v11  ;;  %v14950_v52 = vcombine.high %v3335_v49, %v3347_v54  ;;  %v4091_v7 = vld [vmem:[%s16995_s26 + $0x29d0] sm:$0xff] }
 0x7a5   : > { %13180 = vmatpush2.bf16.msra.mxu1 %v15477_v56  ;;  %v2928_v56 = vld [vmem:[%s16995_s26 + $0x578] sm:$0xff]  ;;  %v4067_v8 = vld [vmem:[%s16995_s26 + $0x2910] sm:$0xff] }
 0x7a6   : > { %13181 = vmatprep.subr.bf16.mxu1 %v15454_v5  ;;  %v15333_v5 = vcombine.low %v3719_v15, %v3731_v43  ;;  %v14544_v18 = vcombine.high %v2928_v56, %v2940_v29  ;;  %v4031_v24 = vld [vmem:[%s16995_s26 + $0x27f0] sm:$0xff] }
 0x7a7   : > { %13139 = vmatpush2.bf16.msra.mxu0 %v15093_v63  ;;  %v4079_v63 = vld [vmem:[%s16995_s26 + $0x2970] sm:$0xff] }
 0x7a8   : > { %13140 = vmatprep.subr.bf16.mxu0 %v15070_v13  ;;  %v14949_v13 = vcombine.low %v3335_v49, %v3347_v54  ;;  %v15694_v35 = vcombine.high %v4079_v63, %v4091_v7  ;;  %v4043_v19 = vld [vmem:[%s16995_s26 + $0x2850] sm:$0xff]  ;;  %v2844_v49 = vld [vmem:[%s16995_s26 + $0x2d8] sm:$0xff] }
 0x7a9   : > { %13182 = vmatpush2.bf16.msra.mxu1 %v15453_v36  ;;  %v2904_v36 = vld [vmem:[%s16995_s26 + $0x4b8] sm:$0xff] }
 0x7aa   : > { %13183 = vmatprep.subr.bf16.mxu1 %v15430_v58  ;;  %v14543_v58 = vcombine.low %v2928_v56, %v2940_v29  ;;  %v14520_v16 = vcombine.high %v2904_v36, %v2916_v14  ;;  %v3995_v56 = vld [vmem:[%s16995_s26 + $0x26d0] sm:$0xff] }
 0x7ab   : > { %13141 = vmatpush2.bf16.msra.mxu0 %v15069_v31  ;;  %v4055_v31 = vld [vmem:[%s16995_s26 + $0x28b0] sm:$0xff] }
 0x7ac   : > { %13142 = vmatprep.subr.bf16.mxu0 %v15046_v21  ;;  %v15693_v21 = vcombine.low %v4079_v63, %v4091_v7  ;;  %v2820_v63 = vld [vmem:[%s16995_s26 + $0x218] sm:$0xff] }
 0x7ad   : > { %13184 = vmatpush2.bf16.msra.mxu1 %v15429_v6  ;;  %v2880_v6 = vld [vmem:[%s16995_s26 + $0x3f8] sm:$0xff] }
 0x7ae   : > { %13185 = vmatprep.subr.bf16.mxu1 %v15406_v41  ;;  %v15670_v41 = vcombine.high %v4055_v31, %v4067_v8  ;;  %v14496_v46 = vcombine.high %v2880_v6, %v2892_v53  ;;  %v14495_v11 = vcombine.low %v2880_v6, %v2892_v53  ;;  %v3947_v6 = vld [vmem:[%s16995_s26 + $0x2550] sm:$0xff] }
 0x7af   : > { %13143 = vmatpush2.bf16.msra.mxu0 %v15045_v39  ;;  %v14519_v39 = vcombine.low %v2904_v36, %v2916_v14  ;;  %v3971_v36 = vld [vmem:[%s16995_s26 + $0x2610] sm:$0xff] }
 0x7b0   : > { %13144 = vmatprep.subr.bf16.mxu0 %v15022_v25 }
 0x7b1   : > { %13186 = vmatpush2.bf16.msra.mxu1 %v15405_v4 }
 0x7b2   : > { %13187 = vmatprep.subr.bf16.mxu1 %v15382_v28  ;;  %v15669_v28 = vcombine.low %v4055_v31, %v4067_v8  ;;  %v2796_v31 = vld [vmem:[%s16995_s26 + $0x158] sm:$0xff] }
 0x7b3   : > { %13145 = vmatpush2.bf16.msra.mxu0 %v15021_v26  ;;  %v2856_v26 = vld [vmem:[%s16995_s26 + $0x338] sm:$0xff] }
 0x7b4   : > { %13146 = vmatprep.subr.bf16.mxu0 %v14998_v3  ;;  %v14472_v43 = vcombine.high %v2856_v26, %v2868_v27 }
 0x7b5   : > { %13188 = vmatpush2.bf16.msra.mxu1 %v15381_v57  ;;  %v15646_v57 = vcombine.high %v4031_v24, %v4043_v19 }
 0x7b6   : > { %13189 = vmatprep.subr.bf16.mxu1 %v15358_v1  ;;  %v4007_v1 = vld [vmem:[%s16995_s26 + $0x2730] sm:$0xff] }
 0x7b7   : > { %13147 = vmatpush2.bf16.msra.mxu0 %v14997_v2 }
 0x7b8   : > { %13148 = vmatprep.subr.bf16.mxu0 %v14974_v44  ;;  %v15645_v44 = vcombine.low %v4031_v24, %v4043_v19  ;;  %v2760_v24 = vld [vmem:[%s16995_s26 + $0x38] sm:$0xff] }
 0x7b9   : > { %13190 = vmatpush2.bf16.msra.mxu1 %v15357_v45  ;;  %v2832_v45 = vld [vmem:[%s16995_s26 + $0x278] sm:$0xff] }
 0x7ba   : > { %13191 = vmatprep.subr.bf16.mxu1 %v15334_v55  ;;  %v14471_v55 = vcombine.low %v2856_v26, %v2868_v27  ;;  %v14448_v29 = vcombine.high %v2832_v45, %v2844_v49  ;;  %v2772_v19 = vld [vmem:[%s16995_s26 + $0x98] sm:$0xff]  ;;  %v3923_v26 = vld [vmem:[%s16995_s26 + $0x2490] sm:$0xff] }
 0x7bb   : > { %13149 = vmatpush2.bf16.msra.mxu0 %v14973_v61  ;;  %v3983_v61 = vld [vmem:[%s16995_s26 + $0x2670] sm:$0xff]  ;;  %v14376_v27 = vcombine.high %v2760_v24, %v2772_v19 }
 0x7bc   : > { %13150 = vmatprep.subr.bf16.mxu0 %v14950_v52  ;;  %v15598_v7 = vcombine.high %v3983_v61, %v3995_v56 }
 0x7bd   : > { %13192 = vmatpush2.bf16.msra.mxu1 %v15333_v5  ;;  %v2808_v5 = vld [vmem:[%s16995_s26 + $0x1b8] sm:$0xff] }
 0x7be   : > { %13243 = vmatprep.subr.bf16.mxu1 %v14544_v18  ;;  %v14447_v18 = vcombine.low %v2832_v45, %v2844_v49  ;;  %v14424_v14 = vcombine.high %v2808_v5, %v2820_v63 }
 0x7bf   : > { %13151 = vmatpush2.bf16.msra.mxu0 %v14949_v13  ;;  %v3959_v13 = vld [vmem:[%s16995_s26 + $0x25b0] sm:$0xff] }
 0x7c0   : > { %v18250_v47 = vpop.f32.mrf.mxu1  ;;  %13194 = vmatmul.mubr.bf16.vlgmr.msra.gmra.mxu1 %v17319_v12  ;;  %13202 = vmatprep.subr.bf16.mxu0 %v15694_v35  ;;  %v15597_v35 = vcombine.low %v3983_v61, %v3995_v56  ;;  %v15574_v8 = vcombine.high %v3959_v13, %v3971_v36  ;;  %v3072_v56 = vld [vmem:[%s16995_s26 + $0x9f8] sm:$0xff] }
 0x7c1   : > { %13244 = vmatpush1.bf16.msra.mxu1 %v14543_v58  ;;  %13275 = vmatprep.mubr.bf16.mxu1 %v17160_v50  ;;  %v2784_v58 = vld [vmem:[%s16995_s26 + $0xf8] sm:$0xff] }
 0x7c2   : > { %v12908_v25 = vpop.f32.mrf.mxu0  ;;  %13153 = vmatmul.mubr.bf16.vlgmr.msra.gmra.mxu0 %v17246_v30  ;;  %v18257_v4 = vpop.f32.mrf.mxu1  ;;  %13245 = vmatprep.subr.bf16.mxu1 %v14520_v16  ;;  %v14423_v16 = vcombine.low %v2808_v5, %v2820_v63  ;;  %v4223_v63 = vld [vmem:[%s16995_s26 + $0x2df0] sm:$0xff] }
 0x7c3   : > { %v12909_v48 = vadd.f32 %v12908_v25, %v18186_v23  ;;  %13203 = vmatpush1.bf16.msra.mxu0 %v15693_v21  ;;  %13234 = vmatprep.mubr.bf16.mxu0 %v17376_v20  ;;  %v4019_v23 = vld [vmem:[%s16995_s26 + $0x2790] sm:$0xff] }
 0x7c4   : > { %v12910_v37 = vpop.f32.mrf.mxu0  ;;  %v12953_v3 = vpop.f32.mrf.mxu1  ;;  %13204 = vmatprep.subr.bf16.mxu0 %v15670_v41  ;;  %v15621_v52 = vcombine.low %v4007_v1, %v4019_v23  ;;  %v3935_v21 = vld [vmem:[%s16995_s26 + $0x24f0] sm:$0xff]  ;;  %v14400_v41 = vcombine.high %v2784_v58, %v2796_v31 }
 0x7c5   : > { %16133 = vtanh.f32 %v12909_v48  ;;  %v12911_v9 = vadd.f32 %v12910_v37, %v18190_v42  ;;  %13246 = vmatpush1.bf16.msra.mxu1 %v14519_v39  ;;  %v15622_v42 = vcombine.high %v4007_v1, %v4019_v23  ;;  %v15573_v39 = vcombine.low %v3959_v13, %v3971_v36  ;;  %v3120_v3 = vld [vmem:[%s16995_s26 + $0xb78] sm:$0xff]  ;;  %v4271_v1 = vld [vmem:[%s16995_s26 + $0x2f70] sm:$0xff] }
 0x7c6   : > { %v12912_v2 = vpop.f32.mrf.mxu0  ;;  %v12954_v15 = vpop.f32.mrf.mxu1  ;;  %13247 = vmatprep.subr.bf16.mxu1 %v14496_v46  ;;  %v15550_v46 = vcombine.high %v3935_v21, %v3947_v6  ;;  %v14399_v48 = vcombine.low %v2784_v58, %v2796_v31  ;;  %v15549_v37 = vcombine.low %v3935_v21, %v3947_v6  ;;  %v4283_v23 = vld [vmem:[%s16995_s26 + $0x2fd0] sm:$0xff]  ;;  %v3048_v36 = vld [vmem:[%s16995_s26 + $0x938] sm:$0xff] }
 0x7c7   : > { %16135 = vtanh.f32 %v12911_v9  ;;  %13205 = vmatpush1.bf16.msra.mxu0 %v15669_v28  ;;  %v3911_v28 = vld [vmem:[%s16995_s26 + $0x2430] sm:$0xff]  ;;  %v15886_v45 = vcombine.high %v4271_v1, %v4283_v23  ;;  %v15885_v61 = vcombine.low %v4271_v1, %v4283_v23  ;;  %v3024_v6 = vld [vmem:[%s16995_s26 + $0x878] sm:$0xff] }
 0x7c8   : > { %v12913_v54 = vpop.f32.mrf.mxu0  ;;  %13206 = vmatprep.subr.bf16.mxu0 %v15646_v57  ;;  %v3132_v57 = vld [vmem:[%s16995_s26 + $0xbd8] sm:$0xff]  ;;  %v15526_v9 = vcombine.high %v3911_v28, %v3923_v26  ;;  %v15525_v15 = vcombine.low %v3911_v28, %v3923_v26  ;;  %v4199_v31 = vld [vmem:[%s16995_s26 + $0x2d30] sm:$0xff] }
 0x7c9   : > { %13248 = vmatpush1.bf16.msra.mxu1 %v14495_v11  ;;  %v14375_v11 = vcombine.low %v2760_v24, %v2772_v19  ;;  %v14736_v2 = vcombine.high %v3120_v3, %v3132_v57  ;;  %v14735_v49 = vcombine.low %v3120_v3, %v3132_v57  ;;  %v4247_v54 = vld [vmem:[%s16995_s26 + $0x2eb0] sm:$0xff]  ;;  %v3012_v28 = vld [vmem:[%s16995_s26 + $0x818] sm:$0xff] }
 0x7ca   : > { %13249 = vmatprep.subr.bf16.mxu1 %v14472_v43  ;;  %v3096_v43 = vld [vmem:[%s16995_s26 + $0xab8] sm:$0xff]  ;;  %v4175_v24 = vld [vmem:[%s16995_s26 + $0x2c70] sm:$0xff] }
 0x7cb   : > { %13207 = vmatpush1.bf16.msra.mxu0 %v15645_v44  ;;  %v3108_v44 = vld [vmem:[%s16995_s26 + $0xb18] sm:$0xff]  ;;  %v4187_v19 = vld [vmem:[%s16995_s26 + $0x2cd0] sm:$0xff] }
 0x7cc   : > { %13208 = vmatprep.subr.bf16.mxu0 %v15622_v42  ;;  %v4259_v42 = vld [vmem:[%s16995_s26 + $0x2f10] sm:$0xff]  ;;  %v14711_v5 = vcombine.low %v3096_v43, %v3108_v44  ;;  %v15790_v26 = vcombine.high %v4175_v24, %v4187_v19  ;;  %v2988_v1 = vld [vmem:[%s16995_s26 + $0x758] sm:$0xff] }
 0x7cd   : > { %13250 = vmatpush1.bf16.msra.mxu1 %v14471_v55  ;;  %v14712_v55 = vcombine.high %v3096_v43, %v3108_v44  ;;  %v15861_v13 = vcombine.low %v4247_v54, %v4259_v42  ;;  %v4163_v3 = vld [vmem:[%s16995_s26 + $0x2c10] sm:$0xff] }
 0x7ce   : > { %13251 = vmatprep.subr.bf16.mxu1 %v14448_v29  ;;  %v3084_v29 = vld [vmem:[%s16995_s26 + $0xa58] sm:$0xff]  ;;  %v4139_v43 = vld [vmem:[%s16995_s26 + $0x2b50] sm:$0xff] }
 0x7cf   : > { %13209 = vmatpush1.bf16.msra.mxu0 %v15621_v52  ;;  %v15862_v52 = vcombine.high %v4247_v54, %v4259_v42  ;;  %v14687_v58 = vcombine.low %v3072_v56, %v3084_v29  ;;  %v2964_v54 = vld [vmem:[%s16995_s26 + $0x698] sm:$0xff] }
 0x7d0   : > { %13210 = vmatprep.subr.bf16.mxu0 %v15598_v7  ;;  %v4235_v7 = vld [vmem:[%s16995_s26 + $0x2e50] sm:$0xff] }
 0x7d1   : > { %13252 = vmatpush1.bf16.msra.mxu1 %v14447_v18  ;;  %v14688_v18 = vcombine.high %v3072_v56, %v3084_v29  ;;  %v15837_v21 = vcombine.low %v4223_v63, %v4235_v7  ;;  %v4115_v56 = vld [vmem:[%s16995_s26 + $0x2a90] sm:$0xff] }
 0x7d2   : > { %v16134_v53 = vpop.eup %16133  ;;  %13253 = vmatprep.subr.bf16.mxu1 %v14424_v14  ;;  %v3060_v14 = vld [vmem:[%s16995_s26 + $0x998] sm:$0xff] }
 0x7d3   : > { %14095 = vst [vmem:[%s17653_s5 + $0x40] sm:$0xff] %v16134_v53  ;;  %13211 = vmatpush1.bf16.msra.mxu0 %v15597_v35  ;;  %v15838_v35 = vcombine.high %v4223_v63, %v4235_v7  ;;  %v3036_v53 = vld [vmem:[%s16995_s26 + $0x8d8] sm:$0xff] }
 0x7d4   : > { %v16136_v25 = vpop.eup %16135  ;;  %13212 = vmatprep.subr.bf16.mxu0 %v15574_v8  ;;  %v4211_v8 = vld [vmem:[%s16995_s26 + $0x2d90] sm:$0xff]  ;;  %v3708_v63 = vld [vmem:[%s16995_s26 + $0x1dd8] sm:$0xff] }
 0x7d5   : > { %14096 = vst [vmem:[%s17653_s5 + $0x48] sm:$0xff] %v16136_v25  ;;  %13254 = vmatpush1.bf16.msra.mxu1 %v14423_v16  ;;  %v14664_v16 = vcombine.high %v3048_v36, %v3060_v14  ;;  %v14640_v25 = vcombine.high %v3024_v6, %v3036_v53 }
 0x7d6   : > { %13255 = vmatprep.subr.bf16.mxu1 %v14400_v41  ;;  %v15814_v41 = vcombine.high %v4199_v31, %v4211_v8 }
 0x7d7   : > { %13213 = vmatpush1.bf16.msra.mxu0 %v15573_v39  ;;  %v14663_v39 = vcombine.low %v3048_v36, %v3060_v14  ;;  %v3324_v36 = vld [vmem:[%s16995_s26 + $0x11d8] sm:$0xff] }
 0x7d8   : > { %13214 = vmatprep.subr.bf16.mxu0 %v15550_v46  ;;  %v15813_v46 = vcombine.low %v4199_v31, %v4211_v8  ;;  %v3684_v31 = vld [vmem:[%s16995_s26 + $0x1d18] sm:$0xff] }
 0x7d9   : > { %13256 = vmatpush1.bf16.msra.mxu1 %v14399_v48  ;;  %v3000_v48 = vld [vmem:[%s16995_s26 + $0x7b8] sm:$0xff] }
 0x7da   : > { %13257 = vmatprep.subr.bf16.mxu1 %v14376_v27  ;;  %v14639_v27 = vcombine.low %v3024_v6, %v3036_v53  ;;  %v14616_v57 = vcombine.high %v3000_v48, %v3012_v28  ;;  %v3288_v6 = vld [vmem:[%s16995_s26 + $0x10b8] sm:$0xff] }
 0x7db   : > { %13215 = vmatpush1.bf16.msra.mxu0 %v15549_v37  ;;  %v4151_v37 = vld [vmem:[%s16995_s26 + $0x2bb0] sm:$0xff]  ;;  %v3300_v53 = vld [vmem:[%s16995_s26 + $0x1118] sm:$0xff] }
 0x7dc   : > { %13216 = vmatprep.subr.bf16.mxu0 %v15526_v9  ;;  %v15789_v9 = vcombine.low %v4175_v24, %v4187_v19  ;;  %v15766_v23 = vcombine.high %v4151_v37, %v4163_v3  ;;  %v3648_v19 = vld [vmem:[%s16995_s26 + $0x1bf8] sm:$0xff] }
 0x7dd   : > { %13258 = vmatpush1.bf16.msra.mxu1 %v14375_v11  ;;  %v2976_v11 = vld [vmem:[%s16995_s26 + $0x6f8] sm:$0xff] }
 0x7de   : > { %13259 = vmatprep.subr.bf16.mxu1 %v14736_v2  ;;  %v14615_v2 = vcombine.low %v3000_v48, %v3012_v28  ;;  %v14592_v44 = vcombine.high %v2976_v11, %v2988_v1  ;;  %v14904_v48 = vcombine.high %v3288_v6, %v3300_v53 }
 0x7df   : > { %13217 = vmatpush1.bf16.msra.mxu0 %v15525_v15  ;;  %v4127_v15 = vld [vmem:[%s16995_s26 + $0x2af0] sm:$0xff] }
 0x7e0   : > { %13218 = vmatprep.subr.bf16.mxu0 %v15886_v45  ;;  %v15765_v45 = vcombine.low %v4151_v37, %v4163_v3  ;;  %v15742_v42 = vcombine.high %v4127_v15, %v4139_v43  ;;  %v3276_v37 = vld [vmem:[%s16995_s26 + $0x1058] sm:$0xff] }
 0x7e1   : > { %13260 = vmatpush2.bf16.msra.mxu1 %v14735_v49  ;;  %v2952_v49 = vld [vmem:[%s16995_s26 + $0x638] sm:$0xff] }
 0x7e2   : > { %13261 = vmatprep.subr.bf16.mxu1 %v14712_v55  ;;  %v14591_v55 = vcombine.low %v2976_v11, %v2988_v1  ;;  %v14568_v29 = vcombine.high %v2952_v49, %v2964_v54  ;;  %v3624_v1 = vld [vmem:[%s16995_s26 + $0x1b38] sm:$0xff] }
 0x7e3   : > { %13219 = vmatpush2.bf16.msra.mxu0 %v15885_v61  ;;  %v4103_v61 = vld [vmem:[%s16995_s26 + $0x2a30] sm:$0xff] }
 0x7e4   : > { %13220 = vmatprep.subr.bf16.mxu0 %v15862_v52  ;;  %v15741_v52 = vcombine.low %v4127_v15, %v4139_v43  ;;  %v15718_v7 = vcombine.high %v4103_v61, %v4115_v56 }
 0x7e5   : > { %13262 = vmatpush2.bf16.msra.mxu1 %v14711_v5  ;;  %v3696_v5 = vld [vmem:[%s16995_s26 + $0x1d78] sm:$0xff] }
 0x7e6   : > { %13263 = vmatprep.subr.bf16.mxu1 %v14688_v18  ;;  %v14567_v18 = vcombine.low %v2952_v49, %v2964_v54  ;;  %v15312_v14 = vcombine.high %v3696_v5, %v3708_v63  ;;  %v3252_v54 = vld [vmem:[%s16995_s26 + $0xf98] sm:$0xff] }
 0x7e7   : > { %13221 = vmatpush2.bf16.msra.mxu0 %v15861_v13  ;;  %v3312_v13 = vld [vmem:[%s16995_s26 + $0x1178] sm:$0xff] }
 0x7e8   : > { %13222 = vmatprep.subr.bf16.mxu0 %v15838_v35  ;;  %v15717_v35 = vcombine.low %v4103_v61, %v4115_v56  ;;  %v14928_v8 = vcombine.high %v3312_v13, %v3324_v36  ;;  %v14927_v24 = vcombine.low %v3312_v13, %v3324_v36  ;;  %v3216_v13 = vld [vmem:[%s16995_s26 + $0xe78] sm:$0xff] }
 0x7e9   : > { %13264 = vmatpush2.bf16.msra.mxu1 %v14687_v58  ;;  %v3672_v58 = vld [vmem:[%s16995_s26 + $0x1cb8] sm:$0xff] }
 0x7ea   : > { %13265 = vmatprep.subr.bf16.mxu1 %v14664_v16  ;;  %v4338_v16 = vrot.slane %v18164_v59, %v17016_v38  ;;  %v3228_v36 = vld [vmem:[%s16995_s26 + $0xed8] sm:$0xff] }
 0x7eb   : > { %13223 = vmatpush2.bf16.msra.mxu0 %v15837_v21  ;;  %v15311_v21 = vcombine.low %v3696_v5, %v3708_v63  ;;  %v3612_v5 = vld [vmem:[%s16995_s26 + $0x1ad8] sm:$0xff] }
 0x7ec   : > { %13224 = vmatprep.subr.bf16.mxu0 %v15814_v41  ;;  %v15288_v41 = vcombine.high %v3672_v58, %v3684_v31  ;;  %v12950_v28 = vadd.f32 %v18250_v47, %v4338_v16  ;;  %v14903_v47 = vcombine.low %v3288_v6, %v3300_v53  ;;  %v3204_v6 = vld [vmem:[%s16995_s26 + $0xe18] sm:$0xff] }
 0x7ed   : > { %13266 = vmatpush2.bf16.msra.mxu1 %v14663_v39  ;;  %v4342_v39 = vrot.slane %v18164_v59, %v17019_v40 }
 0x7ee   : > { %13267 = vmatprep.subr.bf16.mxu1 %v14640_v25  ;;  %v3660_v25 = vld [vmem:[%s16995_s26 + $0x1c58] sm:$0xff] }
 0x7ef   : > { %13225 = vmatpush2.bf16.msra.mxu0 %v15813_v46  ;;  %v15263_v49 = vcombine.low %v3648_v19, %v3660_v25 }
 0x7f0   : > { %13226 = vmatprep.subr.bf16.mxu0 %v15790_v26  ;;  %v15287_v26 = vcombine.low %v3672_v58, %v3684_v31  ;;  %v3576_v58 = vld [vmem:[%s16995_s26 + $0x19b8] sm:$0xff] }
 0x7f1   : > { %13268 = vmatpush2.bf16.msra.mxu1 %v14639_v27  ;;  %v3264_v27 = vld [vmem:[%s16995_s26 + $0xff8] sm:$0xff] }
 0x7f2   : > { %13269 = vmatprep.subr.bf16.mxu1 %v14616_v57  ;;  %v15264_v57 = vcombine.high %v3648_v19, %v3660_v25  ;;  %v14880_v43 = vcombine.high %v3264_v27, %v3276_v37  ;;  %v3588_v31 = vld [vmem:[%s16995_s26 + $0x1a18] sm:$0xff] }
 0x7f3   : > { %13227 = vmatpush2.bf16.msra.mxu0 %v15789_v9  ;;  %v12952_v9 = vadd.f32 %v18257_v4, %v4342_v39  ;;  %v3240_v4 = vld [vmem:[%s16995_s26 + $0xf38] sm:$0xff]  ;;  %v15192_v53 = vcombine.high %v3576_v58, %v3588_v31  ;;  %v15191_v25 = vcombine.low %v3576_v58, %v3588_v31 }
 0x7f4   : > { %13228 = vmatprep.subr.bf16.mxu0 %v15766_v23  ;;  %v3636_v23 = vld [vmem:[%s16995_s26 + $0x1b98] sm:$0xff] }
 0x7f5   : > { %13270 = vmatpush2.bf16.msra.mxu1 %v14615_v2  ;;  %v15240_v61 = vcombine.high %v3624_v1, %v3636_v23  ;;  %v3552_v39 = vld [vmem:[%s16995_s26 + $0x18f8] sm:$0xff] }
 0x7f6   : > { %13271 = vmatprep.subr.bf16.mxu1 %v14592_v44 }
 0x7f7   : > { %13229 = vmatpush2.bf16.msra.mxu0 %v15765_v45 }
 0x7f8   : > { %13230 = vmatprep.subr.bf16.mxu0 %v15742_v42 }
 0x7f9   : > { %13272 = vmatpush2.bf16.msra.mxu1 %v14591_v55 }
 0x7fa   : > { %13273 = vmatprep.subr.bf16.mxu1 %v14568_v29  ;;  %v14879_v29 = vcombine.low %v3264_v27, %v3276_v37  ;;  %v3528_v27 = vld [vmem:[%s16995_s26 + $0x1838] sm:$0xff] }
 0x7fb   : > { %13231 = vmatpush2.bf16.msra.mxu0 %v15741_v52  ;;  %v3600_v52 = vld [vmem:[%s16995_s26 + $0x1a78] sm:$0xff] }
 0x7fc   : > { %13232 = vmatprep.subr.bf16.mxu0 %v15718_v7  ;;  %v14856_v7 = vcombine.high %v3240_v4, %v3252_v54  ;;  %v15215_v16 = vcombine.low %v3600_v52, %v3612_v5  ;;  %v3540_v37 = vld [vmem:[%s16995_s26 + $0x1898] sm:$0xff] }
 0x7fd   : > { %13274 = vmatpush2.bf16.msra.mxu1 %v14567_v18  ;;  %v15239_v18 = vcombine.low %v3624_v1, %v3636_v23  ;;  %v3888_v1 = vld [vmem:[%s16995_s26 + $0x2378] sm:$0xff] }
 0x7fe   : > { %13325 = vmatprep.subr.bf16.mxu1 %v15312_v14  ;;  %v15216_v14 = vcombine.high %v3600_v52, %v3612_v5  ;;  %v3900_v23 = vld [vmem:[%s16995_s26 + $0x23d8] sm:$0xff] }
 0x7ff   : > { %13233 = vmatpush2.bf16.msra.mxu0 %v15717_v35  ;;  %v14855_v35 = vcombine.low %v3240_v4, %v3252_v54  ;;  %v3864_v54 = vld [vmem:[%s16995_s26 + $0x22b8] sm:$0xff] }
 0x800   : > { %v13031_v46 = vpop.f32.mrf.mxu1  ;;  %13276 = vmatmul.mubr.bf16.vlgmr.msra.gmra.mxu1 %v17165_v60  ;;  %13284 = vmatprep.subr.bf16.mxu0 %v14928_v8  ;;  %v14832_v8 = vcombine.high %v3216_v13, %v3228_v36  ;;  %v3492_v52 = vld [vmem:[%s16995_s26 + $0x1718] sm:$0xff] }
 0x801   : > { %13326 = vmatpush1.bf16.msra.mxu1 %v15311_v21  ;;  %13357 = vmatprep.mubr.bf16.mxu1 %v17317_v10  ;;  %v3192_v21 = vld [vmem:[%s16995_s26 + $0xdb8] sm:$0xff] }
 0x802   : > { %v12990_v59 = vpop.f32.mrf.mxu0  ;;  %13235 = vmatmul.mubr.bf16.vlgmr.msra.gmra.mxu0 %v17380_v33  ;;  %v13033_v3 = vpop.f32.mrf.mxu1  ;;  %13327 = vmatprep.subr.bf16.mxu1 %v15288_v41  ;;  %v14831_v41 = vcombine.low %v3216_v13, %v3228_v36  ;;  %v14808_v19 = vcombine.high %v3192_v21, %v3204_v6 }
 0x803   : > { %v12991_v11 = vadd.f32 %v12990_v59, %v12950_v28  ;;  %13285 = vmatpush1.bf16.msra.mxu0 %v14927_v24  ;;  %13316 = vmatprep.mubr.bf16.mxu0 %v17242_v22  ;;  %v3564_v24 = vld [vmem:[%s16995_s26 + $0x1958] sm:$0xff] }
 0x804   : > { %v12992_v2 = vpop.f32.mrf.mxu0  ;;  %v13035_v15 = vpop.f32.mrf.mxu1  ;;  %13286 = vmatprep.subr.bf16.mxu0 %v14904_v48  ;;  %v3180_v48 = vld [vmem:[%s16995_s26 + $0xd58] sm:$0xff]  ;;  %v15168_v28 = vcombine.high %v3552_v39, %v3564_v24 }
 0x805   : > { %v18340_v44 = vadd.f32 %v13031_v46, %v12991_v11  ;;  %v12993_v45 = vadd.f32 %v12992_v2, %v12952_v9  ;;  %13328 = vmatpush1.bf16.msra.mxu1 %v15287_v26  ;;  %v3168_v46 = vld [vmem:[%s16995_s26 + $0xcf8] sm:$0xff]  ;;  %v14807_v26 = vcombine.low %v3192_v21, %v3204_v6  ;;  %v15144_v11 = vcombine.high %v3528_v27, %v3540_v37 }
 0x806   : > { %v12994_v42 = vpop.f32.mrf.mxu0  ;;  %v13036_v55 = vpop.f32.mrf.mxu1  ;;  %13329 = vmatprep.subr.bf16.mxu1 %v15264_v57  ;;  %v14784_v59 = vcombine.high %v3168_v46, %v3180_v48  ;;  %v3144_v57 = vld [vmem:[%s16995_s26 + $0xc38] sm:$0xff]  ;;  %v15143_v15 = vcombine.low %v3528_v27, %v3540_v37 }
 0x807   : > { %v18344_v56 = vadd.f32 %v13033_v3, %v12993_v45  ;;  %13287 = vmatpush1.bf16.msra.mxu0 %v14903_v47  ;;  %v15167_v3 = vcombine.low %v3552_v39, %v3564_v24  ;;  %v3156_v9 = vld [vmem:[%s16995_s26 + $0xc98] sm:$0xff]  ;;  %v14783_v47 = vcombine.low %v3168_v46, %v3180_v48 }
 0x808   : > { %v12995_v63 = vpop.f32.mrf.mxu0  ;;  %13288 = vmatprep.subr.bf16.mxu0 %v14880_v43  ;;  %v14760_v2 = vcombine.high %v3144_v57, %v3156_v9  ;;  %v3504_v43 = vld [vmem:[%s16995_s26 + $0x1778] sm:$0xff]  ;;  %v14759_v4 = vcombine.low %v3144_v57, %v3156_v9 }
 0x809   : > { %13330 = vmatpush1.bf16.msra.mxu1 %v15263_v49  ;;  %v3516_v45 = vld [vmem:[%s16995_s26 + $0x17d8] sm:$0xff]  ;;  %v15504_v49 = vcombine.high %v3888_v1, %v3900_v23 }
 0x80a   : > { %13331 = vmatprep.subr.bf16.mxu1 %v15240_v61  ;;  %v3876_v42 = vld [vmem:[%s16995_s26 + $0x2318] sm:$0xff]  ;;  %v15120_v55 = vcombine.high %v3504_v43, %v3516_v45  ;;  %v15503_v61 = vcombine.low %v3888_v1, %v3900_v23  ;;  %v15119_v63 = vcombine.low %v3504_v43, %v3516_v45 }
 0x80b   : > { %13289 = vmatpush1.bf16.msra.mxu0 %v14879_v29  ;;  %v3480_v29 = vld [vmem:[%s16995_s26 + $0x16b8] sm:$0xff]  ;;  %v15480_v5 = vcombine.high %v3864_v54, %v3876_v42  ;;  %v15479_v36 = vcombine.low %v3864_v54, %v3876_v42 }
 0x80c   : > { %13290 = vmatprep.subr.bf16.mxu0 %v14856_v7  ;;  %v3840_v7 = vld [vmem:[%s16995_s26 + $0x21f8] sm:$0xff]  ;;  %v15096_v13 = vcombine.high %v3480_v29, %v3492_v52  ;;  %v15095_v31 = vcombine.low %v3480_v29, %v3492_v52 }
 0x80d   : > { %13332 = vmatpush1.bf16.msra.mxu1 %v15239_v18  ;;  %v3852_v18 = vld [vmem:[%s16995_s26 + $0x2258] sm:$0xff] }
 0x80e   : > { %13333 = vmatprep.subr.bf16.mxu1 %v15216_v14  ;;  %v3456_v14 = vld [vmem:[%s16995_s26 + $0x15f8] sm:$0xff]  ;;  %v15456_v58 = vcombine.high %v3840_v7, %v3852_v18  ;;  %v15455_v6 = vcombine.low %v3840_v7, %v3852_v18 }
 0x80f   : > { %13291 = vmatpush1.bf16.msra.mxu0 %v14855_v35  ;;  %v3468_v35 = vld [vmem:[%s16995_s26 + $0x1658] sm:$0xff] }
 0x810   : > { %13292 = vmatprep.subr.bf16.mxu0 %v14832_v8  ;;  %v3816_v8 = vld [vmem:[%s16995_s26 + $0x2138] sm:$0xff]  ;;  %v15072_v21 = vcombine.high %v3456_v14, %v3468_v35  ;;  %v15071_v24 = vcombine.low %v3456_v14, %v3468_v35 }
 0x811   : > { %13334 = vmatpush1.bf16.msra.mxu1 %v15215_v16  ;;  %v3828_v16 = vld [vmem:[%s16995_s26 + $0x2198] sm:$0xff] }
 0x812   : > { %13335 = vmatprep.subr.bf16.mxu1 %v15192_v53  ;;  %v3432_v53 = vld [vmem:[%s16995_s26 + $0x1538] sm:$0xff]  ;;  %v15432_v39 = vcombine.high %v3816_v8, %v3828_v16  ;;  %v15431_v48 = vcombine.low %v3816_v8, %v3828_v16 }
 0x813   : > { %13293 = vmatpush1.bf16.msra.mxu0 %v14831_v41  ;;  %v3444_v41 = vld [vmem:[%s16995_s26 + $0x1598] sm:$0xff] }
 0x814   : > { %13294 = vmatprep.subr.bf16.mxu0 %v14808_v19  ;;  %v3792_v19 = vld [vmem:[%s16995_s26 + $0x2078] sm:$0xff]  ;;  %v15048_v46 = vcombine.high %v3432_v53, %v3444_v41  ;;  %v15047_v37 = vcombine.low %v3432_v53, %v3444_v41 }
 0x815   : > { %13336 = vmatpush1.bf16.msra.mxu1 %v15191_v25  ;;  %v3804_v25 = vld [vmem:[%s16995_s26 + $0x20d8] sm:$0xff] }
 0x816   : > { %13337 = vmatprep.subr.bf16.mxu1 %v15168_v28  ;;  %v3408_v28 = vld [vmem:[%s16995_s26 + $0x1478] sm:$0xff]  ;;  %v15408_v27 = vcombine.high %v3792_v19, %v3804_v25  ;;  %v15407_v9 = vcombine.low %v3792_v19, %v3804_v25 }
 0x817   : > { %13295 = vmatpush1.bf16.msra.mxu0 %v14807_v26  ;;  %v3420_v26 = vld [vmem:[%s16995_s26 + $0x14d8] sm:$0xff] }
 0x818   : > { %13296 = vmatprep.subr.bf16.mxu0 %v14784_v59  ;;  %v3768_v59 = vld [vmem:[%s16995_s26 + $0x1fb8] sm:$0xff]  ;;  %v15024_v57 = vcombine.high %v3408_v28, %v3420_v26  ;;  %v15023_v23 = vcombine.low %v3408_v28, %v3420_v26 }
 0x819   : > { %13338 = vmatpush1.bf16.msra.mxu1 %v15167_v3  ;;  %v3780_v3 = vld [vmem:[%s16995_s26 + $0x2018] sm:$0xff] }
 0x81a   : > { %13339 = vmatprep.subr.bf16.mxu1 %v15144_v11  ;;  %v3384_v11 = vld [vmem:[%s16995_s26 + $0x13b8] sm:$0xff]  ;;  %v15384_v1 = vcombine.high %v3768_v59, %v3780_v3  ;;  %v15383_v45 = vcombine.low %v3768_v59, %v3780_v3 }
 0x81b   : > { %13297 = vmatpush1.bf16.msra.mxu0 %v14783_v47  ;;  %v3396_v47 = vld [vmem:[%s16995_s26 + $0x1418] sm:$0xff] }
 0x81c   : > { %13298 = vmatprep.subr.bf16.mxu0 %v14760_v2  ;;  %v3744_v2 = vld [vmem:[%s16995_s26 + $0x1ef8] sm:$0xff]  ;;  %v15000_v43 = vcombine.high %v3384_v11, %v3396_v47  ;;  %v14999_v42 = vcombine.low %v3384_v11, %v3396_v47 }
 0x81d   : > { %13340 = vmatpush1.bf16.msra.mxu1 %v15143_v15  ;;  %v3756_v15 = vld [vmem:[%s16995_s26 + $0x1f58] sm:$0xff] }
 0x81e   : > { %13341 = vmatprep.subr.bf16.mxu1 %v15504_v49  ;;  %v3360_v49 = vld [vmem:[%s16995_s26 + $0x12f8] sm:$0xff]  ;;  %v15360_v54 = vcombine.high %v3744_v2, %v3756_v15  ;;  %v15359_v52 = vcombine.low %v3744_v2, %v3756_v15 }
 0x81f   : > { %13299 = vmatpush1.bf16.msra.mxu0 %v14759_v4  ;;  %v3372_v4 = vld [vmem:[%s16995_s26 + $0x1358] sm:$0xff] }
 0x820   : > { %13300 = vmatprep.subr.bf16.mxu0 %v15120_v55  ;;  %v3720_v55 = vld [vmem:[%s16995_s26 + $0x1e38] sm:$0xff]  ;;  %v14976_v29 = vcombine.high %v3360_v49, %v3372_v4  ;;  %v14975_v18 = vcombine.low %v3360_v49, %v3372_v4 }
 0x821   : > { %13342 = vmatpush2.bf16.msra.mxu1 %v15503_v61  ;;  %v3732_v61 = vld [vmem:[%s16995_s26 + $0x1e98] sm:$0xff] }
 0x822   : > { %13343 = vmatprep.subr.bf16.mxu1 %v15480_v5  ;;  %v3336_v5 = vld [vmem:[%s16995_s26 + $0x1238] sm:$0xff]  ;;  %v15336_v7 = vcombine.high %v3720_v55, %v3732_v61  ;;  %v15335_v35 = vcombine.low %v3720_v55, %v3732_v61 }
 0x823   : > { %13301 = vmatpush2.bf16.msra.mxu0 %v15119_v63  ;;  %v3348_v63 = vld [vmem:[%s16995_s26 + $0x1298] sm:$0xff] }
 0x824   : > { %13302 = vmatprep.subr.bf16.mxu0 %v15096_v13  ;;  %v2929_v13 = vld [vmem:[%s16995_s26 + $0x580] sm:$0xff]  ;;  %v14952_v14 = vcombine.high %v3336_v5, %v3348_v63  ;;  %v14951_v16 = vcombine.low %v3336_v5, %v3348_v63  ;;  %v4044_v59 = vld [vmem:[%s16995_s26 + $0x2858] sm:$0xff] }
 0x825   : > { %13344 = vmatpush2.bf16.msra.mxu1 %v15479_v36  ;;  %v2941_v36 = vld [vmem:[%s16995_s26 + $0x5e0] sm:$0xff]  ;;  %v4008_v4 = vld [vmem:[%s16995_s26 + $0x2738] sm:$0xff] }
 0x826   : > { %13345 = vmatprep.subr.bf16.mxu1 %v15456_v58  ;;  %v4080_v58 = vld [vmem:[%s16995_s26 + $0x2978] sm:$0xff]  ;;  %v14546_v8 = vcombine.high %v2929_v13, %v2941_v36  ;;  %v14545_v41 = vcombine.low %v2929_v13, %v2941_v36 }
 0x827   : > { %13303 = vmatpush2.bf16.msra.mxu0 %v15095_v31  ;;  %v4092_v31 = vld [vmem:[%s16995_s26 + $0x29d8] sm:$0xff] }
 0x828   : > { %13304 = vmatprep.subr.bf16.mxu0 %v15072_v21  ;;  %v2905_v21 = vld [vmem:[%s16995_s26 + $0x4c0] sm:$0xff]  ;;  %v15696_v53 = vcombine.high %v4080_v58, %v4092_v31  ;;  %v15695_v25 = vcombine.low %v4080_v58, %v4092_v31 }
 0x829   : > { %13346 = vmatpush2.bf16.msra.mxu1 %v15455_v6  ;;  %v2917_v6 = vld [vmem:[%s16995_s26 + $0x520] sm:$0xff] }
 0x82a   : > { %13347 = vmatprep.subr.bf16.mxu1 %v15432_v39  ;;  %v4056_v39 = vld [vmem:[%s16995_s26 + $0x28b8] sm:$0xff]  ;;  %v14522_v19 = vcombine.high %v2905_v21, %v2917_v6 }
 0x82b   : > { %13305 = vmatpush2.bf16.msra.mxu0 %v15071_v24  ;;  %v4068_v24 = vld [vmem:[%s16995_s26 + $0x2918] sm:$0xff] }
 0x82c   : > { %13306 = vmatprep.subr.bf16.mxu0 %v15048_v46  ;;  %v2881_v46 = vld [vmem:[%s16995_s26 + $0x400] sm:$0xff]  ;;  %v15672_v26 = vcombine.high %v4056_v39, %v4068_v24  ;;  %v15671_v47 = vcombine.low %v4056_v39, %v4068_v24 }
 0x82d   : > { %13348 = vmatpush2.bf16.msra.mxu1 %v15431_v48  ;;  %v2893_v48 = vld [vmem:[%s16995_s26 + $0x460] sm:$0xff] }
 0x82e   : > { %13349 = vmatprep.subr.bf16.mxu1 %v15408_v27  ;;  %v14521_v27 = vcombine.low %v2905_v21, %v2917_v6  ;;  %v14497_v49 = vcombine.low %v2881_v46, %v2893_v48 }
 0x82f   : > { %13307 = vmatpush2.bf16.msra.mxu0 %v15047_v37  ;;  %v4032_v37 = vld [vmem:[%s16995_s26 + $0x27f8] sm:$0xff] }
 0x830   : > { %13308 = vmatprep.subr.bf16.mxu0 %v15024_v57  ;;  %v15647_v61 = vcombine.low %v4032_v37, %v4044_v59 }
 0x831   : > { %13350 = vmatpush2.bf16.msra.mxu1 %v15407_v9  ;;  %v14498_v9 = vcombine.high %v2881_v46, %v2893_v48 }
 0x832   : > { %13351 = vmatprep.subr.bf16.mxu1 %v15384_v1  ;;  %v2857_v1 = vld [vmem:[%s16995_s26 + $0x340] sm:$0xff] }
 0x833   : > { %13309 = vmatpush2.bf16.msra.mxu0 %v15023_v23  ;;  %v2869_v23 = vld [vmem:[%s16995_s26 + $0x3a0] sm:$0xff] }
 0x834   : > { %13310 = vmatprep.subr.bf16.mxu0 %v15000_v43  ;;  %v15648_v43 = vcombine.high %v4032_v37, %v4044_v59  ;;  %v14474_v55 = vcombine.high %v2857_v1, %v2869_v23  ;;  %v14473_v63 = vcombine.low %v2857_v1, %v2869_v23  ;;  %v2773_v37 = vld [vmem:[%s16995_s26 + $0xa0] sm:$0xff] }
 0x835   : > { %13352 = vmatpush2.bf16.msra.mxu1 %v15383_v45 }
 0x836   : > { %13353 = vmatprep.subr.bf16.mxu1 %v15360_v54 }
 0x837   : > { %13311 = vmatpush2.bf16.msra.mxu0 %v14999_v42 }
 0x838   : > { %13312 = vmatprep.subr.bf16.mxu0 %v14976_v29  ;;  %v2833_v29 = vld [vmem:[%s16995_s26 + $0x280] sm:$0xff] }
 0x839   : > { %13354 = vmatpush2.bf16.msra.mxu1 %v15359_v52  ;;  %v2845_v52 = vld [vmem:[%s16995_s26 + $0x2e0] sm:$0xff] }
 0x83a   : > { %13355 = vmatprep.subr.bf16.mxu1 %v15336_v7  ;;  %v3984_v7 = vld [vmem:[%s16995_s26 + $0x2678] sm:$0xff]  ;;  %v14450_v13 = vcombine.high %v2833_v29, %v2845_v52  ;;  %v14449_v31 = vcombine.low %v2833_v29, %v2845_v52 }
 0x83b   : > { %13313 = vmatpush2.bf16.msra.mxu0 %v14975_v18  ;;  %v3996_v18 = vld [vmem:[%s16995_s26 + $0x26d8] sm:$0xff] }
 0x83c   : > { %13314 = vmatprep.subr.bf16.mxu0 %v14952_v14  ;;  %v2809_v14 = vld [vmem:[%s16995_s26 + $0x1c0] sm:$0xff]  ;;  %v15600_v58 = vcombine.high %v3984_v7, %v3996_v18  ;;  %v15599_v6 = vcombine.low %v3984_v7, %v3996_v18  ;;  %v4248_v52 = vld [vmem:[%s16995_s26 + $0x2eb8] sm:$0xff] }
 0x83d   : > { %13356 = vmatpush2.bf16.msra.mxu1 %v15335_v35  ;;  %v2821_v35 = vld [vmem:[%s16995_s26 + $0x220] sm:$0xff] }
 0x83e   : > { %13407 = vmatprep.subr.bf16.mxu1 %v14546_v8  ;;  %v3960_v8 = vld [vmem:[%s16995_s26 + $0x25b8] sm:$0xff]  ;;  %v14426_v21 = vcombine.high %v2809_v14, %v2821_v35  ;;  %v14425_v24 = vcombine.low %v2809_v14, %v2821_v35  ;;  %v3073_v7 = vld [vmem:[%s16995_s26 + $0xa00] sm:$0xff] }
 0x83f   : > { %13315 = vmatpush2.bf16.msra.mxu0 %v14951_v16  ;;  %v3972_v16 = vld [vmem:[%s16995_s26 + $0x2618] sm:$0xff]  ;;  %v3085_v18 = vld [vmem:[%s16995_s26 + $0xa60] sm:$0xff] }
 0x840   : > { %v18404_v28 = vpop.f32.mrf.mxu1  ;;  %13358 = vmatmul.mubr.bf16.vlgmr.msra.gmra.mxu1 %v17319_v12  ;;  %13366 = vmatprep.subr.bf16.mxu0 %v15696_v53  ;;  %v2785_v53 = vld [vmem:[%s16995_s26 + $0x100] sm:$0xff]  ;;  %v15576_v39 = vcombine.high %v3960_v8, %v3972_v16  ;;  %v4224_v14 = vld [vmem:[%s16995_s26 + $0x2df8] sm:$0xff] }
 0x841   : > { %13408 = vmatpush1.bf16.msra.mxu1 %v14545_v41  ;;  %13439 = vmatprep.mubr.bf16.mxu1 %v17160_v50  ;;  %v2797_v41 = vld [vmem:[%s16995_s26 + $0x160] sm:$0xff]  ;;  %v4236_v35 = vld [vmem:[%s16995_s26 + $0x2e58] sm:$0xff] }
 0x842   : > { %v13072_v3 = vpop.f32.mrf.mxu0  ;;  %13317 = vmatmul.mubr.bf16.vlgmr.msra.gmra.mxu0 %v17246_v30  ;;  %v18411_v57 = vpop.f32.mrf.mxu1  ;;  %13409 = vmatprep.subr.bf16.mxu1 %v14522_v19  ;;  %v3936_v19 = vld [vmem:[%s16995_s26 + $0x24f8] sm:$0xff]  ;;  %v14402_v48 = vcombine.high %v2785_v53, %v2797_v41 }
 0x843   : > { %v13073_v11 = vadd.f32 %v13072_v3, %v18340_v44  ;;  %13367 = vmatpush1.bf16.msra.mxu0 %v15695_v25  ;;  %13398 = vmatprep.mubr.bf16.mxu0 %v17376_v20  ;;  %v4020_v44 = vld [vmem:[%s16995_s26 + $0x2798] sm:$0xff] }
 0x844   : > { %v13074_v2 = vpop.f32.mrf.mxu0  ;;  %v13117_v15 = vpop.f32.mrf.mxu1  ;;  %13368 = vmatprep.subr.bf16.mxu0 %v15672_v26  ;;  %v15623_v36 = vcombine.low %v4008_v4, %v4020_v44  ;;  %v3948_v25 = vld [vmem:[%s16995_s26 + $0x2558] sm:$0xff]  ;;  %v15575_v26 = vcombine.low %v3960_v8, %v3972_v16  ;;  %v3049_v8 = vld [vmem:[%s16995_s26 + $0x940] sm:$0xff] }
 0x845   : > { %16137 = vtanh.f32 %v13073_v11  ;;  %v13075_v45 = vadd.f32 %v13074_v2, %v18344_v56  ;;  %13410 = vmatpush1.bf16.msra.mxu1 %v14521_v27  ;;  %v15624_v56 = vcombine.high %v4008_v4, %v4020_v44  ;;  %v2761_v27 = vld [vmem:[%s16995_s26 + $0x40] sm:$0xff]  ;;  %v15552_v3 = vcombine.high %v3936_v19, %v3948_v25  ;;  %v3912_v11 = vld [vmem:[%s16995_s26 + $0x2438] sm:$0xff] }
 0x846   : > { %v13076_v54 = vpop.f32.mrf.mxu0  ;;  %v13118_v42 = vpop.f32.mrf.mxu1  ;;  %13411 = vmatprep.subr.bf16.mxu1 %v14498_v9  ;;  %v14401_v9 = vcombine.low %v2785_v53, %v2797_v41  ;;  %v14378_v1 = vcombine.high %v2761_v27, %v2773_v37  ;;  %v15551_v23 = vcombine.low %v3936_v19, %v3948_v25  ;;  %v3121_v2 = vld [vmem:[%s16995_s26 + $0xb80] sm:$0xff]  ;;  %v4284_v4 = vld [vmem:[%s16995_s26 + $0x2fd8] sm:$0xff] }
 0x847   : > { %16139 = vtanh.f32 %v13075_v45  ;;  %13369 = vmatpush1.bf16.msra.mxu0 %v15671_v47  ;;  %v3924_v47 = vld [vmem:[%s16995_s26 + $0x2498] sm:$0xff]  ;;  %v3133_v15 = vld [vmem:[%s16995_s26 + $0xbe0] sm:$0xff]  ;;  %v14377_v45 = vcombine.low %v2761_v27, %v2773_v37 }
 0x848   : > { %v13077_v5 = vpop.f32.mrf.mxu0  ;;  %13370 = vmatprep.subr.bf16.mxu0 %v15648_v43  ;;  %v15528_v43 = vcombine.high %v3912_v11, %v3924_v47  ;;  %v14738_v44 = vcombine.high %v3121_v2, %v3133_v15  ;;  %v15527_v54 = vcombine.low %v3912_v11, %v3924_v47  ;;  %v3097_v42 = vld [vmem:[%s16995_s26 + $0xac0] sm:$0xff]  ;;  %v14737_v29 = vcombine.low %v3121_v2, %v3133_v15  ;;  %v4200_v53 = vld [vmem:[%s16995_s26 + $0x2d38] sm:$0xff] }
 0x849   : > { %13412 = vmatpush1.bf16.msra.mxu1 %v14497_v49  ;;  %v4272_v49 = vld [vmem:[%s16995_s26 + $0x2f78] sm:$0xff]  ;;  %v3061_v16 = vld [vmem:[%s16995_s26 + $0x9a0] sm:$0xff] }
 0x84a   : > { %13413 = vmatprep.subr.bf16.mxu1 %v14474_v55  ;;  %v3109_v55 = vld [vmem:[%s16995_s26 + $0xb20] sm:$0xff]  ;;  %v4260_v5 = vld [vmem:[%s16995_s26 + $0x2f18] sm:$0xff] }
 0x84b   : > { %13371 = vmatpush1.bf16.msra.mxu0 %v15647_v61  ;;  %v15888_v61 = vcombine.high %v4272_v49, %v4284_v4  ;;  %v4212_v41 = vld [vmem:[%s16995_s26 + $0x2d98] sm:$0xff]  ;;  %v3025_v19 = vld [vmem:[%s16995_s26 + $0x880] sm:$0xff] }
 0x84c   : > { %13372 = vmatprep.subr.bf16.mxu0 %v15624_v56  ;;  %v14714_v56 = vcombine.high %v3097_v42, %v3109_v55  ;;  %v3037_v25 = vld [vmem:[%s16995_s26 + $0x8e0] sm:$0xff]  ;;  %v4188_v27 = vld [vmem:[%s16995_s26 + $0x2cd8] sm:$0xff] }
 0x84d   : > { %13414 = vmatpush1.bf16.msra.mxu1 %v14473_v63  ;;  %v15887_v63 = vcombine.low %v4272_v49, %v4284_v4  ;;  %v14642_v37 = vcombine.high %v3025_v19, %v3037_v25  ;;  %v14641_v47 = vcombine.low %v3025_v19, %v3037_v25  ;;  %v3289_v19 = vld [vmem:[%s16995_s26 + $0x10c0] sm:$0xff] }
 0x84e   : > { %13415 = vmatprep.subr.bf16.mxu1 %v14450_v13  ;;  %v15864_v13 = vcombine.high %v4248_v52, %v4260_v5  ;;  %v3301_v25 = vld [vmem:[%s16995_s26 + $0x1120] sm:$0xff] }
 0x84f   : > { %13373 = vmatpush1.bf16.msra.mxu0 %v15623_v36  ;;  %v14713_v36 = vcombine.low %v3097_v42, %v3109_v55 }
 0x850   : > { %13374 = vmatprep.subr.bf16.mxu0 %v15600_v58  ;;  %v14690_v58 = vcombine.high %v3073_v7, %v3085_v18 }
 0x851   : > { %13416 = vmatpush1.bf16.msra.mxu1 %v14449_v31  ;;  %v15863_v31 = vcombine.low %v4248_v52, %v4260_v5 }
 0x852   : > { %v16138_v46 = vpop.eup %16137  ;;  %13417 = vmatprep.subr.bf16.mxu1 %v14426_v21  ;;  %v15840_v21 = vcombine.high %v4224_v14, %v4236_v35 }
 0x853   : > { %14097 = vst [vmem:[%s17653_s5 + $0x50] sm:$0xff] %v16138_v46  ;;  %13375 = vmatpush1.bf16.msra.mxu0 %v15599_v6  ;;  %v14689_v6 = vcombine.low %v3073_v7, %v3085_v18  ;;  %v15816_v46 = vcombine.high %v4200_v53, %v4212_v41 }
 0x854   : > { %v16140_v59 = vpop.eup %16139  ;;  %13376 = vmatprep.subr.bf16.mxu0 %v15576_v39  ;;  %v14666_v39 = vcombine.high %v3049_v8, %v3061_v16 }
 0x855   : > { %14098 = vst [vmem:[%s17653_s5 + $0x58] sm:$0xff] %v16140_v59  ;;  %13418 = vmatpush1.bf16.msra.mxu1 %v14425_v24  ;;  %v15839_v24 = vcombine.low %v4224_v14, %v4236_v35  ;;  %v15815_v59 = vcombine.low %v4200_v53, %v4212_v41  ;;  %v18477_v41 = vld [vmem:[%s17450_s1 + $0x8] sm:$0xff] }
 0x856   : > { %13419 = vmatprep.subr.bf16.mxu1 %v14402_v48  ;;  %v14665_v48 = vcombine.low %v3049_v8, %v3061_v16 }
 0x857   : > { %13377 = vmatpush1.bf16.msra.mxu0 %v15575_v26  ;;  %v4176_v26 = vld [vmem:[%s16995_s26 + $0x2c78] sm:$0xff] }
 0x858   : > { %13378 = vmatprep.subr.bf16.mxu0 %v15552_v3  ;;  %v3001_v3 = vld [vmem:[%s16995_s26 + $0x7c0] sm:$0xff]  ;;  %v15792_v11 = vcombine.high %v4176_v26, %v4188_v27  ;;  %v15791_v15 = vcombine.low %v4176_v26, %v4188_v27 }
 0x859   : > { %13420 = vmatpush1.bf16.msra.mxu1 %v14401_v9  ;;  %v3013_v9 = vld [vmem:[%s16995_s26 + $0x820] sm:$0xff] }
 0x85a   : > { %13421 = vmatprep.subr.bf16.mxu1 %v14378_v1  ;;  %v4152_v1 = vld [vmem:[%s16995_s26 + $0x2bb8] sm:$0xff]  ;;  %v14618_v2 = vcombine.high %v3001_v3, %v3013_v9  ;;  %v14617_v4 = vcombine.low %v3001_v3, %v3013_v9  ;;  %v3649_v27 = vld [vmem:[%s16995_s26 + $0x1c00] sm:$0xff]  ;;  %v14906_v3 = vcombine.high %v3289_v19, %v3301_v25 }
 0x85b   : > { %13379 = vmatpush1.bf16.msra.mxu0 %v15551_v23  ;;  %v4164_v23 = vld [vmem:[%s16995_s26 + $0x2c18] sm:$0xff] }
 0x85c   : > { %13380 = vmatprep.subr.bf16.mxu0 %v15528_v43  ;;  %v2977_v43 = vld [vmem:[%s16995_s26 + $0x700] sm:$0xff]  ;;  %v15768_v49 = vcombine.high %v4152_v1, %v4164_v23  ;;  %v15767_v55 = vcombine.low %v4152_v1, %v4164_v23 }
 0x85d   : > { %13422 = vmatpush1.bf16.msra.mxu1 %v14377_v45  ;;  %v2989_v45 = vld [vmem:[%s16995_s26 + $0x760] sm:$0xff] }
 0x85e   : > { %13423 = vmatprep.subr.bf16.mxu1 %v14738_v44  ;;  %v4128_v44 = vld [vmem:[%s16995_s26 + $0x2af8] sm:$0xff]  ;;  %v14594_v42 = vcombine.high %v2977_v43, %v2989_v45  ;;  %v14593_v5 = vcombine.low %v2977_v43, %v2989_v45  ;;  %v3277_v1 = vld [vmem:[%s16995_s26 + $0x1060] sm:$0xff] }
 0x85f   : > { %13381 = vmatpush1.bf16.msra.mxu0 %v15527_v54  ;;  %v4140_v54 = vld [vmem:[%s16995_s26 + $0x2b58] sm:$0xff] }
 0x860   : > { %13382 = vmatprep.subr.bf16.mxu0 %v15888_v61  ;;  %v2953_v61 = vld [vmem:[%s16995_s26 + $0x640] sm:$0xff]  ;;  %v15744_v52 = vcombine.high %v4128_v44, %v4140_v54  ;;  %v15743_v18 = vcombine.low %v4128_v44, %v4140_v54 }
 0x861   : > { %13424 = vmatpush2.bf16.msra.mxu1 %v14737_v29  ;;  %v2965_v29 = vld [vmem:[%s16995_s26 + $0x6a0] sm:$0xff] }
 0x862   : > { %13425 = vmatprep.subr.bf16.mxu1 %v14714_v56  ;;  %v4104_v56 = vld [vmem:[%s16995_s26 + $0x2a38] sm:$0xff]  ;;  %v14570_v7 = vcombine.high %v2953_v61, %v2965_v29  ;;  %v14569_v35 = vcombine.low %v2953_v61, %v2965_v29 }
 0x863   : > { %13383 = vmatpush2.bf16.msra.mxu0 %v15887_v63  ;;  %v4116_v63 = vld [vmem:[%s16995_s26 + $0x2a98] sm:$0xff] }
 0x864   : > { %13384 = vmatprep.subr.bf16.mxu0 %v15864_v13  ;;  %v3697_v13 = vld [vmem:[%s16995_s26 + $0x1d80] sm:$0xff]  ;;  %v15720_v14 = vcombine.high %v4104_v56, %v4116_v63  ;;  %v15719_v16 = vcombine.low %v4104_v56, %v4116_v63 }
 0x865   : > { %13426 = vmatpush2.bf16.msra.mxu1 %v14713_v36  ;;  %v3709_v36 = vld [vmem:[%s16995_s26 + $0x1de0] sm:$0xff] }
 0x866   : > { %13427 = vmatprep.subr.bf16.mxu1 %v14690_v58  ;;  %v3313_v58 = vld [vmem:[%s16995_s26 + $0x1180] sm:$0xff]  ;;  %v15314_v8 = vcombine.high %v3697_v13, %v3709_v36 }
 0x867   : > { %13385 = vmatpush2.bf16.msra.mxu0 %v15863_v31  ;;  %v3325_v31 = vld [vmem:[%s16995_s26 + $0x11e0] sm:$0xff] }
 0x868   : > { %13386 = vmatprep.subr.bf16.mxu0 %v15840_v21  ;;  %v3673_v21 = vld [vmem:[%s16995_s26 + $0x1cc0] sm:$0xff]  ;;  %v14930_v53 = vcombine.high %v3313_v58, %v3325_v31  ;;  %v14929_v26 = vcombine.low %v3313_v58, %v3325_v31 }
 0x869   : > { %13428 = vmatpush2.bf16.msra.mxu1 %v14689_v6  ;;  %v3685_v6 = vld [vmem:[%s16995_s26 + $0x1d20] sm:$0xff] }
 0x86a   : > { %13429 = vmatprep.subr.bf16.mxu1 %v14666_v39  ;;  %v4346_v39 = vrot.slane %v18477_v41, %v17231_v51  ;;  %v3217_v31 = vld [vmem:[%s16995_s26 + $0xe80] sm:$0xff] }
 0x86b   : > { %13387 = vmatpush2.bf16.msra.mxu0 %v15839_v24  ;;  %v15313_v24 = vcombine.low %v3697_v13, %v3709_v36  ;;  %v3601_v13 = vld [vmem:[%s16995_s26 + $0x1a80] sm:$0xff] }
 0x86c   : > { %13388 = vmatprep.subr.bf16.mxu0 %v15816_v46  ;;  %v15290_v46 = vcombine.high %v3673_v21, %v3685_v6  ;;  %v13114_v9 = vadd.f32 %v18404_v28, %v4346_v39  ;;  %v14905_v28 = vcombine.low %v3289_v19, %v3301_v25  ;;  %v3613_v36 = vld [vmem:[%s16995_s26 + $0x1ae0] sm:$0xff] }
 0x86d   : > { %13430 = vmatpush2.bf16.msra.mxu1 %v14665_v48  ;;  %v4350_v48 = vrot.slane %v18477_v41, %v17234_v17  ;;  %v3193_v19 = vld [vmem:[%s16995_s26 + $0xdc0] sm:$0xff] }
 0x86e   : > { %13431 = vmatprep.subr.bf16.mxu1 %v14642_v37  ;;  %v3661_v37 = vld [vmem:[%s16995_s26 + $0x1c60] sm:$0xff] }
 0x86f   : > { %13389 = vmatpush2.bf16.msra.mxu0 %v15815_v59  ;;  %v13116_v43 = vadd.f32 %v18411_v57, %v4350_v48  ;;  %v15265_v29 = vcombine.low %v3649_v27, %v3661_v37  ;;  %v3241_v57 = vld [vmem:[%s16995_s26 + $0xf40] sm:$0xff] }
 0x870   : > { %13390 = vmatprep.subr.bf16.mxu0 %v15792_v11  ;;  %v15289_v11 = vcombine.low %v3673_v21, %v3685_v6  ;;  %v3577_v6 = vld [vmem:[%s16995_s26 + $0x19c0] sm:$0xff] }
 0x871   : > { %13432 = vmatpush2.bf16.msra.mxu1 %v14641_v47  ;;  %v3265_v47 = vld [vmem:[%s16995_s26 + $0x1000] sm:$0xff] }
 0x872   : > { %13433 = vmatprep.subr.bf16.mxu1 %v14618_v2  ;;  %v3205_v25 = vld [vmem:[%s16995_s26 + $0xe20] sm:$0xff] }
 0x873   : > { %13391 = vmatpush2.bf16.msra.mxu0 %v15791_v15  ;;  %v15266_v15 = vcombine.high %v3649_v27, %v3661_v37  ;;  %v3565_v27 = vld [vmem:[%s16995_s26 + $0x1960] sm:$0xff]  ;;  %v14810_v37 = vcombine.high %v3193_v19, %v3205_v25 }
 0x874   : > { %13392 = vmatprep.subr.bf16.mxu0 %v15768_v49  ;;  %v3625_v49 = vld [vmem:[%s16995_s26 + $0x1b40] sm:$0xff] }
 0x875   : > { %13434 = vmatpush2.bf16.msra.mxu1 %v14617_v4  ;;  %v3637_v4 = vld [vmem:[%s16995_s26 + $0x1ba0] sm:$0xff] }
 0x876   : > { %13435 = vmatprep.subr.bf16.mxu1 %v14594_v42  ;;  %v14882_v42 = vcombine.high %v3265_v47, %v3277_v1  ;;  %v15242_v63 = vcombine.high %v3625_v49, %v3637_v4  ;;  %v15241_v58 = vcombine.low %v3625_v49, %v3637_v4  ;;  %v3889_v4 = vld [vmem:[%s16995_s26 + $0x2380] sm:$0xff] }
 0x877   : > { %13393 = vmatpush2.bf16.msra.mxu0 %v15767_v55 }
 0x878   : > { %13394 = vmatprep.subr.bf16.mxu0 %v15744_v52  ;;  %v3253_v52 = vld [vmem:[%s16995_s26 + $0xfa0] sm:$0xff] }
 0x879   : > { %13436 = vmatpush2.bf16.msra.mxu1 %v14593_v5  ;;  %v14857_v21 = vcombine.low %v3241_v57, %v3253_v52 }
 0x87a   : > { %13437 = vmatprep.subr.bf16.mxu1 %v14570_v7 }
 0x87b   : > { %13395 = vmatpush2.bf16.msra.mxu0 %v15743_v18  ;;  %v14881_v18 = vcombine.low %v3265_v47, %v3277_v1  ;;  %v14809_v47 = vcombine.low %v3193_v19, %v3205_v25  ;;  %v3529_v1 = vld [vmem:[%s16995_s26 + $0x1840] sm:$0xff] }
 0x87c   : > { %13396 = vmatprep.subr.bf16.mxu0 %v15720_v14  ;;  %v3829_v19 = vld [vmem:[%s16995_s26 + $0x21a0] sm:$0xff] }
 0x87d   : > { %13438 = vmatpush2.bf16.msra.mxu1 %v14569_v35  ;;  %v14858_v35 = vcombine.high %v3241_v57, %v3253_v52 }
 0x87e   : > { %13489 = vmatprep.subr.bf16.mxu1 %v15314_v8  ;;  %v3229_v8 = vld [vmem:[%s16995_s26 + $0xee0] sm:$0xff] }
 0x87f   : > { %13397 = vmatpush2.bf16.msra.mxu0 %v15719_v16  ;;  %v15218_v16 = vcombine.high %v3601_v13, %v3613_v36  ;;  %v14834_v39 = vcombine.high %v3217_v31, %v3229_v8  ;;  %v14833_v48 = vcombine.low %v3217_v31, %v3229_v8  ;;  %v3853_v31 = vld [vmem:[%s16995_s26 + $0x2260] sm:$0xff] }
 0x880   : > { %v13195_v59 = vpop.f32.mrf.mxu1  ;;  %13440 = vmatmul.mubr.bf16.vlgmr.msra.gmra.mxu1 %v17165_v60  ;;  %13448 = vmatprep.subr.bf16.mxu0 %v14930_v53  ;;  %v3589_v53 = vld [vmem:[%s16995_s26 + $0x1a20] sm:$0xff] }
 0x881   : > { %13490 = vmatpush1.bf16.msra.mxu1 %v15313_v24  ;;  %13521 = vmatprep.mubr.bf16.mxu1 %v17317_v10  ;;  %v15217_v24 = vcombine.low %v3601_v13, %v3613_v36  ;;  %v3481_v13 = vld [vmem:[%s16995_s26 + $0x16c0] sm:$0xff] }
 0x882   : > { %v13154_v23 = vpop.f32.mrf.mxu0  ;;  %13399 = vmatmul.mubr.bf16.vlgmr.msra.gmra.mxu0 %v17380_v33  ;;  %v13197_v2 = vpop.f32.mrf.mxu1  ;;  %13491 = vmatprep.subr.bf16.mxu1 %v15290_v46  ;;  %v15194_v46 = vcombine.high %v3577_v6, %v3589_v53  ;;  %v3493_v36 = vld [vmem:[%s16995_s26 + $0x1720] sm:$0xff] }
 0x883   : > { %v13155_v45 = vadd.f32 %v13154_v23, %v13114_v9  ;;  %13449 = vmatpush1.bf16.msra.mxu0 %v14929_v26  ;;  %13480 = vmatprep.mubr.bf16.mxu0 %v17242_v22  ;;  %v3553_v26 = vld [vmem:[%s16995_s26 + $0x1900] sm:$0xff]  ;;  %v15098_v8 = vcombine.high %v3481_v13, %v3493_v36 }
 0x884   : > { %v13156_v44 = vpop.f32.mrf.mxu0  ;;  %v13199_v54 = vpop.f32.mrf.mxu1  ;;  %13450 = vmatprep.subr.bf16.mxu0 %v14906_v3  ;;  %v3169_v3 = vld [vmem:[%s16995_s26 + $0xd00] sm:$0xff] }
 0x885   : > { %v18497_v55 = vadd.f32 %v13195_v59, %v13155_v45  ;;  %v13157_v61 = vadd.f32 %v13156_v44, %v13116_v43  ;;  %13492 = vmatpush1.bf16.msra.mxu1 %v15289_v11  ;;  %v15193_v59 = vcombine.low %v3577_v6, %v3589_v53  ;;  %v3181_v9 = vld [vmem:[%s16995_s26 + $0xd60] sm:$0xff]  ;;  %v15170_v11 = vcombine.high %v3553_v26, %v3565_v27 }
 0x886   : > { %v13158_v5 = vpop.f32.mrf.mxu0  ;;  %v13200_v56 = vpop.f32.mrf.mxu1  ;;  %13493 = vmatprep.subr.bf16.mxu1 %v15266_v15  ;;  %v3541_v23 = vld [vmem:[%s16995_s26 + $0x18a0] sm:$0xff]  ;;  %v15169_v15 = vcombine.low %v3553_v26, %v3565_v27  ;;  %v14785_v49 = vcombine.low %v3169_v3, %v3181_v9 }
 0x887   : > { %v18501_v7 = vadd.f32 %v13197_v2, %v13157_v61  ;;  %13451 = vmatpush1.bf16.msra.mxu0 %v14905_v28  ;;  %v14786_v2 = vcombine.high %v3169_v3, %v3181_v9  ;;  %v3145_v43 = vld [vmem:[%s16995_s26 + $0xc40] sm:$0xff]  ;;  %v15146_v28 = vcombine.high %v3529_v1, %v3541_v23 }
 0x888   : > { %v13159_v14 = vpop.f32.mrf.mxu0  ;;  %13452 = vmatprep.subr.bf16.mxu0 %v14882_v42  ;;  %v3157_v45 = vld [vmem:[%s16995_s26 + $0xca0] sm:$0xff]  ;;  %v15145_v42 = vcombine.low %v3529_v1, %v3541_v23 }
 0x889   : > { %13494 = vmatpush1.bf16.msra.mxu1 %v15265_v29  ;;  %v3901_v44 = vld [vmem:[%s16995_s26 + $0x23e0] sm:$0xff]  ;;  %v14762_v54 = vcombine.high %v3145_v43, %v3157_v45  ;;  %v14761_v52 = vcombine.low %v3145_v43, %v3157_v45 }
 0x88a   : > { %13495 = vmatprep.subr.bf16.mxu1 %v15242_v63  ;;  %v3505_v61 = vld [vmem:[%s16995_s26 + $0x1780] sm:$0xff]  ;;  %v15506_v57 = vcombine.high %v3889_v4, %v3901_v44 }
 0x88b   : > { %13453 = vmatpush1.bf16.msra.mxu0 %v14881_v18  ;;  %v3517_v29 = vld [vmem:[%s16995_s26 + $0x17e0] sm:$0xff]  ;;  %v15505_v18 = vcombine.low %v3889_v4, %v3901_v44 }
 0x88c   : > { %13454 = vmatprep.subr.bf16.mxu0 %v14858_v35  ;;  %v3865_v5 = vld [vmem:[%s16995_s26 + $0x22c0] sm:$0xff]  ;;  %v15122_v63 = vcombine.high %v3505_v61, %v3517_v29  ;;  %v15121_v35 = vcombine.low %v3505_v61, %v3517_v29 }
 0x88d   : > { %13496 = vmatpush1.bf16.msra.mxu1 %v15241_v58  ;;  %v3877_v56 = vld [vmem:[%s16995_s26 + $0x2320] sm:$0xff] }
 0x88e   : > { %13497 = vmatprep.subr.bf16.mxu1 %v15218_v16  ;;  %v15482_v14 = vcombine.high %v3865_v5, %v3877_v56  ;;  %v3841_v58 = vld [vmem:[%s16995_s26 + $0x2200] sm:$0xff]  ;;  %v15481_v16 = vcombine.low %v3865_v5, %v3877_v56 }
 0x88f   : > { %13455 = vmatpush1.bf16.msra.mxu0 %v14857_v21  ;;  %v3457_v21 = vld [vmem:[%s16995_s26 + $0x1600] sm:$0xff]  ;;  %v15458_v53 = vcombine.high %v3841_v58, %v3853_v31 }
 0x890   : > { %13456 = vmatprep.subr.bf16.mxu0 %v14834_v39  ;;  %v3469_v6 = vld [vmem:[%s16995_s26 + $0x1660] sm:$0xff]  ;;  %v15097_v39 = vcombine.low %v3481_v13, %v3493_v36 }
 0x891   : > { %13498 = vmatpush1.bf16.msra.mxu1 %v15217_v24  ;;  %v3817_v24 = vld [vmem:[%s16995_s26 + $0x2140] sm:$0xff]  ;;  %v15074_v25 = vcombine.high %v3457_v21, %v3469_v6 }
 0x892   : > { %13499 = vmatprep.subr.bf16.mxu1 %v15194_v46  ;;  %v15457_v46 = vcombine.low %v3841_v58, %v3853_v31  ;;  %v3445_v26 = vld [vmem:[%s16995_s26 + $0x15a0] sm:$0xff]  ;;  %v15434_v27 = vcombine.high %v3817_v24, %v3829_v19 }
 0x893   : > { %13457 = vmatpush1.bf16.msra.mxu0 %v14833_v48  ;;  %v3433_v48 = vld [vmem:[%s16995_s26 + $0x1540] sm:$0xff] }
 0x894   : > { %13458 = vmatprep.subr.bf16.mxu0 %v14810_v37  ;;  %v15073_v37 = vcombine.low %v3457_v21, %v3469_v6  ;;  %v3805_v3 = vld [vmem:[%s16995_s26 + $0x20e0] sm:$0xff]  ;;  %v15050_v9 = vcombine.high %v3433_v48, %v3445_v26  ;;  %v2942_v21 = vld [vmem:[%s16995_s26 + $0x5e8] sm:$0xff] }
 0x895   : > { %13500 = vmatpush1.bf16.msra.mxu1 %v15193_v59  ;;  %v3793_v59 = vld [vmem:[%s16995_s26 + $0x2080] sm:$0xff] }
 0x896   : > { %13501 = vmatprep.subr.bf16.mxu1 %v15170_v11  ;;  %v15433_v11 = vcombine.low %v3817_v24, %v3829_v19  ;;  %v3421_v1 = vld [vmem:[%s16995_s26 + $0x14e0] sm:$0xff]  ;;  %v15410_v23 = vcombine.high %v3793_v59, %v3805_v3 }
 0x897   : > { %13459 = vmatpush1.bf16.msra.mxu0 %v14809_v47  ;;  %v3409_v47 = vld [vmem:[%s16995_s26 + $0x1480] sm:$0xff] }
 0x898   : > { %13460 = vmatprep.subr.bf16.mxu0 %v14786_v2  ;;  %v15049_v2 = vcombine.low %v3433_v48, %v3445_v26  ;;  %v3781_v43 = vld [vmem:[%s16995_s26 + $0x2020] sm:$0xff]  ;;  %v15026_v45 = vcombine.high %v3409_v47, %v3421_v1  ;;  %v2918_v48 = vld [vmem:[%s16995_s26 + $0x528] sm:$0xff] }
 0x899   : > { %13502 = vmatpush1.bf16.msra.mxu1 %v15169_v15  ;;  %v3769_v15 = vld [vmem:[%s16995_s26 + $0x1fc0] sm:$0xff] }
 0x89a   : > { %13503 = vmatprep.subr.bf16.mxu1 %v15146_v28  ;;  %v15409_v28 = vcombine.low %v3793_v59, %v3805_v3  ;;  %v3397_v4 = vld [vmem:[%s16995_s26 + $0x1420] sm:$0xff]  ;;  %v15386_v44 = vcombine.high %v3769_v15, %v3781_v43 }
 0x89b   : > { %13461 = vmatpush1.bf16.msra.mxu0 %v14785_v49  ;;  %v3385_v49 = vld [vmem:[%s16995_s26 + $0x13c0] sm:$0xff] }
 0x89c   : > { %13462 = vmatprep.subr.bf16.mxu0 %v14762_v54  ;;  %v15025_v54 = vcombine.low %v3409_v47, %v3421_v1  ;;  %v3757_v61 = vld [vmem:[%s16995_s26 + $0x1f60] sm:$0xff]  ;;  %v15002_v29 = vcombine.high %v3385_v49, %v3397_v4  ;;  %v2894_v47 = vld [vmem:[%s16995_s26 + $0x468] sm:$0xff] }
 0x89d   : > { %13504 = vmatpush1.bf16.msra.mxu1 %v15145_v42  ;;  %v3745_v42 = vld [vmem:[%s16995_s26 + $0x1f00] sm:$0xff] }
 0x89e   : > { %13505 = vmatprep.subr.bf16.mxu1 %v15506_v57  ;;  %v15385_v57 = vcombine.low %v3769_v15, %v3781_v43  ;;  %v3373_v5 = vld [vmem:[%s16995_s26 + $0x1360] sm:$0xff]  ;;  %v15362_v56 = vcombine.high %v3745_v42, %v3757_v61 }
 0x89f   : > { %13463 = vmatpush1.bf16.msra.mxu0 %v14761_v52  ;;  %v3361_v52 = vld [vmem:[%s16995_s26 + $0x1300] sm:$0xff] }
 0x8a0   : > { %13464 = vmatprep.subr.bf16.mxu0 %v15122_v63  ;;  %v15001_v63 = vcombine.low %v3385_v49, %v3397_v4  ;;  %v3733_v13 = vld [vmem:[%s16995_s26 + $0x1ea0] sm:$0xff]  ;;  %v14978_v36 = vcombine.high %v3361_v52, %v3373_v5 }
 0x8a1   : > { %13506 = vmatpush2.bf16.msra.mxu1 %v15505_v18  ;;  %v3721_v18 = vld [vmem:[%s16995_s26 + $0x1e40] sm:$0xff] }
 0x8a2   : > { %13507 = vmatprep.subr.bf16.mxu1 %v15482_v14  ;;  %v15361_v14 = vcombine.low %v3745_v42, %v3757_v61  ;;  %v3349_v58 = vld [vmem:[%s16995_s26 + $0x12a0] sm:$0xff]  ;;  %v15338_v31 = vcombine.high %v3721_v18, %v3733_v13  ;;  %v2870_v42 = vld [vmem:[%s16995_s26 + $0x3a8] sm:$0xff] }
 0x8a3   : > { %13465 = vmatpush2.bf16.msra.mxu0 %v15121_v35  ;;  %v3337_v35 = vld [vmem:[%s16995_s26 + $0x1240] sm:$0xff] }
 0x8a4   : > { %13466 = vmatprep.subr.bf16.mxu0 %v15098_v8  ;;  %v14977_v8 = vcombine.low %v3361_v52, %v3373_v5  ;;  %v14954_v6 = vcombine.high %v3337_v35, %v3349_v58  ;;  %v4093_v24 = vld [vmem:[%s16995_s26 + $0x29e0] sm:$0xff] }
 0x8a5   : > { %13508 = vmatpush2.bf16.msra.mxu1 %v15481_v16  ;;  %v2930_v16 = vld [vmem:[%s16995_s26 + $0x588] sm:$0xff]  ;;  %v4069_v59 = vld [vmem:[%s16995_s26 + $0x2920] sm:$0xff] }
 0x8a6   : > { %13509 = vmatprep.subr.bf16.mxu1 %v15458_v53  ;;  %v15337_v53 = vcombine.low %v3721_v18, %v3733_v13  ;;  %v14548_v19 = vcombine.high %v2930_v16, %v2942_v21  ;;  %v4033_v15 = vld [vmem:[%s16995_s26 + $0x2800] sm:$0xff] }
 0x8a7   : > { %13467 = vmatpush2.bf16.msra.mxu0 %v15097_v39  ;;  %v4081_v39 = vld [vmem:[%s16995_s26 + $0x2980] sm:$0xff] }
 0x8a8   : > { %13468 = vmatprep.subr.bf16.mxu0 %v15074_v25  ;;  %v14953_v25 = vcombine.low %v3337_v35, %v3349_v58  ;;  %v15698_v26 = vcombine.high %v4081_v39, %v4093_v24  ;;  %v4045_v43 = vld [vmem:[%s16995_s26 + $0x2860] sm:$0xff]  ;;  %v2846_v35 = vld [vmem:[%s16995_s26 + $0x2e8] sm:$0xff] }
 0x8a9   : > { %13510 = vmatpush2.bf16.msra.mxu1 %v15457_v46  ;;  %v2906_v46 = vld [vmem:[%s16995_s26 + $0x4c8] sm:$0xff] }
 0x8aa   : > { %13511 = vmatprep.subr.bf16.mxu1 %v15434_v27  ;;  %v14547_v27 = vcombine.low %v2930_v16, %v2942_v21  ;;  %v14524_v3 = vcombine.high %v2906_v46, %v2918_v48  ;;  %v3997_v16 = vld [vmem:[%s16995_s26 + $0x26e0] sm:$0xff] }
 0x8ab   : > { %13469 = vmatpush2.bf16.msra.mxu0 %v15073_v37  ;;  %v4057_v37 = vld [vmem:[%s16995_s26 + $0x28c0] sm:$0xff] }
 0x8ac   : > { %13470 = vmatprep.subr.bf16.mxu0 %v15050_v9  ;;  %v15697_v9 = vcombine.low %v4081_v39, %v4093_v24  ;;  %v2822_v39 = vld [vmem:[%s16995_s26 + $0x228] sm:$0xff] }
 0x8ad   : > { %13512 = vmatpush2.bf16.msra.mxu1 %v15433_v11  ;;  %v2882_v11 = vld [vmem:[%s16995_s26 + $0x408] sm:$0xff] }
 0x8ae   : > { %13513 = vmatprep.subr.bf16.mxu1 %v15410_v23  ;;  %v15674_v23 = vcombine.high %v4057_v37, %v4069_v59  ;;  %v14500_v49 = vcombine.high %v2882_v11, %v2894_v47  ;;  %v14499_v5 = vcombine.low %v2882_v11, %v2894_v47  ;;  %v3949_v11 = vld [vmem:[%s16995_s26 + $0x2560] sm:$0xff] }
 0x8af   : > { %13471 = vmatpush2.bf16.msra.mxu0 %v15049_v2  ;;  %v14523_v2 = vcombine.low %v2906_v46, %v2918_v48  ;;  %v3973_v46 = vld [vmem:[%s16995_s26 + $0x2620] sm:$0xff] }
 0x8b0   : > { %13472 = vmatprep.subr.bf16.mxu0 %v15026_v45 }
 0x8b1   : > { %13514 = vmatpush2.bf16.msra.mxu1 %v15409_v28 }
 0x8b2   : > { %13515 = vmatprep.subr.bf16.mxu1 %v15386_v44  ;;  %v15673_v44 = vcombine.low %v4057_v37, %v4069_v59  ;;  %v2798_v37 = vld [vmem:[%s16995_s26 + $0x168] sm:$0xff] }
 0x8b3   : > { %13473 = vmatpush2.bf16.msra.mxu0 %v15025_v54  ;;  %v2858_v54 = vld [vmem:[%s16995_s26 + $0x348] sm:$0xff] }
 0x8b4   : > { %13474 = vmatprep.subr.bf16.mxu0 %v15002_v29  ;;  %v14476_v13 = vcombine.high %v2858_v54, %v2870_v42 }
 0x8b5   : > { %13516 = vmatpush2.bf16.msra.mxu1 %v15385_v57  ;;  %v15650_v57 = vcombine.high %v4033_v15, %v4045_v43 }
 0x8b6   : > { %13517 = vmatprep.subr.bf16.mxu1 %v15362_v56  ;;  %v4009_v56 = vld [vmem:[%s16995_s26 + $0x2740] sm:$0xff] }
 0x8b7   : > { %13475 = vmatpush2.bf16.msra.mxu0 %v15001_v63 }
 0x8b8   : > { %13476 = vmatprep.subr.bf16.mxu0 %v14978_v36  ;;  %v15649_v36 = vcombine.low %v4033_v15, %v4045_v43  ;;  %v2762_v15 = vld [vmem:[%s16995_s26 + $0x48] sm:$0xff] }
 0x8b9   : > { %13518 = vmatpush2.bf16.msra.mxu1 %v15361_v14  ;;  %v2834_v14 = vld [vmem:[%s16995_s26 + $0x288] sm:$0xff] }
 0x8ba   : > { %13519 = vmatprep.subr.bf16.mxu1 %v15338_v31  ;;  %v14475_v31 = vcombine.low %v2858_v54, %v2870_v42  ;;  %v14452_v21 = vcombine.high %v2834_v14, %v2846_v35  ;;  %v2774_v43 = vld [vmem:[%s16995_s26 + $0xa8] sm:$0xff]  ;;  %v3925_v54 = vld [vmem:[%s16995_s26 + $0x24a0] sm:$0xff] }
 0x8bb   : > { %13477 = vmatpush2.bf16.msra.mxu0 %v14977_v8  ;;  %v3985_v8 = vld [vmem:[%s16995_s26 + $0x2680] sm:$0xff]  ;;  %v14380_v42 = vcombine.high %v2762_v15, %v2774_v43 }
 0x8bc   : > { %13478 = vmatprep.subr.bf16.mxu0 %v14954_v6  ;;  %v15602_v24 = vcombine.high %v3985_v8, %v3997_v16 }
 0x8bd   : > { %13520 = vmatpush2.bf16.msra.mxu1 %v15337_v53  ;;  %v2810_v53 = vld [vmem:[%s16995_s26 + $0x1c8] sm:$0xff] }
 0x8be   : > { %13571 = vmatprep.subr.bf16.mxu1 %v14548_v19  ;;  %v14451_v19 = vcombine.low %v2834_v14, %v2846_v35  ;;  %v14428_v48 = vcombine.high %v2810_v53, %v2822_v39 }
 0x8bf   : > { %13479 = vmatpush2.bf16.msra.mxu0 %v14953_v25  ;;  %v3961_v25 = vld [vmem:[%s16995_s26 + $0x25c0] sm:$0xff] }
 0x8c0   : > { %v18561_v1 = vpop.f32.mrf.mxu1  ;;  %13522 = vmatmul.mubr.bf16.vlgmr.msra.gmra.mxu1 %v17319_v12  ;;  %13530 = vmatprep.subr.bf16.mxu0 %v15698_v26  ;;  %v15601_v26 = vcombine.low %v3985_v8, %v3997_v16  ;;  %v15578_v59 = vcombine.high %v3961_v25, %v3973_v46  ;;  %v3074_v16 = vld [vmem:[%s16995_s26 + $0xa08] sm:$0xff] }
 0x8c1   : > { %13572 = vmatpush1.bf16.msra.mxu1 %v14547_v27  ;;  %13603 = vmatprep.mubr.bf16.mxu1 %v17160_v50  ;;  %v2786_v27 = vld [vmem:[%s16995_s26 + $0x108] sm:$0xff] }
 0x8c2   : > { %v13236_v45 = vpop.f32.mrf.mxu0  ;;  %13481 = vmatmul.mubr.bf16.vlgmr.msra.gmra.mxu0 %v17246_v30  ;;  %v18568_v28 = vpop.f32.mrf.mxu1  ;;  %13573 = vmatprep.subr.bf16.mxu1 %v14524_v3  ;;  %v14427_v3 = vcombine.low %v2810_v53, %v2822_v39  ;;  %v4225_v39 = vld [vmem:[%s16995_s26 + $0x2e00] sm:$0xff] }
 0x8c3   : > { %v13237_v4 = vadd.f32 %v13236_v45, %v18497_v55  ;;  %13531 = vmatpush1.bf16.msra.mxu0 %v15697_v9  ;;  %13562 = vmatprep.mubr.bf16.mxu0 %v17376_v20  ;;  %v4021_v55 = vld [vmem:[%s16995_s26 + $0x27a0] sm:$0xff] }
 0x8c4   : > { %v13238_v61 = vpop.f32.mrf.mxu0  ;;  %v13281_v29 = vpop.f32.mrf.mxu1  ;;  %13532 = vmatprep.subr.bf16.mxu0 %v15674_v23  ;;  %v15625_v6 = vcombine.low %v4009_v56, %v4021_v55  ;;  %v3937_v9 = vld [vmem:[%s16995_s26 + $0x2500] sm:$0xff]  ;;  %v14404_v23 = vcombine.high %v2786_v27, %v2798_v37 }
 0x8c5   : > { %16141 = vtanh.f32 %v13237_v4  ;;  %v13239_v52 = vadd.f32 %v13238_v61, %v18501_v7  ;;  %13574 = vmatpush1.bf16.msra.mxu1 %v14523_v2  ;;  %v15626_v7 = vcombine.high %v4009_v56, %v4021_v55  ;;  %v15577_v2 = vcombine.low %v3961_v25, %v3973_v46  ;;  %v3122_v29 = vld [vmem:[%s16995_s26 + $0xb88] sm:$0xff]  ;;  %v4273_v56 = vld [vmem:[%s16995_s26 + $0x2f80] sm:$0xff] }
 0x8c6   : > { %v13240_v63 = vpop.f32.mrf.mxu0  ;;  %v13282_v18 = vpop.f32.mrf.mxu1  ;;  %13575 = vmatprep.subr.bf16.mxu1 %v14500_v49  ;;  %v15554_v49 = vcombine.high %v3937_v9, %v3949_v11  ;;  %v14403_v4 = vcombine.low %v2786_v27, %v2798_v37  ;;  %v15553_v61 = vcombine.low %v3937_v9, %v3949_v11  ;;  %v4285_v55 = vld [vmem:[%s16995_s26 + $0x2fe0] sm:$0xff]  ;;  %v3050_v46 = vld [vmem:[%s16995_s26 + $0x948] sm:$0xff] }
 0x8c7   : > { %16143 = vtanh.f32 %v13239_v52  ;;  %13533 = vmatpush1.bf16.msra.mxu0 %v15673_v44  ;;  %v3913_v44 = vld [vmem:[%s16995_s26 + $0x2440] sm:$0xff]  ;;  %v15890_v14 = vcombine.high %v4273_v56, %v4285_v55  ;;  %v15889_v8 = vcombine.low %v4273_v56, %v4285_v55  ;;  %v3026_v11 = vld [vmem:[%s16995_s26 + $0x888] sm:$0xff] }
 0x8c8   : > { %v13241_v58 = vpop.f32.mrf.mxu0  ;;  %13534 = vmatprep.subr.bf16.mxu0 %v15650_v57  ;;  %v3134_v57 = vld [vmem:[%s16995_s26 + $0xbe8] sm:$0xff]  ;;  %v15530_v52 = vcombine.high %v3913_v44, %v3925_v54  ;;  %v15529_v18 = vcombine.low %v3913_v44, %v3925_v54  ;;  %v4201_v37 = vld [vmem:[%s16995_s26 + $0x2d40] sm:$0xff] }
 0x8c9   : > { %13576 = vmatpush1.bf16.msra.mxu1 %v14499_v5  ;;  %v14379_v5 = vcombine.low %v2762_v15, %v2774_v43  ;;  %v14740_v63 = vcombine.high %v3122_v29, %v3134_v57  ;;  %v14739_v35 = vcombine.low %v3122_v29, %v3134_v57  ;;  %v4249_v58 = vld [vmem:[%s16995_s26 + $0x2ec0] sm:$0xff]  ;;  %v3014_v44 = vld [vmem:[%s16995_s26 + $0x828] sm:$0xff] }
 0x8ca   : > { %13577 = vmatprep.subr.bf16.mxu1 %v14476_v13  ;;  %v3098_v13 = vld [vmem:[%s16995_s26 + $0xac8] sm:$0xff]  ;;  %v4177_v15 = vld [vmem:[%s16995_s26 + $0x2c80] sm:$0xff] }
 0x8cb   : > { %13535 = vmatpush1.bf16.msra.mxu0 %v15649_v36  ;;  %v3110_v36 = vld [vmem:[%s16995_s26 + $0xb28] sm:$0xff]  ;;  %v4189_v43 = vld [vmem:[%s16995_s26 + $0x2ce0] sm:$0xff] }
 0x8cc   : > { %13536 = vmatprep.subr.bf16.mxu0 %v15626_v7  ;;  %v4261_v7 = vld [vmem:[%s16995_s26 + $0x2f20] sm:$0xff]  ;;  %v14715_v53 = vcombine.low %v3098_v13, %v3110_v36  ;;  %v15794_v54 = vcombine.high %v4177_v15, %v4189_v43  ;;  %v2990_v56 = vld [vmem:[%s16995_s26 + $0x768] sm:$0xff] }
 0x8cd   : > { %13578 = vmatpush1.bf16.msra.mxu1 %v14475_v31  ;;  %v14716_v31 = vcombine.high %v3098_v13, %v3110_v36  ;;  %v15865_v25 = vcombine.low %v4249_v58, %v4261_v7  ;;  %v4165_v29 = vld [vmem:[%s16995_s26 + $0x2c20] sm:$0xff] }
 0x8ce   : > { %13579 = vmatprep.subr.bf16.mxu1 %v14452_v21  ;;  %v3086_v21 = vld [vmem:[%s16995_s26 + $0xa68] sm:$0xff]  ;;  %v4141_v13 = vld [vmem:[%s16995_s26 + $0x2b60] sm:$0xff] }
 0x8cf   : > { %13537 = vmatpush1.bf16.msra.mxu0 %v15625_v6  ;;  %v15866_v6 = vcombine.high %v4249_v58, %v4261_v7  ;;  %v14691_v27 = vcombine.low %v3074_v16, %v3086_v21  ;;  %v2966_v58 = vld [vmem:[%s16995_s26 + $0x6a8] sm:$0xff] }
 0x8d0   : > { %13538 = vmatprep.subr.bf16.mxu0 %v15602_v24  ;;  %v4237_v24 = vld [vmem:[%s16995_s26 + $0x2e60] sm:$0xff] }
 0x8d1   : > { %13580 = vmatpush1.bf16.msra.mxu1 %v14451_v19  ;;  %v14692_v19 = vcombine.high %v3074_v16, %v3086_v21  ;;  %v15841_v9 = vcombine.low %v4225_v39, %v4237_v24  ;;  %v4117_v16 = vld [vmem:[%s16995_s26 + $0x2aa0] sm:$0xff] }
 0x8d2   : > { %v16142_v47 = vpop.eup %16141  ;;  %13581 = vmatprep.subr.bf16.mxu1 %v14428_v48  ;;  %v3062_v48 = vld [vmem:[%s16995_s26 + $0x9a8] sm:$0xff] }
 0x8d3   : > { %14099 = vst [vmem:[%s17653_s5 + $0x60] sm:$0xff] %v16142_v47  ;;  %13539 = vmatpush1.bf16.msra.mxu0 %v15601_v26  ;;  %v15842_v26 = vcombine.high %v4225_v39, %v4237_v24  ;;  %v3038_v47 = vld [vmem:[%s16995_s26 + $0x8e8] sm:$0xff] }
 0x8d4   : > { %v16144_v45 = vpop.eup %16143  ;;  %13540 = vmatprep.subr.bf16.mxu0 %v15578_v59  ;;  %v4213_v59 = vld [vmem:[%s16995_s26 + $0x2da0] sm:$0xff]  ;;  %v3710_v39 = vld [vmem:[%s16995_s26 + $0x1de8] sm:$0xff] }
 0x8d5   : > { %14100 = vst [vmem:[%s17653_s5 + $0x68] sm:$0xff] %v16144_v45  ;;  %13582 = vmatpush1.bf16.msra.mxu1 %v14427_v3  ;;  %v14668_v3 = vcombine.high %v3050_v46, %v3062_v48  ;;  %v14644_v45 = vcombine.high %v3026_v11, %v3038_v47 }
 0x8d6   : > { %13583 = vmatprep.subr.bf16.mxu1 %v14404_v23  ;;  %v15818_v23 = vcombine.high %v4201_v37, %v4213_v59 }
 0x8d7   : > { %13541 = vmatpush1.bf16.msra.mxu0 %v15577_v2  ;;  %v14667_v2 = vcombine.low %v3050_v46, %v3062_v48  ;;  %v3326_v46 = vld [vmem:[%s16995_s26 + $0x11e8] sm:$0xff] }
 0x8d8   : > { %13542 = vmatprep.subr.bf16.mxu0 %v15554_v49  ;;  %v15817_v49 = vcombine.low %v4201_v37, %v4213_v59  ;;  %v3686_v37 = vld [vmem:[%s16995_s26 + $0x1d28] sm:$0xff] }
 0x8d9   : > { %13584 = vmatpush1.bf16.msra.mxu1 %v14403_v4  ;;  %v3002_v4 = vld [vmem:[%s16995_s26 + $0x7c8] sm:$0xff] }
 0x8da   : > { %13585 = vmatprep.subr.bf16.mxu1 %v14380_v42  ;;  %v14643_v42 = vcombine.low %v3026_v11, %v3038_v47  ;;  %v14620_v57 = vcombine.high %v3002_v4, %v3014_v44  ;;  %v3290_v11 = vld [vmem:[%s16995_s26 + $0x10c8] sm:$0xff] }
 0x8db   : > { %13543 = vmatpush1.bf16.msra.mxu0 %v15553_v61  ;;  %v4153_v61 = vld [vmem:[%s16995_s26 + $0x2bc0] sm:$0xff]  ;;  %v3302_v47 = vld [vmem:[%s16995_s26 + $0x1128] sm:$0xff] }
 0x8dc   : > { %13544 = vmatprep.subr.bf16.mxu0 %v15530_v52  ;;  %v15793_v52 = vcombine.low %v4177_v15, %v4189_v43  ;;  %v15770_v55 = vcombine.high %v4153_v61, %v4165_v29  ;;  %v3650_v43 = vld [vmem:[%s16995_s26 + $0x1c08] sm:$0xff] }
 0x8dd   : > { %13586 = vmatpush1.bf16.msra.mxu1 %v14379_v5  ;;  %v2978_v5 = vld [vmem:[%s16995_s26 + $0x708] sm:$0xff] }
 0x8de   : > { %13587 = vmatprep.subr.bf16.mxu1 %v14740_v63  ;;  %v14619_v63 = vcombine.low %v3002_v4, %v3014_v44  ;;  %v14596_v36 = vcombine.high %v2978_v5, %v2990_v56  ;;  %v14908_v4 = vcombine.high %v3290_v11, %v3302_v47 }
 0x8df   : > { %13545 = vmatpush1.bf16.msra.mxu0 %v15529_v18  ;;  %v4129_v18 = vld [vmem:[%s16995_s26 + $0x2b00] sm:$0xff] }
 0x8e0   : > { %13546 = vmatprep.subr.bf16.mxu0 %v15890_v14  ;;  %v15769_v14 = vcombine.low %v4153_v61, %v4165_v29  ;;  %v15746_v7 = vcombine.high %v4129_v18, %v4141_v13  ;;  %v3278_v61 = vld [vmem:[%s16995_s26 + $0x1068] sm:$0xff] }
 0x8e1   : > { %13588 = vmatpush2.bf16.msra.mxu1 %v14739_v35  ;;  %v2954_v35 = vld [vmem:[%s16995_s26 + $0x648] sm:$0xff] }
 0x8e2   : > { %13589 = vmatprep.subr.bf16.mxu1 %v14716_v31  ;;  %v14595_v31 = vcombine.low %v2978_v5, %v2990_v56  ;;  %v14572_v21 = vcombine.high %v2954_v35, %v2966_v58  ;;  %v3626_v56 = vld [vmem:[%s16995_s26 + $0x1b48] sm:$0xff] }
 0x8e3   : > { %13547 = vmatpush2.bf16.msra.mxu0 %v15889_v8  ;;  %v4105_v8 = vld [vmem:[%s16995_s26 + $0x2a40] sm:$0xff] }
 0x8e4   : > { %13548 = vmatprep.subr.bf16.mxu0 %v15866_v6  ;;  %v15745_v6 = vcombine.low %v4129_v18, %v4141_v13  ;;  %v15722_v24 = vcombine.high %v4105_v8, %v4117_v16 }
 0x8e5   : > { %13590 = vmatpush2.bf16.msra.mxu1 %v14715_v53  ;;  %v3698_v53 = vld [vmem:[%s16995_s26 + $0x1d88] sm:$0xff] }
 0x8e6   : > { %13591 = vmatprep.subr.bf16.mxu1 %v14692_v19  ;;  %v14571_v19 = vcombine.low %v2954_v35, %v2966_v58  ;;  %v15316_v48 = vcombine.high %v3698_v53, %v3710_v39  ;;  %v3254_v58 = vld [vmem:[%s16995_s26 + $0xfa8] sm:$0xff] }
 0x8e7   : > { %13549 = vmatpush2.bf16.msra.mxu0 %v15865_v25  ;;  %v3314_v25 = vld [vmem:[%s16995_s26 + $0x1188] sm:$0xff] }
 0x8e8   : > { %13550 = vmatprep.subr.bf16.mxu0 %v15842_v26  ;;  %v15721_v26 = vcombine.low %v4105_v8, %v4117_v16  ;;  %v14932_v59 = vcombine.high %v3314_v25, %v3326_v46  ;;  %v14931_v15 = vcombine.low %v3314_v25, %v3326_v46  ;;  %v3218_v25 = vld [vmem:[%s16995_s26 + $0xe88] sm:$0xff] }
 0x8e9   : > { %13592 = vmatpush2.bf16.msra.mxu1 %v14691_v27  ;;  %v3674_v27 = vld [vmem:[%s16995_s26 + $0x1cc8] sm:$0xff] }
 0x8ea   : > { %13593 = vmatprep.subr.bf16.mxu1 %v14668_v3  ;;  %v4354_v3 = vrot.slane %v18477_v41, %v17307_v62  ;;  %v3230_v46 = vld [vmem:[%s16995_s26 + $0xee8] sm:$0xff] }
 0x8eb   : > { %13551 = vmatpush2.bf16.msra.mxu0 %v15841_v9  ;;  %v15315_v9 = vcombine.low %v3698_v53, %v3710_v39  ;;  %v3614_v53 = vld [vmem:[%s16995_s26 + $0x1ae8] sm:$0xff] }
 0x8ec   : > { %13552 = vmatprep.subr.bf16.mxu0 %v15818_v23  ;;  %v15292_v23 = vcombine.high %v3674_v27, %v3686_v37  ;;  %v13278_v44 = vadd.f32 %v18561_v1, %v4354_v3  ;;  %v14907_v1 = vcombine.low %v3290_v11, %v3302_v47  ;;  %v3206_v11 = vld [vmem:[%s16995_s26 + $0xe28] sm:$0xff] }
 0x8ed   : > { %13594 = vmatpush2.bf16.msra.mxu1 %v14667_v2  ;;  %v4358_v2 = vrot.slane %v18477_v41, %v17312_v0 }
 0x8ee   : > { %13595 = vmatprep.subr.bf16.mxu1 %v14644_v45  ;;  %v3662_v45 = vld [vmem:[%s16995_s26 + $0x1c68] sm:$0xff] }
 0x8ef   : > { %13553 = vmatpush2.bf16.msra.mxu0 %v15817_v49  ;;  %v15267_v35 = vcombine.low %v3650_v43, %v3662_v45 }
 0x8f0   : > { %13554 = vmatprep.subr.bf16.mxu0 %v15794_v54  ;;  %v15291_v54 = vcombine.low %v3674_v27, %v3686_v37  ;;  %v3578_v27 = vld [vmem:[%s16995_s26 + $0x19c8] sm:$0xff] }
 0x8f1   : > { %13596 = vmatpush2.bf16.msra.mxu1 %v14643_v42  ;;  %v3266_v42 = vld [vmem:[%s16995_s26 + $0x1008] sm:$0xff] }
 0x8f2   : > { %13597 = vmatprep.subr.bf16.mxu1 %v14620_v57  ;;  %v15268_v57 = vcombine.high %v3650_v43, %v3662_v45  ;;  %v14884_v13 = vcombine.high %v3266_v42, %v3278_v61  ;;  %v3590_v37 = vld [vmem:[%s16995_s26 + $0x1a28] sm:$0xff] }
 0x8f3   : > { %13555 = vmatpush2.bf16.msra.mxu0 %v15793_v52  ;;  %v13280_v52 = vadd.f32 %v18568_v28, %v4358_v2  ;;  %v3242_v28 = vld [vmem:[%s16995_s26 + $0xf48] sm:$0xff]  ;;  %v15196_v47 = vcombine.high %v3578_v27, %v3590_v37  ;;  %v15195_v45 = vcombine.low %v3578_v27, %v3590_v37 }
 0x8f4   : > { %13556 = vmatprep.subr.bf16.mxu0 %v15770_v55  ;;  %v3638_v55 = vld [vmem:[%s16995_s26 + $0x1ba8] sm:$0xff] }
 0x8f5   : > { %13598 = vmatpush2.bf16.msra.mxu1 %v14619_v63  ;;  %v15244_v8 = vcombine.high %v3626_v56, %v3638_v55  ;;  %v3554_v2 = vld [vmem:[%s16995_s26 + $0x1908] sm:$0xff] }
 0x8f6   : > { %13599 = vmatprep.subr.bf16.mxu1 %v14596_v36 }
 0x8f7   : > { %13557 = vmatpush2.bf16.msra.mxu0 %v15769_v14 }
 0x8f8   : > { %13558 = vmatprep.subr.bf16.mxu0 %v15746_v7 }
 0x8f9   : > { %13600 = vmatpush2.bf16.msra.mxu1 %v14595_v31 }
 0x8fa   : > { %13601 = vmatprep.subr.bf16.mxu1 %v14572_v21  ;;  %v14883_v21 = vcombine.low %v3266_v42, %v3278_v61  ;;  %v3530_v42 = vld [vmem:[%s16995_s26 + $0x1848] sm:$0xff] }
 0x8fb   : > { %13559 = vmatpush2.bf16.msra.mxu0 %v15745_v6  ;;  %v3602_v6 = vld [vmem:[%s16995_s26 + $0x1a88] sm:$0xff] }
 0x8fc   : > { %13560 = vmatprep.subr.bf16.mxu0 %v15722_v24  ;;  %v14860_v24 = vcombine.high %v3242_v28, %v3254_v58  ;;  %v15219_v3 = vcombine.low %v3602_v6, %v3614_v53  ;;  %v3542_v61 = vld [vmem:[%s16995_s26 + $0x18a8] sm:$0xff] }
 0x8fd   : > { %13602 = vmatpush2.bf16.msra.mxu1 %v14571_v19  ;;  %v15243_v19 = vcombine.low %v3626_v56, %v3638_v55  ;;  %v3890_v56 = vld [vmem:[%s16995_s26 + $0x2388] sm:$0xff] }
 0x8fe   : > { %13653 = vmatprep.subr.bf16.mxu1 %v15316_v48  ;;  %v15220_v48 = vcombine.high %v3602_v6, %v3614_v53  ;;  %v3902_v55 = vld [vmem:[%s16995_s26 + $0x23e8] sm:$0xff] }
 0x8ff   : > { %13561 = vmatpush2.bf16.msra.mxu0 %v15721_v26  ;;  %v14859_v26 = vcombine.low %v3242_v28, %v3254_v58  ;;  %v3866_v58 = vld [vmem:[%s16995_s26 + $0x22c8] sm:$0xff] }
 0x900   : > { %v13359_v49 = vpop.f32.mrf.mxu1  ;;  %13604 = vmatmul.mubr.bf16.vlgmr.msra.gmra.mxu1 %v17165_v60  ;;  %13612 = vmatprep.subr.bf16.mxu0 %v14932_v59  ;;  %v14836_v59 = vcombine.high %v3218_v25, %v3230_v46  ;;  %v3494_v6 = vld [vmem:[%s16995_s26 + $0x1728] sm:$0xff] }
 0x901   : > { %13654 = vmatpush1.bf16.msra.mxu1 %v15315_v9  ;;  %13685 = vmatprep.mubr.bf16.mxu1 %v17317_v10  ;;  %v3194_v9 = vld [vmem:[%s16995_s26 + $0xdc8] sm:$0xff] }
 0x902   : > { %v13318_v41 = vpop.f32.mrf.mxu0  ;;  %13563 = vmatmul.mubr.bf16.vlgmr.msra.gmra.mxu0 %v17380_v33  ;;  %v13361_v29 = vpop.f32.mrf.mxu1  ;;  %13655 = vmatprep.subr.bf16.mxu1 %v15292_v23  ;;  %v14835_v23 = vcombine.low %v3218_v25, %v3230_v46  ;;  %v14812_v43 = vcombine.high %v3194_v9, %v3206_v11 }
 0x903   : > { %v13319_v5 = vadd.f32 %v13318_v41, %v13278_v44  ;;  %13613 = vmatpush1.bf16.msra.mxu0 %v14931_v15  ;;  %13644 = vmatprep.mubr.bf16.mxu0 %v17242_v22  ;;  %v3566_v15 = vld [vmem:[%s16995_s26 + $0x1968] sm:$0xff] }
 0x904   : > { %v13320_v63 = vpop.f32.mrf.mxu0  ;;  %v13363_v18 = vpop.f32.mrf.mxu1  ;;  %13614 = vmatprep.subr.bf16.mxu0 %v14908_v4  ;;  %v3182_v4 = vld [vmem:[%s16995_s26 + $0xd68] sm:$0xff]  ;;  %v15172_v44 = vcombine.high %v3554_v2, %v3566_v15 }
 0x905   : > { %v18651_v36 = vadd.f32 %v13359_v49, %v13319_v5  ;;  %v13321_v14 = vadd.f32 %v13320_v63, %v13280_v52  ;;  %13656 = vmatpush1.bf16.msra.mxu1 %v15291_v54  ;;  %v3170_v49 = vld [vmem:[%s16995_s26 + $0xd08] sm:$0xff]  ;;  %v14811_v54 = vcombine.low %v3194_v9, %v3206_v11  ;;  %v15148_v5 = vcombine.high %v3530_v42, %v3542_v61 }
 0x906   : > { %v13322_v7 = vpop.f32.mrf.mxu0  ;;  %v13364_v31 = vpop.f32.mrf.mxu1  ;;  %13657 = vmatprep.subr.bf16.mxu1 %v15268_v57  ;;  %v14788_v41 = vcombine.high %v3170_v49, %v3182_v4  ;;  %v3146_v57 = vld [vmem:[%s16995_s26 + $0xc48] sm:$0xff]  ;;  %v15147_v18 = vcombine.low %v3530_v42, %v3542_v61 }
 0x907   : > { %v18655_v16 = vadd.f32 %v13361_v29, %v13321_v14  ;;  %13615 = vmatpush1.bf16.msra.mxu0 %v14907_v1  ;;  %v15171_v29 = vcombine.low %v3554_v2, %v3566_v15  ;;  %v3158_v52 = vld [vmem:[%s16995_s26 + $0xca8] sm:$0xff]  ;;  %v14787_v1 = vcombine.low %v3170_v49, %v3182_v4 }
 0x908   : > { %v13323_v39 = vpop.f32.mrf.mxu0  ;;  %13616 = vmatprep.subr.bf16.mxu0 %v14884_v13  ;;  %v14764_v63 = vcombine.high %v3146_v57, %v3158_v52  ;;  %v3506_v13 = vld [vmem:[%s16995_s26 + $0x1788] sm:$0xff]  ;;  %v14763_v28 = vcombine.low %v3146_v57, %v3158_v52 }
 0x909   : > { %13658 = vmatpush1.bf16.msra.mxu1 %v15267_v35  ;;  %v3518_v14 = vld [vmem:[%s16995_s26 + $0x17e8] sm:$0xff]  ;;  %v15508_v35 = vcombine.high %v3890_v56, %v3902_v55 }
 0x90a   : > { %13659 = vmatprep.subr.bf16.mxu1 %v15244_v8  ;;  %v3878_v7 = vld [vmem:[%s16995_s26 + $0x2328] sm:$0xff]  ;;  %v15124_v31 = vcombine.high %v3506_v13, %v3518_v14  ;;  %v15507_v8 = vcombine.low %v3890_v56, %v3902_v55  ;;  %v15123_v39 = vcombine.low %v3506_v13, %v3518_v14 }
 0x90b   : > { %13617 = vmatpush1.bf16.msra.mxu0 %v14883_v21  ;;  %v3482_v21 = vld [vmem:[%s16995_s26 + $0x16c8] sm:$0xff]  ;;  %v15484_v53 = vcombine.high %v3866_v58, %v3878_v7  ;;  %v15483_v46 = vcombine.low %v3866_v58, %v3878_v7 }
 0x90c   : > { %13618 = vmatprep.subr.bf16.mxu0 %v14860_v24  ;;  %v3842_v24 = vld [vmem:[%s16995_s26 + $0x2208] sm:$0xff]  ;;  %v15100_v25 = vcombine.high %v3482_v21, %v3494_v6  ;;  %v15099_v37 = vcombine.low %v3482_v21, %v3494_v6 }
 0x90d   : > { %13660 = vmatpush1.bf16.msra.mxu1 %v15243_v19  ;;  %v3854_v19 = vld [vmem:[%s16995_s26 + $0x2268] sm:$0xff] }
 0x90e   : > { %13661 = vmatprep.subr.bf16.mxu1 %v15220_v48  ;;  %v3458_v48 = vld [vmem:[%s16995_s26 + $0x1608] sm:$0xff]  ;;  %v15460_v27 = vcombine.high %v3842_v24, %v3854_v19  ;;  %v15459_v11 = vcombine.low %v3842_v24, %v3854_v19 }
 0x90f   : > { %13619 = vmatpush1.bf16.msra.mxu0 %v14859_v26  ;;  %v3470_v26 = vld [vmem:[%s16995_s26 + $0x1668] sm:$0xff] }
 0x910   : > { %13620 = vmatprep.subr.bf16.mxu0 %v14836_v59  ;;  %v3818_v59 = vld [vmem:[%s16995_s26 + $0x2148] sm:$0xff]  ;;  %v15076_v9 = vcombine.high %v3458_v48, %v3470_v26  ;;  %v15075_v15 = vcombine.low %v3458_v48, %v3470_v26 }
 0x911   : > { %13662 = vmatpush1.bf16.msra.mxu1 %v15219_v3  ;;  %v3830_v3 = vld [vmem:[%s16995_s26 + $0x21a8] sm:$0xff] }
 0x912   : > { %13663 = vmatprep.subr.bf16.mxu1 %v15196_v47  ;;  %v3434_v47 = vld [vmem:[%s16995_s26 + $0x1548] sm:$0xff]  ;;  %v15436_v2 = vcombine.high %v3818_v59, %v3830_v3  ;;  %v15435_v4 = vcombine.low %v3818_v59, %v3830_v3 }
 0x913   : > { %13621 = vmatpush1.bf16.msra.mxu0 %v14835_v23  ;;  %v3446_v23 = vld [vmem:[%s16995_s26 + $0x15a8] sm:$0xff] }
 0x914   : > { %13622 = vmatprep.subr.bf16.mxu0 %v14812_v43  ;;  %v3794_v43 = vld [vmem:[%s16995_s26 + $0x2088] sm:$0xff]  ;;  %v15052_v49 = vcombine.high %v3434_v47, %v3446_v23  ;;  %v15051_v61 = vcombine.low %v3434_v47, %v3446_v23 }
 0x915   : > { %13664 = vmatpush1.bf16.msra.mxu1 %v15195_v45  ;;  %v3806_v45 = vld [vmem:[%s16995_s26 + $0x20e8] sm:$0xff] }
 0x916   : > { %13665 = vmatprep.subr.bf16.mxu1 %v15172_v44  ;;  %v3410_v44 = vld [vmem:[%s16995_s26 + $0x1488] sm:$0xff]  ;;  %v15412_v42 = vcombine.high %v3794_v43, %v3806_v45  ;;  %v15411_v52 = vcombine.low %v3794_v43, %v3806_v45 }
 0x917   : > { %13623 = vmatpush1.bf16.msra.mxu0 %v14811_v54  ;;  %v3422_v54 = vld [vmem:[%s16995_s26 + $0x14e8] sm:$0xff] }
 0x918   : > { %13624 = vmatprep.subr.bf16.mxu0 %v14788_v41  ;;  %v3770_v41 = vld [vmem:[%s16995_s26 + $0x1fc8] sm:$0xff]  ;;  %v15028_v57 = vcombine.high %v3410_v44, %v3422_v54  ;;  %v15027_v55 = vcombine.low %v3410_v44, %v3422_v54 }
 0x919   : > { %13666 = vmatpush1.bf16.msra.mxu1 %v15171_v29  ;;  %v3782_v29 = vld [vmem:[%s16995_s26 + $0x2028] sm:$0xff] }
 0x91a   : > { %13667 = vmatprep.subr.bf16.mxu1 %v15148_v5  ;;  %v3386_v5 = vld [vmem:[%s16995_s26 + $0x13c8] sm:$0xff]  ;;  %v15388_v56 = vcombine.high %v3770_v41, %v3782_v29  ;;  %v15387_v14 = vcombine.low %v3770_v41, %v3782_v29 }
 0x91b   : > { %13625 = vmatpush1.bf16.msra.mxu0 %v14787_v1  ;;  %v3398_v1 = vld [vmem:[%s16995_s26 + $0x1428] sm:$0xff] }
 0x91c   : > { %13626 = vmatprep.subr.bf16.mxu0 %v14764_v63  ;;  %v3746_v63 = vld [vmem:[%s16995_s26 + $0x1f08] sm:$0xff]  ;;  %v15004_v13 = vcombine.high %v3386_v5, %v3398_v1  ;;  %v15003_v7 = vcombine.low %v3386_v5, %v3398_v1 }
 0x91d   : > { %13668 = vmatpush1.bf16.msra.mxu1 %v15147_v18  ;;  %v3758_v18 = vld [vmem:[%s16995_s26 + $0x1f68] sm:$0xff] }
 0x91e   : > { %13669 = vmatprep.subr.bf16.mxu1 %v15508_v35  ;;  %v3362_v35 = vld [vmem:[%s16995_s26 + $0x1308] sm:$0xff]  ;;  %v15364_v58 = vcombine.high %v3746_v63, %v3758_v18  ;;  %v15363_v6 = vcombine.low %v3746_v63, %v3758_v18 }
 0x91f   : > { %13627 = vmatpush1.bf16.msra.mxu0 %v14763_v28  ;;  %v3374_v28 = vld [vmem:[%s16995_s26 + $0x1368] sm:$0xff] }
 0x920   : > { %13628 = vmatprep.subr.bf16.mxu0 %v15124_v31  ;;  %v3722_v31 = vld [vmem:[%s16995_s26 + $0x1e48] sm:$0xff]  ;;  %v14980_v21 = vcombine.high %v3362_v35, %v3374_v28  ;;  %v14979_v19 = vcombine.low %v3362_v35, %v3374_v28 }
 0x921   : > { %13670 = vmatpush2.bf16.msra.mxu1 %v15507_v8  ;;  %v3734_v8 = vld [vmem:[%s16995_s26 + $0x1ea8] sm:$0xff] }
 0x922   : > { %13671 = vmatprep.subr.bf16.mxu1 %v15484_v53  ;;  %v3338_v53 = vld [vmem:[%s16995_s26 + $0x1248] sm:$0xff]  ;;  %v15340_v24 = vcombine.high %v3722_v31, %v3734_v8  ;;  %v15339_v26 = vcombine.low %v3722_v31, %v3734_v8 }
 0x923   : > { %13629 = vmatpush2.bf16.msra.mxu0 %v15123_v39  ;;  %v3350_v39 = vld [vmem:[%s16995_s26 + $0x12a8] sm:$0xff] }
 0x924   : > { %13630 = vmatprep.subr.bf16.mxu0 %v15100_v25  ;;  %v2931_v25 = vld [vmem:[%s16995_s26 + $0x590] sm:$0xff]  ;;  %v14956_v48 = vcombine.high %v3338_v53, %v3350_v39  ;;  %v14955_v3 = vcombine.low %v3338_v53, %v3350_v39  ;;  %v4046_v41 = vld [vmem:[%s16995_s26 + $0x2868] sm:$0xff] }
 0x925   : > { %13672 = vmatpush2.bf16.msra.mxu1 %v15483_v46  ;;  %v2943_v46 = vld [vmem:[%s16995_s26 + $0x5f0] sm:$0xff]  ;;  %v4010_v28 = vld [vmem:[%s16995_s26 + $0x2748] sm:$0xff] }
 0x926   : > { %13673 = vmatprep.subr.bf16.mxu1 %v15460_v27  ;;  %v4082_v27 = vld [vmem:[%s16995_s26 + $0x2988] sm:$0xff]  ;;  %v14550_v59 = vcombine.high %v2931_v25, %v2943_v46  ;;  %v14549_v23 = vcombine.low %v2931_v25, %v2943_v46 }
 0x927   : > { %13631 = vmatpush2.bf16.msra.mxu0 %v15099_v37  ;;  %v4094_v37 = vld [vmem:[%s16995_s26 + $0x29e8] sm:$0xff] }
 0x928   : > { %13632 = vmatprep.subr.bf16.mxu0 %v15076_v9  ;;  %v2907_v9 = vld [vmem:[%s16995_s26 + $0x4d0] sm:$0xff]  ;;  %v15700_v47 = vcombine.high %v4082_v27, %v4094_v37  ;;  %v15699_v45 = vcombine.low %v4082_v27, %v4094_v37 }
 0x929   : > { %13674 = vmatpush2.bf16.msra.mxu1 %v15459_v11  ;;  %v2919_v11 = vld [vmem:[%s16995_s26 + $0x530] sm:$0xff] }
 0x92a   : > { %13675 = vmatprep.subr.bf16.mxu1 %v15436_v2  ;;  %v4058_v2 = vld [vmem:[%s16995_s26 + $0x28c8] sm:$0xff]  ;;  %v14526_v43 = vcombine.high %v2907_v9, %v2919_v11 }
 0x92b   : > { %13633 = vmatpush2.bf16.msra.mxu0 %v15075_v15  ;;  %v4070_v15 = vld [vmem:[%s16995_s26 + $0x2928] sm:$0xff] }
 0x92c   : > { %13634 = vmatprep.subr.bf16.mxu0 %v15052_v49  ;;  %v2883_v49 = vld [vmem:[%s16995_s26 + $0x410] sm:$0xff]  ;;  %v15676_v54 = vcombine.high %v4058_v2, %v4070_v15  ;;  %v15675_v1 = vcombine.low %v4058_v2, %v4070_v15 }
 0x92d   : > { %13676 = vmatpush2.bf16.msra.mxu1 %v15435_v4  ;;  %v2895_v4 = vld [vmem:[%s16995_s26 + $0x470] sm:$0xff] }
 0x92e   : > { %13677 = vmatprep.subr.bf16.mxu1 %v15412_v42  ;;  %v14525_v42 = vcombine.low %v2907_v9, %v2919_v11  ;;  %v14501_v35 = vcombine.low %v2883_v49, %v2895_v4 }
 0x92f   : > { %13635 = vmatpush2.bf16.msra.mxu0 %v15051_v61  ;;  %v4034_v61 = vld [vmem:[%s16995_s26 + $0x2808] sm:$0xff] }
 0x930   : > { %13636 = vmatprep.subr.bf16.mxu0 %v15028_v57  ;;  %v15651_v8 = vcombine.low %v4034_v61, %v4046_v41 }
 0x931   : > { %13678 = vmatpush2.bf16.msra.mxu1 %v15411_v52  ;;  %v14502_v52 = vcombine.high %v2883_v49, %v2895_v4 }
 0x932   : > { %13679 = vmatprep.subr.bf16.mxu1 %v15388_v56  ;;  %v2859_v56 = vld [vmem:[%s16995_s26 + $0x350] sm:$0xff] }
 0x933   : > { %13637 = vmatpush2.bf16.msra.mxu0 %v15027_v55  ;;  %v2871_v55 = vld [vmem:[%s16995_s26 + $0x3b0] sm:$0xff] }
 0x934   : > { %13638 = vmatprep.subr.bf16.mxu0 %v15004_v13  ;;  %v15652_v13 = vcombine.high %v4034_v61, %v4046_v41  ;;  %v14478_v31 = vcombine.high %v2859_v56, %v2871_v55  ;;  %v14477_v39 = vcombine.low %v2859_v56, %v2871_v55  ;;  %v2775_v61 = vld [vmem:[%s16995_s26 + $0xb0] sm:$0xff] }
 0x935   : > { %13680 = vmatpush2.bf16.msra.mxu1 %v15387_v14 }
 0x936   : > { %13681 = vmatprep.subr.bf16.mxu1 %v15364_v58 }
 0x937   : > { %13639 = vmatpush2.bf16.msra.mxu0 %v15003_v7 }
 0x938   : > { %13640 = vmatprep.subr.bf16.mxu0 %v14980_v21  ;;  %v2835_v21 = vld [vmem:[%s16995_s26 + $0x290] sm:$0xff] }
 0x939   : > { %13682 = vmatpush2.bf16.msra.mxu1 %v15363_v6  ;;  %v2847_v6 = vld [vmem:[%s16995_s26 + $0x2f0] sm:$0xff] }
 0x93a   : > { %13683 = vmatprep.subr.bf16.mxu1 %v15340_v24  ;;  %v3986_v24 = vld [vmem:[%s16995_s26 + $0x2688] sm:$0xff]  ;;  %v14454_v25 = vcombine.high %v2835_v21, %v2847_v6  ;;  %v14453_v37 = vcombine.low %v2835_v21, %v2847_v6 }
 0x93b   : > { %13641 = vmatpush2.bf16.msra.mxu0 %v14979_v19  ;;  %v3998_v19 = vld [vmem:[%s16995_s26 + $0x26e8] sm:$0xff] }
 0x93c   : > { %13642 = vmatprep.subr.bf16.mxu0 %v14956_v48  ;;  %v2811_v48 = vld [vmem:[%s16995_s26 + $0x1d0] sm:$0xff]  ;;  %v15604_v27 = vcombine.high %v3986_v24, %v3998_v19  ;;  %v15603_v11 = vcombine.low %v3986_v24, %v3998_v19  ;;  %v4250_v6 = vld [vmem:[%s16995_s26 + $0x2ec8] sm:$0xff] }
 0x93d   : > { %13684 = vmatpush2.bf16.msra.mxu1 %v15339_v26  ;;  %v2823_v26 = vld [vmem:[%s16995_s26 + $0x230] sm:$0xff] }
 0x93e   : > { %13735 = vmatprep.subr.bf16.mxu1 %v14550_v59  ;;  %v3962_v59 = vld [vmem:[%s16995_s26 + $0x25c8] sm:$0xff]  ;;  %v14430_v9 = vcombine.high %v2811_v48, %v2823_v26  ;;  %v14429_v15 = vcombine.low %v2811_v48, %v2823_v26  ;;  %v3075_v24 = vld [vmem:[%s16995_s26 + $0xa10] sm:$0xff] }
 0x93f   : > { %13643 = vmatpush2.bf16.msra.mxu0 %v14955_v3  ;;  %v3974_v3 = vld [vmem:[%s16995_s26 + $0x2628] sm:$0xff]  ;;  %v3087_v19 = vld [vmem:[%s16995_s26 + $0xa70] sm:$0xff] }
 0x940   : > { %v18715_v44 = vpop.f32.mrf.mxu1  ;;  %13686 = vmatmul.mubr.bf16.vlgmr.msra.gmra.mxu1 %v17319_v12  ;;  %13694 = vmatprep.subr.bf16.mxu0 %v15700_v47  ;;  %v2787_v47 = vld [vmem:[%s16995_s26 + $0x110] sm:$0xff]  ;;  %v15580_v2 = vcombine.high %v3962_v59, %v3974_v3  ;;  %v4226_v48 = vld [vmem:[%s16995_s26 + $0x2e08] sm:$0xff] }
 0x941   : > { %13736 = vmatpush1.bf16.msra.mxu1 %v14549_v23  ;;  %13767 = vmatprep.mubr.bf16.mxu1 %v17160_v50  ;;  %v2799_v23 = vld [vmem:[%s16995_s26 + $0x170] sm:$0xff]  ;;  %v4238_v26 = vld [vmem:[%s16995_s26 + $0x2e68] sm:$0xff] }
 0x942   : > { %v13400_v29 = vpop.f32.mrf.mxu0  ;;  %13645 = vmatmul.mubr.bf16.vlgmr.msra.gmra.mxu0 %v17246_v30  ;;  %v18722_v57 = vpop.f32.mrf.mxu1  ;;  %13737 = vmatprep.subr.bf16.mxu1 %v14526_v43  ;;  %v3938_v43 = vld [vmem:[%s16995_s26 + $0x2508] sm:$0xff]  ;;  %v14406_v4 = vcombine.high %v2787_v47, %v2799_v23 }
 0x943   : > { %v13401_v5 = vadd.f32 %v13400_v29, %v18651_v36  ;;  %13695 = vmatpush1.bf16.msra.mxu0 %v15699_v45  ;;  %13726 = vmatprep.mubr.bf16.mxu0 %v17376_v20  ;;  %v4022_v36 = vld [vmem:[%s16995_s26 + $0x27a8] sm:$0xff] }
 0x944   : > { %v13402_v63 = vpop.f32.mrf.mxu0  ;;  %v13445_v18 = vpop.f32.mrf.mxu1  ;;  %13696 = vmatprep.subr.bf16.mxu0 %v15676_v54  ;;  %v15627_v46 = vcombine.low %v4010_v28, %v4022_v36  ;;  %v3950_v45 = vld [vmem:[%s16995_s26 + $0x2568] sm:$0xff]  ;;  %v15579_v54 = vcombine.low %v3962_v59, %v3974_v3  ;;  %v3051_v59 = vld [vmem:[%s16995_s26 + $0x950] sm:$0xff] }
 0x945   : > { %16145 = vtanh.f32 %v13401_v5  ;;  %v13403_v14 = vadd.f32 %v13402_v63, %v18655_v16  ;;  %13738 = vmatpush1.bf16.msra.mxu1 %v14525_v42  ;;  %v15628_v16 = vcombine.high %v4010_v28, %v4022_v36  ;;  %v2763_v42 = vld [vmem:[%s16995_s26 + $0x50] sm:$0xff]  ;;  %v15556_v29 = vcombine.high %v3938_v43, %v3950_v45  ;;  %v3914_v5 = vld [vmem:[%s16995_s26 + $0x2448] sm:$0xff] }
 0x946   : > { %v13404_v58 = vpop.f32.mrf.mxu0  ;;  %v13446_v7 = vpop.f32.mrf.mxu1  ;;  %13739 = vmatprep.subr.bf16.mxu1 %v14502_v52  ;;  %v14405_v52 = vcombine.low %v2787_v47, %v2799_v23  ;;  %v14382_v56 = vcombine.high %v2763_v42, %v2775_v61  ;;  %v15555_v55 = vcombine.low %v3938_v43, %v3950_v45  ;;  %v3123_v63 = vld [vmem:[%s16995_s26 + $0xb90] sm:$0xff]  ;;  %v4286_v28 = vld [vmem:[%s16995_s26 + $0x2fe8] sm:$0xff] }
 0x947   : > { %16147 = vtanh.f32 %v13403_v14  ;;  %13697 = vmatpush1.bf16.msra.mxu0 %v15675_v1  ;;  %v3926_v1 = vld [vmem:[%s16995_s26 + $0x24a8] sm:$0xff]  ;;  %v3135_v18 = vld [vmem:[%s16995_s26 + $0xbf0] sm:$0xff]  ;;  %v14381_v14 = vcombine.low %v2763_v42, %v2775_v61 }
 0x948   : > { %v13405_v53 = vpop.f32.mrf.mxu0  ;;  %13698 = vmatprep.subr.bf16.mxu0 %v15652_v13  ;;  %v15532_v13 = vcombine.high %v3914_v5, %v3926_v1  ;;  %v14742_v36 = vcombine.high %v3123_v63, %v3135_v18  ;;  %v15531_v58 = vcombine.low %v3914_v5, %v3926_v1  ;;  %v3099_v7 = vld [vmem:[%s16995_s26 + $0xad0] sm:$0xff]  ;;  %v14741_v21 = vcombine.low %v3123_v63, %v3135_v18  ;;  %v4202_v47 = vld [vmem:[%s16995_s26 + $0x2d48] sm:$0xff] }
 0x949   : > { %13740 = vmatpush1.bf16.msra.mxu1 %v14501_v35  ;;  %v4274_v35 = vld [vmem:[%s16995_s26 + $0x2f88] sm:$0xff]  ;;  %v3063_v3 = vld [vmem:[%s16995_s26 + $0x9b0] sm:$0xff] }
 0x94a   : > { %13741 = vmatprep.subr.bf16.mxu1 %v14478_v31  ;;  %v3111_v31 = vld [vmem:[%s16995_s26 + $0xb30] sm:$0xff]  ;;  %v4262_v53 = vld [vmem:[%s16995_s26 + $0x2f28] sm:$0xff] }
 0x94b   : > { %13699 = vmatpush1.bf16.msra.mxu0 %v15651_v8  ;;  %v15892_v8 = vcombine.high %v4274_v35, %v4286_v28  ;;  %v4214_v23 = vld [vmem:[%s16995_s26 + $0x2da8] sm:$0xff]  ;;  %v3027_v43 = vld [vmem:[%s16995_s26 + $0x890] sm:$0xff] }
 0x94c   : > { %13700 = vmatprep.subr.bf16.mxu0 %v15628_v16  ;;  %v14718_v16 = vcombine.high %v3099_v7, %v3111_v31  ;;  %v3039_v45 = vld [vmem:[%s16995_s26 + $0x8f0] sm:$0xff]  ;;  %v4190_v42 = vld [vmem:[%s16995_s26 + $0x2ce8] sm:$0xff] }
 0x94d   : > { %13742 = vmatpush1.bf16.msra.mxu1 %v14477_v39  ;;  %v15891_v39 = vcombine.low %v4274_v35, %v4286_v28  ;;  %v14646_v61 = vcombine.high %v3027_v43, %v3039_v45  ;;  %v14645_v1 = vcombine.low %v3027_v43, %v3039_v45  ;;  %v3291_v43 = vld [vmem:[%s16995_s26 + $0x10d0] sm:$0xff] }
 0x94e   : > { %13743 = vmatprep.subr.bf16.mxu1 %v14454_v25  ;;  %v15868_v25 = vcombine.high %v4250_v6, %v4262_v53  ;;  %v3303_v45 = vld [vmem:[%s16995_s26 + $0x1130] sm:$0xff] }
 0x94f   : > { %13701 = vmatpush1.bf16.msra.mxu0 %v15627_v46  ;;  %v14717_v46 = vcombine.low %v3099_v7, %v3111_v31 }
 0x950   : > { %13702 = vmatprep.subr.bf16.mxu0 %v15604_v27  ;;  %v14694_v27 = vcombine.high %v3075_v24, %v3087_v19 }
 0x951   : > { %13744 = vmatpush1.bf16.msra.mxu1 %v14453_v37  ;;  %v15867_v37 = vcombine.low %v4250_v6, %v4262_v53 }
 0x952   : > { %v16146_v49 = vpop.eup %16145  ;;  %13745 = vmatprep.subr.bf16.mxu1 %v14430_v9  ;;  %v15844_v9 = vcombine.high %v4226_v48, %v4238_v26 }
 0x953   : > { %14101 = vst [vmem:[%s17653_s5 + $0x70] sm:$0xff] %v16146_v49  ;;  %13703 = vmatpush1.bf16.msra.mxu0 %v15603_v11  ;;  %v14693_v11 = vcombine.low %v3075_v24, %v3087_v19  ;;  %v15820_v49 = vcombine.high %v4202_v47, %v4214_v23 }
 0x954   : > { %v16148_v41 = vpop.eup %16147  ;;  %13704 = vmatprep.subr.bf16.mxu0 %v15580_v2  ;;  %v14670_v2 = vcombine.high %v3051_v59, %v3063_v3 }
 0x955   : > { %14102 = vst [vmem:[%s17653_s5 + $0x78] sm:$0xff] %v16148_v41  ;;  %13746 = vmatpush1.bf16.msra.mxu1 %v14429_v15  ;;  %v15843_v15 = vcombine.low %v4226_v48, %v4238_v26  ;;  %v15819_v41 = vcombine.low %v4202_v47, %v4214_v23  ;;  %v3687_v47 = vld [vmem:[%s16995_s26 + $0x1d30] sm:$0xff] }
 0x956   : > { %13747 = vmatprep.subr.bf16.mxu1 %v14406_v4  ;;  %v14669_v4 = vcombine.low %v3051_v59, %v3063_v3  ;;  %v18786_v59 = vld [vmem:[%s17450_s1 + $0x10] sm:$0xff] }
 0x957   : > { %13705 = vmatpush1.bf16.msra.mxu0 %v15579_v54  ;;  %v4178_v54 = vld [vmem:[%s16995_s26 + $0x2c88] sm:$0xff] }
 0x958   : > { %13706 = vmatprep.subr.bf16.mxu0 %v15556_v29  ;;  %v3003_v29 = vld [vmem:[%s16995_s26 + $0x7d0] sm:$0xff]  ;;  %v15796_v5 = vcombine.high %v4178_v54, %v4190_v42  ;;  %v15795_v18 = vcombine.low %v4178_v54, %v4190_v42 }
 0x959   : > { %13748 = vmatpush1.bf16.msra.mxu1 %v14405_v52  ;;  %v3015_v52 = vld [vmem:[%s16995_s26 + $0x830] sm:$0xff] }
 0x95a   : > { %13749 = vmatprep.subr.bf16.mxu1 %v14382_v56  ;;  %v4154_v56 = vld [vmem:[%s16995_s26 + $0x2bc8] sm:$0xff]  ;;  %v14622_v63 = vcombine.high %v3003_v29, %v3015_v52  ;;  %v14621_v28 = vcombine.low %v3003_v29, %v3015_v52  ;;  %v3651_v42 = vld [vmem:[%s16995_s26 + $0x1c10] sm:$0xff] }
 0x95b   : > { %13707 = vmatpush1.bf16.msra.mxu0 %v15555_v55  ;;  %v4166_v55 = vld [vmem:[%s16995_s26 + $0x2c28] sm:$0xff] }
 0x95c   : > { %13708 = vmatprep.subr.bf16.mxu0 %v15532_v13  ;;  %v2979_v13 = vld [vmem:[%s16995_s26 + $0x710] sm:$0xff]  ;;  %v15772_v35 = vcombine.high %v4154_v56, %v4166_v55  ;;  %v15771_v31 = vcombine.low %v4154_v56, %v4166_v55 }
 0x95d   : > { %13750 = vmatpush1.bf16.msra.mxu1 %v14381_v14  ;;  %v2991_v14 = vld [vmem:[%s16995_s26 + $0x770] sm:$0xff] }
 0x95e   : > { %13751 = vmatprep.subr.bf16.mxu1 %v14742_v36  ;;  %v4130_v36 = vld [vmem:[%s16995_s26 + $0x2b08] sm:$0xff]  ;;  %v14598_v7 = vcombine.high %v2979_v13, %v2991_v14  ;;  %v14597_v53 = vcombine.low %v2979_v13, %v2991_v14  ;;  %v3627_v13 = vld [vmem:[%s16995_s26 + $0x1b50] sm:$0xff] }
 0x95f   : > { %13709 = vmatpush1.bf16.msra.mxu0 %v15531_v58  ;;  %v4142_v58 = vld [vmem:[%s16995_s26 + $0x2b68] sm:$0xff]  ;;  %v3639_v14 = vld [vmem:[%s16995_s26 + $0x1bb0] sm:$0xff] }
 0x960   : > { %13710 = vmatprep.subr.bf16.mxu0 %v15892_v8  ;;  %v2955_v8 = vld [vmem:[%s16995_s26 + $0x650] sm:$0xff]  ;;  %v15748_v6 = vcombine.high %v4130_v36, %v4142_v58  ;;  %v15747_v19 = vcombine.low %v4130_v36, %v4142_v58 }
 0x961   : > { %13752 = vmatpush2.bf16.msra.mxu1 %v14741_v21  ;;  %v2967_v21 = vld [vmem:[%s16995_s26 + $0x6b0] sm:$0xff] }
 0x962   : > { %13753 = vmatprep.subr.bf16.mxu1 %v14718_v16  ;;  %v4106_v16 = vld [vmem:[%s16995_s26 + $0x2a48] sm:$0xff]  ;;  %v14574_v24 = vcombine.high %v2955_v8, %v2967_v21  ;;  %v14573_v26 = vcombine.low %v2955_v8, %v2967_v21  ;;  %v3255_v8 = vld [vmem:[%s16995_s26 + $0xfb0] sm:$0xff] }
 0x963   : > { %13711 = vmatpush2.bf16.msra.mxu0 %v15891_v39  ;;  %v4118_v39 = vld [vmem:[%s16995_s26 + $0x2aa8] sm:$0xff] }
 0x964   : > { %13712 = vmatprep.subr.bf16.mxu0 %v15868_v25  ;;  %v3699_v25 = vld [vmem:[%s16995_s26 + $0x1d90] sm:$0xff]  ;;  %v15724_v48 = vcombine.high %v4106_v16, %v4118_v39 }
 0x965   : > { %13754 = vmatpush2.bf16.msra.mxu1 %v14717_v46  ;;  %v3711_v46 = vld [vmem:[%s16995_s26 + $0x1df0] sm:$0xff] }
 0x966   : > { %13755 = vmatprep.subr.bf16.mxu1 %v14694_v27  ;;  %v3315_v27 = vld [vmem:[%s16995_s26 + $0x1190] sm:$0xff]  ;;  %v15318_v3 = vcombine.high %v3699_v25, %v3711_v46 }
 0x967   : > { %13713 = vmatpush2.bf16.msra.mxu0 %v15867_v37  ;;  %v3327_v37 = vld [vmem:[%s16995_s26 + $0x11f0] sm:$0xff] }
 0x968   : > { %13714 = vmatprep.subr.bf16.mxu0 %v15844_v9  ;;  %v15723_v9 = vcombine.low %v4106_v16, %v4118_v39  ;;  %v14934_v23 = vcombine.high %v3315_v27, %v3327_v37  ;;  %v14933_v54 = vcombine.low %v3315_v27, %v3327_v37  ;;  %v3231_v27 = vld [vmem:[%s16995_s26 + $0xef0] sm:$0xff] }
 0x969   : > { %13756 = vmatpush2.bf16.msra.mxu1 %v14693_v11  ;;  %v3675_v11 = vld [vmem:[%s16995_s26 + $0x1cd0] sm:$0xff] }
 0x96a   : > { %13757 = vmatprep.subr.bf16.mxu1 %v14670_v2  ;;  %v4362_v2 = vrot.slane %v18786_v59, %v17004_v32  ;;  %v14910_v32 = vcombine.high %v3291_v43, %v3303_v45  ;;  %v15293_v52 = vcombine.low %v3675_v11, %v3687_v47 }
 0x96b   : > { %13715 = vmatpush2.bf16.msra.mxu0 %v15843_v15  ;;  %v15317_v15 = vcombine.low %v3699_v25, %v3711_v46 }
 0x96c   : > { %13716 = vmatprep.subr.bf16.mxu0 %v15820_v49  ;;  %v15294_v49 = vcombine.high %v3675_v11, %v3687_v47  ;;  %v13442_v29 = vadd.f32 %v18715_v44, %v4362_v2  ;;  %v14909_v44 = vcombine.low %v3291_v43, %v3303_v45  ;;  %v3591_v11 = vld [vmem:[%s16995_s26 + $0x1a30] sm:$0xff] }
 0x96d   : > { %13758 = vmatpush2.bf16.msra.mxu1 %v14669_v4  ;;  %v4366_v4 = vrot.slane %v18786_v59, %v17007_v34  ;;  %v3195_v2 = vld [vmem:[%s16995_s26 + $0xdd0] sm:$0xff] }
 0x96e   : > { %13759 = vmatprep.subr.bf16.mxu1 %v14646_v61  ;;  %v3663_v61 = vld [vmem:[%s16995_s26 + $0x1c70] sm:$0xff] }
 0x96f   : > { %13717 = vmatpush2.bf16.msra.mxu0 %v15819_v41  ;;  %v15270_v55 = vcombine.high %v3651_v42, %v3663_v61 }
 0x970   : > { %13718 = vmatprep.subr.bf16.mxu0 %v15796_v5  ;;  %v3267_v5 = vld [vmem:[%s16995_s26 + $0x1010] sm:$0xff] }
 0x971   : > { %13760 = vmatpush2.bf16.msra.mxu1 %v14645_v1  ;;  %v3279_v1 = vld [vmem:[%s16995_s26 + $0x1070] sm:$0xff] }
 0x972   : > { %13761 = vmatprep.subr.bf16.mxu1 %v14622_v63  ;;  %v13444_v63 = vadd.f32 %v18722_v57, %v4366_v4  ;;  %v14886_v36 = vcombine.high %v3267_v5, %v3279_v1  ;;  %v3243_v57 = vld [vmem:[%s16995_s26 + $0xf50] sm:$0xff]  ;;  %v14885_v39 = vcombine.low %v3267_v5, %v3279_v1 }
 0x973   : > { %13719 = vmatpush2.bf16.msra.mxu0 %v15795_v18  ;;  %v14862_v46 = vcombine.high %v3243_v57, %v3255_v8  ;;  %v3567_v4 = vld [vmem:[%s16995_s26 + $0x1970] sm:$0xff] }
 0x974   : > { %13720 = vmatprep.subr.bf16.mxu0 %v15772_v35  ;;  %v3543_v5 = vld [vmem:[%s16995_s26 + $0x18b0] sm:$0xff] }
 0x975   : > { %13762 = vmatpush2.bf16.msra.mxu1 %v14621_v28 }
 0x976   : > { %13763 = vmatprep.subr.bf16.mxu1 %v14598_v7 }
 0x977   : > { %13721 = vmatpush2.bf16.msra.mxu0 %v15771_v31  ;;  %v15269_v31 = vcombine.low %v3651_v42, %v3663_v61  ;;  %v3171_v61 = vld [vmem:[%s16995_s26 + $0xd10] sm:$0xff] }
 0x978   : > { %13722 = vmatprep.subr.bf16.mxu0 %v15748_v6 }
 0x979   : > { %13764 = vmatpush2.bf16.msra.mxu1 %v14597_v53  ;;  %v15246_v53 = vcombine.high %v3627_v13, %v3639_v14 }
 0x97a   : > { %13765 = vmatprep.subr.bf16.mxu1 %v14574_v24  ;;  %v3603_v24 = vld [vmem:[%s16995_s26 + $0x1a90] sm:$0xff] }
 0x97b   : > { %13723 = vmatpush2.bf16.msra.mxu0 %v15747_v19  ;;  %v3615_v19 = vld [vmem:[%s16995_s26 + $0x1af0] sm:$0xff] }
 0x97c   : > { %13724 = vmatprep.subr.bf16.mxu0 %v15724_v48  ;;  %v15245_v48 = vcombine.low %v3627_v13, %v3639_v14  ;;  %v15222_v37 = vcombine.high %v3603_v24, %v3615_v19  ;;  %v3903_v13 = vld [vmem:[%s16995_s26 + $0x23f0] sm:$0xff] }
 0x97d   : > { %13766 = vmatpush2.bf16.msra.mxu1 %v14573_v26  ;;  %v3219_v26 = vld [vmem:[%s16995_s26 + $0xe90] sm:$0xff] }
 0x97e   : > { %13817 = vmatprep.subr.bf16.mxu1 %v15318_v3  ;;  %v14861_v3 = vcombine.low %v3243_v57, %v3255_v8  ;;  %v14838_v47 = vcombine.high %v3219_v26, %v3231_v27  ;;  %v14837_v45 = vcombine.low %v3219_v26, %v3231_v27  ;;  %v3867_v57 = vld [vmem:[%s16995_s26 + $0x22d0] sm:$0xff] }
 0x97f   : > { %13725 = vmatpush2.bf16.msra.mxu0 %v15723_v9  ;;  %v3579_v9 = vld [vmem:[%s16995_s26 + $0x19d0] sm:$0xff] }
 0x980   : > { %v13523_v41 = vpop.f32.mrf.mxu1  ;;  %13768 = vmatmul.mubr.bf16.vlgmr.msra.gmra.mxu1 %v17165_v60  ;;  %13776 = vmatprep.subr.bf16.mxu0 %v14934_v23  ;;  %v15221_v23 = vcombine.low %v3603_v24, %v3615_v19  ;;  %v15198_v43 = vcombine.high %v3579_v9, %v3591_v11  ;;  %v15197_v42 = vcombine.low %v3579_v9, %v3591_v11  ;;  %v3879_v8 = vld [vmem:[%s16995_s26 + $0x2330] sm:$0xff] }
 0x981   : > { %13818 = vmatpush1.bf16.msra.mxu1 %v15317_v15  ;;  %13849 = vmatprep.mubr.bf16.mxu1 %v17317_v10  ;;  %v3207_v15 = vld [vmem:[%s16995_s26 + $0xe30] sm:$0xff]  ;;  %v15486_v24 = vcombine.high %v3867_v57, %v3879_v8  ;;  %v15485_v26 = vcombine.low %v3867_v57, %v3879_v8 }
 0x982   : > { %v13482_v34 = vpop.f32.mrf.mxu0  ;;  %13727 = vmatmul.mubr.bf16.vlgmr.msra.gmra.mxu0 %v17380_v33  ;;  %v13525_v56 = vpop.f32.mrf.mxu1  ;;  %13819 = vmatprep.subr.bf16.mxu1 %v15294_v49  ;;  %v3555_v49 = vld [vmem:[%s16995_s26 + $0x1910] sm:$0xff] }
 0x983   : > { %v13483_v18 = vadd.f32 %v13482_v34, %v13442_v29  ;;  %13777 = vmatpush1.bf16.msra.mxu0 %v14933_v54  ;;  %13808 = vmatprep.mubr.bf16.mxu0 %v17242_v22  ;;  %v14814_v54 = vcombine.high %v3195_v2, %v3207_v15  ;;  %v14813_v29 = vcombine.low %v3195_v2, %v3207_v15  ;;  %v3459_v27 = vld [vmem:[%s16995_s26 + $0x1610] sm:$0xff] }
 0x984   : > { %v13484_v35 = vpop.f32.mrf.mxu0  ;;  %v13527_v28 = vpop.f32.mrf.mxu1  ;;  %13778 = vmatprep.subr.bf16.mxu0 %v14910_v32  ;;  %v15174_v32 = vcombine.high %v3555_v49, %v3567_v4  ;;  %v15173_v34 = vcombine.low %v3555_v49, %v3567_v4  ;;  %v3819_v11 = vld [vmem:[%s16995_s26 + $0x2150] sm:$0xff] }
 0x985   : > { %v18808_v58 = vadd.f32 %v13523_v41, %v13483_v18  ;;  %v13485_v7 = vadd.f32 %v13484_v35, %v13444_v63  ;;  %13820 = vmatpush1.bf16.msra.mxu1 %v15293_v52  ;;  %v3183_v41 = vld [vmem:[%s16995_s26 + $0xd70] sm:$0xff] }
 0x986   : > { %v13486_v21 = vpop.f32.mrf.mxu0  ;;  %v13528_v6 = vpop.f32.mrf.mxu1  ;;  %13821 = vmatprep.subr.bf16.mxu1 %v15270_v55  ;;  %v3531_v52 = vld [vmem:[%s16995_s26 + $0x1850] sm:$0xff]  ;;  %v14790_v1 = vcombine.high %v3171_v61, %v3183_v41  ;;  %v14789_v18 = vcombine.low %v3171_v61, %v3183_v41 }
 0x987   : > { %v18812_v16 = vadd.f32 %v13525_v56, %v13485_v7  ;;  %13779 = vmatpush1.bf16.msra.mxu0 %v14909_v44  ;;  %v3147_v56 = vld [vmem:[%s16995_s26 + $0xc50] sm:$0xff]  ;;  %v15150_v63 = vcombine.high %v3531_v52, %v3543_v5  ;;  %v15149_v35 = vcombine.low %v3531_v52, %v3543_v5 }
 0x988   : > { %v13487_v25 = vpop.f32.mrf.mxu0  ;;  %13780 = vmatprep.subr.bf16.mxu0 %v14886_v36  ;;  %v3159_v55 = vld [vmem:[%s16995_s26 + $0xcb0] sm:$0xff] }
 0x989   : > { %13822 = vmatpush1.bf16.msra.mxu1 %v15269_v31  ;;  %v3891_v44 = vld [vmem:[%s16995_s26 + $0x2390] sm:$0xff]  ;;  %v14766_v14 = vcombine.high %v3147_v56, %v3159_v55  ;;  %v14765_v31 = vcombine.low %v3147_v56, %v3159_v55 }
 0x98a   : > { %13823 = vmatprep.subr.bf16.mxu1 %v15246_v53  ;;  %v3507_v28 = vld [vmem:[%s16995_s26 + $0x1790] sm:$0xff]  ;;  %v15510_v7 = vcombine.high %v3891_v44, %v3903_v13  ;;  %v15509_v6 = vcombine.low %v3891_v44, %v3903_v13 }
 0x98b   : > { %13781 = vmatpush1.bf16.msra.mxu0 %v14885_v39  ;;  %v3519_v36 = vld [vmem:[%s16995_s26 + $0x17f0] sm:$0xff] }
 0x98c   : > { %13782 = vmatprep.subr.bf16.mxu0 %v14862_v46  ;;  %v15126_v21 = vcombine.high %v3507_v28, %v3519_v36  ;;  %v3483_v53 = vld [vmem:[%s16995_s26 + $0x16d0] sm:$0xff]  ;;  %v15125_v19 = vcombine.low %v3507_v28, %v3519_v36 }
 0x98d   : > { %13824 = vmatpush1.bf16.msra.mxu1 %v15245_v48  ;;  %v3495_v39 = vld [vmem:[%s16995_s26 + $0x1730] sm:$0xff] }
 0x98e   : > { %13825 = vmatprep.subr.bf16.mxu1 %v15222_v37  ;;  %v3843_v25 = vld [vmem:[%s16995_s26 + $0x2210] sm:$0xff]  ;;  %v15102_v48 = vcombine.high %v3483_v53, %v3495_v39  ;;  %v15101_v9 = vcombine.low %v3483_v53, %v3495_v39 }
 0x98f   : > { %13783 = vmatpush1.bf16.msra.mxu0 %v14861_v3  ;;  %v3855_v46 = vld [vmem:[%s16995_s26 + $0x2270] sm:$0xff] }
 0x990   : > { %13784 = vmatprep.subr.bf16.mxu0 %v14838_v47  ;;  %v3471_v37 = vld [vmem:[%s16995_s26 + $0x1670] sm:$0xff]  ;;  %v15462_v3 = vcombine.high %v3843_v25, %v3855_v46  ;;  %v15461_v2 = vcombine.low %v3843_v25, %v3855_v46  ;;  %v2932_v46 = vld [vmem:[%s16995_s26 + $0x598] sm:$0xff] }
 0x991   : > { %13826 = vmatpush1.bf16.msra.mxu1 %v15221_v23  ;;  %v3831_v47 = vld [vmem:[%s16995_s26 + $0x21b0] sm:$0xff]  ;;  %v15078_v23 = vcombine.high %v3459_v27, %v3471_v37  ;;  %v15077_v49 = vcombine.low %v3459_v27, %v3471_v37 }
 0x992   : > { %13827 = vmatprep.subr.bf16.mxu1 %v15198_v43  ;;  %v3435_v15 = vld [vmem:[%s16995_s26 + $0x1550] sm:$0xff]  ;;  %v15437_v61 = vcombine.low %v3819_v11, %v3831_v47 }
 0x993   : > { %13785 = vmatpush1.bf16.msra.mxu0 %v14837_v45  ;;  %v3447_v43 = vld [vmem:[%s16995_s26 + $0x15b0] sm:$0xff]  ;;  %v15438_v45 = vcombine.high %v3819_v11, %v3831_v47  ;;  %v2908_v47 = vld [vmem:[%s16995_s26 + $0x4d8] sm:$0xff] }
 0x994   : > { %13786 = vmatprep.subr.bf16.mxu0 %v14814_v54  ;;  %v3795_v4 = vld [vmem:[%s16995_s26 + $0x2090] sm:$0xff]  ;;  %v15053_v52 = vcombine.low %v3435_v15, %v3447_v43 }
 0x995   : > { %13828 = vmatpush1.bf16.msra.mxu1 %v15197_v42  ;;  %v3807_v54 = vld [vmem:[%s16995_s26 + $0x20f0] sm:$0xff]  ;;  %v15054_v42 = vcombine.high %v3435_v15, %v3447_v43 }
 0x996   : > { %13829 = vmatprep.subr.bf16.mxu1 %v15174_v32  ;;  %v3411_v41 = vld [vmem:[%s16995_s26 + $0x1490] sm:$0xff]  ;;  %v15413_v56 = vcombine.low %v3795_v4, %v3807_v54 }
 0x997   : > { %13787 = vmatpush1.bf16.msra.mxu0 %v14813_v29  ;;  %v3423_v32 = vld [vmem:[%s16995_s26 + $0x14f0] sm:$0xff]  ;;  %v15414_v29 = vcombine.high %v3795_v4, %v3807_v54  ;;  %v2884_v54 = vld [vmem:[%s16995_s26 + $0x418] sm:$0xff] }
 0x998   : > { %13788 = vmatprep.subr.bf16.mxu0 %v14790_v1  ;;  %v3771_v5 = vld [vmem:[%s16995_s26 + $0x1fd0] sm:$0xff]  ;;  %v15029_v44 = vcombine.low %v3411_v41, %v3423_v32 }
 0x999   : > { %13830 = vmatpush1.bf16.msra.mxu1 %v15173_v34  ;;  %v3783_v1 = vld [vmem:[%s16995_s26 + $0x2030] sm:$0xff]  ;;  %v15030_v34 = vcombine.high %v3411_v41, %v3423_v32 }
 0x99a   : > { %13831 = vmatprep.subr.bf16.mxu1 %v15150_v63  ;;  %v3387_v55 = vld [vmem:[%s16995_s26 + $0x13d0] sm:$0xff]  ;;  %v15389_v28 = vcombine.low %v3771_v5, %v3783_v1 }
 0x99b   : > { %13789 = vmatpush1.bf16.msra.mxu0 %v14789_v18  ;;  %v3399_v63 = vld [vmem:[%s16995_s26 + $0x1430] sm:$0xff]  ;;  %v15390_v18 = vcombine.high %v3771_v5, %v3783_v1 }
 0x99c   : > { %13790 = vmatprep.subr.bf16.mxu0 %v14766_v14  ;;  %v3747_v13 = vld [vmem:[%s16995_s26 + $0x1f10] sm:$0xff]  ;;  %v15005_v57 = vcombine.low %v3387_v55, %v3399_v63 }
 0x99d   : > { %13832 = vmatpush1.bf16.msra.mxu1 %v15149_v35  ;;  %v3759_v14 = vld [vmem:[%s16995_s26 + $0x1f70] sm:$0xff]  ;;  %v15006_v35 = vcombine.high %v3387_v55, %v3399_v63  ;;  %v2860_v63 = vld [vmem:[%s16995_s26 + $0x358] sm:$0xff] }
 0x99e   : > { %13833 = vmatprep.subr.bf16.mxu1 %v15510_v7  ;;  %v3363_v36 = vld [vmem:[%s16995_s26 + $0x1310] sm:$0xff]  ;;  %v15365_v53 = vcombine.low %v3747_v13, %v3759_v14 }
 0x99f   : > { %13791 = vmatpush1.bf16.msra.mxu0 %v14765_v31  ;;  %v3375_v7 = vld [vmem:[%s16995_s26 + $0x1370] sm:$0xff]  ;;  %v15366_v31 = vcombine.high %v3747_v13, %v3759_v14 }
 0x9a0   : > { %13792 = vmatprep.subr.bf16.mxu0 %v15126_v21  ;;  %v3723_v8 = vld [vmem:[%s16995_s26 + $0x1e50] sm:$0xff]  ;;  %v14981_v25 = vcombine.low %v3363_v36, %v3375_v7 }
 0x9a1   : > { %13834 = vmatpush2.bf16.msra.mxu1 %v15509_v6  ;;  %v3735_v21 = vld [vmem:[%s16995_s26 + $0x1eb0] sm:$0xff]  ;;  %v14982_v6 = vcombine.high %v3363_v36, %v3375_v7 }
 0x9a2   : > { %13835 = vmatprep.subr.bf16.mxu1 %v15486_v24  ;;  %v3339_v39 = vld [vmem:[%s16995_s26 + $0x1250] sm:$0xff]  ;;  %v15341_v27 = vcombine.low %v3723_v8, %v3735_v21 }
 0x9a3   : > { %13793 = vmatpush2.bf16.msra.mxu0 %v15125_v19  ;;  %v3351_v24 = vld [vmem:[%s16995_s26 + $0x12b0] sm:$0xff]  ;;  %v15342_v19 = vcombine.high %v3723_v8, %v3735_v21  ;;  %v2836_v8 = vld [vmem:[%s16995_s26 + $0x298] sm:$0xff] }
 0x9a4   : > { %13794 = vmatprep.subr.bf16.mxu0 %v15102_v48  ;;  %v2944_v48 = vld [vmem:[%s16995_s26 + $0x5f8] sm:$0xff]  ;;  %v4083_v37 = vld [vmem:[%s16995_s26 + $0x2990] sm:$0xff]  ;;  %v14957_v11 = vcombine.low %v3339_v39, %v3351_v24 }
 0x9a5   : > { %13836 = vmatpush2.bf16.msra.mxu1 %v15485_v26  ;;  %v14958_v26 = vcombine.high %v3339_v39, %v3351_v24  ;;  %v14551_v15 = vcombine.low %v2932_v46, %v2944_v48  ;;  %v4059_v43 = vld [vmem:[%s16995_s26 + $0x28d0] sm:$0xff]  ;;  %v2848_v21 = vld [vmem:[%s16995_s26 + $0x2f8] sm:$0xff] }
 0x9a6   : > { %13837 = vmatprep.subr.bf16.mxu1 %v15462_v3  ;;  %v4095_v3 = vld [vmem:[%s16995_s26 + $0x29f0] sm:$0xff] }
 0x9a7   : > { %13795 = vmatpush2.bf16.msra.mxu0 %v15101_v9  ;;  %v14552_v9 = vcombine.high %v2932_v46, %v2944_v48  ;;  %v15701_v4 = vcombine.low %v4083_v37, %v4095_v3  ;;  %v3987_v39 = vld [vmem:[%s16995_s26 + $0x2690] sm:$0xff]  ;;  %v2812_v46 = vld [vmem:[%s16995_s26 + $0x1d8] sm:$0xff] }
 0x9a8   : > { %13796 = vmatprep.subr.bf16.mxu0 %v15078_v23  ;;  %v2920_v23 = vld [vmem:[%s16995_s26 + $0x538] sm:$0xff]  ;;  %v3999_v24 = vld [vmem:[%s16995_s26 + $0x26f0] sm:$0xff] }
 0x9a9   : > { %13838 = vmatpush2.bf16.msra.mxu1 %v15461_v2  ;;  %v15702_v2 = vcombine.high %v4083_v37, %v4095_v3  ;;  %v14527_v32 = vcombine.low %v2908_v47, %v2920_v23  ;;  %v2824_v48 = vld [vmem:[%s16995_s26 + $0x238] sm:$0xff]  ;;  %v3963_v37 = vld [vmem:[%s16995_s26 + $0x25d0] sm:$0xff] }
 0x9aa   : > { %13839 = vmatprep.subr.bf16.mxu1 %v15438_v45  ;;  %v4071_v45 = vld [vmem:[%s16995_s26 + $0x2930] sm:$0xff] }
 0x9ab   : > { %13797 = vmatpush2.bf16.msra.mxu0 %v15077_v49  ;;  %v14528_v49 = vcombine.high %v2908_v47, %v2920_v23  ;;  %v15678_v41 = vcombine.high %v4059_v43, %v4071_v45  ;;  %v15677_v55 = vcombine.low %v4059_v43, %v4071_v45  ;;  %v3975_v3 = vld [vmem:[%s16995_s26 + $0x2630] sm:$0xff]  ;;  %v2788_v47 = vld [vmem:[%s16995_s26 + $0x118] sm:$0xff] }
 0x9ac   : > { %13798 = vmatprep.subr.bf16.mxu0 %v15054_v42  ;;  %v2896_v42 = vld [vmem:[%s16995_s26 + $0x478] sm:$0xff]  ;;  %v3939_v43 = vld [vmem:[%s16995_s26 + $0x2510] sm:$0xff] }
 0x9ad   : > { %13840 = vmatpush2.bf16.msra.mxu1 %v15437_v61  ;;  %v2800_v23 = vld [vmem:[%s16995_s26 + $0x178] sm:$0xff]  ;;  %v3951_v45 = vld [vmem:[%s16995_s26 + $0x2570] sm:$0xff] }
 0x9ae   : > { %13841 = vmatprep.subr.bf16.mxu1 %v15414_v29  ;;  %v4035_v29 = vld [vmem:[%s16995_s26 + $0x2810] sm:$0xff] }
 0x9af   : > { %13799 = vmatpush2.bf16.msra.mxu0 %v15053_v52  ;;  %v4047_v52 = vld [vmem:[%s16995_s26 + $0x2870] sm:$0xff] }
 0x9b0   : > { %13800 = vmatprep.subr.bf16.mxu0 %v15030_v34  ;;  %v14504_v34 = vcombine.high %v2884_v54, %v2896_v42  ;;  %v15654_v13 = vcombine.high %v4035_v29, %v4047_v52 }
 0x9b1   : > { %13842 = vmatpush2.bf16.msra.mxu1 %v15413_v56 }
 0x9b2   : > { %13843 = vmatprep.subr.bf16.mxu1 %v15390_v18 }
 0x9b3   : > { %13801 = vmatpush2.bf16.msra.mxu0 %v15029_v44 }
 0x9b4   : > { %13802 = vmatprep.subr.bf16.mxu0 %v15006_v35  ;;  %v14503_v35 = vcombine.low %v2884_v54, %v2896_v42  ;;  %v15581_v54 = vcombine.low %v3963_v37, %v3975_v3  ;;  %v2764_v42 = vld [vmem:[%s16995_s26 + $0x58] sm:$0xff] }
 0x9b5   : > { %13844 = vmatpush2.bf16.msra.mxu1 %v15389_v28  ;;  %v4011_v28 = vld [vmem:[%s16995_s26 + $0x2750] sm:$0xff] }
 0x9b6   : > { %13845 = vmatprep.subr.bf16.mxu1 %v15366_v31 }
 0x9b7   : > { %13803 = vmatpush2.bf16.msra.mxu0 %v15005_v57  ;;  %v15653_v57 = vcombine.low %v4035_v29, %v4047_v52  ;;  %v15558_v29 = vcombine.high %v3939_v43, %v3951_v45  ;;  %v14407_v52 = vcombine.low %v2788_v47, %v2800_v23 }
 0x9b8   : > { %13804 = vmatprep.subr.bf16.mxu0 %v14982_v6 }
 0x9b9   : > { %13846 = vmatpush2.bf16.msra.mxu1 %v15365_v53 }
 0x9ba   : > { %13847 = vmatprep.subr.bf16.mxu1 %v15342_v19  ;;  %v14456_v19 = vcombine.high %v2836_v8, %v2848_v21 }
 0x9bb   : > { %13805 = vmatpush2.bf16.msra.mxu0 %v14981_v25 }
 0x9bc   : > { %13806 = vmatprep.subr.bf16.mxu0 %v14958_v26  ;;  %v15606_v26 = vcombine.high %v3987_v39, %v3999_v24 }
 0x9bd   : > { %13848 = vmatpush2.bf16.msra.mxu1 %v15341_v27  ;;  %v14455_v27 = vcombine.low %v2836_v8, %v2848_v21  ;;  %v4263_v8 = vld [vmem:[%s16995_s26 + $0x2f30] sm:$0xff] }
 0x9be   : > { %13899 = vmatprep.subr.bf16.mxu1 %v14552_v9  ;;  %v14432_v9 = vcombine.high %v2812_v46, %v2824_v48 }
 0x9bf   : > { %13807 = vmatpush2.bf16.msra.mxu0 %v14957_v11  ;;  %v15605_v11 = vcombine.low %v3987_v39, %v3999_v24 }
 0x9c0   : > { %v18872_v61 = vpop.f32.mrf.mxu1  ;;  %13850 = vmatmul.mubr.bf16.vlgmr.msra.gmra.mxu1 %v17319_v12  ;;  %13858 = vmatprep.subr.bf16.mxu0 %v15702_v2  ;;  %v15582_v2 = vcombine.high %v3963_v37, %v3975_v3 }
 0x9c1   : > { %13900 = vmatpush1.bf16.msra.mxu1 %v14551_v15  ;;  %13931 = vmatprep.mubr.bf16.mxu1 %v17160_v50  ;;  %v2872_v50 = vld [vmem:[%s16995_s26 + $0x3b8] sm:$0xff]  ;;  %v14431_v15 = vcombine.low %v2812_v46, %v2824_v48 }
 0x9c2   : > { %v13564_v5 = vpop.f32.mrf.mxu0  ;;  %13809 = vmatmul.mubr.bf16.vlgmr.msra.gmra.mxu0 %v17246_v30  ;;  %v18879_v1 = vpop.f32.mrf.mxu1  ;;  %13901 = vmatprep.subr.bf16.mxu1 %v14528_v49  ;;  %v14480_v31 = vcombine.high %v2860_v63, %v2872_v50  ;;  %v14479_v53 = vcombine.low %v2860_v63, %v2872_v50  ;;  %v3124_v63 = vld [vmem:[%s16995_s26 + $0xb98] sm:$0xff] }
 0x9c3   : > { %v13565_v56 = vadd.f32 %v13564_v5, %v18808_v58  ;;  %13859 = vmatpush1.bf16.msra.mxu0 %v15701_v4  ;;  %13890 = vmatprep.mubr.bf16.mxu0 %v17376_v20  ;;  %v4023_v58 = vld [vmem:[%s16995_s26 + $0x27b0] sm:$0xff]  ;;  %v14408_v4 = vcombine.high %v2788_v47, %v2800_v23  ;;  %v3136_v50 = vld [vmem:[%s16995_s26 + $0xbf8] sm:$0xff] }
 0x9c4   : > { %v13566_v18 = vpop.f32.mrf.mxu0  ;;  %v13609_v44 = vpop.f32.mrf.mxu1  ;;  %13860 = vmatprep.subr.bf16.mxu0 %v15678_v41  ;;  %v15629_v25 = vcombine.low %v4011_v28, %v4023_v58  ;;  %v2776_v41 = vld [vmem:[%s16995_s26 + $0xb8] sm:$0xff]  ;;  %v3915_v5 = vld [vmem:[%s16995_s26 + $0x2450] sm:$0xff] }
 0x9c5   : > { %16149 = vtanh.f32 %v13565_v56  ;;  %v13567_v14 = vadd.f32 %v13566_v18, %v18812_v16  ;;  %13902 = vmatpush1.bf16.msra.mxu1 %v14527_v32  ;;  %v15630_v16 = vcombine.high %v4011_v28, %v4023_v58  ;;  %v14384_v56 = vcombine.high %v2764_v42, %v2776_v41  ;;  %v3100_v58 = vld [vmem:[%s16995_s26 + $0xad8] sm:$0xff] }
 0x9c6   : > { %v13568_v36 = vpop.f32.mrf.mxu0  ;;  %v13610_v7 = vpop.f32.mrf.mxu1  ;;  %13903 = vmatprep.subr.bf16.mxu1 %v14504_v34  ;;  %v3927_v34 = vld [vmem:[%s16995_s26 + $0x24b0] sm:$0xff]  ;;  %v14383_v44 = vcombine.low %v2764_v42, %v2776_v41  ;;  %v3004_v41 = vld [vmem:[%s16995_s26 + $0x7d8] sm:$0xff] }
 0x9c7   : > { %16151 = vtanh.f32 %v13567_v14  ;;  %13861 = vmatpush1.bf16.msra.mxu0 %v15677_v55  ;;  %v15557_v55 = vcombine.low %v3939_v43, %v3951_v45  ;;  %v15534_v18 = vcombine.high %v3915_v5, %v3927_v34  ;;  %v4287_v14 = vld [vmem:[%s16995_s26 + $0x2ff0] sm:$0xff]  ;;  %v15533_v28 = vcombine.low %v3915_v5, %v3927_v34  ;;  %v3112_v36 = vld [vmem:[%s16995_s26 + $0xb38] sm:$0xff] }
 0x9c8   : > { %v13569_v6 = vpop.f32.mrf.mxu0  ;;  %13862 = vmatprep.subr.bf16.mxu0 %v15654_v13  ;;  %v4275_v13 = vld [vmem:[%s16995_s26 + $0x2f90] sm:$0xff]  ;;  %v14720_v21 = vcombine.high %v3100_v58, %v3112_v36  ;;  %v14719_v24 = vcombine.low %v3100_v58, %v3112_v36  ;;  %v2956_v58 = vld [vmem:[%s16995_s26 + $0x658] sm:$0xff] }
 0x9c9   : > { %13904 = vmatpush1.bf16.msra.mxu1 %v14503_v35  ;;  %v14744_v35 = vcombine.high %v3124_v63, %v3136_v50  ;;  %v15894_v7 = vcombine.high %v4275_v13, %v4287_v14  ;;  %v15893_v6 = vcombine.low %v4275_v13, %v4287_v14  ;;  %v4155_v5 = vld [vmem:[%s16995_s26 + $0x2bd0] sm:$0xff]  ;;  %v2968_v36 = vld [vmem:[%s16995_s26 + $0x6b8] sm:$0xff] }
 0x9ca   : > { %13905 = vmatprep.subr.bf16.mxu1 %v14480_v31  ;;  %v14743_v31 = vcombine.low %v3124_v63, %v3136_v50  ;;  %v4167_v34 = vld [vmem:[%s16995_s26 + $0x2c30] sm:$0xff]  ;;  %v2980_v63 = vld [vmem:[%s16995_s26 + $0x718] sm:$0xff] }
 0x9cb   : > { %13863 = vmatpush1.bf16.msra.mxu0 %v15653_v57  ;;  %v4251_v57 = vld [vmem:[%s16995_s26 + $0x2ed0] sm:$0xff]  ;;  %v2992_v50 = vld [vmem:[%s16995_s26 + $0x778] sm:$0xff] }
 0x9cc   : > { %13864 = vmatprep.subr.bf16.mxu0 %v15630_v16  ;;  %v3076_v16 = vld [vmem:[%s16995_s26 + $0xa18] sm:$0xff]  ;;  %v15870_v39 = vcombine.high %v4251_v57, %v4263_v8  ;;  %v15869_v48 = vcombine.low %v4251_v57, %v4263_v8  ;;  %v4131_v13 = vld [vmem:[%s16995_s26 + $0x2b10] sm:$0xff] }
 0x9cd   : > { %13906 = vmatpush1.bf16.msra.mxu1 %v14479_v53  ;;  %v3088_v53 = vld [vmem:[%s16995_s26 + $0xa78] sm:$0xff]  ;;  %v4143_v14 = vld [vmem:[%s16995_s26 + $0x2b70] sm:$0xff] }
 0x9ce   : > { %13907 = vmatprep.subr.bf16.mxu1 %v14456_v19  ;;  %v4227_v19 = vld [vmem:[%s16995_s26 + $0x2e10] sm:$0xff]  ;;  %v14696_v46 = vcombine.high %v3076_v16, %v3088_v53  ;;  %v14695_v3 = vcombine.low %v3076_v16, %v3088_v53  ;;  %v3700_v16 = vld [vmem:[%s16995_s26 + $0x1d98] sm:$0xff] }
 0x9cf   : > { %13865 = vmatpush1.bf16.msra.mxu0 %v15629_v25  ;;  %v4239_v25 = vld [vmem:[%s16995_s26 + $0x2e70] sm:$0xff]  ;;  %v3712_v53 = vld [vmem:[%s16995_s26 + $0x1df8] sm:$0xff] }
 0x9d0   : > { %13866 = vmatprep.subr.bf16.mxu0 %v15606_v26  ;;  %v3052_v26 = vld [vmem:[%s16995_s26 + $0x958] sm:$0xff]  ;;  %v15846_v37 = vcombine.high %v4227_v19, %v4239_v25  ;;  %v15845_v23 = vcombine.low %v4227_v19, %v4239_v25  ;;  %v4107_v57 = vld [vmem:[%s16995_s26 + $0x2a50] sm:$0xff] }
 0x9d1   : > { %13908 = vmatpush1.bf16.msra.mxu1 %v14455_v27  ;;  %v3064_v27 = vld [vmem:[%s16995_s26 + $0x9b8] sm:$0xff]  ;;  %v4119_v8 = vld [vmem:[%s16995_s26 + $0x2ab0] sm:$0xff] }
 0x9d2   : > { %v16150_v49 = vpop.eup %16149  ;;  %13909 = vmatprep.subr.bf16.mxu1 %v14432_v9  ;;  %v4203_v9 = vld [vmem:[%s16995_s26 + $0x2d50] sm:$0xff]  ;;  %v14672_v47 = vcombine.high %v3052_v26, %v3064_v27  ;;  %v14671_v45 = vcombine.low %v3052_v26, %v3064_v27  ;;  %v3316_v19 = vld [vmem:[%s16995_s26 + $0x1198] sm:$0xff] }
 0x9d3   : > { %14103 = vst [vmem:[%s17653_s5 + $0x80] sm:$0xff] %v16150_v49  ;;  %13867 = vmatpush1.bf16.msra.mxu0 %v15605_v11  ;;  %v4215_v11 = vld [vmem:[%s16995_s26 + $0x2db0] sm:$0xff]  ;;  %v3328_v25 = vld [vmem:[%s16995_s26 + $0x11f8] sm:$0xff] }
 0x9d4   : > { %v16152_v32 = vpop.eup %16151  ;;  %13868 = vmatprep.subr.bf16.mxu0 %v15582_v2  ;;  %v3028_v2 = vld [vmem:[%s16995_s26 + $0x898] sm:$0xff]  ;;  %v15822_v43 = vcombine.high %v4203_v9, %v4215_v11  ;;  %v4179_v49 = vld [vmem:[%s16995_s26 + $0x2c90] sm:$0xff]  ;;  %v15821_v42 = vcombine.low %v4203_v9, %v4215_v11  ;;  %v15319_v9 = vcombine.low %v3700_v16, %v3712_v53 }
 0x9d5   : > { %14104 = vst [vmem:[%s17653_s5 + $0x88] sm:$0xff] %v16152_v32  ;;  %13910 = vmatpush1.bf16.msra.mxu1 %v14431_v15  ;;  %v3040_v15 = vld [vmem:[%s16995_s26 + $0x8f8] sm:$0xff] }
 0x9d6   : > { %13911 = vmatprep.subr.bf16.mxu1 %v14408_v4  ;;  %v4191_v4 = vld [vmem:[%s16995_s26 + $0x2cf0] sm:$0xff]  ;;  %v3016_v32 = vld [vmem:[%s16995_s26 + $0x838] sm:$0xff] }
 0x9d7   : > { %13869 = vmatpush1.bf16.msra.mxu0 %v15581_v54  ;;  %v14648_v54 = vcombine.high %v3028_v2, %v3040_v15  ;;  %v3676_v26 = vld [vmem:[%s16995_s26 + $0x1cd8] sm:$0xff] }
 0x9d8   : > { %13870 = vmatprep.subr.bf16.mxu0 %v15558_v29  ;;  %v15798_v29 = vcombine.high %v4179_v49, %v4191_v4  ;;  %v3688_v27 = vld [vmem:[%s16995_s26 + $0x1d38] sm:$0xff] }
 0x9d9   : > { %13912 = vmatpush1.bf16.msra.mxu1 %v14407_v52  ;;  %v14647_v52 = vcombine.low %v3028_v2, %v3040_v15  ;;  %v3292_v11 = vld [vmem:[%s16995_s26 + $0x10d8] sm:$0xff]  ;;  %v4374_v2 = vrot.slane %v18786_v59, %v17019_v40  ;;  %v14935_v15 = vcombine.low %v3316_v19, %v3328_v25 }
 0x9da   : > { %13913 = vmatprep.subr.bf16.mxu1 %v14384_v56  ;;  %v14624_v56 = vcombine.high %v3004_v41, %v3016_v32 }
 0x9db   : > { %13871 = vmatpush1.bf16.msra.mxu0 %v15557_v55  ;;  %v15797_v55 = vcombine.low %v4179_v49, %v4191_v4 }
 0x9dc   : > { %13872 = vmatprep.subr.bf16.mxu0 %v15534_v18  ;;  %v15774_v18 = vcombine.high %v4155_v5, %v4167_v34 }
 0x9dd   : > { %13914 = vmatpush1.bf16.msra.mxu1 %v14383_v44  ;;  %v14623_v44 = vcombine.low %v3004_v41, %v3016_v32  ;;  %v3280_v41 = vld [vmem:[%s16995_s26 + $0x1078] sm:$0xff] }
 0x9de   : > { %13915 = vmatprep.subr.bf16.mxu1 %v14744_v35  ;;  %v14600_v35 = vcombine.high %v2980_v63, %v2992_v50 }
 0x9df   : > { %13873 = vmatpush1.bf16.msra.mxu0 %v15533_v28  ;;  %v15773_v28 = vcombine.low %v4155_v5, %v4167_v34 }
 0x9e0   : > { %13874 = vmatprep.subr.bf16.mxu0 %v15894_v7  ;;  %v15750_v7 = vcombine.high %v4131_v13, %v4143_v14 }
 0x9e1   : > { %13916 = vmatpush2.bf16.msra.mxu1 %v14743_v31  ;;  %v14599_v31 = vcombine.low %v2980_v63, %v2992_v50 }
 0x9e2   : > { %13917 = vmatprep.subr.bf16.mxu1 %v14720_v21  ;;  %v14576_v21 = vcombine.high %v2956_v58, %v2968_v36 }
 0x9e3   : > { %13875 = vmatpush2.bf16.msra.mxu0 %v15893_v6  ;;  %v15749_v6 = vcombine.low %v4131_v13, %v4143_v14 }
 0x9e4   : > { %13876 = vmatprep.subr.bf16.mxu0 %v15870_v39  ;;  %v15726_v39 = vcombine.high %v4107_v57, %v4119_v8 }
 0x9e5   : > { %13918 = vmatpush2.bf16.msra.mxu1 %v14719_v24  ;;  %v14575_v24 = vcombine.low %v2956_v58, %v2968_v36  ;;  %v3616_v58 = vld [vmem:[%s16995_s26 + $0x1af8] sm:$0xff] }
 0x9e6   : > { %13919 = vmatprep.subr.bf16.mxu1 %v14696_v46  ;;  %v15320_v46 = vcombine.high %v3700_v16, %v3712_v53  ;;  %v3580_v16 = vld [vmem:[%s16995_s26 + $0x19d8] sm:$0xff] }
 0x9e7   : > { %13877 = vmatpush2.bf16.msra.mxu0 %v15869_v48  ;;  %v15725_v48 = vcombine.low %v4107_v57, %v4119_v8  ;;  %v3220_v57 = vld [vmem:[%s16995_s26 + $0xe98] sm:$0xff] }
 0x9e8   : > { %13878 = vmatprep.subr.bf16.mxu0 %v15846_v37  ;;  %v14936_v37 = vcombine.high %v3316_v19, %v3328_v25  ;;  %v3232_v8 = vld [vmem:[%s16995_s26 + $0xef8] sm:$0xff] }
 0x9e9   : > { %13920 = vmatpush2.bf16.msra.mxu1 %v14695_v3  ;;  %v4370_v3 = vrot.slane %v18786_v59, %v17016_v38  ;;  %v3592_v53 = vld [vmem:[%s16995_s26 + $0x1a38] sm:$0xff] }
 0x9ea   : > { %13921 = vmatprep.subr.bf16.mxu1 %v14672_v47  ;;  %v3304_v47 = vld [vmem:[%s16995_s26 + $0x1138] sm:$0xff] }
 0x9eb   : > { %13879 = vmatpush2.bf16.msra.mxu0 %v15845_v23  ;;  %v15296_v23 = vcombine.high %v3676_v26, %v3688_v27  ;;  %v14912_v38 = vcombine.high %v3292_v11, %v3304_v47  ;;  %v13606_v4 = vadd.f32 %v18872_v61, %v4370_v3  ;;  %v14911_v61 = vcombine.low %v3292_v11, %v3304_v47  ;;  %v3196_v19 = vld [vmem:[%s16995_s26 + $0xdd8] sm:$0xff] }
 0x9ec   : > { %13880 = vmatprep.subr.bf16.mxu0 %v15822_v43  ;;  %v3652_v43 = vld [vmem:[%s16995_s26 + $0x1c18] sm:$0xff]  ;;  %v15199_v3 = vcombine.low %v3580_v16, %v3592_v53 }
 0x9ed   : > { %13922 = vmatpush2.bf16.msra.mxu1 %v14671_v45  ;;  %v3664_v45 = vld [vmem:[%s16995_s26 + $0x1c78] sm:$0xff] }
 0x9ee   : > { %13923 = vmatprep.subr.bf16.mxu1 %v14648_v54  ;;  %v15295_v54 = vcombine.low %v3676_v26, %v3688_v27  ;;  %v15272_v32 = vcombine.high %v3652_v43, %v3664_v45  ;;  %v15271_v50 = vcombine.low %v3652_v43, %v3664_v45  ;;  %v3208_v25 = vld [vmem:[%s16995_s26 + $0xe38] sm:$0xff] }
 0x9ef   : > { %13881 = vmatpush2.bf16.msra.mxu0 %v15821_v42  ;;  %v3268_v42 = vld [vmem:[%s16995_s26 + $0x1018] sm:$0xff] }
 0x9f0   : > { %13882 = vmatprep.subr.bf16.mxu0 %v15798_v29  ;;  %v3556_v26 = vld [vmem:[%s16995_s26 + $0x1918] sm:$0xff] }
 0x9f1   : > { %13924 = vmatpush2.bf16.msra.mxu1 %v14647_v52  ;;  %v3628_v52 = vld [vmem:[%s16995_s26 + $0x1b58] sm:$0xff] }
 0x9f2   : > { %13925 = vmatprep.subr.bf16.mxu1 %v14624_v56  ;;  %v14888_v56 = vcombine.high %v3268_v42, %v3280_v41  ;;  %v3568_v27 = vld [vmem:[%s16995_s26 + $0x1978] sm:$0xff] }
 0x9f3   : > { %13883 = vmatpush2.bf16.msra.mxu0 %v15797_v55  ;;  %v3184_v11 = vld [vmem:[%s16995_s26 + $0xd78] sm:$0xff]  ;;  %v15176_v47 = vcombine.high %v3556_v26, %v3568_v27  ;;  %v15175_v45 = vcombine.low %v3556_v26, %v3568_v27 }
 0x9f4   : > { %13884 = vmatprep.subr.bf16.mxu0 %v15774_v18  ;;  %v3256_v18 = vld [vmem:[%s16995_s26 + $0xfb8] sm:$0xff] }
 0x9f5   : > { %13926 = vmatpush2.bf16.msra.mxu1 %v14623_v44 }
 0x9f6   : > { %13927 = vmatprep.subr.bf16.mxu1 %v14600_v35  ;;  %v14887_v35 = vcombine.low %v3268_v42, %v3280_v41  ;;  %v3892_v42 = vld [vmem:[%s16995_s26 + $0x2398] sm:$0xff] }
 0x9f7   : > { %13885 = vmatpush2.bf16.msra.mxu0 %v15773_v28  ;;  %v3604_v28 = vld [vmem:[%s16995_s26 + $0x1a98] sm:$0xff] }
 0x9f8   : > { %13886 = vmatprep.subr.bf16.mxu0 %v15750_v7  ;;  %v3904_v41 = vld [vmem:[%s16995_s26 + $0x23f8] sm:$0xff] }
 0x9f9   : > { %13928 = vmatpush2.bf16.msra.mxu1 %v14599_v31 }
 0x9fa   : > { %13929 = vmatprep.subr.bf16.mxu1 %v14576_v21  ;;  %v15224_v21 = vcombine.high %v3604_v28, %v3616_v58 }
 0x9fb   : > { %13887 = vmatpush2.bf16.msra.mxu0 %v15749_v6 }
 0x9fc   : > { %13888 = vmatprep.subr.bf16.mxu0 %v15726_v39  ;;  %v14840_v39 = vcombine.high %v3220_v57, %v3232_v8 }
 0x9fd   : > { %13930 = vmatpush2.bf16.msra.mxu1 %v14575_v24  ;;  %v15223_v24 = vcombine.low %v3604_v28, %v3616_v58  ;;  %v3472_v28 = vld [vmem:[%s16995_s26 + $0x1678] sm:$0xff] }
 0x9fe   : > { %13981 = vmatprep.subr.bf16.mxu1 %v15320_v46  ;;  %v15200_v46 = vcombine.high %v3580_v16, %v3592_v53 }
 0x9ff   : > { %13889 = vmatpush2.bf16.msra.mxu0 %v15725_v48  ;;  %v14839_v48 = vcombine.low %v3220_v57, %v3232_v8 }
 0xa00   : > { %v13687_v49 = vpop.f32.mrf.mxu1  ;;  %13932 = vmatmul.mubr.bf16.vlgmr.msra.gmra.mxu1 %v17165_v60  ;;  %13940 = vmatprep.subr.bf16.mxu0 %v14936_v37  ;;  %v13608_v60 = vadd.f32 %v18879_v1, %v4374_v2  ;;  %v3244_v1 = vld [vmem:[%s16995_s26 + $0xf58] sm:$0xff]  ;;  %v14816_v37 = vcombine.high %v3196_v19, %v3208_v25 }
 0xa01   : > { %13982 = vmatpush1.bf16.msra.mxu1 %v15319_v9  ;;  %14013 = vmatprep.mubr.bf16.mxu1 %v17317_v10  ;;  %v3640_v10 = vld [vmem:[%s16995_s26 + $0x1bb8] sm:$0xff]  ;;  %v14864_v7 = vcombine.high %v3244_v1, %v3256_v18  ;;  %v14863_v6 = vcombine.low %v3244_v1, %v3256_v18 }
 0xa02   : > { %v13646_v40 = vpop.f32.mrf.mxu0  ;;  %13891 = vmatmul.mubr.bf16.vlgmr.msra.gmra.mxu0 %v17380_v33  ;;  %v13689_v59 = vpop.f32.mrf.mxu1  ;;  %13983 = vmatprep.subr.bf16.mxu1 %v15296_v23  ;;  %v15248_v13 = vcombine.high %v3628_v52, %v3640_v10  ;;  %v15247_v31 = vcombine.low %v3628_v52, %v3640_v10  ;;  %v3172_v9 = vld [vmem:[%s16995_s26 + $0xd18] sm:$0xff]  ;;  %v14815_v23 = vcombine.low %v3196_v19, %v3208_v25 }
 0xa03   : > { %v13647_v29 = vadd.f32 %v13646_v40, %v13606_v4  ;;  %13941 = vmatpush1.bf16.msra.mxu0 %v14935_v15  ;;  %13972 = vmatprep.mubr.bf16.mxu0 %v17242_v22  ;;  %v3532_v2 = vld [vmem:[%s16995_s26 + $0x1858] sm:$0xff]  ;;  %v14792_v43 = vcombine.high %v3172_v9, %v3184_v11 }
 0xa04   : > { %v13648_v5 = vpop.f32.mrf.mxu0  ;;  %v13691_v34 = vpop.f32.mrf.mxu1  ;;  %13942 = vmatprep.subr.bf16.mxu0 %v14912_v38  ;;  %v3544_v15 = vld [vmem:[%s16995_s26 + $0x18b8] sm:$0xff] }
 0xa05   : > { %v18962_v55 = vadd.f32 %v13687_v49, %v13647_v29  ;;  %v13649_v63 = vadd.f32 %v13648_v5, %v13608_v60  ;;  %13984 = vmatpush1.bf16.msra.mxu1 %v15295_v54  ;;  %v3148_v49 = vld [vmem:[%s16995_s26 + $0xc58] sm:$0xff]  ;;  %v15152_v4 = vcombine.high %v3532_v2, %v3544_v15  ;;  %v14791_v54 = vcombine.low %v3172_v9, %v3184_v11 }
 0xa06   : > { %v13650_v44 = vpop.f32.mrf.mxu0  ;;  %v13692_v22 = vpop.f32.mrf.mxu1  ;;  %13985 = vmatprep.subr.bf16.mxu1 %v15272_v32  ;;  %v3160_v38 = vld [vmem:[%s16995_s26 + $0xcb8] sm:$0xff]  ;;  %v15512_v29 = vcombine.high %v3892_v42, %v3904_v41  ;;  %v15511_v34 = vcombine.low %v3892_v42, %v3904_v41 }
 0xa07   : > { %v18966_v14 = vadd.f32 %v13689_v59, %v13649_v63  ;;  %13943 = vmatpush1.bf16.msra.mxu0 %v14911_v61  ;;  %v14768_v40 = vcombine.high %v3148_v49, %v3160_v38  ;;  %v15151_v59 = vcombine.low %v3532_v2, %v3544_v15  ;;  %v3508_v32 = vld [vmem:[%s16995_s26 + $0x1798] sm:$0xff]  ;;  %v14767_v61 = vcombine.low %v3148_v49, %v3160_v38 }
 0xa08   : > { %v13651_v36 = vpop.f32.mrf.mxu0  ;;  %13944 = vmatprep.subr.bf16.mxu0 %v14888_v56  ;;  %v3520_v60 = vld [vmem:[%s16995_s26 + $0x17f8] sm:$0xff] }
 0xa09   : > { %13986 = vmatpush1.bf16.msra.mxu1 %v15271_v50  ;;  %v3868_v52 = vld [vmem:[%s16995_s26 + $0x22d8] sm:$0xff]  ;;  %v15128_v5 = vcombine.high %v3508_v32, %v3520_v60  ;;  %v15127_v1 = vcombine.low %v3508_v32, %v3520_v60 }
 0xa0a   : > { %13987 = vmatprep.subr.bf16.mxu1 %v15248_v13  ;;  %v3880_v10 = vld [vmem:[%s16995_s26 + $0x2338] sm:$0xff] }
 0xa0b   : > { %13945 = vmatpush1.bf16.msra.mxu0 %v14887_v35  ;;  %v3484_v56 = vld [vmem:[%s16995_s26 + $0x16d8] sm:$0xff]  ;;  %v15488_v50 = vcombine.high %v3868_v52, %v3880_v10  ;;  %v15487_v13 = vcombine.low %v3868_v52, %v3880_v10 }
 0xa0c   : > { %13946 = vmatprep.subr.bf16.mxu0 %v14864_v7  ;;  %v3496_v63 = vld [vmem:[%s16995_s26 + $0x1738] sm:$0xff] }
 0xa0d   : > { %13988 = vmatpush1.bf16.msra.mxu1 %v15247_v31  ;;  %v3844_v18 = vld [vmem:[%s16995_s26 + $0x2218] sm:$0xff]  ;;  %v15104_v22 = vcombine.high %v3484_v56, %v3496_v63  ;;  %v15103_v36 = vcombine.low %v3484_v56, %v3496_v63 }
 0xa0e   : > { %13989 = vmatprep.subr.bf16.mxu1 %v15224_v21  ;;  %v3856_v44 = vld [vmem:[%s16995_s26 + $0x2278] sm:$0xff] }
 0xa0f   : > { %13947 = vmatpush1.bf16.msra.mxu0 %v14863_v6  ;;  %v3460_v35 = vld [vmem:[%s16995_s26 + $0x1618] sm:$0xff]  ;;  %v15464_v58 = vcombine.high %v3844_v18, %v3856_v44  ;;  %v15463_v8 = vcombine.low %v3844_v18, %v3856_v44 }
 0xa10   : > { %13948 = vmatprep.subr.bf16.mxu0 %v14840_v39  ;;  %v3820_v7 = vld [vmem:[%s16995_s26 + $0x2158] sm:$0xff]  ;;  %v15080_v57 = vcombine.high %v3460_v35, %v3472_v28  ;;  %v15079_v53 = vcombine.low %v3460_v35, %v3472_v28 }
 0xa11   : > { %13990 = vmatpush1.bf16.msra.mxu1 %v15223_v24  ;;  %v3832_v31 = vld [vmem:[%s16995_s26 + $0x21b8] sm:$0xff] }
 0xa12   : > { %13991 = vmatprep.subr.bf16.mxu1 %v15200_v46  ;;  %v3436_v21 = vld [vmem:[%s16995_s26 + $0x1558] sm:$0xff]  ;;  %v15440_v16 = vcombine.high %v3820_v7, %v3832_v31  ;;  %v15439_v25 = vcombine.low %v3820_v7, %v3832_v31 }
 0xa13   : > { %13949 = vmatpush1.bf16.msra.mxu0 %v14839_v48  ;;  %v3448_v6 = vld [vmem:[%s16995_s26 + $0x15b8] sm:$0xff] }
 0xa14   : > { %13950 = vmatprep.subr.bf16.mxu0 %v14816_v37  ;;  %v3796_v39 = vld [vmem:[%s16995_s26 + $0x2098] sm:$0xff]  ;;  %v15056_v19 = vcombine.high %v3436_v21, %v3448_v6  ;;  %v15055_v27 = vcombine.low %v3436_v21, %v3448_v6 }
 0xa15   : > { %13992 = vmatpush1.bf16.msra.mxu1 %v15199_v3  ;;  %v3808_v24 = vld [vmem:[%s16995_s26 + $0x20f8] sm:$0xff] }
 0xa16   : > { %13993 = vmatprep.subr.bf16.mxu1 %v15176_v47  ;;  %v3412_v46 = vld [vmem:[%s16995_s26 + $0x1498] sm:$0xff]  ;;  %v15416_v26 = vcombine.high %v3796_v39, %v3808_v24  ;;  %v15415_v11 = vcombine.low %v3796_v39, %v3808_v24 }
 0xa17   : > { %13951 = vmatpush1.bf16.msra.mxu0 %v14815_v23  ;;  %v3424_v48 = vld [vmem:[%s16995_s26 + $0x14f8] sm:$0xff] }
 0xa18   : > { %13952 = vmatprep.subr.bf16.mxu0 %v14792_v43  ;;  %v3772_v37 = vld [vmem:[%s16995_s26 + $0x1fd8] sm:$0xff]  ;;  %v15032_v9 = vcombine.high %v3412_v46, %v3424_v48  ;;  %v15031_v15 = vcombine.low %v3412_v46, %v3424_v48 }
 0xa19   : > { %13994 = vmatpush1.bf16.msra.mxu1 %v15175_v45  ;;  %v3784_v3 = vld [vmem:[%s16995_s26 + $0x2038] sm:$0xff] }
 0xa1a   : > { %13995 = vmatprep.subr.bf16.mxu1 %v15152_v4  ;;  %v3388_v47 = vld [vmem:[%s16995_s26 + $0x13d8] sm:$0xff]  ;;  %v15392_v2 = vcombine.high %v3772_v37, %v3784_v3  ;;  %v15391_v38 = vcombine.low %v3772_v37, %v3784_v3 }
 0xa1b   : > { %13953 = vmatpush1.bf16.msra.mxu0 %v14791_v54  ;;  %v3400_v23 = vld [vmem:[%s16995_s26 + $0x1438] sm:$0xff] }
 0xa1c   : > { %13954 = vmatprep.subr.bf16.mxu0 %v14768_v40  ;;  %v3748_v43 = vld [vmem:[%s16995_s26 + $0x1f18] sm:$0xff]  ;;  %v15008_v49 = vcombine.high %v3388_v47, %v3400_v23  ;;  %v15007_v41 = vcombine.low %v3388_v47, %v3400_v23 }
 0xa1d   : > { %13996 = vmatpush1.bf16.msra.mxu1 %v15151_v59  ;;  %v3760_v45 = vld [vmem:[%s16995_s26 + $0x1f78] sm:$0xff] }
 0xa1e   : > { %13997 = vmatprep.subr.bf16.mxu1 %v15512_v29  ;;  %v3364_v4 = vld [vmem:[%s16995_s26 + $0x1318] sm:$0xff]  ;;  %v15368_v42 = vcombine.high %v3748_v43, %v3760_v45  ;;  %v15367_v60 = vcombine.low %v3748_v43, %v3760_v45 }
 0xa1f   : > { %13955 = vmatpush1.bf16.msra.mxu0 %v14767_v61  ;;  %v3376_v54 = vld [vmem:[%s16995_s26 + $0x1378] sm:$0xff] }
 0xa20   : > { %13956 = vmatprep.subr.bf16.mxu0 %v15128_v5  ;;  %v3724_v40 = vld [vmem:[%s16995_s26 + $0x1e58] sm:$0xff]  ;;  %v14984_v32 = vcombine.high %v3364_v4, %v3376_v54  ;;  %v14983_v10 = vcombine.low %v3364_v4, %v3376_v54 }
 0xa21   : > { %13998 = vmatpush2.bf16.msra.mxu1 %v15511_v34  ;;  %v3736_v59 = vld [vmem:[%s16995_s26 + $0x1eb8] sm:$0xff] }
 0xa22   : > { %13999 = vmatprep.subr.bf16.mxu1 %v15488_v50  ;;  %v3340_v29 = vld [vmem:[%s16995_s26 + $0x1258] sm:$0xff]  ;;  %v15344_v52 = vcombine.high %v3724_v40, %v3736_v59  ;;  %v15343_v34 = vcombine.low %v3724_v40, %v3736_v59 }
 0xa23   : > { %13957 = vmatpush2.bf16.msra.mxu0 %v15127_v1  ;;  %v3352_v61 = vld [vmem:[%s16995_s26 + $0x12b8] sm:$0xff] }
 0xa24   : > { %13958 = vmatprep.subr.bf16.mxu0 %v15104_v22  ;;  %v14960_v5 = vcombine.high %v3340_v29, %v3352_v61  ;;  %v4084_v56 = vld [vmem:[%s16995_s26 + $0x2998] sm:$0xff]  ;;  %v14959_v50 = vcombine.low %v3340_v29, %v3352_v61 }
 0xa25   : > { %14000 = vmatpush2.bf16.msra.mxu1 %v15487_v13  ;;  %v4096_v63 = vld [vmem:[%s16995_s26 + $0x29f8] sm:$0xff] }
 0xa26   : > { %14001 = vmatprep.subr.bf16.mxu1 %v15464_v58  ;;  %v15704_v1 = vcombine.high %v4084_v56, %v4096_v63  ;;  %v4060_v18 = vld [vmem:[%s16995_s26 + $0x28d8] sm:$0xff]  ;;  %v15703_v22 = vcombine.low %v4084_v56, %v4096_v63 }
 0xa27   : > { %13959 = vmatpush2.bf16.msra.mxu0 %v15103_v36  ;;  %v4072_v44 = vld [vmem:[%s16995_s26 + $0x2938] sm:$0xff] }
 0xa28   : > { %13960 = vmatprep.subr.bf16.mxu0 %v15080_v57  ;;  %v15680_v35 = vcombine.high %v4060_v18, %v4072_v44  ;;  %v4036_v28 = vld [vmem:[%s16995_s26 + $0x2818] sm:$0xff]  ;;  %v15679_v57 = vcombine.low %v4060_v18, %v4072_v44 }
 0xa29   : > { %14002 = vmatpush2.bf16.msra.mxu1 %v15463_v8  ;;  %v4048_v58 = vld [vmem:[%s16995_s26 + $0x2878] sm:$0xff] }
 0xa2a   : > { %14003 = vmatprep.subr.bf16.mxu1 %v15440_v16  ;;  %v15656_v21 = vcombine.high %v4036_v28, %v4048_v58  ;;  %v4012_v16 = vld [vmem:[%s16995_s26 + $0x2758] sm:$0xff] }
 0xa2b   : > { %13961 = vmatpush2.bf16.msra.mxu0 %v15079_v53  ;;  %v3964_v48 = vld [vmem:[%s16995_s26 + $0x25d8] sm:$0xff] }
 0xa2c   : > { %13962 = vmatprep.subr.bf16.mxu0 %v15056_v19  ;;  %v3988_v19 = vld [vmem:[%s16995_s26 + $0x2698] sm:$0xff] }
 0xa2d   : > { %14004 = vmatpush2.bf16.msra.mxu1 %v15439_v25  ;;  %v4000_v25 = vld [vmem:[%s16995_s26 + $0x26f8] sm:$0xff] }
 0xa2e   : > { %14005 = vmatprep.subr.bf16.mxu1 %v15416_v26  ;;  %v3976_v26 = vld [vmem:[%s16995_s26 + $0x2638] sm:$0xff] }
 0xa2f   : > { %13963 = vmatpush2.bf16.msra.mxu0 %v15055_v27  ;;  %v15607_v27 = vcombine.low %v3988_v19, %v4000_v25  ;;  %v15584_v37 = vcombine.high %v3964_v48, %v3976_v26  ;;  %v3940_v3 = vld [vmem:[%s16995_s26 + $0x2518] sm:$0xff]  ;;  %v15583_v47 = vcombine.low %v3964_v48, %v3976_v26 }
 0xa30   : > { %13964 = vmatprep.subr.bf16.mxu0 %v15032_v9  ;;  %v3952_v9 = vld [vmem:[%s16995_s26 + $0x2578] sm:$0xff] }
 0xa31   : > { %14006 = vmatpush2.bf16.msra.mxu1 %v15415_v11  ;;  %v3928_v43 = vld [vmem:[%s16995_s26 + $0x24b8] sm:$0xff]  ;;  %v15559_v45 = vcombine.low %v3940_v3, %v3952_v9 }
 0xa32   : > { %14007 = vmatprep.subr.bf16.mxu1 %v15392_v2  ;;  %v15560_v2 = vcombine.high %v3940_v3, %v3952_v9  ;;  %v4288_v4 = vld [vmem:[%s16995_s26 + $0x2ff8] sm:$0xff] }
 0xa33   : > { %13965 = vmatpush2.bf16.msra.mxu0 %v15031_v15  ;;  %v3916_v15 = vld [vmem:[%s16995_s26 + $0x2458] sm:$0xff] }
 0xa34   : > { %13966 = vmatprep.subr.bf16.mxu0 %v15008_v49  ;;  %v15536_v49 = vcombine.high %v3916_v15, %v3928_v43  ;;  %v15535_v54 = vcombine.low %v3916_v15, %v3928_v43  ;;  %v4264_v40 = vld [vmem:[%s16995_s26 + $0x2f38] sm:$0xff] }
 0xa35   : > { %14008 = vmatpush2.bf16.msra.mxu1 %v15391_v38  ;;  %v4276_v38 = vld [vmem:[%s16995_s26 + $0x2f98] sm:$0xff] }
 0xa36   : > { %14009 = vmatprep.subr.bf16.mxu1 %v15368_v42  ;;  %v15896_v42 = vcombine.high %v4276_v38, %v4288_v4  ;;  %v15895_v59 = vcombine.low %v4276_v38, %v4288_v4  ;;  %v4240_v29 = vld [vmem:[%s16995_s26 + $0x2e78] sm:$0xff] }
 0xa37   : > { %13967 = vmatpush2.bf16.msra.mxu0 %v15007_v41  ;;  %v4252_v41 = vld [vmem:[%s16995_s26 + $0x2ed8] sm:$0xff] }
 0xa38   : > { %13968 = vmatprep.subr.bf16.mxu0 %v14984_v32  ;;  %v15872_v32 = vcombine.high %v4252_v41, %v4264_v40  ;;  %v15871_v61 = vcombine.low %v4252_v41, %v4264_v40  ;;  %v4180_v63 = vld [vmem:[%s16995_s26 + $0x2c98] sm:$0xff] }
 0xa39   : > { %14010 = vmatpush2.bf16.msra.mxu1 %v15367_v60  ;;  %v4228_v60 = vld [vmem:[%s16995_s26 + $0x2e18] sm:$0xff] }
 0xa3a   : > { %14011 = vmatprep.subr.bf16.mxu1 %v15344_v52  ;;  %v15848_v52 = vcombine.high %v4228_v60, %v4240_v29  ;;  %v4156_v44 = vld [vmem:[%s16995_s26 + $0x2bd8] sm:$0xff] }
 0xa3b   : > { %13969 = vmatpush2.bf16.msra.mxu0 %v14983_v10  ;;  %v4204_v10 = vld [vmem:[%s16995_s26 + $0x2d58] sm:$0xff] }
 0xa3c   : > { %13970 = vmatprep.subr.bf16.mxu0 %v14960_v5  ;;  %v4216_v5 = vld [vmem:[%s16995_s26 + $0x2db8] sm:$0xff] }
 0xa3d   : > { %14012 = vmatpush2.bf16.msra.mxu1 %v15343_v34  ;;  %v15847_v34 = vcombine.low %v4228_v60, %v4240_v29  ;;  %v15824_v56 = vcombine.high %v4204_v10, %v4216_v5 }
 0xa3f   : > { %13971 = vmatpush2.bf16.msra.mxu0 %v14959_v50  ;;  %v4192_v50 = vld [vmem:[%s16995_s26 + $0x2cf8] sm:$0xff] }
 0xa40   : > { %v19020_v13 = vpop.f32.mrf.mxu1  ;;  %14014 = vmatmul.mubr.bf16.vlgmr.msra.gmra.mxu1 %v17319_v12  ;;  %14022 = vmatprep.subr.bf16.mxu0 %v15704_v1  ;;  %v15823_v1 = vcombine.low %v4204_v10, %v4216_v5  ;;  %v15800_v18 = vcombine.high %v4180_v63, %v4192_v50 }
 0xa42   : > { %v13728_v36 = vpop.f32.mrf.mxu0  ;;  %13973 = vmatmul.mubr.bf16.vlgmr.msra.gmra.mxu0 %v17246_v30  ;;  %v19026_v7 = vpop.f32.mrf.mxu1  ;;  %v4024_v30 = vld [vmem:[%s16995_s26 + $0x27b8] sm:$0xff] }
 0xa43   : > { %v13729_v31 = vadd.f32 %v13728_v36, %v18962_v55  ;;  %14023 = vmatpush1.bf16.msra.mxu0 %v15703_v22  ;;  %14054 = vmatprep.mubr.bf16.mxu0 %v17376_v20  ;;  %v15655_v55 = vcombine.low %v4036_v28, %v4048_v58  ;;  %v15632_v24 = vcombine.high %v4012_v16, %v4024_v30  ;;  %v4168_v22 = vld [vmem:[%s16995_s26 + $0x2c38] sm:$0xff] }
 0xa44   : > { %v13730_v8 = vpop.f32.mrf.mxu0  ;;  %v13773_v12 = vpop.f32.mrf.mxu1  ;;  %14024 = vmatprep.subr.bf16.mxu0 %v15680_v35  ;;  %v15631_v46 = vcombine.low %v4012_v16, %v4024_v30  ;;  %v15799_v35 = vcombine.low %v4180_v63, %v4192_v50  ;;  %v15776_v28 = vcombine.high %v4156_v44, %v4168_v22  ;;  %v4132_v58 = vld [vmem:[%s16995_s26 + $0x2b18] sm:$0xff]  ;;  %v16171_v30 = vld [vmem:[%s17450_s1 + $0x10] sm:$0xff] }
 0xa45   : > { %16153 = vtanh.f32 %v13729_v31  ;;  %v13731_v6 = vadd.f32 %v13730_v8, %v18966_v14  ;;  %v15608_v14 = vcombine.high %v3988_v19, %v4000_v25  ;;  %v4144_v36 = vld [vmem:[%s16995_s26 + $0x2b78] sm:$0xff]  ;;  %v15775_v31 = vcombine.low %v4156_v44, %v4168_v22 }
 0xa46   : > { %v13732_v53 = vpop.f32.mrf.mxu0  ;;  %v13774_v39 = vpop.f32.mrf.mxu1  ;;  %v4108_v8 = vld [vmem:[%s16995_s26 + $0x2a58] sm:$0xff]  ;;  %v4386_v38 = vrot.slane %v16171_v30, %v17307_v62  ;;  %v4390_v4 = vrot.slane %v16171_v30, %v17312_v0 }
 0xa47   : > { %16155 = vtanh.f32 %v13731_v6  ;;  %14025 = vmatpush1.bf16.msra.mxu0 %v15679_v57  ;;  %v15752_v57 = vcombine.high %v4132_v58, %v4144_v36  ;;  %v4120_v12 = vld [vmem:[%s16995_s26 + $0x2ab8] sm:$0xff]  ;;  %v4378_v53 = vrot.slane %v16171_v30, %v17231_v51  ;;  %v4382_v39 = vrot.slane %v16171_v30, %v17234_v17 }
 0xa48   : > { %v13733_v20 = vpop.f32.mrf.mxu0  ;;  %14026 = vmatprep.subr.bf16.mxu0 %v15656_v21  ;;  %v15751_v21 = vcombine.low %v4132_v58, %v4144_v36  ;;  %v15728_v6 = vcombine.high %v4108_v8, %v4120_v12  ;;  %v15727_v16 = vcombine.low %v4108_v8, %v4120_v12 }
 0xa49   : > { %v13770_v20 = vadd.f32 %v19020_v13, %v4378_v53  ;;  %v13772_v25 = vadd.f32 %v19026_v7, %v4382_v39 }
 0xa4b   : > { %14027 = vmatpush1.bf16.msra.mxu0 %v15655_v55 }
 0xa4c   : > { %14028 = vmatprep.subr.bf16.mxu0 %v15632_v24 }
 0xa4f   : > { %14029 = vmatpush1.bf16.msra.mxu0 %v15631_v46 }
 0xa50   : > { %14030 = vmatprep.subr.bf16.mxu0 %v15608_v14 }
 0xa52   : > { %v16154_v11 = vpop.eup %16153 }
 0xa53   : > { %14105 = vst [vmem:[%s17653_s5 + $0x90] sm:$0xff] %v16154_v11  ;;  %14031 = vmatpush1.bf16.msra.mxu0 %v15607_v27 }
 0xa54   : > { %v16156_v23 = vpop.eup %16155  ;;  %14032 = vmatprep.subr.bf16.mxu0 %v15584_v37 }
 0xa55   : > { %14106 = vst [vmem:[%s17653_s5 + $0x98] sm:$0xff] %v16156_v23 }
 0xa57   : > { %14033 = vmatpush1.bf16.msra.mxu0 %v15583_v47 }
 0xa58   : > { %14034 = vmatprep.subr.bf16.mxu0 %v15560_v2 }
 0xa5b   : > { %14035 = vmatpush1.bf16.msra.mxu0 %v15559_v45 }
 0xa5c   : > { %14036 = vmatprep.subr.bf16.mxu0 %v15536_v49 }
 0xa5f   : > { %14037 = vmatpush1.bf16.msra.mxu0 %v15535_v54 }
 0xa60   : > { %14038 = vmatprep.subr.bf16.mxu0 %v15896_v42 }
 0xa63   : > { %14039 = vmatpush2.bf16.msra.mxu0 %v15895_v59 }
 0xa64   : > { %14040 = vmatprep.subr.bf16.mxu0 %v15872_v32 }
 0xa67   : > { %14041 = vmatpush2.bf16.msra.mxu0 %v15871_v61 }
 0xa68   : > { %14042 = vmatprep.subr.bf16.mxu0 %v15848_v52 }
 0xa6b   : > { %14043 = vmatpush2.bf16.msra.mxu0 %v15847_v34 }
 0xa6c   : > { %14044 = vmatprep.subr.bf16.mxu0 %v15824_v56 }
 0xa6f   : > { %14045 = vmatpush2.bf16.msra.mxu0 %v15823_v1 }
 0xa70   : > { %14046 = vmatprep.subr.bf16.mxu0 %v15800_v18 }
 0xa73   : > { %14047 = vmatpush2.bf16.msra.mxu0 %v15799_v35 }
 0xa74   : > { %14048 = vmatprep.subr.bf16.mxu0 %v15776_v28 }
 0xa77   : > { %14049 = vmatpush2.bf16.msra.mxu0 %v15775_v31 }
 0xa78   : > { %14050 = vmatprep.subr.bf16.mxu0 %v15752_v57 }
 0xa7b   : > { %14051 = vmatpush2.bf16.msra.mxu0 %v15751_v21 }
 0xa7c   : > { %14052 = vmatprep.subr.bf16.mxu0 %v15728_v6 }
 0xa7f   : > { %14053 = vmatpush2.bf16.msra.mxu0 %v15727_v16 }
 0xa80   : > { %v13851_v55 = vpop.f32.mrf.mxu1 }
 0xa82   : > { %v13810_v24 = vpop.f32.mrf.mxu0  ;;  %14055 = vmatmul.mubr.bf16.vlgmr.msra.gmra.mxu0 %v17380_v33  ;;  %v13853_v19 = vpop.f32.mrf.mxu1 }
 0xa83   : > { %v13811_v46 = vadd.f32 %v13810_v24, %v13770_v20 }
 0xa84   : > { %v13812_v14 = vpop.f32.mrf.mxu0  ;;  %v13855_v48 = vpop.f32.mrf.mxu1 }
 0xa85   : > { %v13852_v26 = vadd.f32 %v13851_v55, %v13811_v46  ;;  %v13813_v27 = vadd.f32 %v13812_v14, %v13772_v25 }
 0xa86   : > { %v13814_v37 = vpop.f32.mrf.mxu0  ;;  %v13856_v3 = vpop.f32.mrf.mxu1 }
 0xa87   : > { %v13854_v51 = vadd.f32 %v13853_v19, %v13813_v27 }
 0xa88   : > { %v13815_v17 = vpop.f32.mrf.mxu0 }
 0xac0   : > { %v13933_v9 = vpop.f32.mrf.mxu1 }
 0xac1   : > { %v13934_v42 = vadd.f32 %v13933_v9, %v4386_v38 }
 0xac2   : > { %v13892_v11 = vpop.f32.mrf.mxu0  ;;  %v13935_v13 = vpop.f32.mrf.mxu1 }
 0xac3   : > { %v13893_v47 = vadd.f32 %v13892_v11, %v13852_v26  ;;  %v13936_v59 = vadd.f32 %v13935_v13, %v4390_v4 }
 0xac4   : > { %v13894_v23 = vpop.f32.mrf.mxu0  ;;  %v13937_v33 = vpop.f32.mrf.mxu1 }
 0xac5   : > { %16157 = vtanh.f32 %v13893_v47  ;;  %v13895_v2 = vadd.f32 %v13894_v23, %v13854_v51 }
 0xac6   : > { %v13896_v7 = vpop.f32.mrf.mxu0  ;;  %v13938_v15 = vpop.f32.mrf.mxu1 }
 0xac7   : > { %16159 = vtanh.f32 %v13895_v2 }
 0xac8   : > { %v13897_v43 = vpop.f32.mrf.mxu0 }
 0xad2   : > { %v16158_v45 = vpop.eup %16157 }
 0xad3   : > { %14107 = vst [vmem:[%s17653_s5 + $0xa0] sm:$0xff] %v16158_v45 }
 0xad4   : > { %v16160_v49 = vpop.eup %16159 }
 0xad5   : > { %14108 = vst [vmem:[%s17653_s5 + $0xa8] sm:$0xff] %v16160_v49 }
 0xb00   : > { %v14015_v54 = vpop.f32.mrf.mxu1 }
 0xb02   : > { %v13974_v41 = vpop.f32.mrf.mxu0  ;;  %v14017_v40 = vpop.f32.mrf.mxu1 }
 0xb03   : > { %v13975_v32 = vadd.f32 %v13974_v41, %v13934_v42 }
 0xb04   : > { %v13976_v60 = vpop.f32.mrf.mxu0  ;;  %v14019_v29 = vpop.f32.mrf.mxu1 }
 0xb05   : > { %v14016_v61 = vadd.f32 %v14015_v54, %v13975_v32  ;;  %v13977_v52 = vadd.f32 %v13976_v60, %v13936_v59 }
 0xb06   : > { %v13978_v10 = vpop.f32.mrf.mxu0  ;;  %v14020_v5 = vpop.f32.mrf.mxu1 }
 0xb07   : > { %v14018_v34 = vadd.f32 %v14017_v40, %v13977_v52 }
 0xb08   : > { %v13979_v56 = vpop.f32.mrf.mxu0 }
 0xb42   : > { %v14056_v63 = vpop.f32.mrf.mxu0 }
 0xb43   : > { %v14057_v62 = vadd.f32 %v14056_v63, %v14016_v61 }
 0xb44   : > { %v14058_v50 = vpop.f32.mrf.mxu0 }
 0xb45   : > { %16161 = vtanh.f32 %v14057_v62  ;;  %v14059_v0 = vadd.f32 %v14058_v50, %v14018_v34 }
 0xb46   : > { %v14060_v1 = vpop.f32.mrf.mxu0 }
 0xb47   : > { %16163 = vtanh.f32 %v14059_v0 }
 0xb48   : > { %v14061_v18 = vpop.f32.mrf.mxu0 }
 0xb52   : > { %v16162_v44 = vpop.eup %16161 }
 0xb53   : > { %14109 = vst [vmem:[%s17653_s5 + $0xb0] sm:$0xff] %v16162_v44 }
 0xb54   : > { %v16164_v22 = vpop.eup %16163 }
 0xb55   : > { %14110 = vst [vmem:[%s17653_s5 + $0xb8] sm:$0xff] %v16164_v22 }
 0xb56 PF: > { %p32_p3 = scmp.ge.s32.totalorder %s16828_s17, 6   ;;  %s19160_s18 = smov %s16620_s19 }
 0xb57   : > { %s19161_s19 = smov %s16624_s20  ;;  %s19162_s20 = smov %s16840_s23 }
 0xb58   : > { %s19163_s21 = smov %s16828_s17  ;;  %34 = sbr.rel (!%p32_p3) target bundleno = 20 (0x14), region = 184 }
 0xb5d   :  { %14133 = vsyncpa [#allocation3], 1 }
 0xb5e   :  { %14135 = vsyncpa [#allocation3 + $0x1], 1 }
 0xb5f   :  { %14136 = vsyncpa [#allocation5], 1 }
 0xb60   :  { %14137 = vsyncpa [#allocation8], 1 }
 0xb61   :  { %14138 = vsyncpa [#allocation11], 1 }
 0xb62   :  { %14139 = vsyncpa [#allocation14], 1 }
 0xb63   :  { %14140 = vsyncpa [#allocation17], 1 }
 0xb64   :  { %14141 = vsyncpa [#allocation20], 1 }
 0xb65   :  { %14142 = vsyncpa [#allocation23], 1 }
 0xb66   :  { %14144 = vsyncpa [#allocation23 + $0x1], 1 }

</bundles_post_ra>
